<compile_context>
chip_gen: v7x
topology: tpu7x:2x2x1
jax: 0.10.0
libtpu: 0.0.40
codegen_flags: <defaults>
</compile_context>

<pallas_src>
import functools
import math

import jax
import jax.numpy as jnp
from jax.experimental import pallas as pl
from jax.experimental.pallas import tpu as pltpu


# MXU operand dtype; accumulation is always f32 via preferred_element_type.
_DOT_DTYPE = jnp.bfloat16
_SQRT_2_OVER_PI = math.sqrt(2.0 / math.pi)


# ----------------------------------------------------------------------------
# In-kernel helpers (elementwise math stays in f32)
# ----------------------------------------------------------------------------
def _layer_norm(x, w, b, eps=1e-5):
    m = jnp.mean(x, axis=-1, keepdims=True)
    v = jnp.mean((x - m) ** 2, axis=-1, keepdims=True)
    return (x - m) * jax.lax.rsqrt(v + eps) * w + b


def _gelu_tanh(x):
    # tanh-approximate GELU: the tanh goes to the (otherwise idle) EUP slot.
    # TODO(synk): PyTorch activation='gelu' defaults to the exact erf form;
    # the tanh approximation deviates by <~3e-3 absolute.
    return 0.5 * x * (1.0 + jnp.tanh(_SQRT_2_OVER_PI * (x + 0.044715 * x * x * x)))


def _softmax_last(s):
    # max-subtracted softmax over the last axis; the divide becomes an
    # approximate EUP reciprocal.
    m = jnp.max(s, axis=-1, keepdims=True)
    e = jnp.exp(s - m)
    return e * pl.reciprocal(jnp.sum(e, axis=-1, keepdims=True), approx=True)


# ----------------------------------------------------------------------------
# Kernel 1: embed + positional/stock encodings + streamed encoder layers
#           + attention pooling over time.
# Grid = (seq_tiles [parallel], num_layers [arbitrary]).
# ----------------------------------------------------------------------------
def _temporal_kernel(x_ref, se_ref,
                     emb_w_ref, emb_b_ref, pe_ref,
                     wqkv_ref, bqkv_ref, wo_ref, bo_ref, ln1w_ref, ln1b_ref,
                     w1_ref, b1_ref, w2_ref, b2_ref, ln2w_ref, ln2b_ref,
                     pool_w_ref, pool_b_ref,
                     o_ref, x2_scr, ctx_scr, *, nhead):
    layer = pl.program_id(1)
    num_layers = pl.num_programs(1)
    nt, t, f = x_ref.shape               # sequences-per-step, time, features
    d = wo_ref.shape[-1]
    hd = d // nhead
    m = nt * t                           # GEMM rows per grid step
    scale = 1.0 / math.sqrt(hd)

    # --- first layer step only: feature embed + stock embed + pos encoding ---
    @pl.when(layer == 0)
    def _():
        x0 = jnp.dot(x_ref[...].reshape(m, f).astype(_DOT_DTYPE),
                     emb_w_ref[...],
                     preferred_element_type=jnp.float32) + emb_b_ref[...]
        x0 = (x0.reshape(nt, t, d)
              + pe_ref[...][None, :, :]
              + se_ref[...][:, None, :])
        x2_scr[...] = x0.reshape(m, d)

    # --- encoder layer `layer` (post-norm, GELU); weights streamed per step ---
    x2 = x2_scr[...]
    # fused QKV projection: one GEMM with 3*d output lanes
    qkv = jnp.dot(x2.astype(_DOT_DTYPE), wqkv_ref[0],
                  preferred_element_type=jnp.float32) + bqkv_ref[0]
    qb = qkv[:, 0 * d:1 * d].astype(_DOT_DTYPE).reshape(nt, t, d)
    kb = qkv[:, 1 * d:2 * d].astype(_DOT_DTYPE).reshape(nt, t, d)
    vb = qkv[:, 2 * d:3 * d].astype(_DOT_DTYPE).reshape(nt, t, d)
    for h in range(nhead):
        sl = slice(h * hd, (h + 1) * hd)
        s = jnp.einsum("nqc,nkc->nqk", qb[:, :, sl], kb[:, :, sl],
                       preferred_element_type=jnp.float32) * scale
        p = _softmax_last(s).astype(_DOT_DTYPE)
        oh = jnp.einsum("nqk,nkc->nqc", p, vb[:, :, sl],
                        preferred_element_type=jnp.float32)
        ctx_scr[:, sl] = oh.reshape(m, hd)            # contiguous head layout
    # single full-K output projection (no per-head K=hd GEMMs, no concat)
    attn = jnp.dot(ctx_scr[...].astype(_DOT_DTYPE), wo_ref[0],
                   preferred_element_type=jnp.float32) + bo_ref[0]
    x1 = _layer_norm(x2 + attn, ln1w_ref[0], ln1b_ref[0])       # post-norm 1
    hmid = _gelu_tanh(jnp.dot(x1.astype(_DOT_DTYPE), w1_ref[0],
                              preferred_element_type=jnp.float32) + b1_ref[0])
    ffn = jnp.dot(hmid.astype(_DOT_DTYPE), w2_ref[0],
                  preferred_element_type=jnp.float32) + b2_ref[0]
    x2 = _layer_norm(x1 + ffn, ln2w_ref[0], ln2b_ref[0])         # post-norm 2
    x2_scr[...] = x2

    # --- last layer step: attention pooling over time, write pooled output ---
    @pl.when(layer == num_layers - 1)
    def _():
        x3 = x2.reshape(nt, t, d)
        scores = (jnp.sum(x3 * pool_w_ref[...][None, :, :], axis=-1)
                  + pool_b_ref[...])
        wts = _softmax_last(scores)                              # (nt, t)
        o_ref[...] = jnp.sum(x3 * wts[:, :, None], axis=1)       # (nt, d)


def _pick_seq_tile(nseq, t, row_target=512):
    """Sequences-per-step tile: (8,128)-legal, divides nseq, targets ~512 GEMM
    rows per step, and prefers leaving >= 2 grid steps (v7x megacore)."""
    cands = [c for c in range(1, nseq + 1)
             if nseq % c == 0 and (c % 8 == 0 or c == nseq)]
    cap = max(1, row_target // max(t, 1))
    good = [c for c in cands if nseq // c >= 2 and c <= cap]
    if good:
        return max(good)
    small = [c for c in cands if c <= cap]
    if small:
        return max(small)
    return min(cands)


def temporal_call(x_seq, se_seq, pe, p, *, nhead):
    nseq, t, f = x_seq.shape
    d = p["wo"].shape[-1]
    num_layers = p["wqkv"].shape[0]
    dff = p["w1"].shape[-1]
    seq_tile = _pick_seq_tile(nseq, t)
    m = seq_tile * t

    operands = [p["emb_w"], p["emb_b"], pe,
                p["wqkv"], p["bqkv"], p["wo"], p["bo"], p["ln1w"], p["ln1b"],
                p["w1"], p["b1"], p["w2"], p["b2"], p["ln2w"], p["ln2b"],
                p["pool_w"], p["pool_b"]]
    is_layer = [False, False, False,
                True, True, True, True, True, True,
                True, True, True, True, True, True,
                False, False]

    def const_spec(a):
        nd = a.ndim
        return pl.BlockSpec(a.shape, lambda i, l, _nd=nd: (0,) * _nd)

    def layer_spec(a):
        nd = a.ndim
        return pl.BlockSpec((1,) + tuple(a.shape[1:]),
                            lambda i, l, _nd=nd: (l,) + (0,) * (_nd - 1))

    in_specs = [pl.BlockSpec((seq_tile, t, f), lambda i, l: (i, 0, 0)),
                pl.BlockSpec((seq_tile, d), lambda i, l: (i, 0))]
    in_specs += [layer_spec(a) if lay else const_spec(a)
                 for a, lay in zip(operands, is_layer)]

    # Explicit VMEM budget (v5e default scoped limit is only ~16 MiB):
    # double-buffered per-layer weight blocks + constants + data tiles +
    # scratches + the (m, dff) FFN intermediate, with headroom.
    def nbytes(a):
        return int(a.size) * a.dtype.itemsize
    layer_bytes = sum(nbytes(a) // num_layers
                      for a, lay in zip(operands, is_layer) if lay)
    const_bytes = sum(nbytes(a) for a, lay in zip(operands, is_layer) if not lay)
    data_bytes = (seq_tile * t * f + 2 * seq_tile * d) * 4
    scratch_bytes = 2 * m * d * 4
    act_bytes = 2 * m * dff * 4
    est = 2 * layer_bytes + const_bytes + 2 * data_bytes + scratch_bytes + act_bytes
    vmem_limit = int(min(max(2 * est, 32 << 20), 56 << 20))

    return pl.pallas_call(
        functools.partial(_temporal_kernel, nhead=nhead),
        out_shape=jax.ShapeDtypeStruct((nseq, d), jnp.float32),
        grid=(nseq // seq_tile, num_layers),
        in_specs=in_specs,
        out_specs=pl.BlockSpec((seq_tile, d), lambda i, l: (i, 0)),
        scratch_shapes=[pltpu.VMEM((m, d), jnp.float32),   # resident activation
                        pltpu.VMEM((m, d), jnp.float32)],  # per-head context
        compiler_params=pltpu.CompilerParams(
            dimension_semantics=("parallel", "arbitrary"),
            vmem_limit_bytes=vmem_limit),
    )(x_seq, se_seq, *operands)


# ----------------------------------------------------------------------------
# Kernel 2: cross-stock MHA + residual + fused (lane-dense) output heads.
# Several batches per grid step so the GEMMs see M = TB*S rows.
# ----------------------------------------------------------------------------
def _cross_heads_kernel(x_ref, wqkv_ref, bqkv_ref, wo_ref, bo_ref,
                        head_w_ref, head_b_ref, o_ref, ctx_scr, *, nhead):
    tb, s_tok, d = x_ref.shape
    hd = d // nhead
    m = tb * s_tok
    pad_out = head_w_ref.shape[-1]
    scale = 1.0 / math.sqrt(hd)

    x = x_ref[...].reshape(m, d)
    # fused cross-attention QKV projection over all TB*S rows
    qkv = jnp.dot(x.astype(_DOT_DTYPE), wqkv_ref[...],
                  preferred_element_type=jnp.float32) + bqkv_ref[...]
    qb = qkv[:, 0 * d:1 * d].astype(_DOT_DTYPE).reshape(tb, s_tok, d)
    kb = qkv[:, 1 * d:2 * d].astype(_DOT_DTYPE).reshape(tb, s_tok, d)
    vb = qkv[:, 2 * d:3 * d].astype(_DOT_DTYPE).reshape(tb, s_tok, d)
    for h in range(nhead):
        sl = slice(h * hd, (h + 1) * hd)
        s = jnp.einsum("bqc,bkc->bqk", qb[:, :, sl], kb[:, :, sl],
                       preferred_element_type=jnp.float32) * scale
        p = _softmax_last(s).astype(_DOT_DTYPE)
        oh = jnp.einsum("bqk,bkc->bqc", p, vb[:, :, sl],
                        preferred_element_type=jnp.float32)
        ctx_scr[:, sl] = oh.reshape(m, hd)
    attn = jnp.dot(ctx_scr[...].astype(_DOT_DTYPE), wo_ref[...],
                   preferred_element_type=jnp.float32) + bo_ref[...]
    res = x + attn                                               # residual
    # all horizons' ranking/risk/return heads fused into one lane-padded GEMM
    out = jnp.dot(res.astype(_DOT_DTYPE), head_w_ref[...],
                  preferred_element_type=jnp.float32) + head_b_ref[...]
    o_ref[...] = out.reshape(tb, s_tok, pad_out)


def _pick_batch_tile(b, s, row_target=256):
    """Smallest batch tile reaching the GEMM row target (keeps grid steps for
    megacore); otherwise the largest divisor of b."""
    best = b
    for tile in range(1, b + 1):
        if b % tile:
            continue
        if tile * s >= row_target:
            return tile
        best = tile
    return best


def cross_heads_call(pooled, p, *, nhead):
    b, s, d = pooled.shape
    pad_out = p["head_w"].shape[-1]
    tb = _pick_batch_tile(b, s)
    weights = [p["ca_wqkv"], p["ca_bqkv"], p["ca_wo"], p["ca_bo"],
               p["head_w"], p["head_b"]]

    def const_spec(a):
        nd = a.ndim
        return pl.BlockSpec(a.shape, lambda i, _nd=nd: (0,) * _nd)

    return pl.pallas_call(
        functools.partial(_cross_heads_kernel, nhead=nhead),
        out_shape=jax.ShapeDtypeStruct((b, s, pad_out), jnp.float32),
        grid=(b // tb,),
        in_specs=[pl.BlockSpec((tb, s, d), lambda i: (i, 0, 0))]
                 + [const_spec(a) for a in weights],
        out_specs=pl.BlockSpec((tb, s, pad_out), lambda i: (i, 0, 0)),
        scratch_shapes=[pltpu.VMEM((tb * s, d), jnp.float32)],
        compiler_params=pltpu.CompilerParams(dimension_semantics=("parallel",)),
    )(pooled, *weights)


# ----------------------------------------------------------------------------
# Parameter construction (deterministic, synthetic)
# ----------------------------------------------------------------------------
def init_params(key, num_features, d_model, nhead, num_layers, num_stocks,
                seq_len, dff, horizons):
    keys = iter(jax.random.split(key, 64))

    def w(shape, scale=0.02, dtype=jnp.float32):
        return (scale * jax.random.normal(next(keys), shape)).astype(dtype)

    L = num_layers
    p = {}
    # GEMM weights stored bf16 (MXU operand dtype; half the DMA/VMEM bytes).
    # NOTE: PyTorch Linear / MultiheadAttention apply x @ W^T; real trained
    # weights must be transposed (and Q/K/V stacked along columns) on load.
    p["emb_w"] = w((num_features, d_model), dtype=jnp.bfloat16)
    p["emb_b"] = jnp.zeros((1, d_model), jnp.float32)
    p["stock_emb"] = w((num_stocks, d_model))

    # sinusoidal positional encoding buffer (identical to the PyTorch module)
    position = jnp.arange(seq_len, dtype=jnp.float32)[:, None]
    div_term = jnp.exp(jnp.arange(0, d_model, 2, dtype=jnp.float32)
                       * (-math.log(10000.0) / d_model))
    pe = jnp.zeros((seq_len, d_model), jnp.float32)
    pe = pe.at[:, 0::2].set(jnp.sin(position * div_term))
    pe = pe.at[:, 1::2].set(jnp.cos(position * div_term))
    p["pe"] = pe

    # temporal encoder layers: leading layer axis so kernel 1 streams one
    # layer per ("arbitrary") grid step.  Fused QKV: columns [Wq | Wk | Wv].
    p["wqkv"] = w((L, d_model, 3 * d_model), dtype=jnp.bfloat16)
    p["bqkv"] = jnp.zeros((L, 1, 3 * d_model), jnp.float32)
    p["wo"] = w((L, d_model, d_model), dtype=jnp.bfloat16)
    p["bo"] = jnp.zeros((L, 1, d_model), jnp.float32)
    p["ln1w"] = jnp.ones((L, 1, d_model), jnp.float32)
    p["ln1b"] = jnp.zeros((L, 1, d_model), jnp.float32)
    p["w1"] = w((L, d_model, dff), dtype=jnp.bfloat16)
    p["b1"] = jnp.zeros((L, 1, dff), jnp.float32)
    p["w2"] = w((L, dff, d_model), dtype=jnp.bfloat16)
    p["b2"] = jnp.zeros((L, 1, d_model), jnp.float32)
    p["ln2w"] = jnp.ones((L, 1, d_model), jnp.float32)
    p["ln2b"] = jnp.zeros((L, 1, d_model), jnp.float32)

    # attention pooling Linear(d_model, 1), stored lane-friendly as (1, d)
    p["pool_w"] = w((1, d_model))
    p["pool_b"] = jnp.zeros((1, 1), jnp.float32)

    # cross-stock multi-head attention (fused QKV)
    p["ca_wqkv"] = w((d_model, 3 * d_model), dtype=jnp.bfloat16)
    p["ca_bqkv"] = jnp.zeros((1, 3 * d_model), jnp.float32)
    p["ca_wo"] = w((d_model, d_model), dtype=jnp.bfloat16)
    p["ca_bo"] = jnp.zeros((1, d_model), jnp.float32)

    # output heads: per horizon [ranking(5), risk(1), return(1)] (gain 0.1
    # style small init), fused into one GEMM zero-padded to a 128-lane
    # multiple so the kernel writes lane-dense slabs.
    n_out = 7 * len(horizons)
    head_cols = []
    for _h in horizons:
        for n_o in (5, 1, 1):
            head_cols.append(w((d_model, n_o), scale=0.01))
    hw = jnp.concatenate(head_cols, axis=1)
    pad_out = ((n_out + 127) // 128) * 128
    head_w = jnp.zeros((d_model, pad_out), jnp.float32).at[:, :n_out].set(hw)
    p["head_w"] = head_w.astype(jnp.bfloat16)
    p["head_b"] = jnp.zeros((1, pad_out), jnp.float32)
    return p


# ----------------------------------------------------------------------------
# Forward pass: only the tiny raw (B,T,S,F) input is re-laid-out wrapper-side;
# the d_model activation never leaves VMEM between embedding, the transformer
# layers and pooling.
# ----------------------------------------------------------------------------
def fortune_forward(x, params, *, nhead, n_out):
    b, t, s, f = x.shape
    d = params["wo"].shape[-1]

    x_seq = jnp.transpose(x, (0, 2, 1, 3)).reshape(b * s, t, f)   # raw features
    se_seq = jnp.tile(params["stock_emb"][:s], (b, 1))            # (B*S, d)
    pe = params["pe"][:t]

    pooled = temporal_call(x_seq, se_seq, pe, params, nhead=nhead)  # (B*S, d)
    pooled = pooled.reshape(b, s, d)

    out = cross_heads_call(pooled, params, nhead=nhead)           # (B,S,pad)
    return out[..., :n_out]


# ----------------------------------------------------------------------------
if __name__ == "__main__":
    key = jax.random.PRNGKey(0)
    kp, kx = jax.random.split(key)

    # small shapes consistent with the module's forward
    B, T, S, NF = 2, 8, 8, 4
    d_model, nhead, num_layers = 32, 4, 2
    dff = 2048                      # PyTorch TransformerEncoderLayer default
    horizons = ("1h", "1d")
    n_out = 7 * len(horizons)

    params = init_params(kp, NF, d_model, nhead, num_layers,
                         num_stocks=S, seq_len=T, dff=dff, horizons=horizons)
    x = jax.random.normal(kx, (B, T, S, NF), dtype=jnp.float32)

    fwd = jax.jit(functools.partial(fortune_forward, nhead=nhead, n_out=n_out))
    out = jax.block_until_ready(fwd(x, params))

    assert out.shape == (B, S, n_out), out.shape
    assert bool(jnp.all(jnp.isfinite(out)))
    print("KERNEL_OK")
</pallas_src>

<mosaic_0001>
module attributes {stable_mosaic.version = 11 : i64} {
  func.func @_temporal_kernel(%arg0: i32, %arg1: i32, %arg2: memref<8x8x4xf32, #tpu.memory_space<vmem>>, %arg3: memref<8x32xf32, #tpu.memory_space<vmem>>, %arg4: memref<4x32xbf16, #tpu.memory_space<vmem>>, %arg5: memref<1x32xf32, #tpu.memory_space<vmem>>, %arg6: memref<8x32xf32, #tpu.memory_space<vmem>>, %arg7: memref<1x32x96xbf16, #tpu.memory_space<vmem>>, %arg8: memref<1x1x96xf32, #tpu.memory_space<vmem>>, %arg9: memref<1x32x32xbf16, #tpu.memory_space<vmem>>, %arg10: memref<1x1x32xf32, #tpu.memory_space<vmem>>, %arg11: memref<1x1x32xf32, #tpu.memory_space<vmem>>, %arg12: memref<1x1x32xf32, #tpu.memory_space<vmem>>, %arg13: memref<1x32x2048xbf16, #tpu.memory_space<vmem>>, %arg14: memref<1x1x2048xf32, #tpu.memory_space<vmem>>, %arg15: memref<1x2048x32xbf16, #tpu.memory_space<vmem>>, %arg16: memref<1x1x32xf32, #tpu.memory_space<vmem>>, %arg17: memref<1x1x32xf32, #tpu.memory_space<vmem>>, %arg18: memref<1x1x32xf32, #tpu.memory_space<vmem>>, %arg19: memref<1x32xf32, #tpu.memory_space<vmem>>, %arg20: memref<1x1xf32, #tpu.memory_space<vmem>>, %arg21: memref<8x32xf32, #tpu.memory_space<vmem>>, %arg22: memref<64x32xf32, #tpu.memory_space<vmem>>, %arg23: memref<64x32xf32, #tpu.memory_space<vmem>>) attributes {dimension_semantics = [#tpu.dimension_semantics<parallel>, #tpu.dimension_semantics<arbitrary>], iteration_bounds = array<i64: 2, 2>, scalar_prefetch = 0 : i64, scratch_operands = 2 : i64, tpu.core_type = #tpu.core_type<tc>, window_params = [{transform_indices = @transform_0, window_bounds = array<i64: 8, 8, 4>}, {transform_indices = @transform_1, window_bounds = array<i64: 8, 32>}, {pipeline_mode = #tpu.pipeline_mode<synchronous>, transform_indices = @transform_2, window_bounds = array<i64: 4, 32>}, {pipeline_mode = #tpu.pipeline_mode<synchronous>, transform_indices = @transform_3, window_bounds = array<i64: 1, 32>}, {pipeline_mode = #tpu.pipeline_mode<synchronous>, transform_indices = @transform_4, window_bounds = array<i64: 8, 32>}, {transform_indices = @transform_5, window_bounds = array<i64: 1, 32, 96>}, {transform_indices = @transform_6, window_bounds = array<i64: 1, 1, 96>}, {transform_indices = @transform_7, window_bounds = array<i64: 1, 32, 32>}, {transform_indices = @transform_8, window_bounds = array<i64: 1, 1, 32>}, {transform_indices = @transform_9, window_bounds = array<i64: 1, 1, 32>}, {transform_indices = @transform_10, window_bounds = array<i64: 1, 1, 32>}, {transform_indices = @transform_11, window_bounds = array<i64: 1, 32, 2048>}, {transform_indices = @transform_12, window_bounds = array<i64: 1, 1, 2048>}, {transform_indices = @transform_13, window_bounds = array<i64: 1, 2048, 32>}, {transform_indices = @transform_14, window_bounds = array<i64: 1, 1, 32>}, {transform_indices = @transform_15, window_bounds = array<i64: 1, 1, 32>}, {transform_indices = @transform_16, window_bounds = array<i64: 1, 1, 32>}, {pipeline_mode = #tpu.pipeline_mode<synchronous>, transform_indices = @transform_17, window_bounds = array<i64: 1, 32>}, {pipeline_mode = #tpu.pipeline_mode<synchronous>, transform_indices = @transform_18, window_bounds = array<i64: 1, 1>}, {transform_indices = @transform_19, window_bounds = array<i64: 8, 32>}]} {
    %c0_i32 = arith.constant 0 : i32
    %0 = arith.cmpi eq, %arg1, %c0_i32 : i32
    %1 = arith.extui %0 : i1 to i32
    %c0_i32_0 = arith.constant 0 : i32
    %2 = arith.cmpi ne, %1, %c0_i32_0 : i32
    scf.if %2 {
      %c0_85 = arith.constant 0 : index
      %c0_86 = arith.constant 0 : index
      %c0_87 = arith.constant 0 : index
      %197 = vector.load %arg2[%c0_85, %c0_86, %c0_87] : memref<8x8x4xf32, #tpu.memory_space<vmem>>, vector<8x8x4xf32>
      %198 = vector.shape_cast %197 : vector<8x8x4xf32> to vector<64x4xf32>
      %199 = arith.truncf %198 : vector<64x4xf32> to vector<64x4xbf16>
      %c0_88 = arith.constant 0 : index
      %c0_89 = arith.constant 0 : index
      %200 = vector.load %arg4[%c0_88, %c0_89] : memref<4x32xbf16, #tpu.memory_space<vmem>>, vector<4x32xbf16>
      %cst_90 = arith.constant dense<0.000000e+00> : vector<64x32xf32>
      %201 = tpu.matmul %199, %200, %cst_90 {dimension_numbers = #tpu.dot_dimension_numbers<[1], [0], [0], [1], [0, 0, 1, 1], [], []>} : vector<64x4xbf16>, vector<4x32xbf16>, vector<64x32xf32> -> vector<64x32xf32>
      %c0_91 = arith.constant 0 : index
      %c0_92 = arith.constant 0 : index
      %202 = vector.load %arg5[%c0_91, %c0_92] : memref<1x32xf32, #tpu.memory_space<vmem>>, vector<1x32xf32>
      %203 = vector.broadcast %202 : vector<1x32xf32> to vector<64x32xf32>
      %204 = arith.addf %201, %203 : vector<64x32xf32>
      %205 = vector.shape_cast %204 : vector<64x32xf32> to vector<8x8x32xf32>
      %c0_93 = arith.constant 0 : index
      %c0_94 = arith.constant 0 : index
      %206 = vector.load %arg6[%c0_93, %c0_94] : memref<8x32xf32, #tpu.memory_space<vmem>>, vector<8x32xf32>
      %207 = vector.shape_cast %206 : vector<8x32xf32> to vector<1x8x32xf32>
      %208 = vector.broadcast %207 : vector<1x8x32xf32> to vector<8x8x32xf32>
      %209 = arith.addf %205, %208 : vector<8x8x32xf32>
      %c0_95 = arith.constant 0 : index
      %c0_96 = arith.constant 0 : index
      %210 = vector.load %arg3[%c0_95, %c0_96] : memref<8x32xf32, #tpu.memory_space<vmem>>, vector<8x32xf32>
      %211 = vector.shape_cast %210 : vector<8x32xf32> to vector<8x1x32xf32>
      %212 = vector.broadcast %211 : vector<8x1x32xf32> to vector<8x8x32xf32>
      %213 = arith.addf %209, %212 : vector<8x8x32xf32>
      %214 = vector.shape_cast %213 : vector<8x8x32xf32> to vector<64x32xf32>
      %c0_97 = arith.constant 0 : index
      %c0_98 = arith.constant 0 : index
      %215 = vector.load %arg22[%c0_97, %c0_98] : memref<64x32xf32, #tpu.memory_space<vmem>>, vector<64x32xf32>
      tpu.vector_store %arg22[%c0_97, %c0_98], %214 {strides = array<i32>} : memref<64x32xf32, #tpu.memory_space<vmem>>, vector<64x32xf32>,
    } else {
    }
    %c0 = arith.constant 0 : index
    %c0_1 = arith.constant 0 : index
    %3 = vector.load %arg22[%c0, %c0_1] : memref<64x32xf32, #tpu.memory_space<vmem>>, vector<64x32xf32>
    %4 = arith.truncf %3 : vector<64x32xf32> to vector<64x32xbf16>
    %c0_2 = arith.constant 0 : index
    %c0_3 = arith.constant 0 : index
    %c0_4 = arith.constant 0 : index
    %5 = vector.load %arg7[%c0_2, %c0_3, %c0_4] : memref<1x32x96xbf16, #tpu.memory_space<vmem>>, vector<1x32x96xbf16>
    %6 = vector.shape_cast %5 : vector<1x32x96xbf16> to vector<32x96xbf16>
    %cst = arith.constant dense<0.000000e+00> : vector<64x96xf32>
    %7 = tpu.matmul %4, %6, %cst {dimension_numbers = #tpu.dot_dimension_numbers<[1], [0], [0], [1], [0, 0, 1, 1], [], []>} : vector<64x32xbf16>, vector<32x96xbf16>, vector<64x96xf32> -> vector<64x96xf32>
    %c0_5 = arith.constant 0 : index
    %c0_6 = arith.constant 0 : index
    %c0_7 = arith.constant 0 : index
    %8 = vector.load %arg8[%c0_5, %c0_6, %c0_7] : memref<1x1x96xf32, #tpu.memory_space<vmem>>, vector<1x1x96xf32>
    %9 = vector.shape_cast %8 : vector<1x1x96xf32> to vector<1x96xf32>
    %10 = vector.broadcast %9 : vector<1x96xf32> to vector<64x96xf32>
    %11 = arith.addf %7, %10 : vector<64x96xf32>
    %12 = vector.extract_strided_slice %11 {offsets = [0, 0], sizes = [64, 32], strides = [1, 1]} : vector<64x96xf32> to vector<64x32xf32>
    %13 = arith.truncf %12 : vector<64x32xf32> to vector<64x32xbf16>
    %14 = vector.shape_cast %13 : vector<64x32xbf16> to vector<8x8x32xbf16>
    %15 = vector.extract_strided_slice %11 {offsets = [0, 32], sizes = [64, 32], strides = [1, 1]} : vector<64x96xf32> to vector<64x32xf32>
    %16 = arith.truncf %15 : vector<64x32xf32> to vector<64x32xbf16>
    %17 = vector.shape_cast %16 : vector<64x32xbf16> to vector<8x8x32xbf16>
    %18 = vector.extract_strided_slice %11 {offsets = [0, 64], sizes = [64, 32], strides = [1, 1]} : vector<64x96xf32> to vector<64x32xf32>
    %19 = arith.truncf %18 : vector<64x32xf32> to vector<64x32xbf16>
    %20 = vector.shape_cast %19 : vector<64x32xbf16> to vector<8x8x32xbf16>
    %21 = vector.extract_strided_slice %14 {offsets = [0, 0, 0], sizes = [8, 8, 8], strides = [1, 1, 1]} : vector<8x8x32xbf16> to vector<8x8x8xbf16>
    %22 = vector.extract_strided_slice %17 {offsets = [0, 0, 0], sizes = [8, 8, 8], strides = [1, 1, 1]} : vector<8x8x32xbf16> to vector<8x8x8xbf16>
    "tpu.trace_start"() <{level = 10 : i32, message = "nqc,nkc->nqk"}> : () -> ()
    %cst_8 = arith.constant dense<0.000000e+00> : vector<8x8x8xf32>
    %23 = tpu.matmul %21, %22, %cst_8 {dimension_numbers = #tpu.dot_dimension_numbers<[2], [2], [1], [1], [0, 0, 0, 1, 1, 1], [0], [0]>} : vector<8x8x8xbf16>, vector<8x8x8xbf16>, vector<8x8x8xf32> -> vector<8x8x8xf32>
    "tpu.trace_stop"() : () -> ()
    %cst_9 = arith.constant 0.353553385 : f32
    %24 = vector.broadcast %cst_9 : f32 to vector<8x8x8xf32>
    %25 = arith.mulf %23, %24 : vector<8x8x8xf32>
    %cst_10 = arith.constant dense<0xFF800000> : vector<8x8xf32>
    %26 = vector.multi_reduction <maximumf>, %25, %cst_10 [2] : vector<8x8x8xf32> to vector<8x8xf32>
    %27 = vector.shape_cast %26 : vector<8x8xf32> to vector<8x8x1xf32>
    %28 = vector.broadcast %27 : vector<8x8x1xf32> to vector<8x8x8xf32>
    %29 = arith.subf %25, %28 : vector<8x8x8xf32>
    %30 = math.exp %29 : vector<8x8x8xf32>
    %cst_11 = arith.constant dense<0.000000e+00> : vector<8x8xf32>
    %31 = vector.multi_reduction <add>, %30, %cst_11 [2] : vector<8x8x8xf32> to vector<8x8xf32>
    %32 = vector.shape_cast %31 : vector<8x8xf32> to vector<8x8x1xf32>
    %33 = tpu.reciprocal %32 {approx = true} : vector<8x8x1xf32> -> vector<8x8x1xf32>
    %34 = vector.broadcast %33 : vector<8x8x1xf32> to vector<8x8x8xf32>
    %35 = arith.mulf %30, %34 : vector<8x8x8xf32>
    %36 = arith.truncf %35 : vector<8x8x8xf32> to vector<8x8x8xbf16>
    %37 = vector.extract_strided_slice %20 {offsets = [0, 0, 0], sizes = [8, 8, 8], strides = [1, 1, 1]} : vector<8x8x32xbf16> to vector<8x8x8xbf16>
    "tpu.trace_start"() <{level = 10 : i32, message = "nqk,nkc->nqc"}> : () -> ()
    %cst_12 = arith.constant dense<0.000000e+00> : vector<8x8x8xf32>
    %38 = tpu.matmul %36, %37, %cst_12 {dimension_numbers = #tpu.dot_dimension_numbers<[2], [1], [1], [2], [0, 0, 0, 1, 1, 2], [0], [0]>} : vector<8x8x8xbf16>, vector<8x8x8xbf16>, vector<8x8x8xf32> -> vector<8x8x8xf32>
    "tpu.trace_stop"() : () -> ()
    %39 = vector.shape_cast %38 : vector<8x8x8xf32> to vector<64x8xf32>
    %c0_13 = arith.constant 0 : index
    %c0_14 = arith.constant 0 : index
    %40 = vector.load %arg23[%c0_13, %c0_14] : memref<64x32xf32, #tpu.memory_space<vmem>>, vector<64x8xf32>
    tpu.vector_store %arg23[%c0_13, %c0_14], %39 {strides = array<i32>} : memref<64x32xf32, #tpu.memory_space<vmem>>, vector<64x8xf32>,
    %41 = vector.extract_strided_slice %14 {offsets = [0, 0, 8], sizes = [8, 8, 8], strides = [1, 1, 1]} : vector<8x8x32xbf16> to vector<8x8x8xbf16>
    %42 = vector.extract_strided_slice %17 {offsets = [0, 0, 8], sizes = [8, 8, 8], strides = [1, 1, 1]} : vector<8x8x32xbf16> to vector<8x8x8xbf16>
    "tpu.trace_start"() <{level = 10 : i32, message = "nqc,nkc->nqk"}> : () -> ()
    %cst_15 = arith.constant dense<0.000000e+00> : vector<8x8x8xf32>
    %43 = tpu.matmul %41, %42, %cst_15 {dimension_numbers = #tpu.dot_dimension_numbers<[2], [2], [1], [1], [0, 0, 0, 1, 1, 1], [0], [0]>} : vector<8x8x8xbf16>, vector<8x8x8xbf16>, vector<8x8x8xf32> -> vector<8x8x8xf32>
    "tpu.trace_stop"() : () -> ()
    %cst_16 = arith.constant 0.353553385 : f32
    %44 = vector.broadcast %cst_16 : f32 to vector<8x8x8xf32>
    %45 = arith.mulf %43, %44 : vector<8x8x8xf32>
    %cst_17 = arith.constant dense<0xFF800000> : vector<8x8xf32>
    %46 = vector.multi_reduction <maximumf>, %45, %cst_17 [2] : vector<8x8x8xf32> to vector<8x8xf32>
    %47 = vector.shape_cast %46 : vector<8x8xf32> to vector<8x8x1xf32>
    %48 = vector.broadcast %47 : vector<8x8x1xf32> to vector<8x8x8xf32>
    %49 = arith.subf %45, %48 : vector<8x8x8xf32>
    %50 = math.exp %49 : vector<8x8x8xf32>
    %cst_18 = arith.constant dense<0.000000e+00> : vector<8x8xf32>
    %51 = vector.multi_reduction <add>, %50, %cst_18 [2] : vector<8x8x8xf32> to vector<8x8xf32>
    %52 = vector.shape_cast %51 : vector<8x8xf32> to vector<8x8x1xf32>
    %53 = tpu.reciprocal %52 {approx = true} : vector<8x8x1xf32> -> vector<8x8x1xf32>
    %54 = vector.broadcast %53 : vector<8x8x1xf32> to vector<8x8x8xf32>
    %55 = arith.mulf %50, %54 : vector<8x8x8xf32>
    %56 = arith.truncf %55 : vector<8x8x8xf32> to vector<8x8x8xbf16>
    %57 = vector.extract_strided_slice %20 {offsets = [0, 0, 8], sizes = [8, 8, 8], strides = [1, 1, 1]} : vector<8x8x32xbf16> to vector<8x8x8xbf16>
    "tpu.trace_start"() <{level = 10 : i32, message = "nqk,nkc->nqc"}> : () -> ()
    %cst_19 = arith.constant dense<0.000000e+00> : vector<8x8x8xf32>
    %58 = tpu.matmul %56, %57, %cst_19 {dimension_numbers = #tpu.dot_dimension_numbers<[2], [1], [1], [2], [0, 0, 0, 1, 1, 2], [0], [0]>} : vector<8x8x8xbf16>, vector<8x8x8xbf16>, vector<8x8x8xf32> -> vector<8x8x8xf32>
    "tpu.trace_stop"() : () -> ()
    %59 = vector.shape_cast %58 : vector<8x8x8xf32> to vector<64x8xf32>
    %c0_20 = arith.constant 0 : index
    %c8 = arith.constant 8 : index
    %60 = vector.load %arg23[%c0_20, %c8] : memref<64x32xf32, #tpu.memory_space<vmem>>, vector<64x8xf32>
    tpu.vector_store %arg23[%c0_20, %c8], %59 {strides = array<i32>} : memref<64x32xf32, #tpu.memory_space<vmem>>, vector<64x8xf32>,
    %61 = vector.extract_strided_slice %14 {offsets = [0, 0, 16], sizes = [8, 8, 8], strides = [1, 1, 1]} : vector<8x8x32xbf16> to vector<8x8x8xbf16>
    %62 = vector.extract_strided_slice %17 {offsets = [0, 0, 16], sizes = [8, 8, 8], strides = [1, 1, 1]} : vector<8x8x32xbf16> to vector<8x8x8xbf16>
    "tpu.trace_start"() <{level = 10 : i32, message = "nqc,nkc->nqk"}> : () -> ()
    %cst_21 = arith.constant dense<0.000000e+00> : vector<8x8x8xf32>
    %63 = tpu.matmul %61, %62, %cst_21 {dimension_numbers = #tpu.dot_dimension_numbers<[2], [2], [1], [1], [0, 0, 0, 1, 1, 1], [0], [0]>} : vector<8x8x8xbf16>, vector<8x8x8xbf16>, vector<8x8x8xf32> -> vector<8x8x8xf32>
    "tpu.trace_stop"() : () -> ()
    %cst_22 = arith.constant 0.353553385 : f32
    %64 = vector.broadcast %cst_22 : f32 to vector<8x8x8xf32>
    %65 = arith.mulf %63, %64 : vector<8x8x8xf32>
    %cst_23 = arith.constant dense<0xFF800000> : vector<8x8xf32>
    %66 = vector.multi_reduction <maximumf>, %65, %cst_23 [2] : vector<8x8x8xf32> to vector<8x8xf32>
    %67 = vector.shape_cast %66 : vector<8x8xf32> to vector<8x8x1xf32>
    %68 = vector.broadcast %67 : vector<8x8x1xf32> to vector<8x8x8xf32>
    %69 = arith.subf %65, %68 : vector<8x8x8xf32>
    %70 = math.exp %69 : vector<8x8x8xf32>
    %cst_24 = arith.constant dense<0.000000e+00> : vector<8x8xf32>
    %71 = vector.multi_reduction <add>, %70, %cst_24 [2] : vector<8x8x8xf32> to vector<8x8xf32>
    %72 = vector.shape_cast %71 : vector<8x8xf32> to vector<8x8x1xf32>
    %73 = tpu.reciprocal %72 {approx = true} : vector<8x8x1xf32> -> vector<8x8x1xf32>
    %74 = vector.broadcast %73 : vector<8x8x1xf32> to vector<8x8x8xf32>
    %75 = arith.mulf %70, %74 : vector<8x8x8xf32>
    %76 = arith.truncf %75 : vector<8x8x8xf32> to vector<8x8x8xbf16>
    %77 = vector.extract_strided_slice %20 {offsets = [0, 0, 16], sizes = [8, 8, 8], strides = [1, 1, 1]} : vector<8x8x32xbf16> to vector<8x8x8xbf16>
    "tpu.trace_start"() <{level = 10 : i32, message = "nqk,nkc->nqc"}> : () -> ()
    %cst_25 = arith.constant dense<0.000000e+00> : vector<8x8x8xf32>
    %78 = tpu.matmul %76, %77, %cst_25 {dimension_numbers = #tpu.dot_dimension_numbers<[2], [1], [1], [2], [0, 0, 0, 1, 1, 2], [0], [0]>} : vector<8x8x8xbf16>, vector<8x8x8xbf16>, vector<8x8x8xf32> -> vector<8x8x8xf32>
    "tpu.trace_stop"() : () -> ()
    %79 = vector.shape_cast %78 : vector<8x8x8xf32> to vector<64x8xf32>
    %c0_26 = arith.constant 0 : index
    %c16 = arith.constant 16 : index
    %80 = vector.load %arg23[%c0_26, %c16] : memref<64x32xf32, #tpu.memory_space<vmem>>, vector<64x8xf32>
    tpu.vector_store %arg23[%c0_26, %c16], %79 {strides = array<i32>} : memref<64x32xf32, #tpu.memory_space<vmem>>, vector<64x8xf32>,
    %81 = vector.extract_strided_slice %14 {offsets = [0, 0, 24], sizes = [8, 8, 8], strides = [1, 1, 1]} : vector<8x8x32xbf16> to vector<8x8x8xbf16>
    %82 = vector.extract_strided_slice %17 {offsets = [0, 0, 24], sizes = [8, 8, 8], strides = [1, 1, 1]} : vector<8x8x32xbf16> to vector<8x8x8xbf16>
    "tpu.trace_start"() <{level = 10 : i32, message = "nqc,nkc->nqk"}> : () -> ()
    %cst_27 = arith.constant dense<0.000000e+00> : vector<8x8x8xf32>
    %83 = tpu.matmul %81, %82, %cst_27 {dimension_numbers = #tpu.dot_dimension_numbers<[2], [2], [1], [1], [0, 0, 0, 1, 1, 1], [0], [0]>} : vector<8x8x8xbf16>, vector<8x8x8xbf16>, vector<8x8x8xf32> -> vector<8x8x8xf32>
    "tpu.trace_stop"() : () -> ()
    %cst_28 = arith.constant 0.353553385 : f32
    %84 = vector.broadcast %cst_28 : f32 to vector<8x8x8xf32>
    %85 = arith.mulf %83, %84 : vector<8x8x8xf32>
    %cst_29 = arith.constant dense<0xFF800000> : vector<8x8xf32>
    %86 = vector.multi_reduction <maximumf>, %85, %cst_29 [2] : vector<8x8x8xf32> to vector<8x8xf32>
    %87 = vector.shape_cast %86 : vector<8x8xf32> to vector<8x8x1xf32>
    %88 = vector.broadcast %87 : vector<8x8x1xf32> to vector<8x8x8xf32>
    %89 = arith.subf %85, %88 : vector<8x8x8xf32>
    %90 = math.exp %89 : vector<8x8x8xf32>
    %cst_30 = arith.constant dense<0.000000e+00> : vector<8x8xf32>
    %91 = vector.multi_reduction <add>, %90, %cst_30 [2] : vector<8x8x8xf32> to vector<8x8xf32>
    %92 = vector.shape_cast %91 : vector<8x8xf32> to vector<8x8x1xf32>
    %93 = tpu.reciprocal %92 {approx = true} : vector<8x8x1xf32> -> vector<8x8x1xf32>
    %94 = vector.broadcast %93 : vector<8x8x1xf32> to vector<8x8x8xf32>
    %95 = arith.mulf %90, %94 : vector<8x8x8xf32>
    %96 = arith.truncf %95 : vector<8x8x8xf32> to vector<8x8x8xbf16>
    %97 = vector.extract_strided_slice %20 {offsets = [0, 0, 24], sizes = [8, 8, 8], strides = [1, 1, 1]} : vector<8x8x32xbf16> to vector<8x8x8xbf16>
    "tpu.trace_start"() <{level = 10 : i32, message = "nqk,nkc->nqc"}> : () -> ()
    %cst_31 = arith.constant dense<0.000000e+00> : vector<8x8x8xf32>
    %98 = tpu.matmul %96, %97, %cst_31 {dimension_numbers = #tpu.dot_dimension_numbers<[2], [1], [1], [2], [0, 0, 0, 1, 1, 2], [0], [0]>} : vector<8x8x8xbf16>, vector<8x8x8xbf16>, vector<8x8x8xf32> -> vector<8x8x8xf32>
    "tpu.trace_stop"() : () -> ()
    %99 = vector.shape_cast %98 : vector<8x8x8xf32> to vector<64x8xf32>
    %c0_32 = arith.constant 0 : index
    %c24 = arith.constant 24 : index
    %100 = vector.load %arg23[%c0_32, %c24] : memref<64x32xf32, #tpu.memory_space<vmem>>, vector<64x8xf32>
    tpu.vector_store %arg23[%c0_32, %c24], %99 {strides = array<i32>} : memref<64x32xf32, #tpu.memory_space<vmem>>, vector<64x8xf32>,
    %c0_33 = arith.constant 0 : index
    %c0_34 = arith.constant 0 : index
    %101 = vector.load %arg23[%c0_33, %c0_34] : memref<64x32xf32, #tpu.memory_space<vmem>>, vector<64x32xf32>
    %102 = arith.truncf %101 : vector<64x32xf32> to vector<64x32xbf16>
    %c0_35 = arith.constant 0 : index
    %c0_36 = arith.constant 0 : index
    %c0_37 = arith.constant 0 : index
    %103 = vector.load %arg9[%c0_35, %c0_36, %c0_37] : memref<1x32x32xbf16, #tpu.memory_space<vmem>>, vector<1x32x32xbf16>
    %104 = vector.shape_cast %103 : vector<1x32x32xbf16> to vector<32x32xbf16>
    %cst_38 = arith.constant dense<0.000000e+00> : vector<64x32xf32>
    %105 = tpu.matmul %102, %104, %cst_38 {dimension_numbers = #tpu.dot_dimension_numbers<[1], [0], [0], [1], [0, 0, 1, 1], [], []>} : vector<64x32xbf16>, vector<32x32xbf16>, vector<64x32xf32> -> vector<64x32xf32>
    %c0_39 = arith.constant 0 : index
    %c0_40 = arith.constant 0 : index
    %c0_41 = arith.constant 0 : index
    %106 = vector.load %arg10[%c0_39, %c0_40, %c0_41] : memref<1x1x32xf32, #tpu.memory_space<vmem>>, vector<1x1x32xf32>
    %107 = vector.shape_cast %106 : vector<1x1x32xf32> to vector<1x32xf32>
    %108 = vector.broadcast %107 : vector<1x32xf32> to vector<64x32xf32>
    %109 = arith.addf %105, %108 : vector<64x32xf32>
    %110 = arith.addf %3, %109 : vector<64x32xf32>
    %c0_42 = arith.constant 0 : index
    %c0_43 = arith.constant 0 : index
    %c0_44 = arith.constant 0 : index
    %111 = vector.load %arg11[%c0_42, %c0_43, %c0_44] : memref<1x1x32xf32, #tpu.memory_space<vmem>>, vector<1x1x32xf32>
    %112 = vector.shape_cast %111 : vector<1x1x32xf32> to vector<1x32xf32>
    %c0_45 = arith.constant 0 : index
    %c0_46 = arith.constant 0 : index
    %c0_47 = arith.constant 0 : index
    %113 = vector.load %arg12[%c0_45, %c0_46, %c0_47] : memref<1x1x32xf32, #tpu.memory_space<vmem>>, vector<1x1x32xf32>
    %114 = vector.shape_cast %113 : vector<1x1x32xf32> to vector<1x32xf32>
    %cst_48 = arith.constant dense<0.000000e+00> : vector<64xf32>
    %115 = vector.multi_reduction <add>, %110, %cst_48 [1] : vector<64x32xf32> to vector<64xf32>
    %116 = vector.shape_cast %115 : vector<64xf32> to vector<64x1xf32>
    %cst_49 = arith.constant 3.200000e+01 : f32
    %117 = vector.broadcast %cst_49 : f32 to vector<64x1xf32>
    %118 = arith.divf %116, %117 : vector<64x1xf32>
    %119 = vector.broadcast %118 : vector<64x1xf32> to vector<64x32xf32>
    %120 = arith.subf %110, %119 : vector<64x32xf32>
    %121 = arith.mulf %120, %120 : vector<64x32xf32>
    %cst_50 = arith.constant dense<0.000000e+00> : vector<64xf32>
    %122 = vector.multi_reduction <add>, %121, %cst_50 [1] : vector<64x32xf32> to vector<64xf32>
    %123 = vector.shape_cast %122 : vector<64xf32> to vector<64x1xf32>
    %cst_51 = arith.constant 3.200000e+01 : f32
    %124 = vector.broadcast %cst_51 : f32 to vector<64x1xf32>
    %125 = arith.divf %123, %124 : vector<64x1xf32>
    %126 = vector.broadcast %118 : vector<64x1xf32> to vector<64x32xf32>
    %127 = arith.subf %110, %126 : vector<64x32xf32>
    %cst_52 = arith.constant 9.99999974E-6 : f32
    %128 = vector.broadcast %cst_52 : f32 to vector<64x1xf32>
    %129 = arith.addf %125, %128 : vector<64x1xf32>
    %130 = math.rsqrt %129 : vector<64x1xf32>
    %131 = vector.broadcast %130 : vector<64x1xf32> to vector<64x32xf32>
    %132 = arith.mulf %127, %131 : vector<64x32xf32>
    %133 = vector.broadcast %112 : vector<1x32xf32> to vector<64x32xf32>
    %134 = arith.mulf %132, %133 : vector<64x32xf32>
    %135 = vector.broadcast %114 : vector<1x32xf32> to vector<64x32xf32>
    %136 = arith.addf %134, %135 : vector<64x32xf32>
    %137 = arith.truncf %136 : vector<64x32xf32> to vector<64x32xbf16>
    %c0_53 = arith.constant 0 : index
    %c0_54 = arith.constant 0 : index
    %c0_55 = arith.constant 0 : index
    %138 = vector.load %arg13[%c0_53, %c0_54, %c0_55] : memref<1x32x2048xbf16, #tpu.memory_space<vmem>>, vector<1x32x2048xbf16>
    %139 = vector.shape_cast %138 : vector<1x32x2048xbf16> to vector<32x2048xbf16>
    %cst_56 = arith.constant dense<0.000000e+00> : vector<64x2048xf32>
    %140 = tpu.matmul %137, %139, %cst_56 {dimension_numbers = #tpu.dot_dimension_numbers<[1], [0], [0], [1], [0, 0, 1, 1], [], []>} : vector<64x32xbf16>, vector<32x2048xbf16>, vector<64x2048xf32> -> vector<64x2048xf32>
    %c0_57 = arith.constant 0 : index
    %c0_58 = arith.constant 0 : index
    %c0_59 = arith.constant 0 : index
    %141 = vector.load %arg14[%c0_57, %c0_58, %c0_59] : memref<1x1x2048xf32, #tpu.memory_space<vmem>>, vector<1x1x2048xf32>
    %142 = vector.shape_cast %141 : vector<1x1x2048xf32> to vector<1x2048xf32>
    %143 = vector.broadcast %142 : vector<1x2048xf32> to vector<64x2048xf32>
    %144 = arith.addf %140, %143 : vector<64x2048xf32>
    %cst_60 = arith.constant 5.000000e-01 : f32
    %145 = vector.broadcast %cst_60 : f32 to vector<64x2048xf32>
    %146 = arith.mulf %145, %144 : vector<64x2048xf32>
    %cst_61 = arith.constant 4.471500e-02 : f32
    %147 = vector.broadcast %cst_61 : f32 to vector<64x2048xf32>
    %148 = arith.mulf %147, %144 : vector<64x2048xf32>
    %149 = arith.mulf %148, %144 : vector<64x2048xf32>
    %150 = arith.mulf %149, %144 : vector<64x2048xf32>
    %151 = arith.addf %144, %150 : vector<64x2048xf32>
    %cst_62 = arith.constant 0.797884583 : f32
    %152 = vector.broadcast %cst_62 : f32 to vector<64x2048xf32>
    %153 = arith.mulf %152, %151 : vector<64x2048xf32>
    %154 = math.tanh %153 : vector<64x2048xf32>
    %cst_63 = arith.constant 1.000000e+00 : f32
    %155 = vector.broadcast %cst_63 : f32 to vector<64x2048xf32>
    %156 = arith.addf %155, %154 : vector<64x2048xf32>
    %157 = arith.mulf %146, %156 : vector<64x2048xf32>
    %158 = arith.truncf %157 : vector<64x2048xf32> to vector<64x2048xbf16>
    %c0_64 = arith.constant 0 : index
    %c0_65 = arith.constant 0 : index
    %c0_66 = arith.constant 0 : index
    %159 = vector.load %arg15[%c0_64, %c0_65, %c0_66] : memref<1x2048x32xbf16, #tpu.memory_space<vmem>>, vector<1x2048x32xbf16>
    %160 = vector.shape_cast %159 : vector<1x2048x32xbf16> to vector<2048x32xbf16>
    %cst_67 = arith.constant dense<0.000000e+00> : vector<64x32xf32>
    %161 = tpu.matmul %158, %160, %cst_67 {dimension_numbers = #tpu.dot_dimension_numbers<[1], [0], [0], [1], [0, 0, 1, 1], [], []>} : vector<64x2048xbf16>, vector<2048x32xbf16>, vector<64x32xf32> -> vector<64x32xf32>
    %c0_68 = arith.constant 0 : index
    %c0_69 = arith.constant 0 : index
    %c0_70 = arith.constant 0 : index
    %162 = vector.load %arg16[%c0_68, %c0_69, %c0_70] : memref<1x1x32xf32, #tpu.memory_space<vmem>>, vector<1x1x32xf32>
    %163 = vector.shape_cast %162 : vector<1x1x32xf32> to vector<1x32xf32>
    %164 = vector.broadcast %163 : vector<1x32xf32> to vector<64x32xf32>
    %165 = arith.addf %161, %164 : vector<64x32xf32>
    %166 = arith.addf %136, %165 : vector<64x32xf32>
    %c0_71 = arith.constant 0 : index
    %c0_72 = arith.constant 0 : index
    %c0_73 = arith.constant 0 : index
    %167 = vector.load %arg17[%c0_71, %c0_72, %c0_73] : memref<1x1x32xf32, #tpu.memory_space<vmem>>, vector<1x1x32xf32>
    %168 = vector.shape_cast %167 : vector<1x1x32xf32> to vector<1x32xf32>
    %c0_74 = arith.constant 0 : index
    %c0_75 = arith.constant 0 : index
    %c0_76 = arith.constant 0 : index
    %169 = vector.load %arg18[%c0_74, %c0_75, %c0_76] : memref<1x1x32xf32, #tpu.memory_space<vmem>>, vector<1x1x32xf32>
    %170 = vector.shape_cast %169 : vector<1x1x32xf32> to vector<1x32xf32>
    %cst_77 = arith.constant dense<0.000000e+00> : vector<64xf32>
    %171 = vector.multi_reduction <add>, %166, %cst_77 [1] : vector<64x32xf32> to vector<64xf32>
    %172 = vector.shape_cast %171 : vector<64xf32> to vector<64x1xf32>
    %cst_78 = arith.constant 3.200000e+01 : f32
    %173 = vector.broadcast %cst_78 : f32 to vector<64x1xf32>
    %174 = arith.divf %172, %173 : vector<64x1xf32>
    %175 = vector.broadcast %174 : vector<64x1xf32> to vector<64x32xf32>
    %176 = arith.subf %166, %175 : vector<64x32xf32>
    %177 = arith.mulf %176, %176 : vector<64x32xf32>
    %cst_79 = arith.constant dense<0.000000e+00> : vector<64xf32>
    %178 = vector.multi_reduction <add>, %177, %cst_79 [1] : vector<64x32xf32> to vector<64xf32>
    %179 = vector.shape_cast %178 : vector<64xf32> to vector<64x1xf32>
    %cst_80 = arith.constant 3.200000e+01 : f32
    %180 = vector.broadcast %cst_80 : f32 to vector<64x1xf32>
    %181 = arith.divf %179, %180 : vector<64x1xf32>
    %182 = vector.broadcast %174 : vector<64x1xf32> to vector<64x32xf32>
    %183 = arith.subf %166, %182 : vector<64x32xf32>
    %cst_81 = arith.constant 9.99999974E-6 : f32
    %184 = vector.broadcast %cst_81 : f32 to vector<64x1xf32>
    %185 = arith.addf %181, %184 : vector<64x1xf32>
    %186 = math.rsqrt %185 : vector<64x1xf32>
    %187 = vector.broadcast %186 : vector<64x1xf32> to vector<64x32xf32>
    %188 = arith.mulf %183, %187 : vector<64x32xf32>
    %189 = vector.broadcast %168 : vector<1x32xf32> to vector<64x32xf32>
    %190 = arith.mulf %188, %189 : vector<64x32xf32>
    %191 = vector.broadcast %170 : vector<1x32xf32> to vector<64x32xf32>
    %192 = arith.addf %190, %191 : vector<64x32xf32>
    %c0_82 = arith.constant 0 : index
    %c0_83 = arith.constant 0 : index
    %193 = vector.load %arg22[%c0_82, %c0_83] : memref<64x32xf32, #tpu.memory_space<vmem>>, vector<64x32xf32>
    tpu.vector_store %arg22[%c0_82, %c0_83], %192 {strides = array<i32>} : memref<64x32xf32, #tpu.memory_space<vmem>>, vector<64x32xf32>,
    %c1_i32 = arith.constant 1 : i32
    %194 = arith.cmpi eq, %arg1, %c1_i32 : i32
    %195 = arith.extui %194 : i1 to i32
    %c0_i32_84 = arith.constant 0 : i32
    %196 = arith.cmpi ne, %195, %c0_i32_84 : i32
    scf.if %196 {
      %197 = vector.shape_cast %192 : vector<64x32xf32> to vector<8x8x32xf32>
      %c0_85 = arith.constant 0 : index
      %c0_86 = arith.constant 0 : index
      %198 = vector.load %arg19[%c0_85, %c0_86] : memref<1x32xf32, #tpu.memory_space<vmem>>, vector<1x32xf32>
      %199 = vector.shape_cast %198 : vector<1x32xf32> to vector<1x1x32xf32>
      %200 = vector.broadcast %199 : vector<1x1x32xf32> to vector<8x8x32xf32>
      %201 = arith.mulf %197, %200 : vector<8x8x32xf32>
      %cst_87 = arith.constant dense<0.000000e+00> : vector<8x8xf32>
      %202 = vector.multi_reduction <add>, %201, %cst_87 [2] : vector<8x8x32xf32> to vector<8x8xf32>
      %c0_88 = arith.constant 0 : index
      %c0_89 = arith.constant 0 : index
      %203 = vector.load %arg20[%c0_88, %c0_89] : memref<1x1xf32, #tpu.memory_space<vmem>>, vector<1x1xf32>
      %204 = vector.broadcast %203 : vector<1x1xf32> to vector<8x8xf32>
      %205 = arith.addf %202, %204 : vector<8x8xf32>
      %cst_90 = arith.constant dense<0xFF800000> : vector<8xf32>
      %206 = vector.multi_reduction <maximumf>, %205, %cst_90 [1] : vector<8x8xf32> to vector<8xf32>
      %207 = vector.shape_cast %206 : vector<8xf32> to vector<8x1xf32>
      %208 = vector.broadcast %207 : vector<8x1xf32> to vector<8x8xf32>
      %209 = arith.subf %205, %208 : vector<8x8xf32>
      %210 = math.exp %209 : vector<8x8xf32>
      %cst_91 = arith.constant dense<0.000000e+00> : vector<8xf32>
      %211 = vector.multi_reduction <add>, %210, %cst_91 [1] : vector<8x8xf32> to vector<8xf32>
      %212 = vector.shape_cast %211 : vector<8xf32> to vector<8x1xf32>
      %213 = tpu.reciprocal %212 {approx = true} : vector<8x1xf32> -> vector<8x1xf32>
      %214 = vector.broadcast %213 : vector<8x1xf32> to vector<8x8xf32>
      %215 = arith.mulf %210, %214 : vector<8x8xf32>
      %216 = vector.shape_cast %215 : vector<8x8xf32> to vector<8x8x1xf32>
      %217 = vector.broadcast %216 : vector<8x8x1xf32> to vector<8x8x32xf32>
      %218 = arith.mulf %197, %217 : vector<8x8x32xf32>
      %cst_92 = arith.constant dense<0.000000e+00> : vector<8x32xf32>
      %219 = vector.multi_reduction <add>, %218, %cst_92 [1] : vector<8x8x32xf32> to vector<8x32xf32>
      %c0_93 = arith.constant 0 : index
      %c0_94 = arith.constant 0 : index
      %220 = vector.load %arg21[%c0_93, %c0_94] : memref<8x32xf32, #tpu.memory_space<vmem>>, vector<8x32xf32>
      tpu.vector_store %arg21[%c0_93, %c0_94], %219 {strides = array<i32>} : memref<8x32xf32, #tpu.memory_space<vmem>>, vector<8x32xf32>,
    } else {
    }
    return
  }
  func.func @transform_0(%arg0: i32, %arg1: i32) -> (i32, i32, i32) {
    %c0_i32 = arith.constant 0 : i32
    %c0_i32_0 = arith.constant 0 : i32
    %c0_i32_1 = arith.constant 0 : i32
    return %arg0, %c0_i32, %c0_i32_0 : i32, i32, i32
  }
  func.func @transform_1(%arg0: i32, %arg1: i32) -> (i32, i32) {
    %c0_i32 = arith.constant 0 : i32
    %c0_i32_0 = arith.constant 0 : i32
    return %arg0, %c0_i32 : i32, i32
  }
  func.func @transform_2(%arg0: i32, %arg1: i32) -> (i32, i32) {
    %c0_i32 = arith.constant 0 : i32
    %c0_i32_0 = arith.constant 0 : i32
    %c0_i32_1 = arith.constant 0 : i32
    return %c0_i32, %c0_i32_0 : i32, i32
  }
  func.func @transform_3(%arg0: i32, %arg1: i32) -> (i32, i32) {
    %c0_i32 = arith.constant 0 : i32
    %c0_i32_0 = arith.constant 0 : i32
    %c0_i32_1 = arith.constant 0 : i32
    return %c0_i32, %c0_i32_0 : i32, i32
  }
  func.func @transform_4(%arg0: i32, %arg1: i32) -> (i32, i32) {
    %c0_i32 = arith.constant 0 : i32
    %c0_i32_0 = arith.constant 0 : i32
    %c0_i32_1 = arith.constant 0 : i32
    return %c0_i32, %c0_i32_0 : i32, i32
  }
  func.func @transform_5(%arg0: i32, %arg1: i32) -> (i32, i32, i32) {
    %c0_i32 = arith.constant 0 : i32
    %c0_i32_0 = arith.constant 0 : i32
    %c0_i32_1 = arith.constant 0 : i32
    return %arg1, %c0_i32, %c0_i32_0 : i32, i32, i32
  }
  func.func @transform_6(%arg0: i32, %arg1: i32) -> (i32, i32, i32) {
    %c0_i32 = arith.constant 0 : i32
    %c0_i32_0 = arith.constant 0 : i32
    %c0_i32_1 = arith.constant 0 : i32
    return %arg1, %c0_i32, %c0_i32_0 : i32, i32, i32
  }
  func.func @transform_7(%arg0: i32, %arg1: i32) -> (i32, i32, i32) {
    %c0_i32 = arith.constant 0 : i32
    %c0_i32_0 = arith.constant 0 : i32
    %c0_i32_1 = arith.constant 0 : i32
    return %arg1, %c0_i32, %c0_i32_0 : i32, i32, i32
  }
  func.func @transform_8(%arg0: i32, %arg1: i32) -> (i32, i32, i32) {
    %c0_i32 = arith.constant 0 : i32
    %c0_i32_0 = arith.constant 0 : i32
    %c0_i32_1 = arith.constant 0 : i32
    return %arg1, %c0_i32, %c0_i32_0 : i32, i32, i32
  }
  func.func @transform_9(%arg0: i32, %arg1: i32) -> (i32, i32, i32) {
    %c0_i32 = arith.constant 0 : i32
    %c0_i32_0 = arith.constant 0 : i32
    %c0_i32_1 = arith.constant 0 : i32
    return %arg1, %c0_i32, %c0_i32_0 : i32, i32, i32
  }
  func.func @transform_10(%arg0: i32, %arg1: i32) -> (i32, i32, i32) {
    %c0_i32 = arith.constant 0 : i32
    %c0_i32_0 = arith.constant 0 : i32
    %c0_i32_1 = arith.constant 0 : i32
    return %arg1, %c0_i32, %c0_i32_0 : i32, i32, i32
  }
  func.func @transform_11(%arg0: i32, %arg1: i32) -> (i32, i32, i32) {
    %c0_i32 = arith.constant 0 : i32
    %c0_i32_0 = arith.constant 0 : i32
    %c0_i32_1 = arith.constant 0 : i32
    return %arg1, %c0_i32, %c0_i32_0 : i32, i32, i32
  }
  func.func @transform_12(%arg0: i32, %arg1: i32) -> (i32, i32, i32) {
    %c0_i32 = arith.constant 0 : i32
    %c0_i32_0 = arith.constant 0 : i32
    %c0_i32_1 = arith.constant 0 : i32
    return %arg1, %c0_i32, %c0_i32_0 : i32, i32, i32
  }
  func.func @transform_13(%arg0: i32, %arg1: i32) -> (i32, i32, i32) {
    %c0_i32 = arith.constant 0 : i32
    %c0_i32_0 = arith.constant 0 : i32
    %c0_i32_1 = arith.constant 0 : i32
    return %arg1, %c0_i32, %c0_i32_0 : i32, i32, i32
  }
  func.func @transform_14(%arg0: i32, %arg1: i32) -> (i32, i32, i32) {
    %c0_i32 = arith.constant 0 : i32
    %c0_i32_0 = arith.constant 0 : i32
    %c0_i32_1 = arith.constant 0 : i32
    return %arg1, %c0_i32, %c0_i32_0 : i32, i32, i32
  }
  func.func @transform_15(%arg0: i32, %arg1: i32) -> (i32, i32, i32) {
    %c0_i32 = arith.constant 0 : i32
    %c0_i32_0 = arith.constant 0 : i32
    %c0_i32_1 = arith.constant 0 : i32
    return %arg1, %c0_i32, %c0_i32_0 : i32, i32, i32
  }
  func.func @transform_16(%arg0: i32, %arg1: i32) -> (i32, i32, i32) {
    %c0_i32 = arith.constant 0 : i32
    %c0_i32_0 = arith.constant 0 : i32
    %c0_i32_1 = arith.constant 0 : i32
    return %arg1, %c0_i32, %c0_i32_0 : i32, i32, i32
  }
  func.func @transform_17(%arg0: i32, %arg1: i32) -> (i32, i32) {
    %c0_i32 = arith.constant 0 : i32
    %c0_i32_0 = arith.constant 0 : i32
    %c0_i32_1 = arith.constant 0 : i32
    return %c0_i32, %c0_i32_0 : i32, i32
  }
  func.func @transform_18(%arg0: i32, %arg1: i32) -> (i32, i32) {
    %c0_i32 = arith.constant 0 : i32
    %c0_i32_0 = arith.constant 0 : i32
    %c0_i32_1 = arith.constant 0 : i32
    return %c0_i32, %c0_i32_0 : i32, i32
  }
  func.func @transform_19(%arg0: i32, %arg1: i32) -> (i32, i32) {
    %c0_i32 = arith.constant 0 : i32
    %c0_i32_0 = arith.constant 0 : i32
    return %arg0, %c0_i32 : i32, i32
  }
}

module attributes {stable_mosaic.version = 11 : i64} {
  func.func @_cross_heads_kernel(%arg0: i32, %arg1: memref<2x8x32xf32, #tpu.memory_space<vmem>>, %arg2: memref<32x96xbf16, #tpu.memory_space<vmem>>, %arg3: memref<1x96xf32, #tpu.memory_space<vmem>>, %arg4: memref<32x32xbf16, #tpu.memory_space<vmem>>, %arg5: memref<1x32xf32, #tpu.memory_space<vmem>>, %arg6: memref<32x128xbf16, #tpu.memory_space<vmem>>, %arg7: memref<1x128xf32, #tpu.memory_space<vmem>>, %arg8: memref<2x8x128xf32, #tpu.memory_space<vmem>>, %arg9: memref<16x32xf32, #tpu.memory_space<vmem>>) attributes {dimension_semantics = [#tpu.dimension_semantics<parallel>], iteration_bounds = array<i64: 1>, scalar_prefetch = 0 : i64, scratch_operands = 1 : i64, tpu.core_type = #tpu.core_type<tc>, window_params = [{transform_indices = @transform_0, window_bounds = array<i64: 2, 8, 32>}, {pipeline_mode = #tpu.pipeline_mode<synchronous>, transform_indices = @transform_1, window_bounds = array<i64: 32, 96>}, {pipeline_mode = #tpu.pipeline_mode<synchronous>, transform_indices = @transform_2, window_bounds = array<i64: 1, 96>}, {pipeline_mode = #tpu.pipeline_mode<synchronous>, transform_indices = @transform_3, window_bounds = array<i64: 32, 32>}, {pipeline_mode = #tpu.pipeline_mode<synchronous>, transform_indices = @transform_4, window_bounds = array<i64: 1, 32>}, {pipeline_mode = #tpu.pipeline_mode<synchronous>, transform_indices = @transform_5, window_bounds = array<i64: 32, 128>}, {pipeline_mode = #tpu.pipeline_mode<synchronous>, transform_indices = @transform_6, window_bounds = array<i64: 1, 128>}, {transform_indices = @transform_7, window_bounds = array<i64: 2, 8, 128>}]} {
    %c0 = arith.constant 0 : index
    %c0_0 = arith.constant 0 : index
    %c0_1 = arith.constant 0 : index
    %0 = vector.load %arg1[%c0, %c0_0, %c0_1] : memref<2x8x32xf32, #tpu.memory_space<vmem>>, vector<2x8x32xf32>
    %1 = vector.shape_cast %0 : vector<2x8x32xf32> to vector<16x32xf32>
    %2 = arith.truncf %1 : vector<16x32xf32> to vector<16x32xbf16>
    %c0_2 = arith.constant 0 : index
    %c0_3 = arith.constant 0 : index
    %3 = vector.load %arg2[%c0_2, %c0_3] : memref<32x96xbf16, #tpu.memory_space<vmem>>, vector<32x96xbf16>
    %cst = arith.constant dense<0.000000e+00> : vector<16x96xf32>
    %4 = tpu.matmul %2, %3, %cst {dimension_numbers = #tpu.dot_dimension_numbers<[1], [0], [0], [1], [0, 0, 1, 1], [], []>} : vector<16x32xbf16>, vector<32x96xbf16>, vector<16x96xf32> -> vector<16x96xf32>
    %c0_4 = arith.constant 0 : index
    %c0_5 = arith.constant 0 : index
    %5 = vector.load %arg3[%c0_4, %c0_5] : memref<1x96xf32, #tpu.memory_space<vmem>>, vector<1x96xf32>
    %6 = vector.broadcast %5 : vector<1x96xf32> to vector<16x96xf32>
    %7 = arith.addf %4, %6 : vector<16x96xf32>
    %8 = vector.extract_strided_slice %7 {offsets = [0, 0], sizes = [16, 32], strides = [1, 1]} : vector<16x96xf32> to vector<16x32xf32>
    %9 = arith.truncf %8 : vector<16x32xf32> to vector<16x32xbf16>
    %10 = vector.shape_cast %9 : vector<16x32xbf16> to vector<2x8x32xbf16>
    %11 = vector.extract_strided_slice %7 {offsets = [0, 32], sizes = [16, 32], strides = [1, 1]} : vector<16x96xf32> to vector<16x32xf32>
    %12 = arith.truncf %11 : vector<16x32xf32> to vector<16x32xbf16>
    %13 = vector.shape_cast %12 : vector<16x32xbf16> to vector<2x8x32xbf16>
    %14 = vector.extract_strided_slice %7 {offsets = [0, 64], sizes = [16, 32], strides = [1, 1]} : vector<16x96xf32> to vector<16x32xf32>
    %15 = arith.truncf %14 : vector<16x32xf32> to vector<16x32xbf16>
    %16 = vector.shape_cast %15 : vector<16x32xbf16> to vector<2x8x32xbf16>
    %17 = vector.extract_strided_slice %10 {offsets = [0, 0, 0], sizes = [2, 8, 8], strides = [1, 1, 1]} : vector<2x8x32xbf16> to vector<2x8x8xbf16>
    %18 = vector.extract_strided_slice %13 {offsets = [0, 0, 0], sizes = [2, 8, 8], strides = [1, 1, 1]} : vector<2x8x32xbf16> to vector<2x8x8xbf16>
    "tpu.trace_start"() <{level = 10 : i32, message = "bqc,bkc->bqk"}> : () -> ()
    %cst_6 = arith.constant dense<0.000000e+00> : vector<2x8x8xf32>
    %19 = tpu.matmul %17, %18, %cst_6 {dimension_numbers = #tpu.dot_dimension_numbers<[2], [2], [1], [1], [0, 0, 0, 1, 1, 1], [0], [0]>} : vector<2x8x8xbf16>, vector<2x8x8xbf16>, vector<2x8x8xf32> -> vector<2x8x8xf32>
    "tpu.trace_stop"() : () -> ()
    %cst_7 = arith.constant 0.353553385 : f32
    %20 = vector.broadcast %cst_7 : f32 to vector<2x8x8xf32>
    %21 = arith.mulf %19, %20 : vector<2x8x8xf32>
    %cst_8 = arith.constant dense<0xFF800000> : vector<2x8xf32>
    %22 = vector.multi_reduction <maximumf>, %21, %cst_8 [2] : vector<2x8x8xf32> to vector<2x8xf32>
    %23 = vector.shape_cast %22 : vector<2x8xf32> to vector<2x8x1xf32>
    %24 = vector.broadcast %23 : vector<2x8x1xf32> to vector<2x8x8xf32>
    %25 = arith.subf %21, %24 : vector<2x8x8xf32>
    %26 = math.exp %25 : vector<2x8x8xf32>
    %cst_9 = arith.constant dense<0.000000e+00> : vector<2x8xf32>
    %27 = vector.multi_reduction <add>, %26, %cst_9 [2] : vector<2x8x8xf32> to vector<2x8xf32>
    %28 = vector.shape_cast %27 : vector<2x8xf32> to vector<2x8x1xf32>
    %29 = tpu.reciprocal %28 {approx = true} : vector<2x8x1xf32> -> vector<2x8x1xf32>
    %30 = vector.broadcast %29 : vector<2x8x1xf32> to vector<2x8x8xf32>
    %31 = arith.mulf %26, %30 : vector<2x8x8xf32>
    %32 = arith.truncf %31 : vector<2x8x8xf32> to vector<2x8x8xbf16>
    %33 = vector.extract_strided_slice %16 {offsets = [0, 0, 0], sizes = [2, 8, 8], strides = [1, 1, 1]} : vector<2x8x32xbf16> to vector<2x8x8xbf16>
    "tpu.trace_start"() <{level = 10 : i32, message = "bqk,bkc->bqc"}> : () -> ()
    %cst_10 = arith.constant dense<0.000000e+00> : vector<2x8x8xf32>
    %34 = tpu.matmul %32, %33, %cst_10 {dimension_numbers = #tpu.dot_dimension_numbers<[2], [1], [1], [2], [0, 0, 0, 1, 1, 2], [0], [0]>} : vector<2x8x8xbf16>, vector<2x8x8xbf16>, vector<2x8x8xf32> -> vector<2x8x8xf32>
    "tpu.trace_stop"() : () -> ()
    %35 = vector.shape_cast %34 : vector<2x8x8xf32> to vector<16x8xf32>
    %c0_11 = arith.constant 0 : index
    %c0_12 = arith.constant 0 : index
    %36 = vector.load %arg9[%c0_11, %c0_12] : memref<16x32xf32, #tpu.memory_space<vmem>>, vector<16x8xf32>
    tpu.vector_store %arg9[%c0_11, %c0_12], %35 {strides = array<i32>} : memref<16x32xf32, #tpu.memory_space<vmem>>, vector<16x8xf32>,
    %37 = vector.extract_strided_slice %10 {offsets = [0, 0, 8], sizes = [2, 8, 8], strides = [1, 1, 1]} : vector<2x8x32xbf16> to vector<2x8x8xbf16>
    %38 = vector.extract_strided_slice %13 {offsets = [0, 0, 8], sizes = [2, 8, 8], strides = [1, 1, 1]} : vector<2x8x32xbf16> to vector<2x8x8xbf16>
    "tpu.trace_start"() <{level = 10 : i32, message = "bqc,bkc->bqk"}> : () -> ()
    %cst_13 = arith.constant dense<0.000000e+00> : vector<2x8x8xf32>
    %39 = tpu.matmul %37, %38, %cst_13 {dimension_numbers = #tpu.dot_dimension_numbers<[2], [2], [1], [1], [0, 0, 0, 1, 1, 1], [0], [0]>} : vector<2x8x8xbf16>, vector<2x8x8xbf16>, vector<2x8x8xf32> -> vector<2x8x8xf32>
    "tpu.trace_stop"() : () -> ()
    %cst_14 = arith.constant 0.353553385 : f32
    %40 = vector.broadcast %cst_14 : f32 to vector<2x8x8xf32>
    %41 = arith.mulf %39, %40 : vector<2x8x8xf32>
    %cst_15 = arith.constant dense<0xFF800000> : vector<2x8xf32>
    %42 = vector.multi_reduction <maximumf>, %41, %cst_15 [2] : vector<2x8x8xf32> to vector<2x8xf32>
    %43 = vector.shape_cast %42 : vector<2x8xf32> to vector<2x8x1xf32>
    %44 = vector.broadcast %43 : vector<2x8x1xf32> to vector<2x8x8xf32>
    %45 = arith.subf %41, %44 : vector<2x8x8xf32>
    %46 = math.exp %45 : vector<2x8x8xf32>
    %cst_16 = arith.constant dense<0.000000e+00> : vector<2x8xf32>
    %47 = vector.multi_reduction <add>, %46, %cst_16 [2] : vector<2x8x8xf32> to vector<2x8xf32>
    %48 = vector.shape_cast %47 : vector<2x8xf32> to vector<2x8x1xf32>
    %49 = tpu.reciprocal %48 {approx = true} : vector<2x8x1xf32> -> vector<2x8x1xf32>
    %50 = vector.broadcast %49 : vector<2x8x1xf32> to vector<2x8x8xf32>
    %51 = arith.mulf %46, %50 : vector<2x8x8xf32>
    %52 = arith.truncf %51 : vector<2x8x8xf32> to vector<2x8x8xbf16>
    %53 = vector.extract_strided_slice %16 {offsets = [0, 0, 8], sizes = [2, 8, 8], strides = [1, 1, 1]} : vector<2x8x32xbf16> to vector<2x8x8xbf16>
    "tpu.trace_start"() <{level = 10 : i32, message = "bqk,bkc->bqc"}> : () -> ()
    %cst_17 = arith.constant dense<0.000000e+00> : vector<2x8x8xf32>
    %54 = tpu.matmul %52, %53, %cst_17 {dimension_numbers = #tpu.dot_dimension_numbers<[2], [1], [1], [2], [0, 0, 0, 1, 1, 2], [0], [0]>} : vector<2x8x8xbf16>, vector<2x8x8xbf16>, vector<2x8x8xf32> -> vector<2x8x8xf32>
    "tpu.trace_stop"() : () -> ()
    %55 = vector.shape_cast %54 : vector<2x8x8xf32> to vector<16x8xf32>
    %c0_18 = arith.constant 0 : index
    %c8 = arith.constant 8 : index
    %56 = vector.load %arg9[%c0_18, %c8] : memref<16x32xf32, #tpu.memory_space<vmem>>, vector<16x8xf32>
    tpu.vector_store %arg9[%c0_18, %c8], %55 {strides = array<i32>} : memref<16x32xf32, #tpu.memory_space<vmem>>, vector<16x8xf32>,
    %57 = vector.extract_strided_slice %10 {offsets = [0, 0, 16], sizes = [2, 8, 8], strides = [1, 1, 1]} : vector<2x8x32xbf16> to vector<2x8x8xbf16>
    %58 = vector.extract_strided_slice %13 {offsets = [0, 0, 16], sizes = [2, 8, 8], strides = [1, 1, 1]} : vector<2x8x32xbf16> to vector<2x8x8xbf16>
    "tpu.trace_start"() <{level = 10 : i32, message = "bqc,bkc->bqk"}> : () -> ()
    %cst_19 = arith.constant dense<0.000000e+00> : vector<2x8x8xf32>
    %59 = tpu.matmul %57, %58, %cst_19 {dimension_numbers = #tpu.dot_dimension_numbers<[2], [2], [1], [1], [0, 0, 0, 1, 1, 1], [0], [0]>} : vector<2x8x8xbf16>, vector<2x8x8xbf16>, vector<2x8x8xf32> -> vector<2x8x8xf32>
    "tpu.trace_stop"() : () -> ()
    %cst_20 = arith.constant 0.353553385 : f32
    %60 = vector.broadcast %cst_20 : f32 to vector<2x8x8xf32>
    %61 = arith.mulf %59, %60 : vector<2x8x8xf32>
    %cst_21 = arith.constant dense<0xFF800000> : vector<2x8xf32>
    %62 = vector.multi_reduction <maximumf>, %61, %cst_21 [2] : vector<2x8x8xf32> to vector<2x8xf32>
    %63 = vector.shape_cast %62 : vector<2x8xf32> to vector<2x8x1xf32>
    %64 = vector.broadcast %63 : vector<2x8x1xf32> to vector<2x8x8xf32>
    %65 = arith.subf %61, %64 : vector<2x8x8xf32>
    %66 = math.exp %65 : vector<2x8x8xf32>
    %cst_22 = arith.constant dense<0.000000e+00> : vector<2x8xf32>
    %67 = vector.multi_reduction <add>, %66, %cst_22 [2] : vector<2x8x8xf32> to vector<2x8xf32>
    %68 = vector.shape_cast %67 : vector<2x8xf32> to vector<2x8x1xf32>
    %69 = tpu.reciprocal %68 {approx = true} : vector<2x8x1xf32> -> vector<2x8x1xf32>
    %70 = vector.broadcast %69 : vector<2x8x1xf32> to vector<2x8x8xf32>
    %71 = arith.mulf %66, %70 : vector<2x8x8xf32>
    %72 = arith.truncf %71 : vector<2x8x8xf32> to vector<2x8x8xbf16>
    %73 = vector.extract_strided_slice %16 {offsets = [0, 0, 16], sizes = [2, 8, 8], strides = [1, 1, 1]} : vector<2x8x32xbf16> to vector<2x8x8xbf16>
    "tpu.trace_start"() <{level = 10 : i32, message = "bqk,bkc->bqc"}> : () -> ()
    %cst_23 = arith.constant dense<0.000000e+00> : vector<2x8x8xf32>
    %74 = tpu.matmul %72, %73, %cst_23 {dimension_numbers = #tpu.dot_dimension_numbers<[2], [1], [1], [2], [0, 0, 0, 1, 1, 2], [0], [0]>} : vector<2x8x8xbf16>, vector<2x8x8xbf16>, vector<2x8x8xf32> -> vector<2x8x8xf32>
    "tpu.trace_stop"() : () -> ()
    %75 = vector.shape_cast %74 : vector<2x8x8xf32> to vector<16x8xf32>
    %c0_24 = arith.constant 0 : index
    %c16 = arith.constant 16 : index
    %76 = vector.load %arg9[%c0_24, %c16] : memref<16x32xf32, #tpu.memory_space<vmem>>, vector<16x8xf32>
    tpu.vector_store %arg9[%c0_24, %c16], %75 {strides = array<i32>} : memref<16x32xf32, #tpu.memory_space<vmem>>, vector<16x8xf32>,
    %77 = vector.extract_strided_slice %10 {offsets = [0, 0, 24], sizes = [2, 8, 8], strides = [1, 1, 1]} : vector<2x8x32xbf16> to vector<2x8x8xbf16>
    %78 = vector.extract_strided_slice %13 {offsets = [0, 0, 24], sizes = [2, 8, 8], strides = [1, 1, 1]} : vector<2x8x32xbf16> to vector<2x8x8xbf16>
    "tpu.trace_start"() <{level = 10 : i32, message = "bqc,bkc->bqk"}> : () -> ()
    %cst_25 = arith.constant dense<0.000000e+00> : vector<2x8x8xf32>
    %79 = tpu.matmul %77, %78, %cst_25 {dimension_numbers = #tpu.dot_dimension_numbers<[2], [2], [1], [1], [0, 0, 0, 1, 1, 1], [0], [0]>} : vector<2x8x8xbf16>, vector<2x8x8xbf16>, vector<2x8x8xf32> -> vector<2x8x8xf32>
    "tpu.trace_stop"() : () -> ()
    %cst_26 = arith.constant 0.353553385 : f32
    %80 = vector.broadcast %cst_26 : f32 to vector<2x8x8xf32>
    %81 = arith.mulf %79, %80 : vector<2x8x8xf32>
    %cst_27 = arith.constant dense<0xFF800000> : vector<2x8xf32>
    %82 = vector.multi_reduction <maximumf>, %81, %cst_27 [2] : vector<2x8x8xf32> to vector<2x8xf32>
    %83 = vector.shape_cast %82 : vector<2x8xf32> to vector<2x8x1xf32>
    %84 = vector.broadcast %83 : vector<2x8x1xf32> to vector<2x8x8xf32>
    %85 = arith.subf %81, %84 : vector<2x8x8xf32>
    %86 = math.exp %85 : vector<2x8x8xf32>
    %cst_28 = arith.constant dense<0.000000e+00> : vector<2x8xf32>
    %87 = vector.multi_reduction <add>, %86, %cst_28 [2] : vector<2x8x8xf32> to vector<2x8xf32>
    %88 = vector.shape_cast %87 : vector<2x8xf32> to vector<2x8x1xf32>
    %89 = tpu.reciprocal %88 {approx = true} : vector<2x8x1xf32> -> vector<2x8x1xf32>
    %90 = vector.broadcast %89 : vector<2x8x1xf32> to vector<2x8x8xf32>
    %91 = arith.mulf %86, %90 : vector<2x8x8xf32>
    %92 = arith.truncf %91 : vector<2x8x8xf32> to vector<2x8x8xbf16>
    %93 = vector.extract_strided_slice %16 {offsets = [0, 0, 24], sizes = [2, 8, 8], strides = [1, 1, 1]} : vector<2x8x32xbf16> to vector<2x8x8xbf16>
    "tpu.trace_start"() <{level = 10 : i32, message = "bqk,bkc->bqc"}> : () -> ()
    %cst_29 = arith.constant dense<0.000000e+00> : vector<2x8x8xf32>
    %94 = tpu.matmul %92, %93, %cst_29 {dimension_numbers = #tpu.dot_dimension_numbers<[2], [1], [1], [2], [0, 0, 0, 1, 1, 2], [0], [0]>} : vector<2x8x8xbf16>, vector<2x8x8xbf16>, vector<2x8x8xf32> -> vector<2x8x8xf32>
    "tpu.trace_stop"() : () -> ()
    %95 = vector.shape_cast %94 : vector<2x8x8xf32> to vector<16x8xf32>
    %c0_30 = arith.constant 0 : index
    %c24 = arith.constant 24 : index
    %96 = vector.load %arg9[%c0_30, %c24] : memref<16x32xf32, #tpu.memory_space<vmem>>, vector<16x8xf32>
    tpu.vector_store %arg9[%c0_30, %c24], %95 {strides = array<i32>} : memref<16x32xf32, #tpu.memory_space<vmem>>, vector<16x8xf32>,
    %c0_31 = arith.constant 0 : index
    %c0_32 = arith.constant 0 : index
    %97 = vector.load %arg9[%c0_31, %c0_32] : memref<16x32xf32, #tpu.memory_space<vmem>>, vector<16x32xf32>
    %98 = arith.truncf %97 : vector<16x32xf32> to vector<16x32xbf16>
    %c0_33 = arith.constant 0 : index
    %c0_34 = arith.constant 0 : index
    %99 = vector.load %arg4[%c0_33, %c0_34] : memref<32x32xbf16, #tpu.memory_space<vmem>>, vector<32x32xbf16>
    %cst_35 = arith.constant dense<0.000000e+00> : vector<16x32xf32>
    %100 = tpu.matmul %98, %99, %cst_35 {dimension_numbers = #tpu.dot_dimension_numbers<[1], [0], [0], [1], [0, 0, 1, 1], [], []>} : vector<16x32xbf16>, vector<32x32xbf16>, vector<16x32xf32> -> vector<16x32xf32>
    %c0_36 = arith.constant 0 : index
    %c0_37 = arith.constant 0 : index
    %101 = vector.load %arg5[%c0_36, %c0_37] : memref<1x32xf32, #tpu.memory_space<vmem>>, vector<1x32xf32>
    %102 = vector.broadcast %101 : vector<1x32xf32> to vector<16x32xf32>
    %103 = arith.addf %100, %102 : vector<16x32xf32>
    %104 = arith.addf %1, %103 : vector<16x32xf32>
    %105 = arith.truncf %104 : vector<16x32xf32> to vector<16x32xbf16>
    %c0_38 = arith.constant 0 : index
    %c0_39 = arith.constant 0 : index
    %106 = vector.load %arg6[%c0_38, %c0_39] : memref<32x128xbf16, #tpu.memory_space<vmem>>, vector<32x128xbf16>
    %cst_40 = arith.constant dense<0.000000e+00> : vector<16x128xf32>
    %107 = tpu.matmul %105, %106, %cst_40 {dimension_numbers = #tpu.dot_dimension_numbers<[1], [0], [0], [1], [0, 0, 1, 1], [], []>} : vector<16x32xbf16>, vector<32x128xbf16>, vector<16x128xf32> -> vector<16x128xf32>
    %c0_41 = arith.constant 0 : index
    %c0_42 = arith.constant 0 : index
    %108 = vector.load %arg7[%c0_41, %c0_42] : memref<1x128xf32, #tpu.memory_space<vmem>>, vector<1x128xf32>
    %109 = vector.broadcast %108 : vector<1x128xf32> to vector<16x128xf32>
    %110 = arith.addf %107, %109 : vector<16x128xf32>
    %111 = vector.shape_cast %110 : vector<16x128xf32> to vector<2x8x128xf32>
    %c0_43 = arith.constant 0 : index
    %c0_44 = arith.constant 0 : index
    %c0_45 = arith.constant 0 : index
    %112 = vector.load %arg8[%c0_43, %c0_44, %c0_45] : memref<2x8x128xf32, #tpu.memory_space<vmem>>, vector<2x8x128xf32>
    tpu.vector_store %arg8[%c0_43, %c0_44, %c0_45], %111 {strides = array<i32>} : memref<2x8x128xf32, #tpu.memory_space<vmem>>, vector<2x8x128xf32>,
    return
  }
  func.func @transform_0(%arg0: i32) -> (i32, i32, i32) {
    %c0_i32 = arith.constant 0 : i32
    %c0_i32_0 = arith.constant 0 : i32
    %c0_i32_1 = arith.constant 0 : i32
    return %arg0, %c0_i32, %c0_i32_0 : i32, i32, i32
  }
  func.func @transform_1(%arg0: i32) -> (i32, i32) {
    %c0_i32 = arith.constant 0 : i32
    %c0_i32_0 = arith.constant 0 : i32
    %c0_i32_1 = arith.constant 0 : i32
    return %c0_i32, %c0_i32_0 : i32, i32
  }
  func.func @transform_2(%arg0: i32) -> (i32, i32) {
    %c0_i32 = arith.constant 0 : i32
    %c0_i32_0 = arith.constant 0 : i32
    %c0_i32_1 = arith.constant 0 : i32
    return %c0_i32, %c0_i32_0 : i32, i32
  }
  func.func @transform_3(%arg0: i32) -> (i32, i32) {
    %c0_i32 = arith.constant 0 : i32
    %c0_i32_0 = arith.constant 0 : i32
    %c0_i32_1 = arith.constant 0 : i32
    return %c0_i32, %c0_i32_0 : i32, i32
  }
  func.func @transform_4(%arg0: i32) -> (i32, i32) {
    %c0_i32 = arith.constant 0 : i32
    %c0_i32_0 = arith.constant 0 : i32
    %c0_i32_1 = arith.constant 0 : i32
    return %c0_i32, %c0_i32_0 : i32, i32
  }
  func.func @transform_5(%arg0: i32) -> (i32, i32) {
    %c0_i32 = arith.constant 0 : i32
    %c0_i32_0 = arith.constant 0 : i32
    %c0_i32_1 = arith.constant 0 : i32
    return %c0_i32, %c0_i32_0 : i32, i32
  }
  func.func @transform_6(%arg0: i32) -> (i32, i32) {
    %c0_i32 = arith.constant 0 : i32
    %c0_i32_0 = arith.constant 0 : i32
    %c0_i32_1 = arith.constant 0 : i32
    return %c0_i32, %c0_i32_0 : i32, i32
  }
  func.func @transform_7(%arg0: i32) -> (i32, i32, i32) {
    %c0_i32 = arith.constant 0 : i32
    %c0_i32_0 = arith.constant 0 : i32
    %c0_i32_1 = arith.constant 0 : i32
    return %arg0, %c0_i32, %c0_i32_0 : i32, i32, i32
  }
}

</mosaic_0001>

<bundles_post_ra>
// kernel: fortune_forward.3
= control target key start
LH: loop header
LB: loop body
LE: loop exit
PB: predicated region body
PF: predicated region fallthrough
CT: control target
= control target key end

     0   :  { %v1457_v1 = vmov 0.0   ;;  %vm1458_vm0 = vmmov 0   ;;  %s1722_s0 = inlined_call_operand.vmem [shape: f32[2,8,32], index: 0, kind: input, shape index: {}]   ;;  %s1723_s1 = inlined_call_operand.vmem [shape: bf16[32,96], index: 1, kind: input, shape index: {}]   ;;  %s1724_s2 = inlined_call_operand.vmem [shape: f32[1,96], index: 2, kind: input, shape index: {}]   ;;  %s1725_s3 = inlined_call_operand.vmem [shape: bf16[32,32], index: 3, kind: input, shape index: {}]   ;;  %s1726_s4 = inlined_call_operand.vmem [shape: f32[1,32], index: 4, kind: input, shape index: {}]   ;;  %s1727_s5 = inlined_call_operand.vmem [shape: bf16[32,128], index: 5, kind: input, shape index: {}]   ;;  %s1728_s6 = inlined_call_operand.vmem [shape: f32[1,128], index: 6, kind: input, shape index: {}]   ;;  %s1729_s7 = inlined_call_operand.hbm [shape: f32[2,8,128], index: 7, kind: output, shape index: {}]  }
   0x1   :  { %v1395_v0 = vld [vmem:[%s1723_s1] sm:$0xff]   ;;  %1257 = vmatprep.subr.bf16.mxu0 %v1457_v1  ;;  %1265 = vmatprep.subr.bf16.mxu1 %v1457_v1  ;;  %v1396_v2 = vld [vmem:[%s1723_s1 + $0x8] sm:$0xff]  }
   0x2   :  { %1258 = vmatpush3.bf16.msra.mxu0 %v1395_v0  ;;  %1261 = vmatprep.mubr.msk.bf16.mxu0 %vm1458_vm0, %v1457_v1  ;;  %v1528_v3 = vld [vmem:[%s1722_s0] sm:$0xff]  ;;  %v1533_v4 = vld [vmem:[%s1722_s0 + $0x8] sm:$0xff] }
   0x3   :  { %1259 = vmatprep.subr.bf16.mxu0 %v1457_v1  ;;  %1267 = vmatprep.mubr.msk.bf16.mxu1 %vm1458_vm0, %v1457_v1  ;;  %v30_v5 = vpack.c.bf16 %v1533_v4, %v1528_v3 }
   0x4   :  { %12 = vsyncpa [#allocation4], 0  ;;  %vm54_vm1 = vcmask 261120   ;;  %v1184_v6 = vld [vmem:[%s1724_s2] ss:$0 sm:$0xff]  ;;  %s1459_s9 = smov 96  }
   0x5   :  { %vm107_vm2 = vcmask 64512   ;;  %s1460_s2 = smov 64   ;;  %s1461_s10 = smov 88   ;;  %vm233_vm3 = vcmask 1043456   ;;  %vm557_vm4 = vcmask 130112   ;;  %vm790_vm5 = vcmask 195712  }
   0x6   :  { %1260 = vmatpush3.bf16.msra.mxu0 %v1396_v2  ;;  %s1462_s11 = smov 120   ;;  %s1463_s12 = smov 56   ;;  %vm1023_vm6 = vcmask 261312  }
   0x7   :  { %1271 = vmatprep.subr.bf16.mxu0 %v1457_v1  ;;  %s1464_s13 = smov 80   ;;  %s1465_s14 = smov 112  }
   0x8   :  { %s1466_s15 = smov 48   ;;  %s1467_s16 = smov 72  }
   0x9   :  { %1262 = vmatmul.mubr.msk.bf16.vlgmr.msra.gmra.mrb[0].mxu0 %vm54_vm1, %v30_v5  ;;  %s1468_s17 = smov 104   ;;  %s1469_s18 = smov 40  }
   0xa   :  { %1273 = vmatprep.mubr.msk.bf16.mxu0 %vm1458_vm0, %v1457_v1  ;;  %s1470_s19 = smov 8   ;;  %s1471_s20 = smov 16  }
   0xb   :  { %s1472_s25 = smov 24   ;;  %s1473_s0 = smov [#allocation3]  }
  0xdc   :  { %v92_v7 = vpop.f32.mrb[0].mxu0 }
  0xdd   :  { %v93_v8 = vadd.f32 %v1184_v6, %v92_v7  ;;  %v1263_v9 = vpop.f32.mrb[1].mxu0 }
  0xde   :  { %v95_v10 = vpop.f32.mrb[2].mxu0 }
  0xdf   :  { %v1547_v11 = vpack.c.bf16 %v93_v8, %v93_v8  ;;  %v96_v12 = vadd.f32 %v1184_v6, %v95_v10  ;;  %v1264_v13 = vpop.f32.mrb[3].mxu0 }
  0xe1   :  { %105 = vrot.lane.b32.xlu0 %v1547_v11, %s1459_s9  ;;  %v1550_v14 = vpack.c.bf16 %v96_v12, %v96_v12 }
  0xe5   :  { %154 = vrot.lane.b32.xlu0 %v1550_v14, %s1459_s9 }
 0x153   :  { %v106_v15 = vpop.permute.xlu0 %105 }
 0x154   :  { %v112_v16 = vsel %vm107_vm2, %v106_v15, 0 }
 0x155   :  { %1266 = vmatpush3.bf16.xpose.msra.mxu1 %v112_v16 }
 0x156   :  { %1277 = vmatprep.subr.bf16.mxu1 %v1457_v1 }
 0x157   :  { %v155_v17 = vpop.permute.xlu0 %154 }
 0x158   :  { %v160_v18 = vsel %vm107_vm2, %v155_v17, 0 }
 0x159   :  { %1272 = vmatpush3.bf16.xpose.msra.mxu0 %v160_v18 }
 0x15a   :  { %1283 = vmatprep.subr.bf16.mxu0 %v1457_v1 }
 0x15c   :  { %1268 = vmatmul.mubr.msk.bf16.vlgmr.msra.gmra.mrb[0].mxu1 %vm107_vm2, %v1547_v11 }
 0x15d   :  { %1279 = vmatprep.mubr.msk.bf16.mxu1 %vm1458_vm0, %v1457_v1 }
 0x160   :  { %1274 = vmatmul.mubr.msk.bf16.vlgmr.msra.gmra.mrb[4].mxu0 %vm107_vm2, %v1550_v14 }
 0x161   :  { %1285 = vmatprep.mubr.msk.bf16.mxu0 %vm1458_vm0, %v1457_v1 }
 0x22f   :  { %v148_v19 = vpop.f32.mrb[0].mxu1 }
 0x230   :  { %v202_v20 = vmul.f32 0.35355338, %v148_v19  ;;  %v1269_v21 = vpop.f32.mrb[1].mxu1 }
 0x231   :  { %v151_v22 = vpop.f32.mrb[2].mxu1 }
 0x232   :  { %v1270_v23 = vpop.f32.mrb[3].mxu1  ;;  %v204_v24 = vsel %vm107_vm2, %v202_v20, -inf }
 0x233   :  { %205 = vmax.xlane.f32.xlu1 %v204_v24  ;;  %v196_v25 = vpop.f32.mrb[4].mxu0 }
 0x234   :  { %v203_v26 = vmul.f32 0.35355338, %v196_v25  ;;  %v1275_v27 = vpop.f32.mrb[5].mxu0 }
 0x235   :  { %v199_v28 = vpop.f32.mrb[6].mxu0 }
 0x236   :  { %v1276_v29 = vpop.f32.mrb[7].mxu0  ;;  %v207_v30 = vsel %vm107_vm2, %v203_v26, -inf }
 0x237   :  { %208 = vmax.xlane.f32.xlu1 %v207_v30 }
 0x248   :  { %228 = vrot.lane.b32.xlu1 %v1547_v11, %s1460_s2 }
 0x24c   :  { %277 = vrot.lane.b32.xlu1 %v1550_v14, %s1460_s2 }
 0x250   :  { %329 = vrot.lane.b32.xlu1 %v1547_v11, %s1461_s10 }
 0x2c0   :  { %v206_v31 = vpop.xlane.xlu1 %205 }
 0x2c1   :  { %v210_v32 = vsub.f32 %v202_v20, %v206_v31 }
 0x2c3   :  { %v212_v33 = vmul.f32 1.442695, %v210_v32 }
 0x2c4   :  { %v209_v34 = vpop.xlane.xlu1 %208 }
 0x2c5   :  { %1401 = vpow2.f32 %v212_v33  ;;  %v211_v35 = vsub.f32 %v203_v26, %v209_v34 }
 0x2c7   :  { %v214_v36 = vmul.f32 1.442695, %v211_v35 }
 0x2c8   :  { %v229_v37 = vpop.permute.xlu1 %228 }
 0x2c9   :  { %1403 = vpow2.f32 %v214_v36  ;;  %v235_v38 = vsel %vm233_vm3, %v229_v37, 0 }
 0x2ca   :  { %1278 = vmatpush3.bf16.msra.mxu1 %v235_v38 }
 0x2cb   :  { %1289 = vmatprep.subr.bf16.mxu1 %v1457_v1 }
 0x2cc   :  { %v278_v39 = vpop.permute.xlu1 %277 }
 0x2cd   :  { %v283_v40 = vsel %vm233_vm3, %v278_v39, 0 }
 0x2ce   :  { %1284 = vmatpush3.bf16.msra.mxu0 %v283_v40 }
 0x2cf   :  { %v1402_v41 = vpop.eup %1401  ;;  %1295 = vmatprep.subr.bf16.mxu0 %v1457_v1 }
 0x2d0   :  { %v216_v42 = vsel %vm107_vm2, %v1402_v41, 0.0  ;;  %v330_v45 = vpop.permute.xlu1 %329 }
 0x2d1   :  { %217 = vadd.xlane.f32.xlu0 %v216_v42  ;;  %v335_v52 = vsel %vm107_vm2, %v330_v45, 0 }
 0x2d3   :  { %v1404_v43 = vpop.eup %1403 }
 0x2d4   :  { %v219_v44 = vsel %vm107_vm2, %v1404_v43, 0.0 }
 0x2d5   :  { %220 = vadd.xlane.f32.xlu1 %v219_v44 }
 0x2e6   :  { %379 = vrot.lane.b32.xlu1 %v1550_v14, %s1461_s10 }
 0x2e7   :  { %327 = vrot.lane.b32.xlu0 %v1547_v11, %s1462_s11 }
 0x2ea   :  { %377 = vrot.lane.b32.xlu1 %v1550_v14, %s1462_s11 }
 0x35e   :  { %v218_v46 = vpop.xlane.xlu0 %217 }
 0x35f   :  { %1405 = vrcp.f32 %v218_v46 }
 0x362   :  { %v221_v47 = vpop.xlane.xlu1 %220  ;;  %v328_v57 = vpop.permute.xlu0 %327 }
 0x363   :  { %1407 = vrcp.f32 %v221_v47 }
 0x366   :  { %v380_v54 = vpop.permute.xlu1 %379 }
 0x367   :  { %v385_v56 = vsel %vm107_vm2, %v380_v54, 0 }
 0x369   :  { %v1406_v48 = vpop.eup %1405 }
 0x36a   :  { %v224_v49 = vmul.f32 %v1406_v48, %v1402_v41  ;;  %v378_v58 = vpop.permute.xlu1 %377 }
 0x36c   :  { %v226_v50 = vpack.c.bf16 %v224_v49, %v224_v49 }
 0x36d   :  { %v1408_v51 = vpop.eup %1407 }
 0x36e   :  { %v225_v53 = vmul.f32 %v1408_v51, %v1404_v43  ;;  %1280 = vmatmul.mubr.msk.bf16.vlgmr.msra.gmra.mrb[4].mxu1 %vm107_vm2, %v226_v50 }
 0x36f   :  { %1290 = vmatpush3.bf16.xpose.msra.mxu1 %v335_v52  ;;  %1291 = vmatprep.mubr.msk.bf16.mxu1 %vm1458_vm0, %v1457_v1 }
 0x370   :  { %v227_v55 = vpack.c.bf16 %v225_v53, %v225_v53  ;;  %1301 = vmatprep.subr.bf16.mxu1 %v1457_v1 }
 0x372   :  { %1286 = vmatmul.mubr.msk.bf16.vlgmr.msra.gmra.mrb[8].mxu0 %vm107_vm2, %v227_v55 }
 0x373   :  { %1296 = vmatpush3.bf16.xpose.msra.mxu0 %v385_v56  ;;  %1297 = vmatprep.mubr.msk.bf16.mxu0 %vm1458_vm0, %v1457_v1 }
 0x374   :  { %1307 = vmatprep.subr.bf16.mxu0 %v1457_v1 }
 0x376   :  { %1292 = vmatmul.mubr.msk.bf16.vlgmr.msra.gmra.mrb[8].mxu1 %vm107_vm2, %v328_v57 }
 0x377   :  { %1303 = vmatprep.mubr.msk.bf16.mxu1 %vm1458_vm0, %v1457_v1 }
 0x37a   :  { %1298 = vmatmul.mubr.msk.bf16.vlgmr.msra.gmra.mrb[12].mxu0 %vm107_vm2, %v378_v58 }
 0x37b   :  { %1309 = vmatprep.mubr.msk.bf16.mxu0 %vm1458_vm0, %v1457_v1 }
 0x441   :  { %v271_v59 = vpop.f32.mrb[4].mxu1 }
 0x442   :  { %325 = vst.msk [vmem:[#allocation2] sm:$0xff] %vm107_vm2, %v271_v59  ;;  %v1281_v60 = vpop.f32.mrb[5].mxu1 }
 0x443   :  { %v274_v61 = vpop.f32.mrb[6].mxu1 }
 0x444   :  { %v1282_v62 = vpop.f32.mrb[7].mxu1 }
 0x445   :  { %v319_v63 = vpop.f32.mrb[8].mxu0 }
 0x446   :  { %326 = vst.msk [vmem:[#allocation2 + $0x8] sm:$0xff] %vm107_vm2, %v319_v63  ;;  %v1287_v0 = vpop.f32.mrb[9].mxu0 }
 0x447   :  { %v322_v2 = vpop.f32.mrb[10].mxu0 }
 0x448   :  { %v1288_v5 = vpop.f32.mrb[11].mxu0 }
 0x449   :  { %v371_v6 = vpop.f32.mrb[8].mxu1 }
 0x44a   :  { %v427_v7 = vmul.f32 0.35355338, %v371_v6  ;;  %v1293_v8 = vpop.f32.mrb[9].mxu1 }
 0x44b   :  { %v374_v9 = vpop.f32.mrb[10].mxu1 }
 0x44c   :  { %v1294_v10 = vpop.f32.mrb[11].mxu1  ;;  %v429_v12 = vsel %vm107_vm2, %v427_v7, -inf }
 0x44d   :  { %430 = vmax.xlane.f32.xlu1 %v429_v12  ;;  %v421_v13 = vpop.f32.mrb[12].mxu0 }
 0x44e   :  { %v428_v15 = vmul.f32 0.35355338, %v421_v13  ;;  %v1299_v16 = vpop.f32.mrb[13].mxu0 }
 0x44f   :  { %v424_v17 = vpop.f32.mrb[14].mxu0 }
 0x450   :  { %v1300_v18 = vpop.f32.mrb[15].mxu0  ;;  %v432_v19 = vsel %vm107_vm2, %v428_v15, -inf }
 0x451   :  { %433 = vmax.xlane.f32.xlu0 %v432_v19 }
 0x45e   :  { %453 = vrot.lane.b32.xlu1 %v1547_v11, %s1463_s12 }
 0x462   :  { %562 = vrot.lane.b32.xlu1 %v1547_v11, %s1464_s13 }
 0x467   :  { %501 = vrot.lane.b32.xlu0 %v1550_v14, %s1463_s12 }
 0x46b   :  { %560 = vrot.lane.b32.xlu0 %v1547_v11, %s1465_s14 }
 0x4da   :  { %v431_v20 = vpop.xlane.xlu1 %430 }
 0x4db   :  { %v435_v21 = vsub.f32 %v427_v7, %v431_v20 }
 0x4dd   :  { %v437_v22 = vmul.f32 1.442695, %v435_v21 }
 0x4de   :  { %v454_v23 = vpop.permute.xlu1 %453  ;;  %v434_v24 = vpop.xlane.xlu0 %433 }
 0x4df   :  { %1409 = vpow2.f32 %v437_v22  ;;  %v459_v25 = vsel %vm233_vm3, %v454_v23, 0  ;;  %v436_v26 = vsub.f32 %v428_v15, %v434_v24 }
 0x4e0   :  { %1302 = vmatpush3.bf16.msra.mxu1 %v459_v25 }
 0x4e1   :  { %v439_v27 = vmul.f32 1.442695, %v436_v26  ;;  %1313 = vmatprep.subr.bf16.mxu1 %v1457_v1 }
 0x4e2   :  { %v502_v28 = vpop.permute.xlu0 %501  ;;  %v563_v34 = vpop.permute.xlu1 %562 }
 0x4e3   :  { %1411 = vpow2.f32 %v439_v27  ;;  %v507_v29 = vsel %vm233_vm3, %v502_v28, 0  ;;  %v568_v41 = vsel %vm107_vm2, %v563_v34, 0 }
 0x4e4   :  { %1308 = vmatpush3.bf16.msra.mxu0 %v507_v29 }
 0x4e5   :  { %1319 = vmatprep.subr.bf16.mxu0 %v1457_v1 }
 0x4e6   :  { %v561_v46 = vpop.permute.xlu0 %560 }
 0x4e9   :  { %v1410_v30 = vpop.eup %1409 }
 0x4ea   :  { %v441_v31 = vsel %vm107_vm2, %v1410_v30, 0.0 }
 0x4eb   :  { %442 = vadd.xlane.f32.xlu1 %v441_v31 }
 0x4ed   :  { %v1412_v32 = vpop.eup %1411 }
 0x4ee   :  { %v444_v33 = vsel %vm107_vm2, %v1412_v32, 0.0 }
 0x4ef   :  { %445 = vadd.xlane.f32.xlu1 %v444_v33 }
 0x500   :  { %612 = vrot.lane.b32.xlu1 %v1550_v14, %s1464_s13 }
 0x504   :  { %610 = vrot.lane.b32.xlu1 %v1550_v14, %s1465_s14 }
 0x578   :  { %v443_v35 = vpop.xlane.xlu1 %442 }
 0x579   :  { %1413 = vrcp.f32 %v443_v35 }
 0x57c   :  { %v446_v36 = vpop.xlane.xlu1 %445 }
 0x57d   :  { %1415 = vrcp.f32 %v446_v36 }
 0x580   :  { %v613_v43 = vpop.permute.xlu1 %612 }
 0x581   :  { %v618_v45 = vsel %vm107_vm2, %v613_v43, 0 }
 0x583   :  { %v1414_v37 = vpop.eup %1413 }
 0x584   :  { %v449_v38 = vmul.f32 %v1414_v37, %v1410_v30  ;;  %v611_v47 = vpop.permute.xlu1 %610 }
 0x586   :  { %v451_v39 = vpack.c.bf16 %v449_v38, %v449_v38 }
 0x587   :  { %v1416_v40 = vpop.eup %1415 }
 0x588   :  { %v450_v42 = vmul.f32 %v1416_v40, %v1412_v32  ;;  %1304 = vmatmul.mubr.msk.bf16.vlgmr.msra.gmra.mrb[12].mxu1 %vm107_vm2, %v451_v39 }
 0x589   :  { %1314 = vmatpush3.bf16.xpose.msra.mxu1 %v568_v41  ;;  %1315 = vmatprep.mubr.msk.bf16.mxu1 %vm1458_vm0, %v1457_v1 }
 0x58a   :  { %v452_v44 = vpack.c.bf16 %v450_v42, %v450_v42  ;;  %1325 = vmatprep.subr.bf16.mxu1 %v1457_v1 }
 0x58c   :  { %1310 = vmatmul.mubr.msk.bf16.vlgmr.msra.gmra.mrb[16].mxu0 %vm107_vm2, %v452_v44 }
 0x58d   :  { %1320 = vmatpush3.bf16.xpose.msra.mxu0 %v618_v45  ;;  %1321 = vmatprep.mubr.msk.bf16.mxu0 %vm1458_vm0, %v1457_v1 }
 0x58e   :  { %1331 = vmatprep.subr.bf16.mxu0 %v1457_v1 }
 0x590   :  { %1316 = vmatmul.mubr.msk.bf16.vlgmr.msra.gmra.mrb[16].mxu1 %vm107_vm2, %v561_v46 }
 0x591   :  { %1327 = vmatprep.mubr.msk.bf16.mxu1 %vm1458_vm0, %v1457_v1 }
 0x594   :  { %1322 = vmatmul.mubr.msk.bf16.vlgmr.msra.gmra.mrb[20].mxu0 %vm107_vm2, %v611_v47 }
 0x595   :  { %1333 = vmatprep.mubr.msk.bf16.mxu0 %vm1458_vm0, %v1457_v1 }
 0x65b   :  { %v1627_v48 = vpop.f32.mrb[12].mxu1 }
 0x65c   :  { %v1305_v49 = vpop.f32.mrb[13].mxu1 }
 0x65d   :  { %v498_v50 = vpop.f32.mrb[14].mxu1 }
 0x65e   :  { %v1306_v51 = vpop.f32.mrb[15].mxu1 }
 0x65f   :  { %v1629_v52 = vpop.f32.mrb[16].mxu0 }
 0x660   :  { %v1311_v53 = vpop.f32.mrb[17].mxu0 }
 0x661   :  { %v546_v54 = vpop.f32.mrb[18].mxu0 }
 0x662   :  { %v1312_v55 = vpop.f32.mrb[19].mxu0 }
 0x663   :  { %v604_v56 = vpop.f32.mrb[16].mxu1 }
 0x664   :  { %v660_v57 = vmul.f32 0.35355338, %v604_v56  ;;  %v1317_v58 = vpop.f32.mrb[17].mxu1 }
 0x665   :  { %v607_v59 = vpop.f32.mrb[18].mxu1 }
 0x666   :  { %v1318_v60 = vpop.f32.mrb[19].mxu1  ;;  %v662_v61 = vsel %vm107_vm2, %v660_v57, -inf }
 0x667   :  { %663 = vmax.xlane.f32.xlu0 %v662_v61  ;;  %v654_v62 = vpop.f32.mrb[20].mxu0 }
 0x668   :  { %v661_v63 = vmul.f32 0.35355338, %v654_v62  ;;  %v1323_v0 = vpop.f32.mrb[21].mxu0 }
 0x669   :  { %v657_v2 = vpop.f32.mrb[22].mxu0 }
 0x66a   :  { %v1324_v5 = vpop.f32.mrb[23].mxu0  ;;  %v665_v6 = vsel %vm107_vm2, %v661_v63, -inf }
 0x66b   :  { %666 = vmax.xlane.f32.xlu1 %v665_v6 }
 0x67c   :  { %686 = vrot.lane.b32.xlu1 %v1547_v11, %s1466_s15 }
 0x680   :  { %795 = vrot.lane.b32.xlu1 %v1547_v11, %s1467_s16 }
 0x684   :  { %845 = vrot.lane.b32.xlu1 %v1550_v14, %s1467_s16 }
 0x688   :  { %843 = vrot.lane.b32.xlu1 %v1550_v14, %s1468_s17 }
 0x6f4   :  { %v664_v7 = vpop.xlane.xlu0 %663 }
 0x6f5   :  { %v668_v8 = vsub.f32 %v660_v57, %v664_v7 }
 0x6f7   :  { %v670_v9 = vmul.f32 1.442695, %v668_v8 }
 0x6f8   :  { %v667_v10 = vpop.xlane.xlu1 %666 }
 0x6f9   :  { %1417 = vpow2.f32 %v670_v9  ;;  %v669_v12 = vsub.f32 %v661_v63, %v667_v10 }
 0x6fb   :  { %v672_v13 = vmul.f32 1.442695, %v669_v12 }
 0x6fc   :  { %v687_v15 = vpop.permute.xlu1 %686 }
 0x6fd   :  { %1419 = vpow2.f32 %v672_v13  ;;  %v692_v16 = vsel %vm233_vm3, %v687_v15, 0 }
 0x6fe   :  { %1326 = vmatpush3.bf16.msra.mxu1 %v692_v16 }
 0x6ff   :  { %1337 = vmatprep.subr.bf16.mxu1 %v1457_v1 }
 0x700   :  { %v796_v26 = vpop.permute.xlu1 %795 }
 0x701   :  { %v801_v30 = vsel %vm107_vm2, %v796_v26, 0 }
 0x703   :  { %v1418_v17 = vpop.eup %1417 }
 0x704   :  { %v674_v18 = vsel %vm107_vm2, %v1418_v17, 0.0  ;;  %v846_v32 = vpop.permute.xlu1 %845 }
 0x705   :  { %675 = vadd.xlane.f32.xlu0 %v674_v18  ;;  %v851_v34 = vsel %vm107_vm2, %v846_v32, 0 }
 0x707   :  { %v1420_v19 = vpop.eup %1419 }
 0x708   :  { %v677_v20 = vsel %vm107_vm2, %v1420_v19, 0.0  ;;  %v844_v36 = vpop.permute.xlu1 %843 }
 0x709   :  { %678 = vadd.xlane.f32.xlu0 %v677_v20 }
 0x71f   :  { %734 = vrot.lane.b32.xlu0 %v1550_v14, %s1466_s15 }
 0x723   :  { %793 = vrot.lane.b32.xlu0 %v1547_v11, %s1468_s17 }
 0x792   :  { %v676_v21 = vpop.xlane.xlu0 %675 }
 0x793   :  { %1421 = vrcp.f32 %v676_v21 }
 0x796   :  { %v679_v22 = vpop.xlane.xlu0 %678 }
 0x797   :  { %1423 = vrcp.f32 %v679_v22  ;;  %v1397_v22 = vld [vmem:[%s1725_s3] sm:$0xff]  }
 0x79a   :  { %v735_v23 = vpop.permute.xlu0 %734 }
 0x79b   :  { %v740_v24 = vsel %vm233_vm3, %v735_v23, 0  ;;  %v1398_v23 = vld [vmem:[%s1725_s3 + $0x8] sm:$0xff]  }
 0x79c   :  { %1332 = vmatpush3.bf16.msra.mxu0 %v740_v24 }
 0x79d   :  { %v1422_v25 = vpop.eup %1421  ;;  %1343 = vmatprep.subr.bf16.mxu0 %v1457_v1 }
 0x79e   :  { %v682_v27 = vmul.f32 %v1422_v25, %v1418_v17  ;;  %v794_v35 = vpop.permute.xlu0 %793 }
 0x7a0   :  { %v684_v28 = vpack.c.bf16 %v682_v27, %v682_v27 }
 0x7a1   :  { %v1424_v29 = vpop.eup %1423 }
 0x7a2   :  { %v683_v31 = vmul.f32 %v1424_v29, %v1420_v19  ;;  %1328 = vmatmul.mubr.msk.bf16.vlgmr.msra.gmra.mrb[20].mxu1 %vm107_vm2, %v684_v28 }
 0x7a3   :  { %1338 = vmatpush3.bf16.xpose.msra.mxu1 %v801_v30  ;;  %1339 = vmatprep.mubr.msk.bf16.mxu1 %vm1458_vm0, %v1457_v1 }
 0x7a4   :  { %v685_v33 = vpack.c.bf16 %v683_v31, %v683_v31  ;;  %1349 = vmatprep.subr.bf16.mxu1 %v1457_v1 }
 0x7a6   :  { %1334 = vmatmul.mubr.msk.bf16.vlgmr.msra.gmra.mrb[24].mxu0 %vm107_vm2, %v685_v33 }
 0x7a7   :  { %1344 = vmatpush3.bf16.xpose.msra.mxu0 %v851_v34  ;;  %1345 = vmatprep.mubr.msk.bf16.mxu0 %vm1458_vm0, %v1457_v1 }
 0x7a8   :  { %1355 = vmatprep.subr.bf16.mxu0 %v1457_v1 }
 0x7aa   :  { %1340 = vmatmul.mubr.msk.bf16.vlgmr.msra.gmra.mrb[24].mxu1 %vm107_vm2, %v794_v35 }
 0x7ab   :  { %1351 = vmatprep.mubr.msk.bf16.mxu1 %vm1458_vm0, %v1457_v1 }
 0x7ae   :  { %1346 = vmatmul.mubr.msk.bf16.vlgmr.msra.gmra.mrb[28].mxu0 %vm107_vm2, %v844_v36 }
 0x7af   :  { %1357 = vmatprep.mubr.msk.bf16.mxu0 %vm1458_vm0, %v1457_v1 }
 0x875   :  { %v728_v37 = vpop.f32.mrb[20].mxu1 }
 0x876   :  { %v1329_v38 = vpop.f32.mrb[21].mxu1 }
 0x877   :  { %v731_v39 = vpop.f32.mrb[22].mxu1  ;;  %v1400_v38 = vld [vmem:[%s1727_s5 + $0x8] sm:$0xff]  }
 0x878   :  { %v1330_v40 = vpop.f32.mrb[23].mxu1  ;;  %v1206_v39 = vld [vmem:[%s1726_s4] ss:$0 sm:$0xff]  ;;  %s1173_s4 = sshll.u32 %s1473_s0, 4  ;;  %s1174_s4 = int_to_ptr.vmem [resolvable:$true] %s1173_s4 }
 0x879   :  { %v776_v41 = vpop.f32.mrb[24].mxu0  ;;  %s1433_s1 = scalar_lea.vmem %s1174_s4, 256  ;;  %p1438_p1 = scmp.lt.s32.totalorder %s1174_s4, %s1174_s4 }
 0x87a   :  { %v1335_v42 = vpop.f32.mrb[25].mxu0  ;;  %p1434_p0 = scmp.ne.s32.totalorder %s1174_s4, %s1433_s1  ;;  %p1439_p2 = scmp.lt.s32.totalorder %s1433_s1, %s1433_s1 }
 0x87b   :  { %v779_v43 = vpop.f32.mrb[26].mxu0 }
 0x87c   :  { %v1336_v44 = vpop.f32.mrb[27].mxu0  ;;  %p1440_p3 = por %p1439_p2, %p1438_p1 }
 0x87d   :  { %v837_v45 = vpop.f32.mrb[24].mxu1 }
 0x87e   :  { %v893_v46 = vmul.f32 0.35355338, %v837_v45  ;;  %v1341_v47 = vpop.f32.mrb[25].mxu1  ;;  %p1441_p4 = pnand %p1440_p3, %p1434_p0 }
 0x87f   :  { %v840_v49 = vpop.f32.mrb[26].mxu1 }
 0x880   :  { %v1342_v50 = vpop.f32.mrb[27].mxu1  ;;  %v895_v51 = vsel %vm107_vm2, %v893_v46, -inf  ;;  %v1210_v49 = vld [vmem:[%s1728_s6] ss:$0 sm:$0xff] }
 0x881   :  { %896 = vmax.xlane.f32.xlu0 %v895_v51  ;;  %v887_v53 = vpop.f32.mrb[28].mxu0 }
 0x882   :  { %v894_v54 = vmul.f32 0.35355338, %v887_v53  ;;  %v1347_v55 = vpop.f32.mrb[29].mxu0 }
 0x883   :  { %v890_v56 = vpop.f32.mrb[30].mxu0 }
 0x884   :  { %v1348_v57 = vpop.f32.mrb[31].mxu0  ;;  %v898_v58 = vsel %vm107_vm2, %v894_v54, -inf }
 0x885   :  { %899 = vmax.xlane.f32.xlu1 %v898_v58 }
 0x896   :  { %919 = vrot.lane.b32.xlu1 %v1547_v11, %s1469_s18 }
 0x89a   :  { %551 = vrot.lane.b32.xlu1 %v1627_v48, %s1470_s19 }
 0x89e   :  { %553 = vrot.lane.b32.xlu1 %v1629_v52, %s1470_s19 }
 0x8a2   :  { %786 = vrot.lane.b32.xlu1 %v776_v41, %s1471_s20 }
 0x90e   :  { %v897_v59 = vpop.xlane.xlu0 %896 }
 0x90f   :  { %v901_v60 = vsub.f32 %v893_v46, %v897_v59 }
 0x911   :  { %v903_v61 = vmul.f32 1.442695, %v901_v60 }
 0x912   :  { %v900_v62 = vpop.xlane.xlu1 %899 }
 0x913   :  { %1425 = vpow2.f32 %v903_v61  ;;  %v902_v63 = vsub.f32 %v894_v54, %v900_v62 }
 0x915   :  { %v905_v0 = vmul.f32 1.442695, %v902_v63 }
 0x916   :  { %v920_v2 = vpop.permute.xlu1 %919 }
 0x917   :  { %1427 = vpow2.f32 %v905_v0  ;;  %v925_v11 = vsel %vm233_vm3, %v920_v2, 0 }
 0x918   :  { %1350 = vmatpush3.bf16.msra.mxu1 %v925_v11 }
 0x919   :  { %1361 = vmatprep.subr.bf16.mxu1 %v1457_v1 }
 0x91a   :  { %v552_v48 = vpop.permute.xlu1 %551 }
 0x91b   :  { %558 = vst.msk [vmem:[#allocation2] sm:$0xff] %vm557_vm4, %v552_v48 }
 0x91d   :  { %v1426_v52 = vpop.eup %1425 }
 0x91e   :  { %v554_v5 = vpop.permute.xlu1 %553  ;;  %v907_v6 = vsel %vm107_vm2, %v1426_v52, 0.0 }
 0x91f   :  { %559 = vst.msk [vmem:[#allocation2 + $0x8] sm:$0xff] %vm557_vm4, %v554_v5  ;;  %908 = vadd.xlane.f32.xlu0 %v907_v6 }
 0x921   :  { %v1428_v7 = vpop.eup %1427 }
 0x922   :  { %v787_v8 = vpop.permute.xlu1 %786  ;;  %v910_v9 = vsel %vm107_vm2, %v1428_v7, 0.0 }
 0x923   :  { %792 = vst.msk [vmem:[#allocation2 + $0x8] sm:$0xff] %vm790_vm5, %v787_v8  ;;  %911 = vadd.xlane.f32.xlu0 %v910_v9 }
 0x939   :  { %967 = vrot.lane.b32.xlu0 %v1550_v14, %s1469_s18 }
 0x93d   :  { %784 = vrot.lane.b32.xlu0 %v728_v37, %s1471_s20  ;;  %v1399_v37 = vld [vmem:[%s1727_s5] sm:$0xff]  }
 0x9ac   :  { %v909_v10 = vpop.xlane.xlu0 %908 }
 0x9ad   :  { %1429 = vrcp.f32 %v909_v10 }
 0x9b0   :  { %v912_v12 = vpop.xlane.xlu0 %911 }
 0x9b1   :  { %1431 = vrcp.f32 %v912_v12 }
 0x9b4   :  { %v968_v13 = vpop.permute.xlu0 %967 }
 0x9b5   :  { %v973_v15 = vsel %vm233_vm3, %v968_v13, 0 }
 0x9b6   :  { %1356 = vmatpush3.bf16.msra.mxu0 %v973_v15 }
 0x9b7   :  { %v1430_v16 = vpop.eup %1429  ;;  %1369 = vmatprep.subr.bf16.mxu0 %v1457_v1 }
 0x9b8   :  { %v915_v17 = vmul.f32 %v1430_v16, %v1426_v52  ;;  %v785_v18 = vpop.permute.xlu0 %784 }
 0x9b9   :  { %791 = vst.msk [vmem:[#allocation2] sm:$0xff] %vm790_vm5, %v785_v18 }
 0x9ba   :  { %v917_v19 = vpack.c.bf16 %v915_v17, %v915_v17 }
 0x9bb   :  { %v1432_v20 = vpop.eup %1431 }
 0x9bc   :  { %v916_v21 = vmul.f32 %v1432_v20, %v1428_v7  ;;  %1352 = vmatmul.mubr.msk.bf16.vlgmr.msra.gmra.mrb[28].mxu1 %vm107_vm2, %v917_v19 }
 0x9bd   :  { %1365 = vmatprep.mubr.msk.bf16.mxu1 %vm1458_vm0, %v1457_v1  ;;  %1362 = vmatpush3.bf16.msra.mxu1 %v1397_v22 }
 0x9be   :  { %v918_v14 = vpack.c.bf16 %v916_v21, %v916_v21  ;;  %1363 = vmatprep.subr.bf16.mxu1 %v1457_v1 }
 0x9c0   :  { %1358 = vmatmul.mubr.msk.bf16.vlgmr.msra.gmra.mrb[32].mxu0 %vm107_vm2, %v918_v14 }
 0x9c1   :  { %1373 = vmatprep.mubr.msk.bf16.mxu0 %vm1458_vm0, %v1457_v1  ;;  %1364 = vmatpush3.bf16.msra.mxu1 %v1398_v23 }
 0x9c2   :  { %1370 = vmatpush3.bf16.msra.mxu0 %v1399_v37 }
 0x9c3   :  { %1371 = vmatprep.subr.bf16.mxu0 %v1457_v1 }
 0x9c6   :  { %1372 = vmatpush3.bf16.msra.mxu0 %v1400_v38 }
 0xa8f   :  { %v961_v24 = vpop.f32.mrb[28].mxu1 }
 0xa90   :  { %1017 = vrot.lane.b32.xlu0 %v961_v24, %s1472_s25  ;;  %v1353_v25 = vpop.f32.mrb[29].mxu1 }
 0xa91   :  { %v964_v26 = vpop.f32.mrb[30].mxu1 }
 0xa92   :  { %v1354_v27 = vpop.f32.mrb[31].mxu1 }
 0xa93   :  { %v1009_v28 = vpop.f32.mrb[32].mxu0 }
 0xa94   :  { %1019 = vrot.lane.b32.xlu1 %v1009_v28, %s1472_s25  ;;  %v1359_v29 = vpop.f32.mrb[33].mxu0 }
 0xa95   :  { %v1012_v30 = vpop.f32.mrb[34].mxu0 }
 0xa96   :  { %v1360_v31 = vpop.f32.mrb[35].mxu0 }
 0xb02   :  { %v1018_v32 = vpop.permute.xlu0 %1017 }
 0xb03   :  { %1024 = vst.msk [vmem:[#allocation2] sm:$0xff] %vm1023_vm6, %v1018_v32 }
 0xb06   :  { %v1020_v33 = vpop.permute.xlu1 %1019 }
 0xb07   :  { %1025 = vst.msk [vmem:[#allocation2 + $0x8] sm:$0xff] %vm1023_vm6, %v1020_v33 }
 0xb0a   :  { %v1026_v34 = vld [vmem:[#allocation2] sm:$0xff] }
 0xb0e   :  { %v1027_v35 = vld [vmem:[#allocation2 + $0x8] sm:$0xff] }
 0xb0f   :  { %v1028_v36 = vpack.c.bf16 %v1027_v35, %v1026_v34 }
 0xb11   :  { %1366 = vmatmul.mubr.msk.bf16.vlgmr.msra.gmra.mrb[32].mxu1 %vm54_vm1, %v1028_v36 }
 0xbe4   :  { %v1089_v40 = vpop.f32.mrb[32].mxu1 }
 0xbe5   :  { %v1090_v41 = vadd.f32 %v1206_v39, %v1089_v40  ;;  %v1367_v42 = vpop.f32.mrb[33].mxu1 }
 0xbe6   :  { %v1092_v43 = vpop.f32.mrb[34].mxu1 }
 0xbe7   :  { %v1093_v44 = vadd.f32 %v1206_v39, %v1092_v43  ;;  %v1368_v45 = vpop.f32.mrb[35].mxu1  ;;  %v1096_v46 = vadd.f32 %v1090_v41, %v1528_v3 }
 0xbe9   :  { %v1097_v47 = vadd.f32 %v1093_v44, %v1533_v4 }
 0xbeb   :  { %v1098_v1 = vpack.c.bf16 %v1097_v47, %v1096_v46 }
 0xbed   :  { %1374 = vmatmul.mubr.msk.bf16.vlgmr.msra.gmra.mrb[36].mxu0 %vm54_vm1, %v1098_v1 }
 0xcc0   :  { %v1159_v50 = vpop.f32.mrb[36].mxu0 }
 0xcc1   :  { %v1160_v51 = vadd.f32 %v1210_v49, %v1159_v50  ;;  %v1375_v53 = vpop.f32.mrb[37].mxu0 }
 0xcc2   :  { %v1162_v54 = vpop.f32.mrb[38].mxu0 }
 0xcc3   :  { %1166 = vst [vmem:[#allocation3] sm:$0xff] %v1160_v51  ;;  %v1163_v55 = vadd.f32 %v1210_v49, %v1162_v54  ;;  %v1376_v56 = vpop.f32.mrb[39].mxu0 }
 0xcc5   :  { %1167 = vst [vmem:[#allocation3 + $0x8] sm:$0xff] %v1163_v55 }
 0xcc6   :  { %1444 = shalt.err (!%p1441_p4)
}
 0xcc7   :  { %s1445_s2 = scalar_lea.hbm %s1729_s7, 256 }
 0xcc8   :  { %p1446_p5 = scmp.ne.s32.totalorder %s1729_s7, %s1445_s2  ;;  %p1449_p6 = scmp.lt.u32.totalorder %s1445_s2, %s1729_s7 }
 0xcca   :  { %p1451_p7 = pnand %p1449_p6, %p1446_p5 }
 0xccc   :  { %1454 = shalt.err (!%p1451_p7)
}
 0xccd   :  { %s1474_s14 = smov 128  }
 0xcce   :  { %1179 = dma.vmem_to_hbm [thread:$0]  %s1174_s4, 256, %s1729_s7, [#allocation4], %s1474_s14, %s1474_s14, %s1470_s19  }
 0xccf   :  { %1455 = dma.done.wait [#allocation4], 256  }
 0xcd0   :  { %1456 = vsyncadd [#allocation4], 4294967040 }
 0xcd1   :  { %1183 = vsyncpa [#allocation4], 1 }

// kernel: fortune_forward.2
= control target key start
LH: loop header
LB: loop body
LE: loop exit
PB: predicated region body
PF: predicated region fallthrough
CT: control target
= control target key end

     0   :  { %s11551_s20 = smov 0   ;;  %s11553_s21 = smov 0   ;;  %s15178_s0 = inlined_call_operand.vmem [shape: f32[16,8,4], index: 0, kind: input, shape index: {}]   ;;  %s15179_s1 = inlined_call_operand.vmem [shape: f32[16,32], index: 1, kind: input, shape index: {}]   ;;  %s15180_s2 = inlined_call_operand.vmem [shape: bf16[4,32], index: 2, kind: input, shape index: {}]   ;;  %s15181_s3 = inlined_call_operand.vmem [shape: f32[1,32], index: 3, kind: input, shape index: {}]   ;;  %s15182_s4 = inlined_call_operand.vmem [shape: f32[8,32], index: 4, kind: input, shape index: {}]   ;;  %s15183_s5 = inlined_call_operand.vmem [shape: bf16[2,32,96], index: 5, kind: input, shape index: {}]   ;;  %s15184_s6 = inlined_call_operand.vmem [shape: f32[2,1,96], index: 6, kind: input, shape index: {}]   ;;  %s15185_s7 = inlined_call_operand.vmem [shape: bf16[2,32,32], index: 7, kind: input, shape index: {}]   ;;  %s15186_s8 = inlined_call_operand.vmem [shape: f32[2,1,32], index: 8, kind: input, shape index: {}]   ;;  %s15187_s9 = inlined_call_operand.vmem [shape: f32[2,1,32], index: 9, kind: input, shape index: {}]   ;;  %s15188_s10 = inlined_call_operand.vmem [shape: f32[2,1,32], index: 10, kind: input, shape index: {}]   ;;  %s15189_s11 = inlined_call_operand.vmem [shape: bf16[2,32,2048], index: 11, kind: input, shape index: {}]   ;;  %s15190_s12 = inlined_call_operand.vmem [shape: f32[2,1,2048], index: 12, kind: input, shape index: {}]   ;;  %s15191_s13 = inlined_call_operand.vmem [shape: bf16[2,2048,32], index: 13, kind: input, shape index: {}]   ;;  %s15192_s14 = inlined_call_operand.vmem [shape: f32[2,1,32], index: 14, kind: input, shape index: {}]   ;;  %s15193_s15 = inlined_call_operand.vmem [shape: f32[2,1,32], index: 15, kind: input, shape index: {}]   ;;  %s15194_s16 = inlined_call_operand.vmem [shape: f32[2,1,32], index: 16, kind: input, shape index: {}]   ;;  %s15195_s17 = inlined_call_operand.vmem [shape: f32[1,32], index: 17, kind: input, shape index: {}]   ;;  %s15196_s18 = inlined_call_operand.<no memory space> [shape: f32[1,1], index: 18, kind: input, shape index: {}]   ;;  %s15197_s19 = inlined_call_operand.vmem [shape: f32[16,32], index: 19, kind: output, shape index: {}]  }
   0x1   :  { %15333 = sst [smem:[#allocation108_spill]] %s15178_s0  ;;  %v24_v0 = vstv %s15196_s18  ;;  %s11557_s22 = smov 0  }
   0x2   :  { %15334 = sst [smem:[#allocation109_spill]] %s15179_s1  ;;  %25 = vst [vmem:[#allocation4] sm:$0x1] %v24_v0  ;;  %s11555_s1 = smov 0  }
   0x3   :  { %15335 = sst [smem:[#allocation110_spill]] %s15180_s2  ;;  %s11559_s2 = smov 0  }
   0x4   :  { %15336 = sst [smem:[#allocation111_spill]] %s15181_s3 }
   0x5   :  { %15337 = sst [smem:[#allocation112_spill]] %s15182_s4 }
   0x6   :  { %15338 = sst [smem:[#allocation113_spill]] %s15183_s5 }
   0x7   :  { %15339 = sst [smem:[#allocation114_spill]] %s15184_s6 }
   0x8   :  { %15340 = sst [smem:[#allocation115_spill]] %s15185_s7 }
   0x9   :  { %15341 = sst [smem:[#allocation116_spill]] %s15195_s17 }
   0xa   :  { %15342 = sst [smem:[#allocation117_spill]] %s15197_s19 }
   0xb LB: > { %15343 = sst [smem:[#allocation5_spill]] %s11419_s1  ;;  %s40_s18 = sadd.s32 1, %s11419_s1  ;;  %s11427_s2 = sphi %s11559_s2, %s31_s2   ;;  %s11423_s22 = sphi %s11557_s22, %s15777_s22   ;;  %s11419_s1 = sphi %s11555_s1, %s15776_s1   ;;  %s11415_s21 = sphi %s11553_s21, %s15775_s21   ;;  %s11411_s20 = sphi %s11551_s20, %s15774_s20  }
   0xc   : > { %15344 = sst [smem:[#allocation6_spill]] %s11423_s22  ;;  %s43_s23 = sadd.s32 1, %s11423_s22 }
   0xd   : > { %15345 = sst [smem:[#allocation7_spill]] %s11427_s2  ;;  %p41_p0 = scmp.ge.s32.totalorder %s40_s18, 2 }
   0xe   : > { %p9542_p1 = scmp.ge.s32.totalorder %s11427_s2, 1  ;;  %p666_p2 = scmp.lt.s32.totalorder %s11427_s2, 5 }
   0xf   : > { %s15779_s18 = smov (%p41_p0, %s40_s18), 0  ;;  %s15781_s23 = smov (!%p41_p0, %s43_s23), %s11423_s22 }
  0x10   : > { %15346 = sst [smem:[#allocation8_spill]] %s15779_s18  ;;  %p667_p3 = pnand %p9542_p1, %p666_p2 }
  0x11   : > { %p45_p4 = scmp.ge.s32.totalorder %s15781_s23, 2 }
  0x12   : > { %670 = sbr.rel (%p667_p3) target bundleno = 5840 (0x16d0), region = 96 }
  0x13   : > { %s15783_s23 = smov (%p45_p4, %s15781_s23), 0 }
  0x14   : > { %15347 = sst [smem:[#allocation9_spill]] %s15783_s23 }
  0x19   : > { %s9543_s24 = sshll.u32 %s11415_s21, 3  ;;  %p776_p5 = scmp.lt.s32.totalorder %s11415_s21, 1 }
  0x1a   : > { %p771_p6 = scmp.lt.s32.totalorder %s9543_s24, 15  ;;  %p780_p7 = scmp.lt.s32.totalorder %s11411_s20, 1 }
  0x1b   : > { %s15785_s21 = smov (!%p776_p5, %s11415_s21), 1  ;;  %s15348_s28 = sld [smem:[#allocation109_spill]] }
  0x1c   : > { %s15787_s24 = smov (!%p771_p6, %s9543_s24), 15  ;;  %s9545_s25 = sshll.u32 %s15785_s21, 3 }
  0x1d   : > { %s9544_s3 = sshll.u32 %s15787_s24, 3  ;;  %s15350_s18 = sld [smem:[#allocation108_spill]] }
  0x1e   : > { %s15351_s19 = sld [smem:[#allocation117_spill]]  ;;  %s15354_s5 = sld [smem:[#allocation113_spill]] }
  0x1f   : > { %s11600_s17 = scalar_select %p780_p7, %s11411_s20, 1 }
  0x20   : > { %s15355_s7 = sld [smem:[#allocation115_spill]]  ;;  %p9556_p8 = scmp.ne.s32.totalorder %s11411_s20, 0 }
  0x21   : > { %s11587_s29 = scalar_lea.vmem %s15348_s28, %s9545_s25  ;;  %s9850_s21 = sshll.u32 %s11600_s17, 4  ;;  %vm867_vm0 = vcmask (!%p9556_p8), 1041408   ;;  %vm854_vm1 = vcmask (!%p9556_p8), 31744   ;;  %v11429_v15 = vmov (!%p9556_p8), 1966171168   ;;  %v951_v17 = vlaneseq (!%p9556_p8) }
  0x22   : > { %15349 = sst [smem:[#allocation10_spill]] %s11587_s29  ;;  %s9852_s1 = sshll.u32 %s11600_s17, 8  ;;  %v949_v16 = vunpack.c.l.s4 (!%p9556_p8), %v11429_v15  ;;  %vm1044_vm2 = vcmask (!%p9556_p8), 261120  }
  0x23   : > { %s11592_s23 = scalar_lea.vmem %s15350_s18, %s9544_s3  ;;  %s11633_s6 = scalar_lea.vmem %s15189_s11, %s9852_s1  ;;  %v952_v19 = vshrl.u32 (!%p9556_p8), %v951_v17, 7 }
  0x24   : > { %s11597_s2 = scalar_lea.vmem %s15351_s19, %s9545_s25  ;;  %s11610_s25 = scalar_lea.vmem %s15354_s5, %s9850_s21  ;;  %v834_v2 = vld [vmem:[%s11592_s23] sm:$0xff] (!%p9556_p8)  ;;  %v835_v3 = vld [vmem:[%s11592_s23 + $0x8] sm:$0xff] (!%p9556_p8)  ;;  %v836_v8 = vld [vmem:[%s11592_s23 + $0x10] sm:$0xff] (!%p9556_p8)  ;;  %v950_v18 = vunpack.c.0.s8 (!%p9556_p8), %v949_v16 }
  0x25   : > { %15352 = sst [smem:[#allocation11_spill]] %s11597_s2  ;;  %s9853_s0 = sshll.u32 %s11600_s17, 10  ;;  %v842_v5 = vpack.c.bf16 (!%p9556_p8), %v835_v3, %v834_v2  ;;  %v838_v6 = vld [vmem:[%s11592_s23 + $0x20] sm:$0xff] (!%p9556_p8)  ;;  %v839_v7 = vld [vmem:[%s11592_s23 + $0x28] sm:$0xff] (!%p9556_p8)  ;;  %v837_v10 = vld [vmem:[%s11592_s23 + $0x18] sm:$0xff] (!%p9556_p8)  ;;  %v998_v32 = vsub.s32 (!%p9556_p8), 0, %v952_v19 }
  0x26   : > { %s11615_s28 = scalar_lea.vmem %s15355_s7, %s9850_s21  ;;  %s11638_s7 = scalar_lea.vmem %s15190_s12, %s9850_s21  ;;  %v844_v9 = vpack.c.bf16 (!%p9556_p8), %v839_v7, %v838_v6  ;;  %v840_v11 = vld [vmem:[%s11592_s23 + $0x30] sm:$0xff] (!%p9556_p8)  ;;  %v841_v12 = vld [vmem:[%s11592_s23 + $0x38] sm:$0xff] (!%p9556_p8)  ;;  %v843_v13 = vpack.c.bf16 (!%p9556_p8), %v837_v10, %v836_v8  ;;  %v953_v21 = vsub.s32 (!%p9556_p8), %v950_v18, %v952_v19 }
  0x27   : > { %s818_s4 = scalar_lea.vmem %s15192_s14, %s11600_s17  ;;  %s11648_s18 = scalar_lea.vmem %s15191_s13, %s9853_s0  ;;  %10329 = vmatprep.mubr.msk.bf16.mxu0 (!%p9556_p8), %vm854_vm1, %v842_v5  ;;  %v845_v14 = vpack.c.bf16 (!%p9556_p8), %v841_v12, %v840_v11 }
  0x28   : > { %s821_s5 = scalar_lea.vmem %s15193_s15, %s11600_s17  ;;  %s824_s26 = scalar_lea.vmem %s15194_s16, %s11600_s17  ;;  %10333 = vmatprep.mubr.msk.bf16.mxu1 (!%p9556_p8), %vm854_vm1, %v844_v9 }
  0x29   : > { %833 = sbr.rel (%p9556_p8) target bundleno = 274 (0x112), region = 100  ;;  %s15356_s19 = sld [smem:[#allocation110_spill]] (!%p9556_p8) }
  0x2a   : > { %s15357_s29 = sld [smem:[#allocation10_spill]] (!%p9556_p8)  ;;  %s15358_s0 = sld [smem:[#allocation111_spill]] (!%p9556_p8) }
  0x2b   : > { %s15359_s24 = sld [smem:[#allocation112_spill]] (!%p9556_p8) }
  0x2f   : > { %v846_v1 = vld [vmem:[%s15356_s19] sm:$0x3] (!%p9556_p8) }
  0x30   : > { %10751 = vmatprep.subr.msk.bf16.mxu0 %vm867_vm0, %v846_v1  ;;  %10752 = vmatprep.subr.msk.bf16.mxu1 %vm867_vm0, %v846_v1  ;;  %v869_v4 = vsel %vm867_vm0, %v846_v1, 0  ;;  %v945_v20 = vld [vmem:[%s15357_s29] sm:$0xff] }
  0x31   : > { %10328 = vmatpush3.bf16.msra.mxu0 %v869_v4  ;;  %10746 = vmatpush3.bf16.msra.mxu1 %v869_v4  ;;  %v947_v22 = vcombine.high %v945_v20, %v945_v20  ;;  %v954_v23 = vrot.slane %v945_v20, %v953_v21  ;;  %v9557_v36 = vld [vmem:[%s15358_s0] ss:$0 sm:$0xff] }
  0x32   : > { %v936_v39 = vld [vmem:[%s15359_s24] sm:$0xff] }
  0x33   : > { %v961_v24 = vrot.slane %v947_v22, %v953_v21  ;;  %v962_v25 = vcombine.high %v954_v23, %v954_v23  ;;  %v970_v27 = vrot.slane %v954_v23, %v953_v21 }
  0x34   : > { %10330 = vmatmul.mubr.msk.bf16.vlgmr.msra.gmra.mrb[0].mxu0 %vm854_vm1, %v843_v13  ;;  %10334 = vmatmul.mubr.msk.bf16.vlgmr.msra.gmra.mrb[0].mxu1 %vm854_vm1, %v845_v14 }
  0x35   : > { %v963_v26 = vcombine.high %v961_v24, %v961_v24  ;;  %v977_v28 = vrot.slane %v961_v24, %v953_v21  ;;  %v984_v29 = vrot.slane %v962_v25, %v953_v21  ;;  %v992_v31 = vcombine.high %v970_v27, %v970_v27 }
  0x36   : > { %v999_v42 = vrot.slane %v970_v27, %v998_v32 }
  0x37   : > { %v991_v30 = vrot.slane %v963_v26, %v953_v21  ;;  %v993_v33 = vcombine.high %v977_v28, %v977_v28  ;;  %v994_v34 = vcombine.high %v984_v29, %v984_v29  ;;  %v1007_v37 = vrot.slane %v992_v31, %v998_v32 }
  0x38   : > { %v1015_v43 = vrot.slane %v977_v28, %v998_v32  ;;  %v1003_v54 = vrot.slane %v984_v29, %v998_v32 }
  0x39   : > { %v995_v35 = vcombine.high %v991_v30, %v991_v30  ;;  %v1023_v41 = vrot.slane %v993_v33, %v998_v32  ;;  %v1011_v48 = vrot.slane %v994_v34, %v998_v32  ;;  %v1019_v55 = vrot.slane %v991_v30, %v998_v32 }
  0x3b   : > { %v1027_v49 = vrot.slane %v995_v35, %v998_v32 }
 0x107   : > { %v10331_v38 = vpop.f32.mrb[0].mxu0  ;;  %v10335_v40 = vpop.f32.mrb[0].mxu1 }
 0x108   : > { %v914_v44 = vadd.f32 %v10331_v38, %v9557_v36  ;;  %v930_v45 = vadd.f32 %v10335_v40, %v9557_v36  ;;  %v905_v46 = vpop.f32.mrb[1].mxu0  ;;  %v921_v47 = vpop.f32.mrb[1].mxu1 }
 0x109   : > { %v906_v50 = vadd.f32 %v9557_v36, %v905_v46  ;;  %v922_v51 = vadd.f32 %v9557_v36, %v921_v47  ;;  %v10332_v52 = vpop.f32.mrb[2].mxu0  ;;  %v10336_v53 = vpop.f32.mrb[2].mxu1 }
 0x10a   : > { %v939_v56 = vadd.f32 %v936_v39, %v914_v44  ;;  %v943_v57 = vadd.f32 %v936_v39, %v930_v45  ;;  %v917_v58 = vadd.f32 %v10332_v52, %v9557_v36  ;;  %v933_v59 = vadd.f32 %v10336_v53, %v9557_v36  ;;  %v908_v60 = vpop.f32.mrb[3].mxu0  ;;  %v924_v61 = vpop.f32.mrb[3].mxu1 }
 0x10b   : > { %v937_v62 = vadd.f32 %v936_v39, %v906_v50  ;;  %v941_v63 = vadd.f32 %v936_v39, %v922_v51  ;;  %v909_v0 = vadd.f32 %v9557_v36, %v908_v60  ;;  %v925_v1 = vadd.f32 %v9557_v36, %v924_v61 }
 0x10c   : > { %v1038_v2 = vadd.f32 %v1007_v37, %v939_v56  ;;  %v1042_v3 = vadd.f32 %v1023_v41, %v943_v57  ;;  %v940_v4 = vadd.f32 %v936_v39, %v917_v58  ;;  %v944_v5 = vadd.f32 %v936_v39, %v933_v59 }
 0x10d   : > { %v1036_v6 = vadd.f32 %v999_v42, %v937_v62  ;;  %v1040_v7 = vadd.f32 %v1015_v43, %v941_v63  ;;  %v938_v8 = vadd.f32 %v936_v39, %v909_v0  ;;  %v942_v9 = vadd.f32 %v936_v39, %v925_v1 }
 0x10e   : > { %1047 = vst.msk [vmem:[#allocation2 + $0x10] sm:$0xff] %vm1044_vm2, %v1038_v2  ;;  %1051 = vst.msk [vmem:[#allocation2 + $0x30] sm:$0xff] %vm1044_vm2, %v1042_v3  ;;  %v1039_v10 = vadd.f32 %v1011_v48, %v940_v4  ;;  %v1043_v11 = vadd.f32 %v1027_v49, %v944_v5 }
 0x10f   : > { %1045 = vst.msk [vmem:[#allocation2] sm:$0xff] %vm1044_vm2, %v1036_v6  ;;  %1049 = vst.msk [vmem:[#allocation2 + $0x20] sm:$0xff] %vm1044_vm2, %v1040_v7  ;;  %v1037_v12 = vadd.f32 %v1003_v54, %v938_v8  ;;  %v1041_v13 = vadd.f32 %v1019_v55, %v942_v9 }
 0x110   : > { %1048 = vst.msk [vmem:[#allocation2 + $0x18] sm:$0xff] %vm1044_vm2, %v1039_v10  ;;  %1052 = vst.msk [vmem:[#allocation2 + $0x38] sm:$0xff] %vm1044_vm2, %v1043_v11 }
 0x111   : > { %1046 = vst.msk [vmem:[#allocation2 + $0x8] sm:$0xff] %vm1044_vm2, %v1037_v12  ;;  %1050 = vst.msk [vmem:[#allocation2 + $0x28] sm:$0xff] %vm1044_vm2, %v1041_v13 }
 0x112 PF: > { %v10812_v14 = vld [vmem:[%s11610_s25] sm:$0xff]   ;;  %v10813_v15 = vld [vmem:[%s11610_s25 + $0x8] sm:$0xff]   ;;  %vm1088_vm3 = vcmask 261120   ;;  %v11430_v28 = vmov 0.0   ;;  %s15360_s22 = sld [smem:[#allocation114_spill]]  ;;  %vm11431_vm4 = vmmov 0  }
 0x113   : > { %10337 = vmatprep.subr.bf16.mxu0 %v10812_v14  ;;  %10747 = vmatprep.subr.bf16.mxu1 %v10812_v14  ;;  %s11432_s27 = smov 96   ;;  %vm1192_vm5 = vcmask 64512   ;;  %s11433_s19 = smov 64   ;;  %vm1684_vm6 = vcmask 1043456   ;;  %vm2992_vm7 = vcmask 130112   ;;  %vm3921_vm8 = vcmask 195712  }
 0x114   : > { %10338 = vmatpush3.bf16.msra.mxu0 %v10812_v14  ;;  %10749 = vmatpush3.bf16.msra.mxu1 %v10812_v14  ;;  %s11434_s29 = smov 88   ;;  %s11435_s23 = smov 120   ;;  %vm4850_vm9 = vcmask 261312  }
 0x115   : > { %v1055_v18 = vld [vmem:[#allocation2 + $0x10] sm:$0xff]  ;;  %10339 = vmatprep.subr.bf16.mxu0 %v10813_v15  ;;  %10748 = vmatprep.subr.bf16.mxu1 %v10813_v15  ;;  %s11436_s3 = smov 56   ;;  %s11437_s0 = smov 80  }
 0x116   : > { %v1053_v16 = vld [vmem:[#allocation2] sm:$0xff]  ;;  %v1059_v24 = vld [vmem:[#allocation2 + $0x30] sm:$0xff]  ;;  %s11438_s30 = smov 112   ;;  %s11439_s2 = smov 48  }
 0x117   : > { %v1056_v20 = vld [vmem:[#allocation2 + $0x18] sm:$0xff]  ;;  %v1057_v21 = vld [vmem:[#allocation2 + $0x20] sm:$0xff]  ;;  %s11440_s24 = smov 72   ;;  %s11441_s25 = smov 104  }
 0x118   : > { %v1054_v17 = vld [vmem:[#allocation2 + $0x8] sm:$0xff]  ;;  %v1060_v25 = vld [vmem:[#allocation2 + $0x38] sm:$0xff]  ;;  %v1062_v26 = vpack.c.bf16 %v1056_v20, %v1055_v18  ;;  %10340 = vmatpush3.bf16.msra.mxu0 %v10813_v15  ;;  %10750 = vmatpush3.bf16.msra.mxu1 %v10813_v15  ;;  %s15361_s21 = scalar_lea.vmem %s15360_s22, %s11600_s17  ;;  %s11442_s1 = smov 40  }
 0x119   : > { %v1061_v19 = vpack.c.bf16 %v1054_v17, %v1053_v16  ;;  %v1058_v22 = vld [vmem:[#allocation2 + $0x28] sm:$0xff]  ;;  %v1064_v27 = vpack.c.bf16 %v1060_v25, %v1059_v24  ;;  %10361 = vmatprep.subr.bf16.mxu0 %v11430_v28  ;;  %10349 = vmatprep.subr.bf16.mxu1 %v11430_v28  ;;  %v9562_v29 = vld [vmem:[%s15361_s21] ss:$0 sm:$0xff]  ;;  %s11443_s22 = smov 8   ;;  %s11444_s21 = smov 16  }
 0x11a   : > { %v1063_v23 = vpack.c.bf16 %v1058_v22, %v1057_v21  ;;  %p9845_p9 = scmp.ne.s32.totalorder %s11411_s20, 1 }
 0x11b   : > { %10341 = vmatprep.mubr.msk.bf16.mxu0 %vm1088_vm3, %v1061_v19  ;;  %vm9010_vm10 = vcmask (!%p9845_p9), 1041409   ;;  %vm9012_vm11 = vcmask (!%p9845_p9), 1042434   ;;  %vm9014_vm12 = vcmask (!%p9845_p9), 1043459   ;;  %vm9016_vm13 = vcmask (!%p9845_p9), 1044484   ;;  %s15772_s20 = sld [smem:[#allocation11_spill]] (!%p9845_p9) }
 0x11c   : > { %10345 = vmatprep.mubr.msk.bf16.mxu1 %vm1088_vm3, %v1063_v23  ;;  %10342 = vmatmul.mubr.msk.bf16.vlgmr.msra.gmra.mrb[0].mxu0 %vm1088_vm3, %v1062_v26  ;;  %vm9018_vm14 = vcmask (!%p9845_p9), 1045509   ;;  %vm9020_vm15 = vcmask (!%p9845_p9), 1046534   ;;  %vm9022_vm0 = vcmask (!%p9845_p9), 1047559  }
 0x11d   : > { %10346 = vmatmul.mubr.msk.bf16.vlgmr.msra.gmra.mrb[0].mxu1 %vm1088_vm3, %v1064_v27  ;;  %10363 = vmatprep.mubr.msk.bf16.mxu0 %vm11431_vm4, %v11430_v28 }
 0x11e   : > { %10351 = vmatprep.mubr.msk.bf16.mxu1 %vm11431_vm4, %v11430_v28 }
 0x1ef   : > { %v10343_v30 = vpop.f32.mrb[0].mxu0 }
 0x1f0   : > { %v10347_v31 = vpop.f32.mrb[0].mxu1  ;;  %v1144_v32 = vadd.f32 %v10343_v30, %v9562_v29  ;;  %v1135_v33 = vpop.f32.mrb[1].mxu0 }
 0x1f1   : > { %v1151_v34 = vpop.f32.mrb[1].mxu1  ;;  %v1136_v35 = vadd.f32 %v9562_v29, %v1135_v33  ;;  %v10344_v36 = vpop.f32.mrb[2].mxu0  ;;  %v1160_v50 = vadd.f32 %v10347_v31, %v9562_v29 }
 0x1f2   : > { %v10348_v37 = vpop.f32.mrb[2].mxu1  ;;  %v11706_v38 = vpack.c.bf16 %v1144_v32, %v1144_v32  ;;  %v1147_v39 = vadd.f32 %v10344_v36, %v9562_v29  ;;  %v1138_v40 = vpop.f32.mrb[3].mxu0  ;;  %v1152_v45 = vadd.f32 %v9562_v29, %v1151_v34 }
 0x1f3   : > { %v1154_v41 = vpop.f32.mrb[3].mxu1  ;;  %v11708_v42 = vpack.c.bf16 %v1136_v35, %v1136_v35  ;;  %v1139_v43 = vadd.f32 %v9562_v29, %v1138_v40  ;;  %v1163_v48 = vadd.f32 %v10348_v37, %v9562_v29  ;;  %v11725_v53 = vpack.c.bf16 %v1160_v50, %v1160_v50 }
 0x1f4   : > { %1287 = vrot.lane.b32.xlu1 %v11706_v38, %s11432_s27  ;;  %v1155_v44 = vadd.f32 %v9562_v29, %v1154_v41  ;;  %v11712_v46 = vpack.c.bf16 %v1147_v39, %v1147_v39  ;;  %v11719_v51 = vpack.c.bf16 %v1152_v45, %v1152_v45 }
 0x1f5   : > { %1190 = vrot.lane.b32.xlu0 %v11708_v42, %s11432_s27  ;;  %v11714_v47 = vpack.c.bf16 %v1139_v43, %v1139_v43  ;;  %v11722_v52 = vpack.c.bf16 %v1163_v48, %v1163_v48 }
 0x1f6   : > { %v11717_v49 = vpack.c.bf16 %v1155_v44, %v1155_v44 }
 0x1f8   : > { %1335 = vrot.lane.b32.xlu1 %v11712_v46, %s11432_s27 }
 0x1f9   : > { %1239 = vrot.lane.b32.xlu0 %v11714_v47, %s11432_s27 }
 0x1fc   : > { %1431 = vrot.lane.b32.xlu1 %v11717_v49, %s11432_s27 }
 0x1fd   : > { %1383 = vrot.lane.b32.xlu0 %v11719_v51, %s11432_s27 }
 0x200   : > { %1527 = vrot.lane.b32.xlu1 %v11722_v52, %s11432_s27 }
 0x201   : > { %1479 = vrot.lane.b32.xlu0 %v11725_v53, %s11432_s27  ;;  %s11445_s27 = smov 24  }
 0x266   : > { %v1288_v54 = vpop.permute.xlu1 %1287 }
 0x267   : > { %v1293_v55 = vsel %vm1192_vm5, %v1288_v54, 0  ;;  %v1191_v56 = vpop.permute.xlu0 %1190 }
 0x268   : > { %v1197_v57 = vsel %vm1192_vm5, %v1191_v56, 0  ;;  %10362 = vmatpush3.bf16.xpose.msra.mxu0 %v1293_v55 }
 0x269   : > { %10350 = vmatpush3.bf16.xpose.msra.mxu1 %v1197_v57  ;;  %10373 = vmatprep.subr.bf16.mxu0 %v11430_v28 }
 0x26a   : > { %10355 = vmatprep.subr.bf16.mxu1 %v11430_v28  ;;  %v1336_v63 = vpop.permute.xlu1 %1335 }
 0x26b   : > { %v1240_v58 = vpop.permute.xlu0 %1239  ;;  %v1341_v1 = vsel %vm1192_vm5, %v1336_v63, 0 }
 0x26c   : > { %v1245_v60 = vsel %vm1192_vm5, %v1240_v58, 0 }
 0x26e   : > { %v1432_v2 = vpop.permute.xlu1 %1431 }
 0x26f   : > { %10364 = vmatmul.mubr.msk.bf16.vlgmr.msra.gmra.mrb[4].mxu0 %vm1192_vm5, %v11706_v38  ;;  %v1384_v59 = vpop.permute.xlu0 %1383  ;;  %v1437_v3 = vsel %vm1192_vm5, %v1432_v2, 0 }
 0x270   : > { %v1389_v61 = vsel %vm1192_vm5, %v1384_v59, 0  ;;  %10352 = vmatmul.mubr.msk.bf16.vlgmr.msra.gmra.mrb[4].mxu1 %vm1192_vm5, %v11708_v42  ;;  %10375 = vmatprep.mubr.msk.bf16.mxu0 %vm11431_vm4, %v11430_v28 }
 0x271   : > { %10356 = vmatpush3.bf16.xpose.msra.mxu1 %v1245_v60  ;;  %10374 = vmatpush3.bf16.xpose.msra.mxu0 %v1389_v61 }
 0x272   : > { %10357 = vmatprep.mubr.msk.bf16.mxu1 %vm11431_vm4, %v11430_v28  ;;  %10367 = vmatprep.subr.bf16.mxu1 %v11430_v28  ;;  %v1528_v4 = vpop.permute.xlu1 %1527 }
 0x273   : > { %v1480_v62 = vpop.permute.xlu0 %1479  ;;  %10385 = vmatprep.subr.bf16.mxu0 %v11430_v28  ;;  %v1533_v5 = vsel %vm1192_vm5, %v1528_v4, 0 }
 0x274   : > { %v1485_v0 = vsel %vm1192_vm5, %v1480_v62, 0 }
 0x278   : > { %10358 = vmatmul.mubr.msk.bf16.vlgmr.msra.gmra.mrb[8].mxu1 %vm1192_vm5, %v11714_v47  ;;  %10376 = vmatmul.mubr.msk.bf16.vlgmr.msra.gmra.mrb[8].mxu0 %vm1192_vm5, %v11719_v51 }
 0x279   : > { %10368 = vmatpush3.bf16.xpose.msra.mxu1 %v1341_v1  ;;  %10386 = vmatpush3.bf16.xpose.msra.mxu0 %v1485_v0 }
 0x27a   : > { %10369 = vmatprep.mubr.msk.bf16.mxu1 %vm11431_vm4, %v11430_v28  ;;  %10387 = vmatprep.mubr.msk.bf16.mxu0 %vm11431_vm4, %v11430_v28 }
 0x27b   : > { %10379 = vmatprep.subr.bf16.mxu1 %v11430_v28  ;;  %10397 = vmatprep.subr.bf16.mxu0 %v11430_v28 }
 0x280   : > { %10370 = vmatmul.mubr.msk.bf16.vlgmr.msra.gmra.mrb[12].mxu1 %vm1192_vm5, %v11712_v46  ;;  %10388 = vmatmul.mubr.msk.bf16.vlgmr.msra.gmra.mrb[12].mxu0 %vm1192_vm5, %v11725_v53 }
 0x281   : > { %10380 = vmatpush3.bf16.xpose.msra.mxu1 %v1437_v3  ;;  %10381 = vmatprep.mubr.msk.bf16.mxu1 %vm11431_vm4, %v11430_v28 }
 0x282   : > { %10391 = vmatprep.subr.bf16.mxu1 %v11430_v28  ;;  %10399 = vmatprep.mubr.msk.bf16.mxu0 %vm11431_vm4, %v11430_v28 }
 0x288   : > { %10382 = vmatmul.mubr.msk.bf16.vlgmr.msra.gmra.mrb[16].mxu1 %vm1192_vm5, %v11717_v49 }
 0x289   : > { %10392 = vmatpush3.bf16.xpose.msra.mxu1 %v1533_v5  ;;  %10393 = vmatprep.mubr.msk.bf16.mxu1 %vm11431_vm4, %v11430_v28 }
 0x28a   : > { %10403 = vmatprep.subr.bf16.mxu1 %v11430_v28 }
 0x290   : > { %10394 = vmatmul.mubr.msk.bf16.vlgmr.msra.gmra.mrb[20].mxu1 %vm1192_vm5, %v11722_v52 }
 0x291   : > { %10405 = vmatprep.mubr.msk.bf16.mxu1 %vm11431_vm4, %v11430_v28 }
 0x342   : > { %v1329_v6 = vpop.f32.mrb[4].mxu0 }
 0x343   : > { %v1233_v7 = vpop.f32.mrb[4].mxu1  ;;  %v10365_v8 = vpop.f32.mrb[5].mxu0  ;;  %v1577_v9 = vmul.f32 0.35355338, %v1329_v6 }
 0x344   : > { %v10353_v10 = vpop.f32.mrb[5].mxu1  ;;  %v1332_v11 = vpop.f32.mrb[6].mxu0  ;;  %v1575_v15 = vmul.f32 0.35355338, %v1233_v7 }
 0x345   : > { %v1236_v12 = vpop.f32.mrb[6].mxu1  ;;  %v10366_v13 = vpop.f32.mrb[7].mxu0  ;;  %v1589_v14 = vsel %vm1192_vm5, %v1577_v9, -inf }
 0x346   : > { %1590 = vmax.xlane.f32.xlu0 %v1589_v14  ;;  %v10354_v16 = vpop.f32.mrb[7].mxu1  ;;  %v1583_v17 = vsel %vm1192_vm5, %v1575_v15, -inf }
 0x34a   : > { %1584 = vmax.xlane.f32.xlu0 %v1583_v17 }
 0x34b   : > { %v1281_v18 = vpop.f32.mrb[8].mxu1  ;;  %v1425_v19 = vpop.f32.mrb[8].mxu0 }
 0x34c   : > { %v1579_v20 = vmul.f32 0.35355338, %v1425_v19  ;;  %v10359_v21 = vpop.f32.mrb[9].mxu1  ;;  %v10377_v22 = vpop.f32.mrb[9].mxu0  ;;  %v1576_v25 = vmul.f32 0.35355338, %v1281_v18 }
 0x34d   : > { %v1284_v23 = vpop.f32.mrb[10].mxu1  ;;  %v1428_v24 = vpop.f32.mrb[10].mxu0 }
 0x34e   : > { %v10360_v26 = vpop.f32.mrb[11].mxu1  ;;  %v10378_v27 = vpop.f32.mrb[11].mxu0  ;;  %v1595_v29 = vsel %vm1192_vm5, %v1579_v20, -inf  ;;  %v1586_v30 = vsel %vm1192_vm5, %v1576_v25, -inf }
 0x34f   : > { %1596 = vmax.xlane.f32.xlu1 %v1595_v29 }
 0x353   : > { %v1377_v31 = vpop.f32.mrb[12].mxu1  ;;  %1587 = vmax.xlane.f32.xlu1 %v1586_v30  ;;  %v1521_v32 = vpop.f32.mrb[12].mxu0 }
 0x354   : > { %v10371_v33 = vpop.f32.mrb[13].mxu1  ;;  %v10389_v34 = vpop.f32.mrb[13].mxu0  ;;  %v1578_v55 = vmul.f32 0.35355338, %v1377_v31  ;;  %v1581_v60 = vmul.f32 0.35355338, %v1521_v32 }
 0x355   : > { %v1380_v35 = vpop.f32.mrb[14].mxu1  ;;  %v1524_v36 = vpop.f32.mrb[14].mxu0 }
 0x356   : > { %v10372_v37 = vpop.f32.mrb[15].mxu1  ;;  %v10390_v39 = vpop.f32.mrb[15].mxu0  ;;  %v1592_v57 = vsel %vm1192_vm5, %v1578_v55, -inf  ;;  %v1601_v62 = vsel %vm1192_vm5, %v1581_v60, -inf }
 0x35b   : > { %v1473_v40 = vpop.f32.mrb[16].mxu1 }
 0x35c   : > { %v10383_v41 = vpop.f32.mrb[17].mxu1  ;;  %v1580_v56 = vmul.f32 0.35355338, %v1473_v40 }
 0x35d   : > { %v1476_v43 = vpop.f32.mrb[18].mxu1 }
 0x35e   : > { %v10384_v44 = vpop.f32.mrb[19].mxu1  ;;  %v1598_v59 = vsel %vm1192_vm5, %v1580_v56, -inf }
 0x360   : > { %1728 = vrot.lane.b32.xlu0 %v11714_v47, %s11433_s19 }
 0x363   : > { %v1569_v45 = vpop.f32.mrb[20].mxu1 }
 0x364   : > { %v10395_v48 = vpop.f32.mrb[21].mxu1  ;;  %1679 = vrot.lane.b32.xlu1 %v11708_v42, %s11433_s19  ;;  %v11787_v58 = vmul.f32 0.35355338, %v1569_v45 }
 0x365   : > { %v1572_v50 = vpop.f32.mrb[22].mxu1 }
 0x366   : > { %v10396_v54 = vpop.f32.mrb[23].mxu1  ;;  %v1604_v61 = vsel %vm1192_vm5, %v11787_v58, -inf }
 0x37f   : > { %1593 = vmax.xlane.f32.xlu0 %v1592_v57 }
 0x383   : > { %1599 = vmax.xlane.f32.xlu0 %v1598_v59 }
 0x387   : > { %1605 = vmax.xlane.f32.xlu0 %v1604_v61 }
 0x388   : > { %1602 = vmax.xlane.f32.xlu1 %v1601_v62 }
 0x399   : > { %1776 = vrot.lane.b32.xlu1 %v11706_v38, %s11433_s19 }
 0x39d   : > { %1872 = vrot.lane.b32.xlu0 %v11719_v51, %s11433_s19  ;;  %1824 = vrot.lane.b32.xlu1 %v11712_v46, %s11433_s19 }
 0x3a1   : > { %1920 = vrot.lane.b32.xlu1 %v11717_v49, %s11433_s19 }
 0x3d3   : > { %v1591_v63 = vpop.xlane.xlu0 %1590 }
 0x3d4   : > { %v1609_v0 = vsub.f32 %v1577_v9, %v1591_v63 }
 0x3d6   : > { %v1619_v1 = vmul.f32 1.442695, %v1609_v0 }
 0x3d7   : > { %v1585_v2 = vpop.xlane.xlu0 %1584 }
 0x3d8   : > { %10944 = vpow2.f32 %v1619_v1  ;;  %v1607_v3 = vsub.f32 %v1575_v15, %v1585_v2 }
 0x3da   : > { %v1615_v4 = vmul.f32 1.442695, %v1607_v3 }
 0x3db   : > { %v1729_v5 = vpop.permute.xlu0 %1728 }
 0x3dc   : > { %10946 = vpow2.f32 %v1615_v4  ;;  %v1734_v6 = vsel %vm1684_vm6, %v1729_v5, 0  ;;  %v1597_v7 = vpop.xlane.xlu1 %1596 }
 0x3dd   : > { %v1611_v8 = vsub.f32 %v1579_v20, %v1597_v7  ;;  %10404 = vmatpush3.bf16.msra.mxu1 %v1734_v6 }
 0x3de   : > { %10415 = vmatprep.subr.bf16.mxu1 %v11430_v28 }
 0x3df   : > { %v1623_v10 = vmul.f32 1.442695, %v1611_v8 }
 0x3e0   : > { %v1588_v11 = vpop.xlane.xlu1 %1587 }
 0x3e1   : > { %10948 = vpow2.f32 %v1623_v10  ;;  %v1608_v12 = vsub.f32 %v1576_v25, %v1588_v11 }
 0x3e2   : > { %v11803_v9 = vpop.eup %10944 }
 0x3e3   : > { %v1617_v13 = vmul.f32 1.442695, %v1608_v12  ;;  %v1637_v14 = vsel %vm1192_vm5, %v11803_v9, 0.0 }
 0x3e4   : > { %v1680_v15 = vpop.permute.xlu1 %1679  ;;  %1638 = vadd.xlane.f32.xlu1 %v1637_v14 }
 0x3e5   : > { %10950 = vpow2.f32 %v1617_v13  ;;  %v1686_v16 = vsel %vm1684_vm6, %v1680_v15, 0 }
 0x3e6   : > { %v11808_v17 = vpop.eup %10946  ;;  %10398 = vmatpush3.bf16.msra.mxu0 %v1686_v16 }
 0x3e7   : > { %v1631_v18 = vsel %vm1192_vm5, %v11808_v17, 0.0  ;;  %10409 = vmatprep.subr.bf16.mxu0 %v11430_v28 }
 0x3e8   : > { %1632 = vadd.xlane.f32.xlu1 %v1631_v18 }
 0x3eb   : > { %v11813_v19 = vpop.eup %10948 }
 0x3ec   : > { %v1643_v20 = vsel %vm1192_vm5, %v11813_v19, 0.0 }
 0x3ed   : > { %1644 = vadd.xlane.f32.xlu1 %v1643_v20 }
 0x3ef   : > { %v11817_v21 = vpop.eup %10950 }
 0x3f0   : > { %v1634_v22 = vsel %vm1192_vm5, %v11817_v21, 0.0 }
 0x3f1   : > { %1635 = vadd.xlane.f32.xlu0 %v1634_v22 }
 0x40c   : > { %v1594_v23 = vpop.xlane.xlu0 %1593 }
 0x40d   : > { %v1610_v24 = vsub.f32 %v1578_v55, %v1594_v23 }
 0x40f   : > { %v1621_v25 = vmul.f32 1.442695, %v1610_v24 }
 0x410   : > { %v1600_v26 = vpop.xlane.xlu0 %1599 }
 0x411   : > { %10952 = vpow2.f32 %v1621_v25  ;;  %v1612_v27 = vsub.f32 %v1580_v56, %v1600_v26 }
 0x413   : > { %v1625_v29 = vmul.f32 1.442695, %v1612_v27 }
 0x414   : > { %v1606_v40 = vpop.xlane.xlu0 %1605 }
 0x415   : > { %10954 = vpow2.f32 %v1625_v29  ;;  %v1603_v30 = vpop.xlane.xlu1 %1602  ;;  %v1614_v41 = vsub.f32 %v11787_v58, %v1606_v40 }
 0x416   : > { %v1613_v31 = vsub.f32 %v1581_v60, %v1603_v30 }
 0x417   : > { %v1629_v43 = vmul.f32 1.442695, %v1614_v41 }
 0x418   : > { %v1627_v32 = vmul.f32 1.442695, %v1613_v31  ;;  %v1873_v57 = vpop.permute.xlu0 %1872 }
 0x419   : > { %v1777_v48 = vpop.permute.xlu1 %1776  ;;  %v1878_v7 = vsel %vm1684_vm6, %v1873_v57, 0 }
 0x41a   : > { %10956 = vpow2.f32 %v1627_v32  ;;  %v1782_v0 = vsel %vm1684_vm6, %v1777_v48, 0 }
 0x41b   : > { %v11821_v33 = vpop.eup %10952  ;;  %10958 = vpow2.f32 %v1629_v43 }
 0x41c   : > { %v1640_v34 = vsel %vm1192_vm5, %v11821_v33, 0.0 }
 0x41d   : > { %1641 = vadd.xlane.f32.xlu0 %v1640_v34  ;;  %v1825_v50 = vpop.permute.xlu1 %1824 }
 0x41e   : > { %v1830_v8 = vsel %vm1684_vm6, %v1825_v50, 0 }
 0x41f   : > { %v11825_v35 = vpop.eup %10954 }
 0x420   : > { %v1646_v36 = vsel %vm1192_vm5, %v11825_v35, 0.0 }
 0x421   : > { %1647 = vadd.xlane.f32.xlu0 %v1646_v36  ;;  %v1921_v54 = vpop.permute.xlu1 %1920 }
 0x422   : > { %v1926_v20 = vsel %vm1684_vm6, %v1921_v54, 0 }
 0x424   : > { %v11829_v37 = vpop.eup %10956 }
 0x425   : > { %v1649_v39 = vsel %vm1192_vm5, %v11829_v37, 0.0  ;;  %v11850_v44 = vpop.eup %10958 }
 0x426   : > { %1650 = vadd.xlane.f32.xlu1 %v1649_v39  ;;  %v1652_v45 = vsel %vm1192_vm5, %v11850_v44, 0.0 }
 0x437   : > { %2016 = vrot.lane.b32.xlu1 %v11722_v52, %s11433_s19  ;;  %1968 = vrot.lane.b32.xlu0 %v11725_v53, %s11433_s19 }
 0x43b   : > { %2124 = vrot.lane.b32.xlu1 %v11714_v47, %s11434_s29 }
 0x43f   : > { %2122 = vrot.lane.b32.xlu1 %v11714_v47, %s11435_s23 }
 0x443   : > { %2224 = vrot.lane.b32.xlu1 %v11712_v46, %s11434_s29 }
 0x447   : > { %2222 = vrot.lane.b32.xlu1 %v11712_v46, %s11435_s23 }
 0x44b   : > { %2324 = vrot.lane.b32.xlu1 %v11717_v49, %s11434_s29 }
 0x44f   : > { %2322 = vrot.lane.b32.xlu1 %v11717_v49, %s11435_s23 }
 0x453   : > { %2424 = vrot.lane.b32.xlu1 %v11722_v52, %s11434_s29 }
 0x456   : > { %1653 = vadd.xlane.f32.xlu0 %v1652_v45 }
 0x457   : > { %2422 = vrot.lane.b32.xlu1 %v11722_v52, %s11435_s23 }
 0x45b   : > { %2576 = vrot.lane.b32.xlu1 %v11708_v42, %s11436_s3 }
 0x45f   : > { %2672 = vrot.lane.b32.xlu1 %v11706_v38, %s11436_s3 }
 0x463   : > { %2720 = vrot.lane.b32.xlu1 %v11712_v46, %s11436_s3 }
 0x46c   : > { %2074 = vrot.lane.b32.xlu0 %v11708_v42, %s11434_s29 }
 0x470   : > { %2072 = vrot.lane.b32.xlu0 %v11708_v42, %s11435_s23 }
 0x471   : > { %v1639_v55 = vpop.xlane.xlu1 %1638 }
 0x474   : > { %2174 = vrot.lane.b32.xlu0 %v11706_v38, %s11434_s29 }
 0x475   : > { %v1633_v56 = vpop.xlane.xlu1 %1632 }
 0x476   : > { %10960 = vrcp.f32 %v1633_v56 }
 0x477   : > { %10962 = vrcp.f32 %v1639_v55 }
 0x478   : > { %2172 = vrot.lane.b32.xlu0 %v11706_v38, %s11435_s23 }
 0x47a   : > { %v1645_v59 = vpop.xlane.xlu1 %1644 }
 0x47c   : > { %2274 = vrot.lane.b32.xlu0 %v11719_v51, %s11434_s29 }
 0x47e   : > { %v1636_v58 = vpop.xlane.xlu0 %1635 }
 0x47f   : > { %10964 = vrcp.f32 %v1636_v58 }
 0x480   : > { %v10961_v60 = vpop.eup %10960  ;;  %2272 = vrot.lane.b32.xlu0 %v11719_v51, %s11435_s23  ;;  %10966 = vrcp.f32 %v1645_v59 }
 0x481   : > { %v1663_v61 = vmul.f32 %v10961_v60, %v11808_v17  ;;  %v10963_v63 = vpop.eup %10962 }
 0x482   : > { %v1665_v1 = vmul.f32 %v10963_v63, %v11803_v9 }
 0x483   : > { %v1671_v62 = vpack.c.bf16 %v1663_v61, %v1663_v61 }
 0x484   : > { %2374 = vrot.lane.b32.xlu0 %v11725_v53, %s11434_s29  ;;  %v1673_v4 = vpack.c.bf16 %v1665_v1, %v1665_v1  ;;  %s15362_s29 = scalar_lea.vmem %s15186_s8, %s11600_s17 }
 0x485   : > { %10400 = vmatmul.mubr.msk.bf16.vlgmr.msra.gmra.mrb[16].mxu0 %vm1192_vm5, %v1671_v62 }
 0x486   : > { %10410 = vmatpush3.bf16.msra.mxu0 %v1782_v0  ;;  %10411 = vmatprep.mubr.msk.bf16.mxu0 %vm11431_vm4, %v11430_v28 }
 0x487   : > { %10421 = vmatprep.subr.bf16.mxu0 %v11430_v28 }
 0x488   : > { %2372 = vrot.lane.b32.xlu0 %v11725_v53, %s11435_s23 }
 0x489   : > { %v10965_v2 = vpop.eup %10964 }
 0x48a   : > { %v1664_v3 = vmul.f32 %v10965_v2, %v11817_v21  ;;  %v10967_v5 = vpop.eup %10966 }
 0x48b   : > { %v1667_v10 = vmul.f32 %v10967_v5, %v11813_v19 }
 0x48c   : > { %2624 = vrot.lane.b32.xlu0 %v11714_v47, %s11436_s3  ;;  %v1672_v6 = vpack.c.bf16 %v1664_v3, %v1664_v3 }
 0x48d   : > { %10412 = vmatmul.mubr.msk.bf16.vlgmr.msra.gmra.mrb[20].mxu0 %vm1192_vm5, %v1673_v4  ;;  %v1675_v11 = vpack.c.bf16 %v1667_v10, %v1667_v10 }
 0x48e   : > { %10422 = vmatpush3.bf16.msra.mxu0 %v1878_v7  ;;  %10406 = vmatmul.mubr.msk.bf16.vlgmr.msra.gmra.mrb[24].mxu1 %vm1192_vm5, %v1672_v6 }
 0x48f   : > { %10416 = vmatpush3.bf16.msra.mxu1 %v1830_v8  ;;  %10423 = vmatprep.mubr.msk.bf16.mxu0 %vm11431_vm4, %v11430_v28 }
 0x490   : > { %10433 = vmatprep.subr.bf16.mxu0 %v11430_v28  ;;  %10417 = vmatprep.mubr.msk.bf16.mxu1 %vm11431_vm4, %v11430_v28 }
 0x491   : > { %10427 = vmatprep.subr.bf16.mxu1 %v11430_v28 }
 0x495   : > { %10424 = vmatmul.mubr.msk.bf16.vlgmr.msra.gmra.mrb[24].mxu0 %vm1192_vm5, %v1675_v11 }
 0x496   : > { %10435 = vmatprep.mubr.msk.bf16.mxu0 %vm11431_vm4, %v11430_v28 }
 0x4aa   : > { %v1642_v12 = vpop.xlane.xlu0 %1641 }
 0x4ab   : > { %10968 = vrcp.f32 %v1642_v12 }
 0x4ae   : > { %v1648_v9 = vpop.xlane.xlu0 %1647 }
 0x4af   : > { %10970 = vrcp.f32 %v1648_v9 }
 0x4b2   : > { %v1969_v13 = vpop.permute.xlu0 %1968 }
 0x4b3   : > { %v1974_v14 = vsel %vm1684_vm6, %v1969_v13, 0  ;;  %v1651_v15 = vpop.xlane.xlu1 %1650 }
 0x4b4   : > { %10972 = vrcp.f32 %v1651_v15  ;;  %10434 = vmatpush3.bf16.msra.mxu0 %v1974_v14 }
 0x4b5   : > { %v10969_v16 = vpop.eup %10968  ;;  %10445 = vmatprep.subr.bf16.mxu0 %v11430_v28 }
 0x4b6   : > { %v1666_v17 = vmul.f32 %v10969_v16, %v11821_v33 }
 0x4b7   : > { %v2017_v23 = vpop.permute.xlu1 %2016 }
 0x4b8   : > { %v1674_v18 = vpack.c.bf16 %v1666_v17, %v1666_v17  ;;  %v2022_v27 = vsel %vm1684_vm6, %v2017_v23, 0 }
 0x4b9   : > { %v10971_v19 = vpop.eup %10970 }
 0x4ba   : > { %10418 = vmatmul.mubr.msk.bf16.vlgmr.msra.gmra.mrb[28].mxu1 %vm1192_vm5, %v1674_v18  ;;  %v1668_v21 = vmul.f32 %v10971_v19, %v11825_v35 }
 0x4bb   : > { %10428 = vmatpush3.bf16.msra.mxu1 %v1926_v20  ;;  %10429 = vmatprep.mubr.msk.bf16.mxu1 %vm11431_vm4, %v11430_v28  ;;  %v2125_v29 = vpop.permute.xlu1 %2124 }
 0x4bc   : > { %10439 = vmatprep.subr.bf16.mxu1 %v11430_v28  ;;  %v1676_v25 = vpack.c.bf16 %v1668_v21, %v1668_v21  ;;  %v2130_v48 = vsel %vm1192_vm5, %v2125_v29, 0 }
 0x4be   : > { %v10973_v22 = vpop.eup %10972 }
 0x4bf   : > { %v1669_v24 = vmul.f32 %v10973_v22, %v11829_v37  ;;  %v2123_v30 = vpop.permute.xlu1 %2122 }
 0x4c1   : > { %v1677_v26 = vpack.c.bf16 %v1669_v24, %v1669_v24 }
 0x4c2   : > { %10430 = vmatmul.mubr.msk.bf16.vlgmr.msra.gmra.mrb[32].mxu1 %vm1192_vm5, %v1676_v25 }
 0x4c3   : > { %10440 = vmatpush3.bf16.msra.mxu1 %v2022_v27  ;;  %10436 = vmatmul.mubr.msk.bf16.vlgmr.msra.gmra.mrb[28].mxu0 %vm1192_vm5, %v1677_v26  ;;  %v2225_v31 = vpop.permute.xlu1 %2224 }
 0x4c4   : > { %10447 = vmatprep.mubr.msk.bf16.mxu0 %vm11431_vm4, %v11430_v28  ;;  %10441 = vmatprep.mubr.msk.bf16.mxu1 %vm11431_vm4, %v11430_v28  ;;  %v2230_v57 = vsel %vm1192_vm5, %v2225_v31, 0 }
 0x4c5   : > { %10451 = vmatprep.subr.bf16.mxu1 %v11430_v28 }
 0x4c7   : > { %v2223_v33 = vpop.permute.xlu1 %2222 }
 0x4cb   : > { %v2325_v37 = vpop.permute.xlu1 %2324 }
 0x4cc   : > { %v2330_v62 = vsel %vm1192_vm5, %v2325_v37, 0 }
 0x4cf   : > { %v2323_v50 = vpop.permute.xlu1 %2322 }
 0x4d3   : > { %v2425_v56 = vpop.permute.xlu1 %2424 }
 0x4d4   : > { %v2430_v2 = vsel %vm1192_vm5, %v2425_v56, 0 }
 0x4d7   : > { %v2423_v59 = vpop.permute.xlu1 %2422 }
 0x4db   : > { %v2577_v63 = vpop.permute.xlu1 %2576 }
 0x4dc   : > { %v2582_v1 = vsel %vm1684_vm6, %v2577_v63, 0 }
 0x4e3   : > { %v1654_v32 = vpop.xlane.xlu0 %1653 }
 0x4e4   : > { %10974 = vrcp.f32 %v1654_v32 }
 0x4e7   : > { %v2075_v34 = vpop.permute.xlu0 %2074 }
 0x4e8   : > { %v2080_v35 = vsel %vm1192_vm5, %v2075_v34, 0 }
 0x4e9   : > { %10446 = vmatpush3.bf16.xpose.msra.mxu0 %v2080_v35 }
 0x4ea   : > { %10457 = vmatprep.subr.bf16.mxu0 %v11430_v28 }
 0x4eb   : > { %v2073_v36 = vpop.permute.xlu0 %2072 }
 0x4ee   : > { %v10975_v39 = vpop.eup %10974 }
 0x4ef   : > { %v2175_v40 = vpop.permute.xlu0 %2174  ;;  %v1670_v41 = vmul.f32 %v10975_v39, %v11850_v44 }
 0x4f0   : > { %v2180_v43 = vsel %vm1192_vm5, %v2175_v40, 0  ;;  %10448 = vmatmul.mubr.msk.bf16.vlgmr.msra.gmra.mrb[32].mxu0 %vm1192_vm5, %v2073_v36 }
 0x4f1   : > { %10458 = vmatpush3.bf16.xpose.msra.mxu0 %v2180_v43  ;;  %v1678_v45 = vpack.c.bf16 %v1670_v41, %v1670_v41  ;;  %10459 = vmatprep.mubr.msk.bf16.mxu0 %vm11431_vm4, %v11430_v28 }
 0x4f2   : > { %10469 = vmatprep.subr.bf16.mxu0 %v11430_v28 }
 0x4f3   : > { %10442 = vmatmul.mubr.msk.bf16.vlgmr.msra.gmra.mrb[36].mxu1 %vm1192_vm5, %v1678_v45  ;;  %v2173_v54 = vpop.permute.xlu0 %2172 }
 0x4f4   : > { %10452 = vmatpush3.bf16.xpose.msra.mxu1 %v2130_v48  ;;  %10453 = vmatprep.mubr.msk.bf16.mxu1 %vm11431_vm4, %v11430_v28 }
 0x4f5   : > { %10463 = vmatprep.subr.bf16.mxu1 %v11430_v28 }
 0x4f7   : > { %v2275_v44 = vpop.permute.xlu0 %2274 }
 0x4f8   : > { %v2280_v55 = vsel %vm1192_vm5, %v2275_v44, 0  ;;  %10460 = vmatmul.mubr.msk.bf16.vlgmr.msra.gmra.mrb[36].mxu0 %vm1192_vm5, %v2173_v54 }
 0x4f9   : > { %10470 = vmatpush3.bf16.xpose.msra.mxu0 %v2280_v55  ;;  %10471 = vmatprep.mubr.msk.bf16.mxu0 %vm11431_vm4, %v11430_v28 }
 0x4fa   : > { %10481 = vmatprep.subr.bf16.mxu0 %v11430_v28 }
 0x4fb   : > { %10454 = vmatmul.mubr.msk.bf16.vlgmr.msra.gmra.mrb[40].mxu1 %vm1192_vm5, %v2123_v30  ;;  %v2273_v58 = vpop.permute.xlu0 %2272 }
 0x4fc   : > { %10464 = vmatpush3.bf16.xpose.msra.mxu1 %v2230_v57  ;;  %10465 = vmatprep.mubr.msk.bf16.mxu1 %vm11431_vm4, %v11430_v28 }
 0x4fd   : > { %10475 = vmatprep.subr.bf16.mxu1 %v11430_v28 }
 0x4ff   : > { %v2375_v60 = vpop.permute.xlu0 %2374 }
 0x500   : > { %v2380_v61 = vsel %vm1192_vm5, %v2375_v60, 0  ;;  %10472 = vmatmul.mubr.msk.bf16.vlgmr.msra.gmra.mrb[40].mxu0 %vm1192_vm5, %v2273_v58 }
 0x501   : > { %10482 = vmatpush3.bf16.xpose.msra.mxu0 %v2380_v61  ;;  %10483 = vmatprep.mubr.msk.bf16.mxu0 %vm11431_vm4, %v11430_v28 }
 0x502   : > { %10493 = vmatprep.subr.bf16.mxu0 %v11430_v28 }
 0x503   : > { %10466 = vmatmul.mubr.msk.bf16.vlgmr.msra.gmra.mrb[44].mxu1 %vm1192_vm5, %v2223_v33  ;;  %v2373_v0 = vpop.permute.xlu0 %2372 }
 0x504   : > { %10476 = vmatpush3.bf16.xpose.msra.mxu1 %v2330_v62  ;;  %10477 = vmatprep.mubr.msk.bf16.mxu1 %vm11431_vm4, %v11430_v28 }
 0x505   : > { %10487 = vmatprep.subr.bf16.mxu1 %v11430_v28 }
 0x507   : > { %v2625_v3 = vpop.permute.xlu0 %2624 }
 0x508   : > { %10484 = vmatmul.mubr.msk.bf16.vlgmr.msra.gmra.mrb[44].mxu0 %vm1192_vm5, %v2373_v0  ;;  %v2630_v4 = vsel %vm1684_vm6, %v2625_v3, 0 }
 0x509   : > { %10494 = vmatpush3.bf16.msra.mxu0 %v2582_v1  ;;  %10495 = vmatprep.mubr.msk.bf16.mxu0 %vm11431_vm4, %v11430_v28 }
 0x50a   : > { %10505 = vmatprep.subr.bf16.mxu0 %v11430_v28 }
 0x50b   : > { %10478 = vmatmul.mubr.msk.bf16.vlgmr.msra.gmra.mrb[48].mxu1 %vm1192_vm5, %v2323_v50 }
 0x50c   : > { %10488 = vmatpush3.bf16.xpose.msra.mxu1 %v2430_v2  ;;  %10489 = vmatprep.mubr.msk.bf16.mxu1 %vm11431_vm4, %v11430_v28 }
 0x50d   : > { %10499 = vmatprep.subr.bf16.mxu1 %v11430_v28 }
 0x513   : > { %10490 = vmatmul.mubr.msk.bf16.vlgmr.msra.gmra.mrb[52].mxu1 %vm1192_vm5, %v2423_v59 }
 0x514   : > { %10500 = vmatpush3.bf16.msra.mxu1 %v2630_v4  ;;  %10501 = vmatprep.mubr.msk.bf16.mxu1 %vm11431_vm4, %v11430_v28 }
 0x515   : > { %10511 = vmatprep.subr.bf16.mxu1 %v11430_v28 }
 0x558   : > { %v1722_v5 = vpop.f32.mrb[16].mxu0 }
 0x559   : > { %2064 = vst.msk [vmem:[#allocation3] sm:$0xff] %vm1192_vm5, %v1722_v5  ;;  %v10401_v6 = vpop.f32.mrb[17].mxu0 }
 0x55a   : > { %v1725_v7 = vpop.f32.mrb[18].mxu0 }
 0x55b   : > { %v10402_v8 = vpop.f32.mrb[19].mxu0 }
 0x560   : > { %v1818_v10 = vpop.f32.mrb[20].mxu0 }
 0x561   : > { %2066 = vst.msk [vmem:[#allocation3 + $0x10] sm:$0xff] %vm1192_vm5, %v1818_v10  ;;  %v1770_v11 = vpop.f32.mrb[24].mxu1  ;;  %v10413_v12 = vpop.f32.mrb[21].mxu0 }
 0x562   : > { %2065 = vst.msk [vmem:[#allocation3 + $0x8] sm:$0xff] %vm1192_vm5, %v1770_v11  ;;  %v10407_v9 = vpop.f32.mrb[25].mxu1  ;;  %v1821_v13 = vpop.f32.mrb[22].mxu0 }
 0x563   : > { %v1773_v14 = vpop.f32.mrb[26].mxu1  ;;  %v10414_v15 = vpop.f32.mrb[23].mxu0 }
 0x564   : > { %v10408_v16 = vpop.f32.mrb[27].mxu1 }
 0x568   : > { %v1914_v17 = vpop.f32.mrb[24].mxu0 }
 0x569   : > { %2068 = vst.msk [vmem:[#allocation3 + $0x20] sm:$0xff] %vm1192_vm5, %v1914_v17  ;;  %v10425_v18 = vpop.f32.mrb[25].mxu0 }
 0x56a   : > { %v1917_v19 = vpop.f32.mrb[26].mxu0 }
 0x56b   : > { %v10426_v20 = vpop.f32.mrb[27].mxu0 }
 0x58d   : > { %v1866_v21 = vpop.f32.mrb[28].mxu1 }
 0x58e   : > { %2067 = vst.msk [vmem:[#allocation3 + $0x18] sm:$0xff] %vm1192_vm5, %v1866_v21  ;;  %v10419_v22 = vpop.f32.mrb[29].mxu1 }
 0x58f   : > { %v1869_v23 = vpop.f32.mrb[30].mxu1 }
 0x590   : > { %v10420_v24 = vpop.f32.mrb[31].mxu1 }
 0x595   : > { %v1962_v25 = vpop.f32.mrb[32].mxu1 }
 0x596   : > { %2069 = vst.msk [vmem:[#allocation3 + $0x28] sm:$0xff] %vm1192_vm5, %v1962_v25  ;;  %v10431_v26 = vpop.f32.mrb[33].mxu1  ;;  %v2010_v27 = vpop.f32.mrb[28].mxu0 }
 0x597   : > { %2070 = vst.msk [vmem:[#allocation3 + $0x30] sm:$0xff] %vm1192_vm5, %v2010_v27  ;;  %v1965_v29 = vpop.f32.mrb[34].mxu1  ;;  %v10437_v30 = vpop.f32.mrb[29].mxu0 }
 0x598   : > { %v10432_v31 = vpop.f32.mrb[35].mxu1  ;;  %v2013_v32 = vpop.f32.mrb[30].mxu0 }
 0x599   : > { %v10438_v33 = vpop.f32.mrb[31].mxu0  ;;  %v11996_v32 = vpop.permute.xlu1 %2672 }
 0x5c3   : > { %v2116_v34 = vpop.f32.mrb[32].mxu0 }
 0x5c4   : > { %v11977_v35 = vmul.f32 0.35355338, %v2116_v34  ;;  %v10449_v36 = vpop.f32.mrb[33].mxu0 }
 0x5c5   : > { %v2119_v37 = vpop.f32.mrb[34].mxu0  ;;  %v11999_v36 = vpop.permute.xlu1 %2720 }
 0x5c6   : > { %v2058_v39 = vpop.f32.mrb[36].mxu1  ;;  %v10450_v40 = vpop.f32.mrb[35].mxu0  ;;  %v2480_v41 = vsel %vm1192_vm5, %v11977_v35, -inf }
 0x5c7   : > { %2071 = vst.msk [vmem:[#allocation3 + $0x38] sm:$0xff] %vm1192_vm5, %v2058_v39  ;;  %v10443_v43 = vpop.f32.mrb[37].mxu1  ;;  %2481 = vmax.xlane.f32.xlu0 %v2480_v41 }
 0x5c8   : > { %v2061_v45 = vpop.f32.mrb[38].mxu1 }
 0x5c9   : > { %v10444_v48 = vpop.f32.mrb[39].mxu1 }
 0x5cb   : > { %v2216_v50 = vpop.f32.mrb[36].mxu0 }
 0x5cc   : > { %v2474_v54 = vmul.f32 0.35355338, %v2216_v50  ;;  %v10461_v44 = vpop.f32.mrb[37].mxu0 }
 0x5cd   : > { %v2219_v55 = vpop.f32.mrb[38].mxu0 }
 0x5ce   : > { %v2166_v56 = vpop.f32.mrb[40].mxu1  ;;  %v10462_v57 = vpop.f32.mrb[39].mxu0  ;;  %v2486_v58 = vsel %vm1192_vm5, %v2474_v54, -inf }
 0x5cf   : > { %v2473_v59 = vmul.f32 0.35355338, %v2166_v56  ;;  %v10455_v60 = vpop.f32.mrb[41].mxu1  ;;  %2487 = vmax.xlane.f32.xlu0 %v2486_v58 }
 0x5d0   : > { %v2169_v61 = vpop.f32.mrb[42].mxu1 }
 0x5d1   : > { %v10456_v62 = vpop.f32.mrb[43].mxu1  ;;  %v2483_v63 = vsel %vm1192_vm5, %v2473_v59, -inf }
 0x5d2   : > { %2484 = vmax.xlane.f32.xlu1 %v2483_v63 }
 0x5d3   : > { %v2316_v0 = vpop.f32.mrb[40].mxu0 }
 0x5d4   : > { %v2476_v1 = vmul.f32 0.35355338, %v2316_v0  ;;  %v10473_v2 = vpop.f32.mrb[41].mxu0 }
 0x5d5   : > { %v2319_v3 = vpop.f32.mrb[42].mxu0 }
 0x5d6   : > { %v2266_v4 = vpop.f32.mrb[44].mxu1  ;;  %v10474_v5 = vpop.f32.mrb[43].mxu0  ;;  %v2492_v6 = vsel %vm1192_vm5, %v2476_v1, -inf }
 0x5d7   : > { %v2475_v7 = vmul.f32 0.35355338, %v2266_v4  ;;  %v10467_v8 = vpop.f32.mrb[45].mxu1  ;;  %2493 = vmax.xlane.f32.xlu1 %v2492_v6 }
 0x5d8   : > { %v2269_v10 = vpop.f32.mrb[46].mxu1 }
 0x5d9   : > { %v10468_v11 = vpop.f32.mrb[47].mxu1  ;;  %v2489_v12 = vsel %vm1192_vm5, %v2475_v7, -inf }
 0x5da   : > { %2490 = vmax.xlane.f32.xlu0 %v2489_v12 }
 0x5db   : > { %v2416_v9 = vpop.f32.mrb[44].mxu0 }
 0x5dc   : > { %v11986_v13 = vmul.f32 0.35355338, %v2416_v9  ;;  %v10485_v14 = vpop.f32.mrb[45].mxu0 }
 0x5dd   : > { %v2419_v15 = vpop.f32.mrb[46].mxu0 }
 0x5de   : > { %v2366_v16 = vpop.f32.mrb[48].mxu1  ;;  %v10486_v17 = vpop.f32.mrb[47].mxu0  ;;  %v2498_v18 = vsel %vm1192_vm5, %v11986_v13, -inf }
 0x5df   : > { %v2477_v19 = vmul.f32 0.35355338, %v2366_v16  ;;  %v10479_v20 = vpop.f32.mrb[49].mxu1  ;;  %2499 = vmax.xlane.f32.xlu1 %v2498_v18 }
 0x5e0   : > { %v2369_v21 = vpop.f32.mrb[50].mxu1 }
 0x5e1   : > { %v10480_v22 = vpop.f32.mrb[51].mxu1  ;;  %v2495_v23 = vsel %vm1192_vm5, %v2477_v19, -inf }
 0x5e2   : > { %2496 = vmax.xlane.f32.xlu0 %v2495_v23 }
 0x5e6   : > { %v2466_v24 = vpop.f32.mrb[52].mxu1 }
 0x5e7   : > { %v2479_v25 = vmul.f32 0.35355338, %v2466_v24  ;;  %v10491_v26 = vpop.f32.mrb[53].mxu1 }
 0x5e8   : > { %v2469_v27 = vpop.f32.mrb[54].mxu1 }
 0x5e9   : > { %v10492_v29 = vpop.f32.mrb[55].mxu1  ;;  %v2501_v30 = vsel %vm1192_vm5, %v2479_v25, -inf }
 0x5ea   : > { %2502 = vmax.xlane.f32.xlu0 %v2501_v30 }
 0x5f0   : > { %2816 = vrot.lane.b32.xlu1 %v11717_v49, %s11436_s3 }
 0x600   : > { %2768 = vrot.lane.b32.xlu0 %v11719_v51, %s11436_s3 }
 0x654   : > { %v2482_v31 = vpop.xlane.xlu0 %2481 }
 0x655   : > { %v2504_v33 = vsub.f32 %v11977_v35, %v2482_v31 }
 0x657   : > { %v2512_v34 = vmul.f32 1.442695, %v2504_v33 }
 0x659   : > { %10976 = vpow2.f32 %v2512_v34 }
 0x65c   : > { %v2488_v37 = vpop.xlane.xlu0 %2487 }
 0x65d   : > { %v2506_v39 = vsub.f32 %v2474_v54, %v2488_v37 }
 0x65f   : > { %v2516_v40 = vmul.f32 1.442695, %v2506_v39  ;;  %v2485_v41 = vpop.xlane.xlu1 %2484 }
 0x660   : > { %v2505_v43 = vsub.f32 %v2473_v59, %v2485_v41 }
 0x661   : > { %10978 = vpow2.f32 %v2516_v40  ;;  %v2726_v40 = vsel %vm1684_vm6, %v11999_v36, 0 }
 0x662   : > { %v2514_v45 = vmul.f32 1.442695, %v2505_v43 }
 0x663   : > { %v12001_v48 = vpop.eup %10976 }
 0x664   : > { %10980 = vpow2.f32 %v2514_v45  ;;  %v2494_v50 = vpop.xlane.xlu1 %2493  ;;  %v2528_v44 = vsel %vm1192_vm5, %v12001_v48, 0.0 }
 0x665   : > { %v2508_v55 = vsub.f32 %v2476_v1, %v2494_v50  ;;  %2529 = vadd.xlane.f32.xlu1 %v2528_v44 }
 0x667   : > { %v2520_v35 = vmul.f32 1.442695, %v2508_v55  ;;  %v2491_v56 = vpop.xlane.xlu0 %2490 }
 0x668   : > { %v2507_v57 = vsub.f32 %v2475_v7, %v2491_v56 }
 0x669   : > { %10982 = vpow2.f32 %v2520_v35 }
 0x66a   : > { %v2518_v58 = vmul.f32 1.442695, %v2507_v57 }
 0x66b   : > { %v12005_v54 = vpop.eup %10978 }
 0x66c   : > { %10984 = vpow2.f32 %v2518_v58  ;;  %v2534_v59 = vsel %vm1192_vm5, %v12005_v54, 0.0  ;;  %v2500_v7 = vpop.xlane.xlu1 %2499 }
 0x66d   : > { %2535 = vadd.xlane.f32.xlu1 %v2534_v59  ;;  %v2510_v8 = vsub.f32 %v11986_v13, %v2500_v7 }
 0x66e   : > { %v12009_v60 = vpop.eup %10980 }
 0x66f   : > { %v2497_v61 = vpop.xlane.xlu0 %2496  ;;  %v2531_v62 = vsel %vm1192_vm5, %v12009_v60, 0.0  ;;  %v2524_v10 = vmul.f32 1.442695, %v2510_v8 }
 0x670   : > { %v2509_v63 = vsub.f32 %v2477_v19, %v2497_v61  ;;  %2532 = vadd.xlane.f32.xlu0 %v2531_v62  ;;  %v2817_v17 = vpop.permute.xlu1 %2816 }
 0x671   : > { %v2822_v35 = vsel %vm1684_vm6, %v2817_v17, 0 }
 0x672   : > { %v2522_v0 = vmul.f32 1.442695, %v2509_v63 }
 0x673   : > { %v12013_v1 = vpop.eup %10982 }
 0x674   : > { %10986 = vpow2.f32 %v2522_v0  ;;  %v2540_v2 = vsel %vm1192_vm5, %v12013_v1, 0.0 }
 0x675   : > { %2541 = vadd.xlane.f32.xlu1 %v2540_v2  ;;  %10988 = vpow2.f32 %v2524_v10 }
 0x676   : > { %v12017_v3 = vpop.eup %10984 }
 0x677   : > { %v2537_v4 = vsel %vm1192_vm5, %v12017_v3, 0.0  ;;  %v2503_v11 = vpop.xlane.xlu0 %2502 }
 0x678   : > { %2538 = vadd.xlane.f32.xlu0 %v2537_v4  ;;  %v2511_v12 = vsub.f32 %v2479_v25, %v2503_v11  ;;  %v2678_v25 = vsel %vm1684_vm6, %v11996_v32, 0 }
 0x67a   : > { %v2526_v9 = vmul.f32 1.442695, %v2511_v12 }
 0x67b   : > { %v2769_v19 = vpop.permute.xlu0 %2768 }
 0x67c   : > { %10990 = vpow2.f32 %v2526_v9  ;;  %v2774_v32 = vsel %vm1684_vm6, %v2769_v19, 0 }
 0x67e   : > { %v12021_v5 = vpop.eup %10986 }
 0x67f   : > { %v2543_v6 = vsel %vm1192_vm5, %v12021_v5, 0.0  ;;  %v12030_v14 = vpop.eup %10988 }
 0x680   : > { %2544 = vadd.xlane.f32.xlu0 %v2543_v6  ;;  %v2546_v15 = vsel %vm1192_vm5, %v12030_v14, 0.0 }
 0x686   : > { %2912 = vrot.lane.b32.xlu1 %v11722_v52, %s11436_s3  ;;  %v12034_v16 = vpop.eup %10990 }
 0x687   : > { %v2549_v13 = vsel %vm1192_vm5, %v12034_v16, 0.0 }
 0x696   : > { %2864 = vrot.lane.b32.xlu0 %v11725_v53, %s11436_s3 }
 0x6aa   : > { %2547 = vadd.xlane.f32.xlu1 %v2546_v15 }
 0x6b5   : > { %2550 = vadd.xlane.f32.xlu0 %v2549_v13 }
 0x6bb   : > { %3053 = vrot.lane.b32.xlu1 %v11714_v47, %s11437_s0 }
 0x6bf   : > { %3051 = vrot.lane.b32.xlu1 %v11714_v47, %s11438_s30 }
 0x6c3   : > { %3153 = vrot.lane.b32.xlu1 %v11712_v46, %s11437_s0 }
 0x6c7   : > { %3151 = vrot.lane.b32.xlu1 %v11712_v46, %s11438_s30 }
 0x6cb   : > { %3253 = vrot.lane.b32.xlu1 %v11717_v49, %s11437_s0  ;;  %3003 = vrot.lane.b32.xlu0 %v11708_v42, %s11437_s0 }
 0x6cf   : > { %3251 = vrot.lane.b32.xlu1 %v11717_v49, %s11438_s30  ;;  %3001 = vrot.lane.b32.xlu0 %v11708_v42, %s11438_s30 }
 0x6d3   : > { %3353 = vrot.lane.b32.xlu1 %v11722_v52, %s11437_s0  ;;  %3103 = vrot.lane.b32.xlu0 %v11706_v38, %s11437_s0 }
 0x6d7   : > { %3351 = vrot.lane.b32.xlu1 %v11722_v52, %s11438_s30  ;;  %3101 = vrot.lane.b32.xlu0 %v11706_v38, %s11438_s30 }
 0x6db   : > { %3505 = vrot.lane.b32.xlu1 %v11708_v42, %s11439_s2  ;;  %3203 = vrot.lane.b32.xlu0 %v11719_v51, %s11437_s0 }
 0x6df   : > { %3601 = vrot.lane.b32.xlu1 %v11706_v38, %s11439_s2  ;;  %3201 = vrot.lane.b32.xlu0 %v11719_v51, %s11438_s30 }
 0x6e3   : > { %3649 = vrot.lane.b32.xlu1 %v11712_v46, %s11439_s2  ;;  %3303 = vrot.lane.b32.xlu0 %v11725_v53, %s11437_s0  ;;  %s15363_s0 = scalar_lea.vmem %s15187_s9, %s11600_s17 }
 0x6e7   : > { %3301 = vrot.lane.b32.xlu0 %v11725_v53, %s11438_s30 }
 0x6eb   : > { %3553 = vrot.lane.b32.xlu0 %v11714_v47, %s11439_s2 }
 0x6f2   : > { %v2530_v18 = vpop.xlane.xlu1 %2529 }
 0x6f3   : > { %10992 = vrcp.f32 %v2530_v18 }
 0x6fa   : > { %v2536_v20 = vpop.xlane.xlu1 %2535 }
 0x6fb   : > { %10994 = vrcp.f32 %v2536_v20 }
 0x6fd   : > { %v10993_v21 = vpop.eup %10992  ;;  %v2533_v22 = vpop.xlane.xlu0 %2532 }
 0x6fe   : > { %10996 = vrcp.f32 %v2533_v22  ;;  %v2560_v23 = vmul.f32 %v10993_v21, %v12001_v48 }
 0x700   : > { %v2568_v24 = vpack.c.bf16 %v2560_v23, %v2560_v23 }
 0x702   : > { %10496 = vmatmul.mubr.msk.bf16.vlgmr.msra.gmra.mrb[48].mxu0 %vm1192_vm5, %v2568_v24  ;;  %v2542_v26 = vpop.xlane.xlu1 %2541 }
 0x703   : > { %10506 = vmatpush3.bf16.msra.mxu0 %v2678_v25  ;;  %10998 = vrcp.f32 %v2542_v26  ;;  %10507 = vmatprep.mubr.msk.bf16.mxu0 %vm11431_vm4, %v11430_v28 }
 0x704   : > { %10517 = vmatprep.subr.bf16.mxu0 %v11430_v28 }
 0x705   : > { %v10995_v27 = vpop.eup %10994  ;;  %v2539_v29 = vpop.xlane.xlu0 %2538 }
 0x706   : > { %11000 = vrcp.f32 %v2539_v29  ;;  %v2562_v30 = vmul.f32 %v10995_v27, %v12005_v54  ;;  %v2913_v58 = vpop.permute.xlu1 %2912 }
 0x707   : > { %v2918_v59 = vsel %vm1684_vm6, %v2913_v58, 0 }
 0x708   : > { %v10997_v31 = vpop.eup %10996  ;;  %v2570_v33 = vpack.c.bf16 %v2562_v30, %v2562_v30 }
 0x709   : > { %v2561_v34 = vmul.f32 %v10997_v31, %v12009_v60 }
 0x70a   : > { %10508 = vmatmul.mubr.msk.bf16.vlgmr.msra.gmra.mrb[52].mxu0 %vm1192_vm5, %v2570_v33 }
 0x70b   : > { %10518 = vmatpush3.bf16.msra.mxu0 %v2774_v32  ;;  %v2569_v37 = vpack.c.bf16 %v2561_v34, %v2561_v34  ;;  %10519 = vmatprep.mubr.msk.bf16.mxu0 %vm11431_vm4, %v11430_v28 }
 0x70c   : > { %10529 = vmatprep.subr.bf16.mxu0 %v11430_v28 }
 0x70d   : > { %v10999_v39 = vpop.eup %10998  ;;  %10502 = vmatmul.mubr.msk.bf16.vlgmr.msra.gmra.mrb[56].mxu1 %vm1192_vm5, %v2569_v37  ;;  %v2545_v41 = vpop.xlane.xlu0 %2544 }
 0x70e   : > { %10512 = vmatpush3.bf16.msra.mxu1 %v2726_v40  ;;  %11002 = vrcp.f32 %v2545_v41  ;;  %v2564_v43 = vmul.f32 %v10999_v39, %v12013_v1  ;;  %10513 = vmatprep.mubr.msk.bf16.mxu1 %vm11431_vm4, %v11430_v28 }
 0x70f   : > { %10523 = vmatprep.subr.bf16.mxu1 %v11430_v28 }
 0x710   : > { %v11001_v45 = vpop.eup %11000  ;;  %v2572_v48 = vpack.c.bf16 %v2564_v43, %v2564_v43 }
 0x711   : > { %v2865_v50 = vpop.permute.xlu0 %2864  ;;  %v2563_v44 = vmul.f32 %v11001_v45, %v12017_v3 }
 0x712   : > { %v2870_v55 = vsel %vm1684_vm6, %v2865_v50, 0  ;;  %10520 = vmatmul.mubr.msk.bf16.vlgmr.msra.gmra.mrb[56].mxu0 %vm1192_vm5, %v2572_v48 }
 0x713   : > { %10530 = vmatpush3.bf16.msra.mxu0 %v2870_v55  ;;  %v2571_v36 = vpack.c.bf16 %v2563_v44, %v2563_v44  ;;  %10531 = vmatprep.mubr.msk.bf16.mxu0 %vm11431_vm4, %v11430_v28 }
 0x714   : > { %10541 = vmatprep.subr.bf16.mxu0 %v11430_v28 }
 0x715   : > { %10514 = vmatmul.mubr.msk.bf16.vlgmr.msra.gmra.mrb[60].mxu1 %vm1192_vm5, %v2571_v36 }
 0x716   : > { %10524 = vmatpush3.bf16.msra.mxu1 %v2822_v35  ;;  %10525 = vmatprep.mubr.msk.bf16.mxu1 %vm11431_vm4, %v11430_v28 }
 0x717   : > { %10535 = vmatprep.subr.bf16.mxu1 %v11430_v28 }
 0x718   : > { %v11003_v56 = vpop.eup %11002 }
 0x719   : > { %v2565_v57 = vmul.f32 %v11003_v56, %v12021_v5 }
 0x71b   : > { %v2573_v54 = vpack.c.bf16 %v2565_v57, %v2565_v57 }
 0x71d   : > { %10526 = vmatmul.mubr.msk.bf16.vlgmr.msra.gmra.mrb[64].mxu1 %vm1192_vm5, %v2573_v54 }
 0x71e   : > { %10536 = vmatpush3.bf16.msra.mxu1 %v2918_v59  ;;  %10537 = vmatprep.mubr.msk.bf16.mxu1 %vm11431_vm4, %v11430_v28 }
 0x71f   : > { %10547 = vmatprep.subr.bf16.mxu1 %v11430_v28 }
 0x737   : > { %v2548_v60 = vpop.xlane.xlu1 %2547 }
 0x738   : > { %11004 = vrcp.f32 %v2548_v60 }
 0x73b   : > { %v3054_v61 = vpop.permute.xlu1 %3053 }
 0x73c   : > { %v3059_v15 = vsel %vm1192_vm5, %v3054_v61, 0 }
 0x73f   : > { %v3052_v62 = vpop.permute.xlu1 %3051 }
 0x742   : > { %v11005_v63 = vpop.eup %11004  ;;  %v2551_v0 = vpop.xlane.xlu0 %2550 }
 0x743   : > { %11006 = vrcp.f32 %v2551_v0  ;;  %v3154_v1 = vpop.permute.xlu1 %3153  ;;  %v2566_v2 = vmul.f32 %v11005_v63, %v12030_v14 }
 0x744   : > { %v3159_v20 = vsel %vm1192_vm5, %v3154_v1, 0 }
 0x745   : > { %v2574_v3 = vpack.c.bf16 %v2566_v2, %v2566_v2 }
 0x746   : > { %v3004_v4 = vpop.permute.xlu0 %3003 }
 0x747   : > { %v3009_v5 = vsel %vm1192_vm5, %v3004_v4, 0  ;;  %v3152_v6 = vpop.permute.xlu1 %3151  ;;  %10532 = vmatmul.mubr.msk.bf16.vlgmr.msra.gmra.mrb[60].mxu0 %vm1192_vm5, %v2574_v3 }
 0x748   : > { %10542 = vmatpush3.bf16.xpose.msra.mxu0 %v3009_v5  ;;  %10543 = vmatprep.mubr.msk.bf16.mxu0 %vm11431_vm4, %v11430_v28 }
 0x749   : > { %10553 = vmatprep.subr.bf16.mxu0 %v11430_v28 }
 0x74a   : > { %v3002_v7 = vpop.permute.xlu0 %3001 }
 0x74b   : > { %v3254_v8 = vpop.permute.xlu1 %3253 }
 0x74c   : > { %v3259_v25 = vsel %vm1192_vm5, %v3254_v8, 0 }
 0x74d   : > { %v11007_v10 = vpop.eup %11006 }
 0x74e   : > { %v3104_v11 = vpop.permute.xlu0 %3103  ;;  %v2567_v12 = vmul.f32 %v11007_v10, %v12034_v16 }
 0x74f   : > { %v3109_v9 = vsel %vm1192_vm5, %v3104_v11, 0  ;;  %10544 = vmatmul.mubr.msk.bf16.vlgmr.msra.gmra.mrb[64].mxu0 %vm1192_vm5, %v3002_v7  ;;  %v3252_v13 = vpop.permute.xlu1 %3251 }
 0x750   : > { %10554 = vmatpush3.bf16.xpose.msra.mxu0 %v3109_v9  ;;  %v2575_v14 = vpack.c.bf16 %v2567_v12, %v2567_v12  ;;  %10555 = vmatprep.mubr.msk.bf16.mxu0 %vm11431_vm4, %v11430_v28 }
 0x751   : > { %10565 = vmatprep.subr.bf16.mxu0 %v11430_v28 }
 0x752   : > { %10538 = vmatmul.mubr.msk.bf16.vlgmr.msra.gmra.mrb[68].mxu1 %vm1192_vm5, %v2575_v14  ;;  %v3102_v17 = vpop.permute.xlu0 %3101 }
 0x753   : > { %10548 = vmatpush3.bf16.xpose.msra.mxu1 %v3059_v15  ;;  %10549 = vmatprep.mubr.msk.bf16.mxu1 %vm11431_vm4, %v11430_v28  ;;  %v3354_v19 = vpop.permute.xlu1 %3353 }
 0x754   : > { %10559 = vmatprep.subr.bf16.mxu1 %v11430_v28  ;;  %v3359_v30 = vsel %vm1192_vm5, %v3354_v19, 0 }
 0x756   : > { %v3204_v16 = vpop.permute.xlu0 %3203 }
 0x757   : > { %v3209_v18 = vsel %vm1192_vm5, %v3204_v16, 0  ;;  %10556 = vmatmul.mubr.msk.bf16.vlgmr.msra.gmra.mrb[68].mxu0 %vm1192_vm5, %v3102_v17  ;;  %v3352_v22 = vpop.permute.xlu1 %3351 }
 0x758   : > { %10566 = vmatpush3.bf16.xpose.msra.mxu0 %v3209_v18  ;;  %10567 = vmatprep.mubr.msk.bf16.mxu0 %vm11431_vm4, %v11430_v28 }
 0x759   : > { %10577 = vmatprep.subr.bf16.mxu0 %v11430_v28 }
 0x75a   : > { %10550 = vmatmul.mubr.msk.bf16.vlgmr.msra.gmra.mrb[72].mxu1 %vm1192_vm5, %v3052_v62  ;;  %v3202_v21 = vpop.permute.xlu0 %3201 }
 0x75b   : > { %10560 = vmatpush3.bf16.xpose.msra.mxu1 %v3159_v20  ;;  %10561 = vmatprep.mubr.msk.bf16.mxu1 %vm11431_vm4, %v11430_v28  ;;  %v3506_v26 = vpop.permute.xlu1 %3505 }
 0x75c   : > { %10571 = vmatprep.subr.bf16.mxu1 %v11430_v28  ;;  %v3511_v29 = vsel %vm1684_vm6, %v3506_v26, 0 }
 0x75e   : > { %v3304_v23 = vpop.permute.xlu0 %3303 }
 0x75f   : > { %v3309_v24 = vsel %vm1192_vm5, %v3304_v23, 0  ;;  %10568 = vmatmul.mubr.msk.bf16.vlgmr.msra.gmra.mrb[72].mxu0 %vm1192_vm5, %v3202_v21 }
 0x760   : > { %10578 = vmatpush3.bf16.xpose.msra.mxu0 %v3309_v24  ;;  %10579 = vmatprep.mubr.msk.bf16.mxu0 %vm11431_vm4, %v11430_v28 }
 0x761   : > { %10589 = vmatprep.subr.bf16.mxu0 %v11430_v28 }
 0x762   : > { %10562 = vmatmul.mubr.msk.bf16.vlgmr.msra.gmra.mrb[76].mxu1 %vm1192_vm5, %v3152_v6  ;;  %v3302_v27 = vpop.permute.xlu0 %3301 }
 0x763   : > { %10572 = vmatpush3.bf16.xpose.msra.mxu1 %v3259_v25  ;;  %10573 = vmatprep.mubr.msk.bf16.mxu1 %vm11431_vm4, %v11430_v28 }
 0x764   : > { %10583 = vmatprep.subr.bf16.mxu1 %v11430_v28 }
 0x766   : > { %v3554_v31 = vpop.permute.xlu0 %3553 }
 0x767   : > { %10580 = vmatmul.mubr.msk.bf16.vlgmr.msra.gmra.mrb[76].mxu0 %vm1192_vm5, %v3302_v27  ;;  %v3559_v33 = vsel %vm1684_vm6, %v3554_v31, 0 }
 0x768   : > { %10590 = vmatpush3.bf16.msra.mxu0 %v3511_v29  ;;  %10591 = vmatprep.mubr.msk.bf16.mxu0 %vm11431_vm4, %v11430_v28 }
 0x769   : > { %10601 = vmatprep.subr.bf16.mxu0 %v11430_v28 }
 0x76a   : > { %10574 = vmatmul.mubr.msk.bf16.vlgmr.msra.gmra.mrb[80].mxu1 %vm1192_vm5, %v3252_v13 }
 0x76b   : > { %10584 = vmatpush3.bf16.xpose.msra.mxu1 %v3359_v30  ;;  %10585 = vmatprep.mubr.msk.bf16.mxu1 %vm11431_vm4, %v11430_v28 }
 0x76c   : > { %10595 = vmatprep.subr.bf16.mxu1 %v11430_v28 }
 0x772   : > { %10586 = vmatmul.mubr.msk.bf16.vlgmr.msra.gmra.mrb[84].mxu1 %vm1192_vm5, %v3352_v22 }
 0x773   : > { %10596 = vmatpush3.bf16.msra.mxu1 %v3559_v33  ;;  %10597 = vmatprep.mubr.msk.bf16.mxu1 %vm11431_vm4, %v11430_v28 }
 0x774   : > { %10607 = vmatprep.subr.bf16.mxu1 %v11430_v28 }
 0x7d5   : > { %v12152_v34 = vpop.f32.mrb[48].mxu0 }
 0x7d6   : > { %v10497_v32 = vpop.f32.mrb[49].mxu0 }
 0x7d7   : > { %v2621_v37 = vpop.f32.mrb[50].mxu0 }
 0x7d8   : > { %v10498_v39 = vpop.f32.mrb[51].mxu0 }
 0x7dd   : > { %v12154_v40 = vpop.f32.mrb[52].mxu0 }
 0x7de   : > { %v10509_v41 = vpop.f32.mrb[53].mxu0 }
 0x7df   : > { %v2717_v43 = vpop.f32.mrb[54].mxu0 }
 0x7e0   : > { %v12156_v45 = vpop.f32.mrb[56].mxu1  ;;  %v10510_v48 = vpop.f32.mrb[55].mxu0 }
 0x7e1   : > { %v10503_v50 = vpop.f32.mrb[57].mxu1 }
 0x7e2   : > { %v2669_v44 = vpop.f32.mrb[58].mxu1 }
 0x7e3   : > { %v10504_v55 = vpop.f32.mrb[59].mxu1 }
 0x7e5   : > { %v12158_v36 = vpop.f32.mrb[56].mxu0 }
 0x7e6   : > { %v10521_v35 = vpop.f32.mrb[57].mxu0 }
 0x7e7   : > { %v2813_v56 = vpop.f32.mrb[58].mxu0 }
 0x7e8   : > { %v12160_v57 = vpop.f32.mrb[60].mxu1  ;;  %v10522_v58 = vpop.f32.mrb[59].mxu0 }
 0x7e9   : > { %v10515_v54 = vpop.f32.mrb[61].mxu1 }
 0x7ea   : > { %v2765_v59 = vpop.f32.mrb[62].mxu1 }
 0x7eb   : > { %v10516_v60 = vpop.f32.mrb[63].mxu1 }
 0x7f0   : > { %v12162_v61 = vpop.f32.mrb[64].mxu1 }
 0x7f1   : > { %v10527_v62 = vpop.f32.mrb[65].mxu1 }
 0x7f2   : > { %v2861_v63 = vpop.f32.mrb[66].mxu1 }
 0x7f3   : > { %v10528_v0 = vpop.f32.mrb[67].mxu1 }
 0x81a   : > { %v12164_v1 = vpop.f32.mrb[60].mxu0 }
 0x81b   : > { %v10533_v2 = vpop.f32.mrb[61].mxu0 }
 0x81c   : > { %v2909_v3 = vpop.f32.mrb[62].mxu0 }
 0x81d   : > { %v10534_v4 = vpop.f32.mrb[63].mxu0 }
 0x822   : > { %v3045_v5 = vpop.f32.mrb[64].mxu0 }
 0x823   : > { %v12166_v6 = vmul.f32 0.35355338, %v3045_v5  ;;  %v10545_v7 = vpop.f32.mrb[65].mxu0 }
 0x824   : > { %v3048_v8 = vpop.f32.mrb[66].mxu0 }
 0x825   : > { %v12168_v10 = vpop.f32.mrb[68].mxu1  ;;  %v10546_v11 = vpop.f32.mrb[67].mxu0  ;;  %v3409_v12 = vsel %vm1192_vm5, %v12166_v6, -inf }
 0x826   : > { %v10539_v9 = vpop.f32.mrb[69].mxu1  ;;  %3410 = vmax.xlane.f32.xlu0 %v3409_v12 }
 0x827   : > { %v2957_v14 = vpop.f32.mrb[70].mxu1  ;;  %v12186_v9 = vpop.permute.xlu1 %3601 }
 0x828   : > { %v10540_v15 = vpop.f32.mrb[71].mxu1 }
 0x82a   : > { %v3145_v13 = vpop.f32.mrb[68].mxu0 }
 0x82b   : > { %v3403_v17 = vmul.f32 0.35355338, %v3145_v13  ;;  %v10557_v16 = vpop.f32.mrb[69].mxu0  ;;  %v12189_v13 = vpop.permute.xlu1 %3649 }
 0x82c   : > { %v3148_v18 = vpop.f32.mrb[70].mxu0 }
 0x82d   : > { %v3095_v19 = vpop.f32.mrb[72].mxu1  ;;  %v10558_v20 = vpop.f32.mrb[71].mxu0  ;;  %v3415_v21 = vsel %vm1192_vm5, %v3403_v17, -inf }
 0x82e   : > { %v3402_v22 = vmul.f32 0.35355338, %v3095_v19  ;;  %v10551_v23 = vpop.f32.mrb[73].mxu1  ;;  %3416 = vmax.xlane.f32.xlu0 %v3415_v21 }
 0x82f   : > { %v3098_v24 = vpop.f32.mrb[74].mxu1 }
 0x830   : > { %v10552_v25 = vpop.f32.mrb[75].mxu1  ;;  %v3412_v26 = vsel %vm1192_vm5, %v3402_v22, -inf }
 0x831   : > { %3413 = vmax.xlane.f32.xlu1 %v3412_v26 }
 0x832   : > { %v3245_v27 = vpop.f32.mrb[72].mxu0 }
 0x833   : > { %v3405_v29 = vmul.f32 0.35355338, %v3245_v27  ;;  %v10569_v30 = vpop.f32.mrb[73].mxu0 }
 0x834   : > { %v3248_v31 = vpop.f32.mrb[74].mxu0 }
 0x835   : > { %v3195_v33 = vpop.f32.mrb[76].mxu1  ;;  %v10570_v32 = vpop.f32.mrb[75].mxu0  ;;  %v3421_v37 = vsel %vm1192_vm5, %v3405_v29, -inf }
 0x836   : > { %v3404_v39 = vmul.f32 0.35355338, %v3195_v33  ;;  %v10563_v41 = vpop.f32.mrb[77].mxu1  ;;  %3422 = vmax.xlane.f32.xlu1 %v3421_v37 }
 0x837   : > { %v3198_v43 = vpop.f32.mrb[78].mxu1 }
 0x838   : > { %v10564_v48 = vpop.f32.mrb[79].mxu1  ;;  %v3418_v50 = vsel %vm1192_vm5, %v3404_v39, -inf }
 0x839   : > { %3419 = vmax.xlane.f32.xlu0 %v3418_v50 }
 0x83a   : > { %v3345_v44 = vpop.f32.mrb[76].mxu0 }
 0x83b   : > { %v12176_v55 = vmul.f32 0.35355338, %v3345_v44  ;;  %v10581_v35 = vpop.f32.mrb[77].mxu0 }
 0x83c   : > { %v3348_v56 = vpop.f32.mrb[78].mxu0 }
 0x83d   : > { %v3295_v58 = vpop.f32.mrb[80].mxu1  ;;  %v10582_v54 = vpop.f32.mrb[79].mxu0  ;;  %v3427_v59 = vsel %vm1192_vm5, %v12176_v55, -inf }
 0x83e   : > { %v3406_v60 = vmul.f32 0.35355338, %v3295_v58  ;;  %v10575_v62 = vpop.f32.mrb[81].mxu1  ;;  %3428 = vmax.xlane.f32.xlu1 %v3427_v59 }
 0x83f   : > { %v3298_v63 = vpop.f32.mrb[82].mxu1 }
 0x840   : > { %v10576_v0 = vpop.f32.mrb[83].mxu1  ;;  %v3424_v2 = vsel %vm1192_vm5, %v3406_v60, -inf }
 0x841   : > { %3425 = vmax.xlane.f32.xlu0 %v3424_v2 }
 0x845   : > { %v3395_v3 = vpop.f32.mrb[84].mxu1 }
 0x846   : > { %v3408_v4 = vmul.f32 0.35355338, %v3395_v3  ;;  %v10587_v5 = vpop.f32.mrb[85].mxu1 }
 0x847   : > { %v3398_v7 = vpop.f32.mrb[86].mxu1 }
 0x848   : > { %v10588_v8 = vpop.f32.mrb[87].mxu1  ;;  %v3430_v11 = vsel %vm1192_vm5, %v3408_v4, -inf }
 0x849   : > { %3431 = vmax.xlane.f32.xlu0 %v3430_v11 }
 0x84f   : > { %3745 = vrot.lane.b32.xlu1 %v11717_v49, %s11439_s2 }
 0x85f   : > { %3697 = vrot.lane.b32.xlu0 %v11719_v51, %s11439_s2 }
 0x8b3   : > { %v3411_v12 = vpop.xlane.xlu0 %3410 }
 0x8b4   : > { %v3433_v14 = vsub.f32 %v12166_v6, %v3411_v12 }
 0x8b6   : > { %v3441_v15 = vmul.f32 1.442695, %v3433_v14 }
 0x8b8   : > { %11008 = vpow2.f32 %v3441_v15  ;;  %v3607_v15 = vsel %vm1684_vm6, %v12186_v9, 0 }
 0x8bb   : > { %v3417_v16 = vpop.xlane.xlu0 %3416 }
 0x8bc   : > { %v3435_v18 = vsub.f32 %v3403_v17, %v3417_v16 }
 0x8be   : > { %v3445_v19 = vmul.f32 1.442695, %v3435_v18  ;;  %v3414_v20 = vpop.xlane.xlu1 %3413 }
 0x8bf   : > { %v3434_v21 = vsub.f32 %v3402_v22, %v3414_v20 }
 0x8c0   : > { %11010 = vpow2.f32 %v3445_v19 }
 0x8c1   : > { %v3443_v23 = vmul.f32 1.442695, %v3434_v21 }
 0x8c2   : > { %v12191_v24 = vpop.eup %11008 }
 0x8c3   : > { %11012 = vpow2.f32 %v3443_v23  ;;  %v3423_v25 = vpop.xlane.xlu1 %3422  ;;  %v3457_v26 = vsel %vm1192_vm5, %v12191_v24, 0.0 }
 0x8c4   : > { %v3437_v27 = vsub.f32 %v3405_v29, %v3423_v25  ;;  %3458 = vadd.xlane.f32.xlu1 %v3457_v26 }
 0x8c6   : > { %v3449_v6 = vmul.f32 1.442695, %v3437_v27  ;;  %v3420_v30 = vpop.xlane.xlu0 %3419  ;;  %v3655_v27 = vsel %vm1684_vm6, %v12189_v13, 0 }
 0x8c7   : > { %v3436_v31 = vsub.f32 %v3404_v39, %v3420_v30 }
 0x8c8   : > { %11014 = vpow2.f32 %v3449_v6 }
 0x8c9   : > { %v3447_v33 = vmul.f32 1.442695, %v3436_v31 }
 0x8ca   : > { %v12195_v17 = vpop.eup %11010 }
 0x8cb   : > { %11016 = vpow2.f32 %v3447_v33  ;;  %v3463_v22 = vsel %vm1192_vm5, %v12195_v17, 0.0  ;;  %v3429_v58 = vpop.xlane.xlu1 %3428 }
 0x8cc   : > { %3464 = vadd.xlane.f32.xlu1 %v3463_v22  ;;  %v3439_v54 = vsub.f32 %v12176_v55, %v3429_v58 }
 0x8cd   : > { %v12199_v32 = vpop.eup %11012 }
 0x8ce   : > { %v3426_v37 = vpop.xlane.xlu0 %3425  ;;  %v3460_v41 = vsel %vm1192_vm5, %v12199_v32, 0.0  ;;  %v3453_v59 = vmul.f32 1.442695, %v3439_v54 }
 0x8cf   : > { %v3438_v29 = vsub.f32 %v3406_v60, %v3426_v37  ;;  %3461 = vadd.xlane.f32.xlu0 %v3460_v41 }
 0x8d1   : > { %v3451_v43 = vmul.f32 1.442695, %v3438_v29 }
 0x8d2   : > { %v12203_v48 = vpop.eup %11014 }
 0x8d3   : > { %11018 = vpow2.f32 %v3451_v43  ;;  %v3469_v39 = vsel %vm1192_vm5, %v12203_v48, 0.0 }
 0x8d4   : > { %3470 = vadd.xlane.f32.xlu1 %v3469_v39  ;;  %11020 = vpow2.f32 %v3453_v59 }
 0x8d5   : > { %v12207_v50 = vpop.eup %11016 }
 0x8d6   : > { %v3466_v44 = vsel %vm1192_vm5, %v12207_v50, 0.0  ;;  %v3432_v60 = vpop.xlane.xlu0 %3431 }
 0x8d7   : > { %3467 = vadd.xlane.f32.xlu0 %v3466_v44  ;;  %v3440_v62 = vsub.f32 %v3408_v4, %v3432_v60  ;;  %v3746_v4 = vpop.permute.xlu1 %3745 }
 0x8d8   : > { %v3751_v37 = vsel %vm1684_vm6, %v3746_v4, 0 }
 0x8d9   : > { %v3455_v63 = vmul.f32 1.442695, %v3440_v62 }
 0x8da   : > { %v3698_v7 = vpop.permute.xlu0 %3697 }
 0x8db   : > { %11022 = vpow2.f32 %v3455_v63  ;;  %v3703_v9 = vsel %vm1684_vm6, %v3698_v7, 0 }
 0x8dd   : > { %v12211_v35 = vpop.eup %11018 }
 0x8de   : > { %v3472_v56 = vsel %vm1192_vm5, %v12211_v35, 0.0  ;;  %v12220_v0 = vpop.eup %11020 }
 0x8df   : > { %3473 = vadd.xlane.f32.xlu0 %v3472_v56  ;;  %v3475_v2 = vsel %vm1192_vm5, %v12220_v0, 0.0 }
 0x8e5   : > { %3841 = vrot.lane.b32.xlu1 %v11722_v52, %s11439_s2  ;;  %v12224_v3 = vpop.eup %11022 }
 0x8e6   : > { %v3478_v55 = vsel %vm1192_vm5, %v12224_v3, 0.0 }
 0x8f5   : > { %3793 = vrot.lane.b32.xlu0 %v11725_v53, %s11439_s2 }
 0x909   : > { %3476 = vadd.xlane.f32.xlu1 %v3475_v2 }
 0x914   : > { %3479 = vadd.xlane.f32.xlu0 %v3478_v55 }
 0x91a   : > { %3982 = vrot.lane.b32.xlu1 %v11714_v47, %s11440_s24 }
 0x91e   : > { %3980 = vrot.lane.b32.xlu1 %v11714_v47, %s11441_s25 }
 0x922   : > { %4082 = vrot.lane.b32.xlu1 %v11712_v46, %s11440_s24 }
 0x926   : > { %4080 = vrot.lane.b32.xlu1 %v11712_v46, %s11441_s25 }
 0x92a   : > { %4182 = vrot.lane.b32.xlu1 %v11717_v49, %s11440_s24  ;;  %3932 = vrot.lane.b32.xlu0 %v11708_v42, %s11440_s24 }
 0x92e   : > { %4180 = vrot.lane.b32.xlu1 %v11717_v49, %s11441_s25  ;;  %3930 = vrot.lane.b32.xlu0 %v11708_v42, %s11441_s25 }
 0x932   : > { %4282 = vrot.lane.b32.xlu1 %v11722_v52, %s11440_s24  ;;  %4032 = vrot.lane.b32.xlu0 %v11706_v38, %s11440_s24 }
 0x936   : > { %4280 = vrot.lane.b32.xlu1 %v11722_v52, %s11441_s25  ;;  %4030 = vrot.lane.b32.xlu0 %v11706_v38, %s11441_s25 }
 0x93a   : > { %4434 = vrot.lane.b32.xlu1 %v11708_v42, %s11442_s1  ;;  %4132 = vrot.lane.b32.xlu0 %v11719_v51, %s11440_s24 }
 0x93e   : > { %4130 = vrot.lane.b32.xlu0 %v11719_v51, %s11441_s25 }
 0x942   : > { %4232 = vrot.lane.b32.xlu0 %v11725_v53, %s11440_s24  ;;  %s15364_s24 = scalar_lea.vmem %s15188_s10, %s11600_s17 }
 0x946   : > { %4230 = vrot.lane.b32.xlu0 %v11725_v53, %s11441_s25 }
 0x951   : > { %v3459_v5 = vpop.xlane.xlu1 %3458 }
 0x952   : > { %11024 = vrcp.f32 %v3459_v5 }
 0x959   : > { %v3465_v8 = vpop.xlane.xlu1 %3464 }
 0x95a   : > { %11026 = vrcp.f32 %v3465_v8 }
 0x95c   : > { %v11025_v11 = vpop.eup %11024  ;;  %v3462_v12 = vpop.xlane.xlu0 %3461 }
 0x95d   : > { %11028 = vrcp.f32 %v3462_v12  ;;  %v3489_v14 = vmul.f32 %v11025_v11, %v12191_v24 }
 0x95f   : > { %v3497_v42 = vpack.c.bf16 %v3489_v14, %v3489_v14 }
 0x961   : > { %10592 = vmatmul.mubr.msk.bf16.vlgmr.msra.gmra.mrb[80].mxu0 %vm1192_vm5, %v3497_v42  ;;  %v3471_v16 = vpop.xlane.xlu1 %3470 }
 0x962   : > { %10602 = vmatpush3.bf16.msra.mxu0 %v3607_v15  ;;  %11030 = vrcp.f32 %v3471_v16  ;;  %10603 = vmatprep.mubr.msk.bf16.mxu0 %vm11431_vm4, %v11430_v28 }
 0x963   : > { %10613 = vmatprep.subr.bf16.mxu0 %v11430_v28 }
 0x964   : > { %v11027_v18 = vpop.eup %11026  ;;  %v3468_v19 = vpop.xlane.xlu0 %3467 }
 0x965   : > { %11032 = vrcp.f32 %v3468_v19  ;;  %v3491_v20 = vmul.f32 %v11027_v18, %v12195_v17  ;;  %v3842_v43 = vpop.permute.xlu1 %3841 }
 0x966   : > { %v3847_v39 = vsel %vm1684_vm6, %v3842_v43, 0 }
 0x967   : > { %v11029_v21 = vpop.eup %11028  ;;  %v3499_v23 = vpack.c.bf16 %v3491_v20, %v3491_v20 }
 0x968   : > { %v3490_v24 = vmul.f32 %v11029_v21, %v12199_v32 }
 0x969   : > { %10604 = vmatmul.mubr.msk.bf16.vlgmr.msra.gmra.mrb[84].mxu0 %vm1192_vm5, %v3499_v23 }
 0x96a   : > { %10614 = vmatpush3.bf16.msra.mxu0 %v3703_v9  ;;  %v3498_v25 = vpack.c.bf16 %v3490_v24, %v3490_v24  ;;  %10615 = vmatprep.mubr.msk.bf16.mxu0 %vm11431_vm4, %v11430_v28 }
 0x96b   : > { %10625 = vmatprep.subr.bf16.mxu0 %v11430_v28 }
 0x96c   : > { %v11031_v26 = vpop.eup %11030  ;;  %10598 = vmatmul.mubr.msk.bf16.vlgmr.msra.gmra.mrb[88].mxu1 %vm1192_vm5, %v3498_v25  ;;  %v3474_v6 = vpop.xlane.xlu0 %3473 }
 0x96d   : > { %10608 = vmatpush3.bf16.msra.mxu1 %v3655_v27  ;;  %11034 = vrcp.f32 %v3474_v6  ;;  %v3493_v30 = vmul.f32 %v11031_v26, %v12203_v48  ;;  %10609 = vmatprep.mubr.msk.bf16.mxu1 %vm11431_vm4, %v11430_v28 }
 0x96e   : > { %10619 = vmatprep.subr.bf16.mxu1 %v11430_v28 }
 0x96f   : > { %v11033_v31 = vpop.eup %11032  ;;  %v3501_v33 = vpack.c.bf16 %v3493_v30, %v3493_v30 }
 0x970   : > { %v3794_v17 = vpop.permute.xlu0 %3793  ;;  %v3492_v22 = vmul.f32 %v11033_v31, %v12207_v50 }
 0x971   : > { %v3799_v32 = vsel %vm1684_vm6, %v3794_v17, 0  ;;  %10616 = vmatmul.mubr.msk.bf16.vlgmr.msra.gmra.mrb[88].mxu0 %vm1192_vm5, %v3501_v33 }
 0x972   : > { %10626 = vmatpush3.bf16.msra.mxu0 %v3799_v32  ;;  %v3500_v13 = vpack.c.bf16 %v3492_v22, %v3492_v22  ;;  %10627 = vmatprep.mubr.msk.bf16.mxu0 %vm11431_vm4, %v11430_v28 }
 0x973   : > { %10637 = vmatprep.subr.bf16.mxu0 %v11430_v28 }
 0x974   : > { %10610 = vmatmul.mubr.msk.bf16.vlgmr.msra.gmra.mrb[92].mxu1 %vm1192_vm5, %v3500_v13 }
 0x975   : > { %10620 = vmatpush3.bf16.msra.mxu1 %v3751_v37  ;;  %10621 = vmatprep.mubr.msk.bf16.mxu1 %vm11431_vm4, %v11430_v28 }
 0x976   : > { %10631 = vmatprep.subr.bf16.mxu1 %v11430_v28 }
 0x977   : > { %v11035_v41 = vpop.eup %11034 }
 0x978   : > { %v3494_v29 = vmul.f32 %v11035_v41, %v12211_v35 }
 0x97a   : > { %v3502_v48 = vpack.c.bf16 %v3494_v29, %v3494_v29 }
 0x97c   : > { %10622 = vmatmul.mubr.msk.bf16.vlgmr.msra.gmra.mrb[96].mxu1 %vm1192_vm5, %v3502_v48 }
 0x97d   : > { %10632 = vmatpush3.bf16.msra.mxu1 %v3847_v39  ;;  %10633 = vmatprep.mubr.msk.bf16.mxu1 %vm11431_vm4, %v11430_v28 }
 0x97e   : > { %10643 = vmatprep.subr.bf16.mxu1 %v11430_v28 }
 0x996   : > { %v3477_v50 = vpop.xlane.xlu1 %3476 }
 0x997   : > { %11036 = vrcp.f32 %v3477_v50 }
 0x99a   : > { %v3983_v44 = vpop.permute.xlu1 %3982 }
 0x99b   : > { %v3988_v12 = vsel %vm1192_vm5, %v3983_v44, 0 }
 0x99e   : > { %v3981_v56 = vpop.permute.xlu1 %3980 }
 0x9a1   : > { %v11037_v58 = vpop.eup %11036  ;;  %v3480_v54 = vpop.xlane.xlu0 %3479 }
 0x9a2   : > { %v3495_v35 = vmul.f32 %v11037_v58, %v12220_v0  ;;  %11038 = vrcp.f32 %v3480_v54  ;;  %v4083_v59 = vpop.permute.xlu1 %4082 }
 0x9a3   : > { %v4088_v18 = vsel %vm1192_vm5, %v4083_v59, 0 }
 0x9a4   : > { %v3503_v60 = vpack.c.bf16 %v3495_v35, %v3495_v35 }
 0x9a5   : > { %v3933_v62 = vpop.permute.xlu0 %3932 }
 0x9a6   : > { %v3938_v63 = vsel %vm1192_vm5, %v3933_v62, 0  ;;  %v4081_v2 = vpop.permute.xlu1 %4080  ;;  %10628 = vmatmul.mubr.msk.bf16.vlgmr.msra.gmra.mrb[92].mxu0 %vm1192_vm5, %v3503_v60 }
 0x9a7   : > { %10638 = vmatpush3.bf16.xpose.msra.mxu0 %v3938_v63  ;;  %10639 = vmatprep.mubr.msk.bf16.mxu0 %vm11431_vm4, %v11430_v28 }
 0x9a8   : > { %10649 = vmatprep.subr.bf16.mxu0 %v11430_v28 }
 0x9a9   : > { %v3931_v55 = vpop.permute.xlu0 %3930 }
 0x9aa   : > { %v4183_v4 = vpop.permute.xlu1 %4182 }
 0x9ab   : > { %v4188_v24 = vsel %vm1192_vm5, %v4183_v4, 0 }
 0x9ac   : > { %v11039_v5 = vpop.eup %11038 }
 0x9ad   : > { %v4033_v7 = vpop.permute.xlu0 %4032  ;;  %v3496_v0 = vmul.f32 %v11039_v5, %v12224_v3 }
 0x9ae   : > { %v4038_v8 = vsel %vm1192_vm5, %v4033_v7, 0  ;;  %10640 = vmatmul.mubr.msk.bf16.vlgmr.msra.gmra.mrb[96].mxu0 %vm1192_vm5, %v3931_v55  ;;  %v4181_v14 = vpop.permute.xlu1 %4180 }
 0x9af   : > { %10650 = vmatpush3.bf16.xpose.msra.mxu0 %v4038_v8  ;;  %v3504_v11 = vpack.c.bf16 %v3496_v0, %v3496_v0  ;;  %10651 = vmatprep.mubr.msk.bf16.mxu0 %vm11431_vm4, %v11430_v28 }
 0x9b0   : > { %10661 = vmatprep.subr.bf16.mxu0 %v11430_v28 }
 0x9b1   : > { %10634 = vmatmul.mubr.msk.bf16.vlgmr.msra.gmra.mrb[100].mxu1 %vm1192_vm5, %v3504_v11  ;;  %v4031_v42 = vpop.permute.xlu0 %4030 }
 0x9b2   : > { %10644 = vmatpush3.bf16.xpose.msra.mxu1 %v3988_v12  ;;  %10645 = vmatprep.mubr.msk.bf16.mxu1 %vm11431_vm4, %v11430_v28  ;;  %v4283_v16 = vpop.permute.xlu1 %4282 }
 0x9b3   : > { %10655 = vmatprep.subr.bf16.mxu1 %v11430_v28  ;;  %v4288_v27 = vsel %vm1192_vm5, %v4283_v16, 0 }
 0x9b5   : > { %v4133_v3 = vpop.permute.xlu0 %4132 }
 0x9b6   : > { %v4138_v15 = vsel %vm1192_vm5, %v4133_v3, 0  ;;  %10652 = vmatmul.mubr.msk.bf16.vlgmr.msra.gmra.mrb[100].mxu0 %vm1192_vm5, %v4031_v42  ;;  %v4281_v20 = vpop.permute.xlu1 %4280 }
 0x9b7   : > { %10662 = vmatpush3.bf16.xpose.msra.mxu0 %v4138_v15  ;;  %10663 = vmatprep.mubr.msk.bf16.mxu0 %vm11431_vm4, %v11430_v28 }
 0x9b8   : > { %10673 = vmatprep.subr.bf16.mxu0 %v11430_v28 }
 0x9b9   : > { %10646 = vmatmul.mubr.msk.bf16.vlgmr.msra.gmra.mrb[104].mxu1 %vm1192_vm5, %v3981_v56  ;;  %v4131_v19 = vpop.permute.xlu0 %4130 }
 0x9ba   : > { %10656 = vmatpush3.bf16.xpose.msra.mxu1 %v4088_v18  ;;  %10657 = vmatprep.mubr.msk.bf16.mxu1 %vm11431_vm4, %v11430_v28  ;;  %v4435_v9 = vpop.permute.xlu1 %4434 }
 0x9bb   : > { %10667 = vmatprep.subr.bf16.mxu1 %v11430_v28  ;;  %v4440_v26 = vsel %vm1684_vm6, %v4435_v9, 0 }
 0x9bd   : > { %v4233_v21 = vpop.permute.xlu0 %4232 }
 0x9be   : > { %v4238_v23 = vsel %vm1192_vm5, %v4233_v21, 0  ;;  %10664 = vmatmul.mubr.msk.bf16.vlgmr.msra.gmra.mrb[104].mxu0 %vm1192_vm5, %v4131_v19 }
 0x9bf   : > { %10674 = vmatpush3.bf16.xpose.msra.mxu0 %v4238_v23  ;;  %10675 = vmatprep.mubr.msk.bf16.mxu0 %vm11431_vm4, %v11430_v28 }
 0x9c0   : > { %10685 = vmatprep.subr.bf16.mxu0 %v11430_v28 }
 0x9c1   : > { %10658 = vmatmul.mubr.msk.bf16.vlgmr.msra.gmra.mrb[108].mxu1 %vm1192_vm5, %v4081_v2  ;;  %v4231_v25 = vpop.permute.xlu0 %4230 }
 0x9c2   : > { %10668 = vmatpush3.bf16.xpose.msra.mxu1 %v4188_v24  ;;  %10669 = vmatprep.mubr.msk.bf16.mxu1 %vm11431_vm4, %v11430_v28 }
 0x9c3   : > { %10679 = vmatprep.subr.bf16.mxu1 %v11430_v28 }
 0x9c6   : > { %10676 = vmatmul.mubr.msk.bf16.vlgmr.msra.gmra.mrb[108].mxu0 %vm1192_vm5, %v4231_v25 }
 0x9c7   : > { %10686 = vmatpush3.bf16.msra.mxu0 %v4440_v26  ;;  %10687 = vmatprep.mubr.msk.bf16.mxu0 %vm11431_vm4, %v11430_v28 }
 0x9c8   : > { %10697 = vmatprep.subr.bf16.mxu0 %v11430_v28 }
 0x9c9   : > { %10670 = vmatmul.mubr.msk.bf16.vlgmr.msra.gmra.mrb[112].mxu1 %vm1192_vm5, %v4181_v14 }
 0x9ca   : > { %10680 = vmatpush3.bf16.xpose.msra.mxu1 %v4288_v27  ;;  %10681 = vmatprep.mubr.msk.bf16.mxu1 %vm11431_vm4, %v11430_v28 }
 0x9cb   : > { %10691 = vmatprep.subr.bf16.mxu1 %v11430_v28 }
 0x9d1   : > { %10682 = vmatmul.mubr.msk.bf16.vlgmr.msra.gmra.mrb[116].mxu1 %vm1192_vm5, %v4281_v20 }
 0x9d2   : > { %10693 = vmatprep.mubr.msk.bf16.mxu1 %vm11431_vm4, %v11430_v28 }
 0xa34   : > { %v12334_v6 = vpop.f32.mrb[80].mxu0 }
 0xa35   : > { %v10593_v30 = vpop.f32.mrb[81].mxu0 }
 0xa36   : > { %v3550_v31 = vpop.f32.mrb[82].mxu0 }
 0xa37   : > { %v10594_v33 = vpop.f32.mrb[83].mxu0 }
 0xa3c   : > { %v12336_v17 = vpop.f32.mrb[84].mxu0 }
 0xa3d   : > { %v10605_v22 = vpop.f32.mrb[85].mxu0 }
 0xa3e   : > { %v3646_v32 = vpop.f32.mrb[86].mxu0 }
 0xa3f   : > { %v12338_v13 = vpop.f32.mrb[88].mxu1  ;;  %v10606_v37 = vpop.f32.mrb[87].mxu0 }
 0xa40   : > { %v10599_v41 = vpop.f32.mrb[89].mxu1 }
 0xa41   : > { %v3598_v29 = vpop.f32.mrb[90].mxu1 }
 0xa42   : > { %v10600_v43 = vpop.f32.mrb[91].mxu1 }
 0xa44   : > { %v12340_v48 = vpop.f32.mrb[88].mxu0 }
 0xa45   : > { %v10617_v39 = vpop.f32.mrb[89].mxu0 }
 0xa46   : > { %v3742_v50 = vpop.f32.mrb[90].mxu0 }
 0xa47   : > { %v12342_v44 = vpop.f32.mrb[92].mxu1  ;;  %v10618_v56 = vpop.f32.mrb[91].mxu0 }
 0xa48   : > { %v10611_v58 = vpop.f32.mrb[93].mxu1 }
 0xa49   : > { %v3694_v54 = vpop.f32.mrb[94].mxu1 }
 0xa4a   : > { %v10612_v35 = vpop.f32.mrb[95].mxu1 }
 0xa4f   : > { %v12344_v59 = vpop.f32.mrb[96].mxu1 }
 0xa50   : > { %v10623_v60 = vpop.f32.mrb[97].mxu1 }
 0xa51   : > { %v3790_v62 = vpop.f32.mrb[98].mxu1 }
 0xa52   : > { %v10624_v63 = vpop.f32.mrb[99].mxu1 }
 0xa79   : > { %v12346_v2 = vpop.f32.mrb[92].mxu0 }
 0xa7a   : > { %v10629_v55 = vpop.f32.mrb[93].mxu0 }
 0xa7b   : > { %v3838_v4 = vpop.f32.mrb[94].mxu0 }
 0xa7c   : > { %v10630_v5 = vpop.f32.mrb[95].mxu0 }
 0xa81   : > { %v3974_v7 = vpop.f32.mrb[96].mxu0 }
 0xa82   : > { %v12348_v0 = vmul.f32 0.35355338, %v3974_v7  ;;  %v10641_v8 = vpop.f32.mrb[97].mxu0 }
 0xa83   : > { %v3977_v11 = vpop.f32.mrb[98].mxu0 }
 0xa84   : > { %v12350_v12 = vpop.f32.mrb[100].mxu1  ;;  %v10642_v14 = vpop.f32.mrb[99].mxu0  ;;  %v4338_v42 = vsel %vm1192_vm5, %v12348_v0, -inf }
 0xa85   : > { %v10635_v3 = vpop.f32.mrb[101].mxu1  ;;  %4339 = vmax.xlane.f32.xlu0 %v4338_v42 }
 0xa86   : > { %v3886_v15 = vpop.f32.mrb[102].mxu1 }
 0xa87   : > { %v10636_v16 = vpop.f32.mrb[103].mxu1 }
 0xa89   : > { %v4074_v18 = vpop.f32.mrb[100].mxu0 }
 0xa8a   : > { %v4332_v19 = vmul.f32 0.35355338, %v4074_v18  ;;  %v10653_v20 = vpop.f32.mrb[101].mxu0 }
 0xa8b   : > { %v4077_v21 = vpop.f32.mrb[102].mxu0 }
 0xa8c   : > { %v4024_v23 = vpop.f32.mrb[104].mxu1  ;;  %v10654_v24 = vpop.f32.mrb[103].mxu0  ;;  %v4344_v9 = vsel %vm1192_vm5, %v4332_v19, -inf }
 0xa8d   : > { %v4331_v25 = vmul.f32 0.35355338, %v4024_v23  ;;  %v10647_v26 = vpop.f32.mrb[105].mxu1  ;;  %4345 = vmax.xlane.f32.xlu0 %v4344_v9 }
 0xa8e   : > { %v4027_v27 = vpop.f32.mrb[106].mxu1 }
 0xa8f   : > { %v10648_v30 = vpop.f32.mrb[107].mxu1  ;;  %v4341_v31 = vsel %vm1192_vm5, %v4331_v25, -inf }
 0xa90   : > { %4342 = vmax.xlane.f32.xlu1 %v4341_v31 }
 0xa91   : > { %v4174_v33 = vpop.f32.mrb[104].mxu0 }
 0xa92   : > { %v12356_v22 = vmul.f32 0.35355338, %v4174_v33  ;;  %v10665_v32 = vpop.f32.mrb[105].mxu0 }
 0xa93   : > { %v4177_v37 = vpop.f32.mrb[106].mxu0 }
 0xa94   : > { %v4124_v41 = vpop.f32.mrb[108].mxu1  ;;  %v10666_v29 = vpop.f32.mrb[107].mxu0  ;;  %v4350_v43 = vsel %vm1192_vm5, %v12356_v22, -inf }
 0xa95   : > { %v4333_v39 = vmul.f32 0.35355338, %v4124_v41  ;;  %v10659_v50 = vpop.f32.mrb[109].mxu1  ;;  %4351 = vmax.xlane.f32.xlu1 %v4350_v43 }
 0xa96   : > { %v4127_v56 = vpop.f32.mrb[110].mxu1 }
 0xa97   : > { %v10660_v58 = vpop.f32.mrb[111].mxu1  ;;  %v4347_v54 = vsel %vm1192_vm5, %v4333_v39, -inf }
 0xa98   : > { %4348 = vmax.xlane.f32.xlu0 %v4347_v54 }
 0xa99   : > { %v4274_v35 = vpop.f32.mrb[108].mxu0 }
 0xa9a   : > { %v12361_v60 = vmul.f32 0.35355338, %v4274_v35  ;;  %v10677_v62 = vpop.f32.mrb[109].mxu0 }
 0xa9b   : > { %v4277_v63 = vpop.f32.mrb[110].mxu0 }
 0xa9c   : > { %v4224_v55 = vpop.f32.mrb[112].mxu1  ;;  %v10678_v4 = vpop.f32.mrb[111].mxu0  ;;  %v4356_v5 = vsel %vm1192_vm5, %v12361_v60, -inf }
 0xa9d   : > { %v4335_v7 = vmul.f32 0.35355338, %v4224_v55  ;;  %v10671_v8 = vpop.f32.mrb[113].mxu1  ;;  %4357 = vmax.xlane.f32.xlu1 %v4356_v5 }
 0xa9e   : > { %v4227_v11 = vpop.f32.mrb[114].mxu1 }
 0xa9f   : > { %v10672_v14 = vpop.f32.mrb[115].mxu1  ;;  %v4353_v42 = vsel %vm1192_vm5, %v4335_v7, -inf }
 0xaa0   : > { %4354 = vmax.xlane.f32.xlu0 %v4353_v42 }
 0xaa4   : > { %v4324_v3 = vpop.f32.mrb[116].mxu1 }
 0xaa5   : > { %v4337_v15 = vmul.f32 0.35355338, %v4324_v3  ;;  %v10683_v16 = vpop.f32.mrb[117].mxu1 }
 0xaa6   : > { %v4327_v18 = vpop.f32.mrb[118].mxu1 }
 0xaa7   : > { %v10684_v20 = vpop.f32.mrb[119].mxu1  ;;  %v4359_v21 = vsel %vm1192_vm5, %v4337_v15, -inf }
 0xaa8   : > { %4360 = vmax.xlane.f32.xlu0 %v4359_v21 }
 0xaae   : > { %4530 = vrot.lane.b32.xlu1 %v11706_v38, %s11442_s1 }
 0xab2   : > { %4578 = vrot.lane.b32.xlu1 %v11712_v46, %s11442_s1 }
 0xabe   : > { %4482 = vrot.lane.b32.xlu0 %v11714_v47, %s11442_s1 }
 0xb12   : > { %v4340_v23 = vpop.xlane.xlu0 %4339 }
 0xb13   : > { %v4362_v24 = vsub.f32 %v12348_v0, %v4340_v23 }
 0xb15   : > { %v4370_v9 = vmul.f32 1.442695, %v4362_v24 }
 0xb17   : > { %11040 = vpow2.f32 %v4370_v9 }
 0xb1a   : > { %v4346_v26 = vpop.xlane.xlu0 %4345 }
 0xb1b   : > { %v4364_v27 = vsub.f32 %v4332_v19, %v4346_v26 }
 0xb1d   : > { %v4374_v30 = vmul.f32 1.442695, %v4364_v27  ;;  %v4343_v31 = vpop.xlane.xlu1 %4342 }
 0xb1e   : > { %v4363_v33 = vsub.f32 %v4331_v25, %v4343_v31 }
 0xb1f   : > { %11042 = vpow2.f32 %v4374_v30 }
 0xb20   : > { %v4372_v32 = vmul.f32 1.442695, %v4363_v33 }
 0xb21   : > { %v12374_v37 = vpop.eup %11040 }
 0xb22   : > { %11044 = vpow2.f32 %v4372_v32  ;;  %v4386_v38 = vsel %vm1192_vm5, %v12374_v37, 0.0  ;;  %v4352_v35 = vpop.xlane.xlu1 %4351 }
 0xb23   : > { %4387 = vadd.xlane.f32.xlu1 %v4386_v38  ;;  %v4366_v62 = vsub.f32 %v12356_v22, %v4352_v35 }
 0xb25   : > { %v4349_v46 = vpop.xlane.xlu0 %4348  ;;  %v4378_v55 = vmul.f32 1.442695, %v4366_v62 }
 0xb26   : > { %v4365_v47 = vsub.f32 %v4333_v39, %v4349_v46 }
 0xb28   : > { %v4376_v41 = vmul.f32 1.442695, %v4365_v47 }
 0xb29   : > { %v12378_v0 = vpop.eup %11042 }
 0xb2a   : > { %11046 = vpow2.f32 %v4376_v41  ;;  %v4392_v19 = vsel %vm1192_vm5, %v12378_v0, 0.0  ;;  %v4358_v63 = vpop.xlane.xlu1 %4357 }
 0xb2b   : > { %4393 = vadd.xlane.f32.xlu1 %v4392_v19  ;;  %v4368_v4 = vsub.f32 %v12361_v60, %v4358_v63  ;;  %11048 = vpow2.f32 %v4378_v55 }
 0xb2c   : > { %v12382_v25 = vpop.eup %11044 }
 0xb2d   : > { %v4389_v29 = vsel %vm1192_vm5, %v12382_v25, 0.0  ;;  %v4355_v43 = vpop.xlane.xlu0 %4354  ;;  %v4382_v5 = vmul.f32 1.442695, %v4368_v4 }
 0xb2e   : > { %4390 = vadd.xlane.f32.xlu0 %v4389_v29  ;;  %v4367_v8 = vsub.f32 %v4335_v7, %v4355_v43 }
 0xb2f   : > { %11050 = vpow2.f32 %v4382_v5 }
 0xb30   : > { %v4380_v11 = vmul.f32 1.442695, %v4367_v8 }
 0xb32   : > { %11052 = vpow2.f32 %v4380_v11 }
 0xb34   : > { %v12386_v50 = vpop.eup %11046 }
 0xb35   : > { %v4361_v56 = vpop.xlane.xlu0 %4360  ;;  %v4395_v39 = vsel %vm1192_vm5, %v12386_v50, 0.0  ;;  %v12398_v42 = vpop.eup %11048 }
 0xb36   : > { %4396 = vadd.xlane.f32.xlu0 %v4395_v39  ;;  %v4369_v14 = vsub.f32 %v4337_v15, %v4361_v56  ;;  %v4398_v22 = vsel %vm1192_vm5, %v12398_v42, 0.0 }
 0xb39   : > { %v4483_v58 = vpop.permute.xlu0 %4482  ;;  %v12402_v3 = vpop.eup %11050 }
 0xb3a   : > { %v4488_v54 = vsel %vm1684_vm6, %v4483_v58, 0 }
 0xb3b   : > { %10692 = vmatpush3.bf16.msra.mxu1 %v4488_v54 }
 0xb3c   : > { %4674 = vrot.lane.b32.xlu1 %v11717_v49, %s11442_s1  ;;  %10703 = vmatprep.subr.bf16.mxu1 %v11430_v28  ;;  %v4384_v49 = vmul.f32 1.442695, %v4369_v14  ;;  %v12406_v60 = vpop.eup %11052 }
 0xb3d   : > { %v4401_v7 = vsel %vm1192_vm5, %v12406_v60, 0.0 }
 0xb3e   : > { %11054 = vpow2.f32 %v4384_v49 }
 0xb48   : > { %v12410_v15 = vpop.eup %11054 }
 0xb49   : > { %v4407_v16 = vsel %vm1192_vm5, %v12410_v15, 0.0 }
 0xb4c   : > { %4626 = vrot.lane.b32.xlu0 %v11719_v51, %s11442_s1  ;;  %v4404_v51 = vsel %vm1192_vm5, %v12402_v3, 0.0 }
 0xb60   : > { %4399 = vadd.xlane.f32.xlu1 %v4398_v22 }
 0xb64   : > { %4405 = vadd.xlane.f32.xlu1 %v4404_v51 }
 0xb6b   : > { %4402 = vadd.xlane.f32.xlu0 %v4401_v7 }
 0xb6f   : > { %4408 = vadd.xlane.f32.xlu0 %v4407_v16 }
 0xb75   : > { %4770 = vrot.lane.b32.xlu1 %v11722_v52, %s11442_s1  ;;  %v4531_v52 = vpop.permute.xlu1 %4530 }
 0xb79   : > { %2970 = vrot.lane.b32.xlu1 %v12156_v45, %s11443_s22 }
 0xb7d   : > { %2974 = vrot.lane.b32.xlu1 %v12160_v57, %s11443_s22 }
 0xb81   : > { %3899 = vrot.lane.b32.xlu1 %v12338_v13, %s11444_s21 }
 0xb85   : > { %3903 = vrot.lane.b32.xlu1 %v12342_v44, %s11444_s21  ;;  %4722 = vrot.lane.b32.xlu0 %v11725_v53, %s11442_s1  ;;  %v4579_v53 = vpop.permute.xlu1 %4578 }
 0xb86   : > { %v4584_v24 = vsel %vm1684_vm6, %v4579_v53, 0 }
 0xb89   : > { %2978 = vrot.lane.b32.xlu1 %v12162_v61, %s11443_s22  ;;  %2968 = vrot.lane.b32.xlu0 %v12152_v34, %s11443_s22 }
 0xb8d   : > { %2982 = vrot.lane.b32.xlu1 %v12168_v10, %s11443_s22  ;;  %2972 = vrot.lane.b32.xlu0 %v12154_v40, %s11443_s22 }
 0xb91   : > { %3897 = vrot.lane.b32.xlu0 %v12334_v6, %s11444_s21  ;;  %v4536_v6 = vsel %vm1684_vm6, %v4531_v52, 0  ;;  %v10814_v52 = vld [vmem:[%s11615_s28] sm:$0xff]  }
 0xb95   : > { %3901 = vrot.lane.b32.xlu0 %v12336_v17, %s11444_s21 }
 0xb99   : > { %2976 = vrot.lane.b32.xlu0 %v12158_v36, %s11443_s22 }
 0xb9d   : > { %2980 = vrot.lane.b32.xlu0 %v12164_v1, %s11443_s22 }
 0xbb0   : > { %v4388_v45 = vpop.xlane.xlu1 %4387 }
 0xbb1   : > { %11056 = vrcp.f32 %v4388_v45 }
 0xbb8   : > { %v4394_v57 = vpop.xlane.xlu1 %4393 }
 0xbb9   : > { %11058 = vrcp.f32 %v4394_v57 }
 0xbbb   : > { %v11057_v34 = vpop.eup %11056  ;;  %v4391_v61 = vpop.xlane.xlu0 %4390 }
 0xbbc   : > { %v4418_v40 = vmul.f32 %v11057_v34, %v12374_v37  ;;  %11060 = vrcp.f32 %v4391_v61  ;;  %v4675_v27 = vpop.permute.xlu1 %4674 }
 0xbbd   : > { %v4680_v31 = vsel %vm1684_vm6, %v4675_v27, 0 }
 0xbbe   : > { %v4426_v10 = vpack.c.bf16 %v4418_v40, %v4418_v40  ;;  %v10815_v40 = vld [vmem:[%s11615_s28 + $0x8] sm:$0xff]  }
 0xbc0   : > { %10688 = vmatmul.mubr.msk.bf16.vlgmr.msra.gmra.mrb[112].mxu0 %vm1192_vm5, %v4426_v10 }
 0xbc1   : > { %10698 = vmatpush3.bf16.msra.mxu0 %v4536_v6  ;;  %10699 = vmatprep.mubr.msk.bf16.mxu0 %vm11431_vm4, %v11430_v28 }
 0xbc2   : > { %10709 = vmatprep.subr.bf16.mxu0 %v11430_v28 }
 0xbc3   : > { %v11059_v36 = vpop.eup %11058  ;;  %v4397_v1 = vpop.xlane.xlu0 %4396 }
 0xbc4   : > { %v4420_v17 = vmul.f32 %v11059_v36, %v12378_v0  ;;  %11062 = vrcp.f32 %v4397_v1 }
 0xbc6   : > { %v11061_v13 = vpop.eup %11060  ;;  %v4428_v44 = vpack.c.bf16 %v4420_v17, %v4420_v17 }
 0xbc7   : > { %v4419_v18 = vmul.f32 %v11061_v13, %v12382_v25  ;;  %v4627_v20 = vpop.permute.xlu0 %4626 }
 0xbc8   : > { %v4632_v21 = vsel %vm1684_vm6, %v4627_v20, 0  ;;  %10700 = vmatmul.mubr.msk.bf16.vlgmr.msra.gmra.mrb[116].mxu0 %vm1192_vm5, %v4428_v44 }
 0xbc9   : > { %10710 = vmatpush3.bf16.msra.mxu0 %v4632_v21  ;;  %v4427_v23 = vpack.c.bf16 %v4419_v18, %v4419_v18  ;;  %10711 = vmatprep.mubr.msk.bf16.mxu0 %vm11431_vm4, %v11430_v28 }
 0xbca   : > { %10721 = vmatprep.subr.bf16.mxu0 %v11430_v28 }
 0xbcb   : > { %10694 = vmatmul.mubr.msk.bf16.vlgmr.msra.gmra.mrb[120].mxu1 %vm1192_vm5, %v4427_v23 }
 0xbcc   : > { %10704 = vmatpush3.bf16.msra.mxu1 %v4584_v24  ;;  %10705 = vmatprep.mubr.msk.bf16.mxu1 %vm11431_vm4, %v11430_v28 }
 0xbcd   : > { %10715 = vmatprep.subr.bf16.mxu1 %v11430_v28 }
 0xbce   : > { %v11063_v9 = vpop.eup %11062 }
 0xbcf   : > { %v4421_v26 = vmul.f32 %v11063_v9, %v12386_v50 }
 0xbd1   : > { %v4429_v30 = vpack.c.bf16 %v4421_v26, %v4421_v26 }
 0xbd3   : > { %10706 = vmatmul.mubr.msk.bf16.vlgmr.msra.gmra.mrb[124].mxu1 %vm1192_vm5, %v4429_v30 }
 0xbd4   : > { %10716 = vmatpush3.bf16.msra.mxu1 %v4680_v31  ;;  %10717 = vmatprep.mubr.msk.bf16.mxu1 %vm11431_vm4, %v11430_v28 }
 0xbd5   : > { %10727 = vmatprep.subr.bf16.mxu1 %v11430_v28 }
 0xbed   : > { %v4400_v33 = vpop.xlane.xlu1 %4399 }
 0xbee   : > { %11064 = vrcp.f32 %v4400_v33 }
 0xbf1   : > { %v4406_v32 = vpop.xlane.xlu1 %4405 }
 0xbf2   : > { %11066 = vrcp.f32 %v4406_v32 }
 0xbf5   : > { %v4771_v37 = vpop.permute.xlu1 %4770 }
 0xbf6   : > { %v4776_v5 = vsel %vm1684_vm6, %v4771_v37, 0 }
 0xbf8   : > { %v11065_v38 = vpop.eup %11064  ;;  %v4403_v46 = vpop.xlane.xlu0 %4402 }
 0xbf9   : > { %v4422_v47 = vmul.f32 %v11065_v38, %v12398_v42  ;;  %11068 = vrcp.f32 %v4403_v46  ;;  %v2971_v41 = vpop.permute.xlu1 %2970 }
 0xbfa   : > { %2994 = vst.msk [vmem:[#allocation3 + $0x8] sm:$0xff] %vm2992_vm7, %v2971_v41 }
 0xbfb   : > { %v4430_v0 = vpack.c.bf16 %v4422_v47, %v4422_v47 }
 0xbfc   : > { %v11067_v19 = vpop.eup %11066  ;;  %v4409_v25 = vpop.xlane.xlu0 %4408 }
 0xbfd   : > { %11070 = vrcp.f32 %v4409_v25  ;;  %v2975_v29 = vpop.permute.xlu1 %2974  ;;  %10712 = vmatmul.mubr.msk.bf16.vlgmr.msra.gmra.mrb[120].mxu0 %vm1192_vm5, %v4430_v0  ;;  %v4424_v43 = vmul.f32 %v11067_v19, %v12402_v3 }
 0xbfe   : > { %2996 = vst.msk [vmem:[#allocation3 + $0x18] sm:$0xff] %vm2992_vm7, %v2975_v29  ;;  %10723 = vmatprep.mubr.msk.bf16.mxu0 %vm11431_vm4, %v11430_v28 }
 0xbff   : > { %v4432_v54 = vpack.c.bf16 %v4424_v43, %v4424_v43 }
 0xc00   : > { %v4723_v50 = vpop.permute.xlu0 %4722 }
 0xc01   : > { %v4728_v56 = vsel %vm1684_vm6, %v4723_v50, 0  ;;  %v3900_v39 = vpop.permute.xlu1 %3899 }
 0xc02   : > { %3923 = vst.msk [vmem:[#allocation3 + $0x8] sm:$0xff] %vm3921_vm8, %v3900_v39  ;;  %10722 = vmatpush3.bf16.msra.mxu0 %v4728_v56 }
 0xc03   : > { %v11069_v58 = vpop.eup %11068  ;;  %10733 = vmatprep.subr.bf16.mxu0 %v10814_v52 }
 0xc04   : > { %v4423_v35 = vmul.f32 %v11069_v58, %v12406_v60  ;;  %v2969_v62 = vpop.permute.xlu0 %2968 }
 0xc05   : > { %2993 = vst.msk [vmem:[#allocation3] sm:$0xff] %vm2992_vm7, %v2969_v62  ;;  %v3904_v63 = vpop.permute.xlu1 %3903  ;;  %10724 = vmatmul.mubr.msk.bf16.vlgmr.msra.gmra.mrb[124].mxu0 %vm1192_vm5, %v4432_v54 }
 0xc06   : > { %3925 = vst.msk [vmem:[#allocation3 + $0x18] sm:$0xff] %vm3921_vm8, %v3904_v63  ;;  %v4431_v55 = vpack.c.bf16 %v4423_v35, %v4423_v35  ;;  %10734 = vmatpush3.bf16.msra.mxu0 %v10814_v52  ;;  %v11361_v52 = vld [vmem:[#allocation2 + $0x10] sm:$0xff] }
 0xc07   : > { %v11071_v4 = vpop.eup %11070  ;;  %10735 = vmatprep.subr.bf16.mxu0 %v10815_v40 }
 0xc08   : > { %10718 = vmatmul.mubr.msk.bf16.vlgmr.msra.gmra.mrb[128].mxu1 %vm1192_vm5, %v4431_v55  ;;  %v2973_v8 = vpop.permute.xlu0 %2972  ;;  %v4425_v14 = vmul.f32 %v11071_v4, %v12410_v15 }
 0xc09   : > { %10728 = vmatpush3.bf16.msra.mxu1 %v4776_v5  ;;  %2995 = vst.msk [vmem:[#allocation3 + $0x10] sm:$0xff] %vm2992_vm7, %v2973_v8  ;;  %v2979_v11 = vpop.permute.xlu1 %2978  ;;  %10729 = vmatprep.mubr.msk.bf16.mxu1 %vm11431_vm4, %v11430_v28 }
 0xc0a   : > { %2998 = vst.msk [vmem:[#allocation3 + $0x28] sm:$0xff] %vm2992_vm7, %v2979_v11  ;;  %v4433_v22 = vpack.c.bf16 %v4425_v14, %v4425_v14  ;;  %10736 = vmatpush3.bf16.msra.mxu0 %v10815_v40 }
 0xc0c   : > { %v3898_v42 = vpop.permute.xlu0 %3897 }
 0xc0d   : > { %3922 = vst.msk [vmem:[#allocation3] sm:$0xff] %vm3921_vm8, %v3898_v42  ;;  %v2983_v49 = vpop.permute.xlu1 %2982  ;;  %v9641_v42 = vld [vmem:[%s15362_s29] ss:$0 sm:$0xff] }
 0xc0e   : > { %3000 = vst.msk [vmem:[#allocation3 + $0x38] sm:$0xff] %vm2992_vm7, %v2983_v49 }
 0xc10   : > { %10730 = vmatmul.mubr.msk.bf16.vlgmr.msra.gmra.mrb[132].mxu1 %vm1192_vm5, %v4433_v22  ;;  %v3902_v3 = vpop.permute.xlu0 %3901 }
 0xc11   : > { %3924 = vst.msk [vmem:[#allocation3 + $0x10] sm:$0xff] %vm3921_vm8, %v3902_v3 }
 0xc14   : > { %v2977_v51 = vpop.permute.xlu0 %2976 }
 0xc15   : > { %2997 = vst.msk [vmem:[#allocation3 + $0x20] sm:$0xff] %vm2992_vm7, %v2977_v51 }
 0xc18   : > { %v2981_v28 = vpop.permute.xlu0 %2980 }
 0xc19   : > { %2999 = vst.msk [vmem:[#allocation3 + $0x30] sm:$0xff] %vm2992_vm7, %v2981_v28 }
 0xc93   : > { %v4476_v60 = vpop.f32.mrb[112].mxu0 }
 0xc94   : > { %v10689_v7 = vpop.f32.mrb[113].mxu0  ;;  %4826 = vrot.lane.b32.xlu0 %v4476_v60, %s11445_s27 }
 0xc95   : > { %v4479_v15 = vpop.f32.mrb[114].mxu0  ;;  %v11360_v7 = vld [vmem:[#allocation2] sm:$0xff] }
 0xc96   : > { %v10690_v16 = vpop.f32.mrb[115].mxu0 }
 0xc9b   : > { %v4572_v53 = vpop.f32.mrb[116].mxu0 }
 0xc9c   : > { %v10701_v45 = vpop.f32.mrb[117].mxu0  ;;  %4830 = vrot.lane.b32.xlu0 %v4572_v53, %s11445_s27 }
 0xc9d   : > { %v4575_v57 = vpop.f32.mrb[118].mxu0 }
 0xc9e   : > { %v4524_v34 = vpop.f32.mrb[120].mxu1  ;;  %v10702_v61 = vpop.f32.mrb[119].mxu0  ;;  %v11362_v57 = vld [vmem:[#allocation2 + $0x8] sm:$0xff] }
 0xc9f   : > { %4828 = vrot.lane.b32.xlu1 %v4524_v34, %s11445_s27  ;;  %v10695_v10 = vpop.f32.mrb[121].mxu1 }
 0xca0   : > { %3905 = vrot.lane.b32.xlu0 %v12340_v48, %s11444_s21  ;;  %v4527_v6 = vpop.f32.mrb[122].mxu1  ;;  %v11363_v10 = vld [vmem:[#allocation2 + $0x18] sm:$0xff] }
 0xca1   : > { %v10696_v36 = vpop.f32.mrb[123].mxu1 }
 0xca4   : > { %3909 = vrot.lane.b32.xlu0 %v12346_v2, %s11444_s21 }
 0xca6   : > { %v4620_v1 = vpop.f32.mrb[124].mxu1 }
 0xca7   : > { %4832 = vrot.lane.b32.xlu1 %v4620_v1, %s11445_s27  ;;  %v10707_v17 = vpop.f32.mrb[125].mxu1 }
 0xca8   : > { %v4623_v13 = vpop.f32.mrb[126].mxu1 }
 0xca9   : > { %v10708_v44 = vpop.f32.mrb[127].mxu1 }
 0xcab   : > { %3907 = vrot.lane.b32.xlu1 %v12344_v59, %s11444_s21 }
 0xcaf   : > { %3911 = vrot.lane.b32.xlu1 %v12350_v12, %s11444_s21 }
 0xcd0   : > { %v4668_v48 = vpop.f32.mrb[120].mxu0 }
 0xcd1   : > { %4834 = vrot.lane.b32.xlu0 %v4668_v48, %s11445_s27  ;;  %v10713_v18 = vpop.f32.mrb[121].mxu0 }
 0xcd2   : > { %v4671_v20 = vpop.f32.mrb[122].mxu0 }
 0xcd3   : > { %v10714_v21 = vpop.f32.mrb[123].mxu0 }
 0xcd8   : > { %v4764_v23 = vpop.f32.mrb[124].mxu0 }
 0xcd9   : > { %4838 = vrot.lane.b32.xlu0 %v4764_v23, %s11445_s27  ;;  %v10725_v2 = vpop.f32.mrb[125].mxu0  ;;  %v11364_v23 = vld [vmem:[#allocation2 + $0x20] sm:$0xff] }
 0xcda   : > { %v4767_v24 = vpop.f32.mrb[126].mxu0 }
 0xcdb   : > { %v4716_v9 = vpop.f32.mrb[128].mxu1  ;;  %v10726_v26 = vpop.f32.mrb[127].mxu0 }
 0xcdc   : > { %4836 = vrot.lane.b32.xlu1 %v4716_v9, %s11445_s27  ;;  %v10719_v27 = vpop.f32.mrb[129].mxu1  ;;  %v11365_v9 = vld [vmem:[#allocation2 + $0x30] sm:$0xff] }
 0xcdd   : > { %v4719_v59 = vpop.f32.mrb[130].mxu1  ;;  %v11366_v27 = vld [vmem:[#allocation2 + $0x28] sm:$0xff] }
 0xcde   : > { %v10720_v30 = vpop.f32.mrb[131].mxu1 }
 0xce3   : > { %v4812_v31 = vpop.f32.mrb[132].mxu1 }
 0xce4   : > { %4840 = vrot.lane.b32.xlu1 %v4812_v31, %s11445_s27  ;;  %v10731_v12 = vpop.f32.mrb[133].mxu1  ;;  %v11367_v31 = vld [vmem:[#allocation2 + $0x38] sm:$0xff] }
 0xce5   : > { %v4815_v33 = vpop.f32.mrb[134].mxu1 }
 0xce6   : > { %v10732_v32 = vpop.f32.mrb[135].mxu1 }
 0xd06   : > { %v4827_v37 = vpop.permute.xlu0 %4826 }
 0xd07   : > { %4851 = vst.msk [vmem:[#allocation3] sm:$0xff] %vm4850_vm9, %v4827_v37 }
 0xd0e   : > { %v4831_v38 = vpop.permute.xlu0 %4830  ;;  %v4859_v19 = vld [vmem:[#allocation3] sm:$0xff] }
 0xd0f   : > { %4853 = vst.msk [vmem:[#allocation3 + $0x10] sm:$0xff] %vm4850_vm9, %v4831_v38 }
 0xd11   : > { %v4829_v46 = vpop.permute.xlu1 %4828 }
 0xd12   : > { %4852 = vst.msk [vmem:[#allocation3 + $0x8] sm:$0xff] %vm4850_vm9, %v4829_v46  ;;  %v3906_v47 = vpop.permute.xlu0 %3905 }
 0xd13   : > { %3926 = vst.msk [vmem:[#allocation3 + $0x20] sm:$0xff] %vm3921_vm8, %v3906_v47 }
 0xd16   : > { %v3910_v41 = vpop.permute.xlu0 %3909  ;;  %v4861_v56 = vld [vmem:[#allocation3 + $0x10] sm:$0xff] }
 0xd17   : > { %3928 = vst.msk [vmem:[#allocation3 + $0x30] sm:$0xff] %vm3921_vm8, %v3910_v41 }
 0xd19   : > { %v4833_v0 = vpop.permute.xlu1 %4832  ;;  %v4860_v25 = vld [vmem:[#allocation3 + $0x8] sm:$0xff] }
 0xd1a   : > { %4854 = vst.msk [vmem:[#allocation3 + $0x18] sm:$0xff] %vm4850_vm9, %v4833_v0  ;;  %v4867_v29 = vpack.c.bf16 %v4860_v25, %v4859_v19 }
 0xd1c   : > { %10737 = vmatprep.mubr.msk.bf16.mxu0 %vm1088_vm3, %v4867_v29 }
 0xd1d   : > { %v3908_v43 = vpop.permute.xlu1 %3907 }
 0xd1e   : > { %3927 = vst.msk [vmem:[#allocation3 + $0x28] sm:$0xff] %vm3921_vm8, %v3908_v43 }
 0xd21   : > { %v3912_v50 = vpop.permute.xlu1 %3911  ;;  %v4862_v39 = vld [vmem:[#allocation3 + $0x18] sm:$0xff] }
 0xd22   : > { %3929 = vst.msk [vmem:[#allocation3 + $0x38] sm:$0xff] %vm3921_vm8, %v3912_v50  ;;  %v4868_v58 = vpack.c.bf16 %v4862_v39, %v4861_v56 }
 0xd24   : > { %10738 = vmatmul.mubr.msk.bf16.vlgmr.msra.gmra.mrb[128].mxu0 %vm1088_vm3, %v4868_v58 }
 0xd43   : > { %v4835_v54 = vpop.permute.xlu0 %4834 }
 0xd44   : > { %4855 = vst.msk [vmem:[#allocation3 + $0x20] sm:$0xff] %vm4850_vm9, %v4835_v54 }
 0xd4b   : > { %v4839_v35 = vpop.permute.xlu0 %4838  ;;  %v4863_v55 = vld [vmem:[#allocation3 + $0x20] sm:$0xff] }
 0xd4c   : > { %4857 = vst.msk [vmem:[#allocation3 + $0x30] sm:$0xff] %vm4850_vm9, %v4839_v35 }
 0xd4e   : > { %v4837_v62 = vpop.permute.xlu1 %4836 }
 0xd4f   : > { %4856 = vst.msk [vmem:[#allocation3 + $0x28] sm:$0xff] %vm4850_vm9, %v4837_v62 }
 0xd53   : > { %v4865_v8 = vld [vmem:[#allocation3 + $0x30] sm:$0xff] }
 0xd56   : > { %v4841_v63 = vpop.permute.xlu1 %4840  ;;  %v4864_v4 = vld [vmem:[#allocation3 + $0x28] sm:$0xff] }
 0xd57   : > { %4858 = vst.msk [vmem:[#allocation3 + $0x38] sm:$0xff] %vm4850_vm9, %v4841_v63  ;;  %v4869_v5 = vpack.c.bf16 %v4864_v4, %v4863_v55 }
 0xd59   : > { %10741 = vmatprep.mubr.msk.bf16.mxu0 %vm1088_vm3, %v4869_v5 }
 0xd5e   : > { %v4866_v11 = vld [vmem:[#allocation3 + $0x38] sm:$0xff] }
 0xd5f   : > { %v4870_v14 = vpack.c.bf16 %v4866_v11, %v4865_v8  ;;  %v5118_v8 = vld [vmem:[%s11633_s6] sm:$0xff] }
 0xd60   : > { %v5126_v11 = vld [vmem:[%s11633_s6 + $0x40] sm:$0xff] }
 0xd61   : > { %10742 = vmatmul.mubr.msk.bf16.gmra.mrb[132].mxu0 %vm1088_vm3, %v4870_v14  ;;  %v5119_v14 = vld [vmem:[%s11633_s6 + $0x8] sm:$0xff] }
 0xdf7   : > { %v10739_v49 = vpop.f32.mrb[128].mxu0 }
 0xdf8   : > { %v4940_v22 = vpop.f32.mrb[129].mxu0  ;;  %v4949_v3 = vadd.f32 %v10739_v49, %v9641_v42  ;;  %v5127_v49 = vld [vmem:[%s11633_s6 + $0x48] sm:$0xff] }
 0xdf9   : > { %v4941_v51 = vadd.f32 %v9641_v42, %v4940_v22  ;;  %v10740_v28 = vpop.f32.mrb[130].mxu0  ;;  %v9650_v22 = vcombine.low %v5118_v8, %v5126_v11 }
 0xdfa   : > { %v4943_v60 = vpop.f32.mrb[131].mxu0  ;;  %v4973_v53 = vadd.f32 %v11361_v52, %v4949_v3  ;;  %v4952_v45 = vadd.f32 %v10740_v28, %v9641_v42  ;;  %v9652_v3 = vcombine.low %v5119_v14, %v5127_v49  ;;  %v5134_v28 = vld [vmem:[%s11633_s6 + $0x80] sm:$0xff] }
 0xdfb   : > { %v4971_v15 = vadd.f32 %v11360_v7, %v4941_v51  ;;  %v4944_v16 = vadd.f32 %v9641_v42, %v4943_v60  ;;  %v9653_v51 = vcombine.high %v5119_v14, %v5127_v49  ;;  %v5142_v60 = vld [vmem:[%s11633_s6 + $0xc0] sm:$0xff]  ;;  %v5135_v7 = vld [vmem:[%s11633_s6 + $0x88] sm:$0xff] }
 0xdfc   : > { %v4974_v6 = vadd.f32 %v11363_v10, %v4952_v45  ;;  %v4987_v36 = vsel %vm1088_vm3, %v4973_v53, 0.0  ;;  %v9666_v52 = vcombine.low %v5134_v28, %v5142_v60 }
 0xdfd   : > { %v4972_v34 = vadd.f32 %v11362_v57, %v4944_v16  ;;  %v4981_v61 = vsel %vm1088_vm3, %v4971_v15, 0.0  ;;  %5479 = vmatprep.subr.bf16.mxu0 %v9653_v51  ;;  %v5143_v16 = vld [vmem:[%s11633_s6 + $0xc8] sm:$0xff]  ;;  %v11446_v57 = vmov 0  }
 0xdfe   : > { %4982 = vadd.xlane.f32.xlu0 %v4981_v61  ;;  %v4990_v1 = vsel %vm1088_vm3, %v4974_v6, 0.0  ;;  %5480 = vmatpush1.bf16.msra.mxu0 %v9652_v3  ;;  %v9669_v45 = vcombine.high %v5135_v7, %v5143_v16 }
 0xdff   : > { %v4984_v40 = vsel %vm1088_vm3, %v4972_v34, 0.0  ;;  %5438 = vmatprep.mubr.bf16.mxu1 %v11446_v57  ;;  %5511 = vmatprep.mubr.bf16.mxu0 %v11446_v57 }
 0xe00   : > { %4985 = vadd.xlane.f32.xlu1 %v4984_v40  ;;  %5481 = vmatprep.subr.bf16.mxu0 %v9669_v45  ;;  %v5145_v45 = vld [vmem:[%s11633_s6 + $0xd8] sm:$0xff] }
 0xe02   : > { %4988 = vadd.xlane.f32.xlu0 %v4987_v36 }
 0xe06   : > { %4991 = vadd.xlane.f32.xlu0 %v4990_v1 }
 0xe34   : > { %v10743_v17 = vpop.f32.mrb[132].mxu0 }
 0xe35   : > { %v4965_v13 = vadd.f32 %v10743_v17, %v9641_v42  ;;  %v4956_v44 = vpop.f32.mrb[133].mxu0 }
 0xe36   : > { %v4957_v48 = vadd.f32 %v9641_v42, %v4956_v44  ;;  %v10744_v18 = vpop.f32.mrb[134].mxu0 }
 0xe37   : > { %v4968_v20 = vadd.f32 %v10744_v18, %v9641_v42  ;;  %v4959_v21 = vpop.f32.mrb[135].mxu0  ;;  %v12529_v26 = vadd.f32 %v11365_v9, %v4965_v13 }
 0xe38   : > { %v12527_v2 = vadd.f32 %v11364_v23, %v4957_v48  ;;  %v4960_v24 = vadd.f32 %v9641_v42, %v4959_v21  ;;  %v9651_v42 = vcombine.high %v5118_v8, %v5126_v11 }
 0xe39   : > { %v12535_v12 = vadd.f32 %v11367_v31, %v4968_v20  ;;  %v4999_v32 = vsel %vm1088_vm3, %v12529_v26, 0.0  ;;  %v5121_v31 = vld [vmem:[%s11633_s6 + $0x18] sm:$0xff] }
 0xe3a   : > { %v12531_v59 = vadd.f32 %v11366_v27, %v4960_v24  ;;  %v4993_v30 = vsel %vm1088_vm3, %v12527_v2, 0.0  ;;  %5406 = vmatprep.subr.bf16.mxu1 %v9651_v42  ;;  %v12622_v42 = vld [vmem:[%s15363_s0] ss:$0 sm:$0xff] }
 0xe3b   : > { %4994 = vadd.xlane.f32.xlu1 %v4993_v30  ;;  %v5002_v37 = vsel %vm1088_vm3, %v12535_v12, 0.0  ;;  %5407 = vmatpush1.bf16.msra.mxu1 %v9650_v22  ;;  %v5128_v30 = vld [vmem:[%s11633_s6 + $0x50] sm:$0xff] }
 0xe3c   : > { %v4996_v33 = vsel %vm1088_vm3, %v12531_v59, 0.0 }
 0xe3d   : > { %4997 = vadd.xlane.f32.xlu0 %v4996_v33 }
 0xe3f   : > { %5000 = vadd.xlane.f32.xlu1 %v4999_v32  ;;  %v5129_v32 = vld [vmem:[%s11633_s6 + $0x58] sm:$0xff] }
 0xe41   : > { %5003 = vadd.xlane.f32.xlu0 %v5002_v37  ;;  %v9657_v37 = vcombine.high %v5121_v31, %v5129_v32 }
 0xe8b   : > { %v4983_v38 = vpop.xlane.xlu0 %4982 }
 0xe8c   : > { %v5006_v46 = vmul.f32 0.03125, %v4983_v38  ;;  %v12602_v38 = vld [vmem:[%s11633_s6 + $0x20] sm:$0xff] }
 0xe8d   : > { %v4986_v47 = vpop.xlane.xlu1 %4985 }
 0xe8e   : > { %v12543_v41 = vsub.f32 %v4971_v15, %v5006_v46  ;;  %v5007_v0 = vmul.f32 0.03125, %v4986_v47  ;;  %v9667_v15 = vcombine.high %v5134_v28, %v5142_v60  ;;  %v12605_v46 = vld [vmem:[%s11633_s6 + $0x60] sm:$0xff] }
 0xe8f   : > { %v4989_v19 = vpop.xlane.xlu0 %4988  ;;  %v9658_v47 = vcombine.low %v12602_v38, %v12605_v46  ;;  %v12632_v60 = vld [vmem:[%s15364_s24] ss:$0 sm:$0xff] }
 0xe90   : > { %v12545_v25 = vsub.f32 %v4972_v34, %v5007_v0  ;;  %v5008_v29 = vmul.f32 0.03125, %v4989_v19  ;;  %v5022_v43 = vmul.f32 %v12543_v41, %v12543_v41  ;;  %5408 = vmatprep.subr.bf16.mxu1 %v9667_v15  ;;  %v12610_v0 = vld [vmem:[%s11633_s6 + $0x28] sm:$0xff]  ;;  %v5136_v15 = vld [vmem:[%s11633_s6 + $0x90] sm:$0xff] }
 0xe91   : > { %5409 = vmatpush1.bf16.msra.mxu1 %v9666_v52  ;;  %v12613_v19 = vld [vmem:[%s11633_s6 + $0x68] sm:$0xff] }
 0xe92   : > { %v12549_v50 = vsub.f32 %v4973_v53, %v5008_v29  ;;  %v5030_v56 = vsel %vm1088_vm3, %v5022_v43, 0.0  ;;  %v5023_v39 = vmul.f32 %v12545_v25, %v12545_v25  ;;  %v9668_v53 = vcombine.low %v5135_v7, %v5143_v16 }
 0xe93   : > { %5031 = vadd.xlane.f32.xlu1 %v5030_v56  ;;  %v4992_v58 = vpop.xlane.xlu0 %4991  ;;  %v9660_v29 = vcombine.low %v12610_v0, %v12613_v19 }
 0xe94   : > { %v5009_v54 = vmul.f32 0.03125, %v4992_v58  ;;  %v5033_v35 = vsel %vm1088_vm3, %v5023_v39, 0.0  ;;  %v5024_v62 = vmul.f32 %v12549_v50, %v12549_v50  ;;  %5482 = vmatpush1.bf16.msra.mxu0 %v9668_v53  ;;  %v5144_v53 = vld [vmem:[%s11633_s6 + $0xd0] sm:$0xff] }
 0xe95   : > { %5034 = vadd.xlane.f32.xlu0 %v5033_v35  ;;  %5625 = vmatprep.subr.bf16.mxu0 %v9657_v37 }
 0xe96   : > { %v12557_v63 = vsub.f32 %v4974_v6, %v5009_v54  ;;  %v5036_v55 = vsel %vm1088_vm3, %v5024_v62, 0.0 }
 0xe97   : > { %5037 = vadd.xlane.f32.xlu1 %v5036_v55 }
 0xe98   : > { %v5025_v4 = vmul.f32 %v12557_v63, %v12557_v63 }
 0xe9a   : > { %v5039_v5 = vsel %vm1088_vm3, %v5025_v4, 0.0 }
 0xe9b   : > { %5040 = vadd.xlane.f32.xlu0 %v5039_v5 }
 0xec8   : > { %v4995_v34 = vpop.xlane.xlu1 %4994 }
 0xec9   : > { %v5010_v61 = vmul.f32 0.03125, %v4995_v34 }
 0xeca   : > { %v4998_v40 = vpop.xlane.xlu0 %4997 }
 0xecb   : > { %v12574_v10 = vsub.f32 %v12527_v2, %v5010_v61  ;;  %v5011_v6 = vmul.f32 0.03125, %v4998_v40 }
 0xecc   : > { %v5001_v36 = vpop.xlane.xlu1 %5000 }
 0xecd   : > { %v12577_v1 = vsub.f32 %v12531_v59, %v5011_v6  ;;  %v5012_v17 = vmul.f32 0.03125, %v5001_v36  ;;  %v5026_v13 = vmul.f32 %v12574_v10, %v12574_v10  ;;  %v5120_v59 = vld [vmem:[%s11633_s6 + $0x10] sm:$0xff]  ;;  %v9656_v6 = vcombine.low %v5121_v31, %v5129_v32 }
 0xece   : > { %v5004_v44 = vpop.xlane.xlu0 %5003  ;;  %v9655_v33 = vcombine.high %v5120_v59, %v5128_v30  ;;  %v9671_v36 = vcombine.high %v5136_v15, %v5144_v53 }
 0xecf   : > { %v12582_v48 = vsub.f32 %v12529_v26, %v5012_v17  ;;  %v5013_v18 = vmul.f32 0.03125, %v5004_v44  ;;  %v5042_v20 = vsel %vm1088_vm3, %v5026_v13, 0.0  ;;  %v5027_v21 = vmul.f32 %v12577_v1, %v12577_v1 }
 0xed0   : > { %5043 = vadd.xlane.f32.xlu1 %v5042_v20  ;;  %5552 = vmatprep.subr.bf16.mxu1 %v9655_v33  ;;  %v9659_v20 = vcombine.high %v12602_v38, %v12605_v46  ;;  %v5140_v38 = vld [vmem:[%s11633_s6 + $0xb0] sm:$0xff] }
 0xed1   : > { %v12588_v23 = vsub.f32 %v12535_v12, %v5013_v18  ;;  %v5045_v2 = vsel %vm1088_vm3, %v5027_v21, 0.0  ;;  %v5028_v24 = vmul.f32 %v12582_v48, %v12582_v48  ;;  %v9654_v12 = vcombine.low %v5120_v59, %v5128_v30  ;;  %v5148_v46 = vld [vmem:[%s11633_s6 + $0xf0] sm:$0xff] }
 0xed2   : > { %5046 = vadd.xlane.f32.xlu0 %v5045_v2  ;;  %v9661_v21 = vcombine.high %v12610_v0, %v12613_v19  ;;  %v5149_v0 = vld [vmem:[%s11633_s6 + $0xf8] sm:$0xff] }
 0xed3   : > { %v5048_v9 = vsel %vm1088_vm3, %v5028_v24, 0.0  ;;  %v5029_v26 = vmul.f32 %v12588_v23, %v12588_v23 }
 0xed4   : > { %5049 = vadd.xlane.f32.xlu1 %v5048_v9 }
 0xed5   : > { %v5051_v27 = vsel %vm1088_vm3, %v5029_v26, 0.0 }
 0xed6   : > { %5052 = vadd.xlane.f32.xlu0 %v5051_v27 }
 0xf20   : > { %v5032_v43 = vpop.xlane.xlu1 %5031 }
 0xf21   : > { %v5054_v56 = vmul.f32 0.03125, %v5032_v43 }
 0xf22   : > { %v5035_v39 = vpop.xlane.xlu0 %5034 }
 0xf23   : > { %v5062_v58 = vadd.f32 1e-05, %v5054_v56  ;;  %v5055_v54 = vmul.f32 0.03125, %v5035_v39 }
 0xf24   : > { %v5038_v35 = vpop.xlane.xlu1 %5037 }
 0xf25   : > { %11072 = vrsqrt.f32 %v5062_v58  ;;  %v5063_v62 = vadd.f32 1e-05, %v5055_v54  ;;  %v5056_v55 = vmul.f32 0.03125, %v5038_v35 }
 0xf27   : > { %11074 = vrsqrt.f32 %v5063_v62  ;;  %v5064_v4 = vadd.f32 1e-05, %v5056_v55 }
 0xf28   : > { %v5041_v5 = vpop.xlane.xlu0 %5040 }
 0xf29   : > { %11076 = vrsqrt.f32 %v5064_v4  ;;  %v5057_v8 = vmul.f32 0.03125, %v5041_v5 }
 0xf2b   : > { %v5065_v11 = vadd.f32 1e-05, %v5057_v8 }
 0xf2d   : > { %11078 = vrsqrt.f32 %v5065_v11 }
 0xf2f   : > { %v11073_v14 = vpop.eup %11072 }
 0xf30   : > { %v5078_v49 = vmul.f32 %v11073_v14, %v12543_v41 }
 0xf31   : > { %v11075_v22 = vpop.eup %11074 }
 0xf32   : > { %v5092_v3 = vmul.f32 %v12622_v42, %v5078_v49  ;;  %v5079_v51 = vmul.f32 %v11075_v22, %v12545_v25  ;;  %v5137_v25 = vld [vmem:[%s11633_s6 + $0x98] sm:$0xff] }
 0xf33   : > { %v11077_v28 = vpop.eup %11076  ;;  %v9673_v17 = vcombine.high %v5137_v25, %v5145_v45  ;;  %v9672_v18 = vcombine.low %v5137_v25, %v5145_v45  ;;  %v5125_v25 = vld [vmem:[%s11633_s6 + $0x38] sm:$0xff] }
 0xf34   : > { %v5093_v7 = vmul.f32 %v12622_v42, %v5079_v51  ;;  %v12637_v16 = vadd.f32 %v12632_v60, %v5092_v3  ;;  %v5080_v52 = vmul.f32 %v11077_v28, %v12549_v50  ;;  %v5138_v3 = vld [vmem:[%s11633_s6 + $0xa0] sm:$0xff]  ;;  %v5139_v28 = vld [vmem:[%s11633_s6 + $0xa8] sm:$0xff]  ;;  %v5133_v45 = vld [vmem:[%s11633_s6 + $0x78] sm:$0xff] }
 0xf35   : > { %v5146_v51 = vld [vmem:[%s11633_s6 + $0xe0] sm:$0xff] }
 0xf36   : > { %15365 = vst [vmem:[#allocation12_spill] sm:$0xff] %v12637_v16  ;;  %v12640_v41 = vadd.f32 %v12632_v60, %v5093_v7  ;;  %v5094_v13 = vmul.f32 %v12622_v42, %v5080_v52  ;;  %v5147_v7 = vld [vmem:[%s11633_s6 + $0xe8] sm:$0xff] }
 0xf37   : > { %v11079_v34 = vpop.eup %11078  ;;  %v9677_v52 = vcombine.high %v5139_v28, %v5147_v7 }
 0xf38   : > { %15366 = vst [vmem:[#allocation13_spill] sm:$0xff] %v12640_v41  ;;  %v12648_v61 = vpack.c.bf16 %v12640_v41, %v12637_v16  ;;  %v5081_v40 = vmul.f32 %v11079_v34, %v12557_v63  ;;  %v9670_v63 = vcombine.low %v5136_v15, %v5144_v53  ;;  %v12667_v2 = vadd.f32 %v12632_v60, %v5094_v13  ;;  %v5132_v53 = vld [vmem:[%s11633_s6 + $0x70] sm:$0xff] }
 0xf39   : > { %v9675_v15 = vcombine.high %v5138_v3, %v5146_v51  ;;  %v9674_v34 = vcombine.low %v5138_v3, %v5146_v51  ;;  %v10847_v3 = vld [vmem:[%s11648_s18 + $0xb8] sm:$0xff]   ;;  %v10848_v51 = vld [vmem:[%s11648_s18 + $0x140] sm:$0xff]  }
 0xf3a   : > { %v5095_v44 = vmul.f32 %v12622_v42, %v5081_v40  ;;  %9682 = vmatmul.mubr.msk.bf16.vlgmr.msra.gmra.mrb[136].mxu1 %vm1088_vm3, %v12648_v61  ;;  %9686 = vmatmul.mubr.msk.bf16.vlgmr.msra.gmra.mrb[136].mxu0 %vm1088_vm3, %v12648_v61  ;;  %15368 = vst [vmem:[#allocation15_spill] sm:$0xff] %v12667_v2  ;;  %v9676_v40 = vcombine.low %v5139_v28, %v5147_v7  ;;  %v10849_v28 = vld [vmem:[%s11648_s18 + $0x1c0] sm:$0xff]   ;;  %v15201_v7 = vlaneseq }
 0xf3b   : > { %5448 = vmatprep.mubr.bf16.mxu1 %v11446_v57  ;;  %5521 = vmatprep.mubr.bf16.mxu0 %v11446_v57 }
 0xf3c   : > { %v12660_v50 = vadd.f32 %v12632_v60, %v5095_v44  ;;  %5553 = vmatpush1.bf16.msra.mxu1 %v9654_v12  ;;  %5626 = vmatpush1.bf16.msra.mxu0 %v9656_v6  ;;  %v9678_v44 = vcombine.low %v5140_v38, %v5148_v46 }
 0xf3d   : > { %5554 = vmatprep.subr.bf16.mxu1 %v9671_v36  ;;  %5627 = vmatprep.subr.bf16.mxu0 %v9673_v17  ;;  %v9665_v36 = vcombine.high %v5125_v25, %v5133_v45  ;;  %v9679_v17 = vcombine.high %v5140_v38, %v5148_v46 }
 0xf3e   : > { %15367 = vst [vmem:[#allocation14_spill] sm:$0xff] %v12660_v50  ;;  %v12671_v24 = vpack.c.bf16 %v12660_v50, %v12667_v2 }
 0xf40   : > { %5555 = vmatpush1.bf16.msra.mxu1 %v9670_v63  ;;  %5628 = vmatpush1.bf16.msra.mxu0 %v9672_v18  ;;  %v10816_v18 = vld [vmem:[%s11648_s18 + $0x40] sm:$0xff]  }
 0xf41   : > { %5698 = vmatprep.subr.bf16.mxu1 %v9659_v20  ;;  %5771 = vmatprep.subr.bf16.mxu0 %v9661_v21  ;;  %v10817_v20 = vld [vmem:[%s11648_s18 + $0xc0] sm:$0xff]  }
 0xf42   : > { %9683 = vmatmul.mubr.msk.bf16.gmra.mrb[140].mxu1 %vm1088_vm3, %v12671_v24  ;;  %9687 = vmatmul.mubr.msk.bf16.gmra.mrb[140].mxu0 %vm1088_vm3, %v12671_v24  ;;  %v10818_v21 = vld [vmem:[%s11648_s18] sm:$0xff]  }
 0xf43   : > { %5458 = vmatprep.mubr.bf16.mxu1 %v11446_v57  ;;  %5531 = vmatprep.mubr.bf16.mxu0 %v11446_v57 }
 0xf5d   : > { %v5044_v9 = vpop.xlane.xlu1 %5043 }
 0xf5e   : > { %v5058_v26 = vmul.f32 0.03125, %v5044_v9  ;;  %v10819_v9 = vld [vmem:[%s11648_s18 + $0x80] sm:$0xff]  }
 0xf5f   : > { %v5047_v27 = vpop.xlane.xlu0 %5046 }
 0xf60   : > { %v5066_v59 = vadd.f32 1e-05, %v5058_v26  ;;  %v5059_v30 = vmul.f32 0.03125, %v5047_v27  ;;  %v10820_v26 = vld [vmem:[%s11648_s18 + $0x48] sm:$0xff]  }
 0xf61   : > { %v5050_v31 = vpop.xlane.xlu1 %5049  ;;  %v10821_v27 = vld [vmem:[%s11648_s18 + $0xc8] sm:$0xff]  }
 0xf62   : > { %11080 = vrsqrt.f32 %v5066_v59  ;;  %v5067_v12 = vadd.f32 1e-05, %v5059_v30  ;;  %v5060_v33 = vmul.f32 0.03125, %v5050_v31  ;;  %v10822_v59 = vld [vmem:[%s11648_s18 + $0x8] sm:$0xff]   ;;  %v10824_v31 = vld [vmem:[%s11648_s18 + $0x50] sm:$0xff]  }
 0xf63   : > { %v5053_v32 = vpop.xlane.xlu0 %5052  ;;  %v10823_v30 = vld [vmem:[%s11648_s18 + $0x88] sm:$0xff]  }
 0xf64   : > { %11082 = vrsqrt.f32 %v5067_v12  ;;  %v5068_v37 = vadd.f32 1e-05, %v5060_v33  ;;  %v5061_v43 = vmul.f32 0.03125, %v5053_v32  ;;  %v10825_v12 = vld [vmem:[%s11648_s18 + $0xd0] sm:$0xff]   ;;  %v10828_v32 = vld [vmem:[%s11648_s18 + $0x58] sm:$0xff]  }
 0xf65   : > { %v10826_v33 = vld [vmem:[%s11648_s18 + $0x10] sm:$0xff]  }
 0xf66   : > { %11084 = vrsqrt.f32 %v5068_v37  ;;  %v5069_v56 = vadd.f32 1e-05, %v5061_v43  ;;  %v10829_v37 = vld [vmem:[%s11648_s18 + $0xd8] sm:$0xff]  }
 0xf67   : > { %v10830_v43 = vld [vmem:[%s11648_s18 + $0x18] sm:$0xff]  }
 0xf68   : > { %11086 = vrsqrt.f32 %v5069_v56  ;;  %v10831_v56 = vld [vmem:[%s11648_s18 + $0x98] sm:$0xff]  }
 0xf6c   : > { %v11081_v39 = vpop.eup %11080 }
 0xf6d   : > { %v5082_v58 = vmul.f32 %v11081_v39, %v12574_v10  ;;  %v10832_v39 = vld [vmem:[%s11648_s18 + $0x60] sm:$0xff]  }
 0xf6e   : > { %v11083_v54 = vpop.eup %11082 }
 0xf6f   : > { %v5096_v35 = vmul.f32 %v12622_v42, %v5082_v58  ;;  %v5083_v62 = vmul.f32 %v11083_v54, %v12577_v1  ;;  %v10833_v58 = vld [vmem:[%s11648_s18 + $0xe0] sm:$0xff]  }
 0xf70   : > { %v11085_v55 = vpop.eup %11084  ;;  %v10834_v54 = vld [vmem:[%s11648_s18 + $0x20] sm:$0xff]  }
 0xf71   : > { %v5097_v4 = vmul.f32 %v12622_v42, %v5083_v62  ;;  %v12684_v8 = vadd.f32 %v12632_v60, %v5096_v35  ;;  %v5084_v14 = vmul.f32 %v11085_v55, %v12582_v48  ;;  %v10836_v35 = vld [vmem:[%s11648_s18 + $0x68] sm:$0xff]  }
 0xf72   : > { %v11087_v5 = vpop.eup %11086  ;;  %v10837_v62 = vld [vmem:[%s11648_s18 + $0xe8] sm:$0xff]  }
 0xf73   : > { %15369 = vst [vmem:[#allocation16_spill] sm:$0xff] %v12684_v8  ;;  %v12687_v11 = vadd.f32 %v12632_v60, %v5097_v4  ;;  %v5085_v10 = vmul.f32 %v11087_v5, %v12588_v23  ;;  %v5098_v22 = vmul.f32 %v12622_v42, %v5084_v14  ;;  %v10838_v55 = vld [vmem:[%s11648_s18 + $0x28] sm:$0xff]   ;;  %v10840_v5 = vld [vmem:[%s11648_s18 + $0x70] sm:$0xff]  }
 0xf74   : > { %v10839_v4 = vld [vmem:[%s11648_s18 + $0xa8] sm:$0xff]   ;;  %v10841_v14 = vld [vmem:[%s11648_s18 + $0xf0] sm:$0xff]  }
 0xf75   : > { %15370 = vst [vmem:[#allocation17_spill] sm:$0xff] %v12687_v11  ;;  %v12693_v49 = vpack.c.bf16 %v12687_v11, %v12684_v8  ;;  %v5099_v1 = vmul.f32 %v12622_v42, %v5085_v10  ;;  %v12707_v23 = vadd.f32 %v12632_v60, %v5098_v22  ;;  %v10842_v10 = vld [vmem:[%s11648_s18 + $0x30] sm:$0xff]   ;;  %v10846_v22 = vld [vmem:[%s11648_s18 + $0x38] sm:$0xff]  }
 0xf77   : > { %9684 = vmatmul.mubr.msk.bf16.gmra.mrb[144].mxu1 %vm1088_vm3, %v12693_v49  ;;  %9688 = vmatmul.mubr.msk.bf16.gmra.mrb[144].mxu0 %vm1088_vm3, %v12693_v49  ;;  %v12704_v48 = vadd.f32 %v12632_v60, %v5099_v1  ;;  %15372 = vst [vmem:[#allocation19_spill] sm:$0xff] %v12707_v23  ;;  %v5124_v60 = vld [vmem:[%s11633_s6 + $0x30] sm:$0xff]  ;;  %v10845_v1 = vld [vmem:[%s11648_s18 + $0xf8] sm:$0xff]  }
 0xf78   : > { %5468 = vmatprep.mubr.bf16.mxu1 %v11446_v57  ;;  %5541 = vmatprep.mubr.bf16.mxu0 %v11446_v57  ;;  %v9663_v6 = vcombine.high %v5124_v60, %v5132_v53  ;;  %v9662_v19 = vcombine.low %v5124_v60, %v5132_v53  ;;  %v12842_v60 = vshrl.u32 %v15201_v7, 7 }
 0xf79   : > { %15371 = vst [vmem:[#allocation18_spill] sm:$0xff] %v12704_v48  ;;  %v12711_v42 = vpack.c.bf16 %v12704_v48, %v12707_v23 }
 0xf7a   : > { %15373 = vst [vmem:[#allocation20_spill] sm:$0xff] %v12842_v60  ;;  %v12854_v53 = vsub.s32 1, %v12842_v60 }
 0xf7c   : > { %15376 = vst [vmem:[#allocation23_spill] sm:$0xff] %v12854_v53 }
 0xf7f   : > { %9685 = vmatmul.mubr.msk.bf16.gmra.mrb[148].mxu1 %vm1088_vm3, %v12711_v42  ;;  %9689 = vmatmul.mubr.msk.bf16.gmra.mrb[148].mxu0 %vm1088_vm3, %v12711_v42 }
 0xf80   : > { %5584 = vmatprep.mubr.bf16.mxu1 %v11446_v57  ;;  %5657 = vmatprep.mubr.bf16.mxu0 %v11446_v57 }
 0xf87   : > { %9690 = vmatmul.mubr.msk.bf16.vlgmr.msra.gmra.mrb[152].mxu1 %vm1088_vm3, %v12648_v61  ;;  %9694 = vmatmul.mubr.msk.bf16.vlgmr.msra.gmra.mrb[152].mxu0 %vm1088_vm3, %v12648_v61 }
 0xf88   : > { %5699 = vmatpush1.bf16.msra.mxu1 %v9658_v47  ;;  %5772 = vmatpush1.bf16.msra.mxu0 %v9660_v29  ;;  %v5141_v47 = vld [vmem:[%s11633_s6 + $0xb8] sm:$0xff]  ;;  %v9664_v29 = vcombine.low %v5125_v25, %v5133_v45 }
 0xf89   : > { %5594 = vmatprep.mubr.bf16.mxu1 %v11446_v57  ;;  %5667 = vmatprep.mubr.bf16.mxu0 %v11446_v57  ;;  %v9681_v13 = vcombine.high %v5141_v47, %v5149_v0  ;;  %v9680_v63 = vcombine.low %v5141_v47, %v5149_v0 }
 0xf8a   : > { %5700 = vmatprep.subr.bf16.mxu1 %v9675_v15  ;;  %5773 = vmatprep.subr.bf16.mxu0 %v9677_v52  ;;  %v12845_v15 = vsub.s32 0, %v12842_v60  ;;  %v12851_v52 = vld [vmem:[%s11638_s7] sm:$0xff] }
 0xf8c   : > { %5701 = vmatpush1.bf16.msra.mxu1 %v9674_v34  ;;  %5774 = vmatpush1.bf16.msra.mxu0 %v9676_v40  ;;  %15374 = vst [vmem:[#allocation21_spill] sm:$0xff] %v12845_v15  ;;  %v12858_v25 = vrot.slane %v12851_v52, %v12845_v15  ;;  %v12865_v34 = vsub.s32 3, %v12842_v60 }
 0xf8d   : > { %5844 = vmatprep.subr.bf16.mxu1 %v9663_v6  ;;  %5917 = vmatprep.subr.bf16.mxu0 %v9665_v36  ;;  %v12869_v36 = vrot.slane %v12851_v52, %v12854_v53 }
 0xf8e   : > { %15377 = vst [vmem:[#allocation24_spill] sm:$0xff] %v12865_v34 }
 0xf8f   : > { %9691 = vmatmul.mubr.msk.bf16.gmra.mrb[156].mxu1 %vm1088_vm3, %v12671_v24  ;;  %9695 = vmatmul.mubr.msk.bf16.gmra.mrb[156].mxu0 %vm1088_vm3, %v12671_v24 }
 0xf90   : > { %5604 = vmatprep.mubr.bf16.mxu1 %v11446_v57  ;;  %5677 = vmatprep.mubr.bf16.mxu0 %v11446_v57 }
 0xf97   : > { %9692 = vmatmul.mubr.msk.bf16.gmra.mrb[160].mxu1 %vm1088_vm3, %v12693_v49  ;;  %9696 = vmatmul.mubr.msk.bf16.gmra.mrb[160].mxu0 %vm1088_vm3, %v12693_v49 }
 0xf98   : > { %5614 = vmatprep.mubr.bf16.mxu1 %v11446_v57  ;;  %5687 = vmatprep.mubr.bf16.mxu0 %v11446_v57 }
 0xf9f   : > { %9693 = vmatmul.mubr.msk.bf16.gmra.mrb[164].mxu1 %vm1088_vm3, %v12711_v42  ;;  %9697 = vmatmul.mubr.msk.bf16.gmra.mrb[164].mxu0 %vm1088_vm3, %v12711_v42 }
 0xfa0   : > { %5730 = vmatprep.mubr.bf16.mxu1 %v11446_v57  ;;  %5803 = vmatprep.mubr.bf16.mxu0 %v11446_v57 }
 0xfa7   : > { %9698 = vmatmul.mubr.msk.bf16.vlgmr.msra.gmra.mrb[168].mxu1 %vm1088_vm3, %v12648_v61  ;;  %9702 = vmatmul.mubr.msk.bf16.vlgmr.msra.gmra.mrb[168].mxu0 %vm1088_vm3, %v12648_v61 }
 0xfa8   : > { %5845 = vmatpush1.bf16.msra.mxu1 %v9662_v19  ;;  %5918 = vmatpush1.bf16.msra.mxu0 %v9664_v29  ;;  %v12875_v19 = vrot.slane %v12851_v52, %v12865_v34 }
 0xfa9   : > { %5740 = vmatprep.mubr.bf16.mxu1 %v11446_v57  ;;  %5813 = vmatprep.mubr.bf16.mxu0 %v11446_v57 }
 0xfaa   : > { %5846 = vmatprep.subr.bf16.mxu1 %v9679_v17  ;;  %5919 = vmatprep.subr.bf16.mxu0 %v9681_v13 }
 0xfac   : > { %5847 = vmatpush1.bf16.msra.mxu1 %v9678_v44  ;;  %5920 = vmatpush1.bf16.msra.mxu0 %v9680_v63 }
 0xfad   : > { %10007 = vmatprep.subr.bf16.mxu1 %v10816_v18  ;;  %10047 = vmatprep.subr.bf16.mxu0 %v10817_v20 }
 0xfaf   : > { %9699 = vmatmul.mubr.msk.bf16.gmra.mrb[172].mxu1 %vm1088_vm3, %v12671_v24  ;;  %9703 = vmatmul.mubr.msk.bf16.gmra.mrb[172].mxu0 %vm1088_vm3, %v12671_v24 }
 0xfb0   : > { %5750 = vmatprep.mubr.bf16.mxu1 %v11446_v57  ;;  %5823 = vmatprep.mubr.bf16.mxu0 %v11446_v57 }
 0xfb7   : > { %9700 = vmatmul.mubr.msk.bf16.gmra.mrb[176].mxu1 %vm1088_vm3, %v12693_v49  ;;  %9704 = vmatmul.mubr.msk.bf16.gmra.mrb[176].mxu0 %vm1088_vm3, %v12693_v49 }
 0xfb8   : > { %5760 = vmatprep.mubr.bf16.mxu1 %v11446_v57  ;;  %5833 = vmatprep.mubr.bf16.mxu0 %v11446_v57 }
 0xfbf   : > { %9701 = vmatmul.mubr.msk.bf16.gmra.mrb[180].mxu1 %vm1088_vm3, %v12711_v42  ;;  %9705 = vmatmul.mubr.msk.bf16.gmra.mrb[180].mxu0 %vm1088_vm3, %v12711_v42 }
 0xfc0   : > { %5876 = vmatprep.mubr.bf16.mxu1 %v11446_v57  ;;  %5949 = vmatprep.mubr.bf16.mxu0 %v11446_v57 }
 0xfc7   : > { %9706 = vmatmul.mubr.msk.bf16.vlgmr.msra.gmra.mrb[184].mxu1 %vm1088_vm3, %v12648_v61  ;;  %9710 = vmatmul.mubr.msk.bf16.vlgmr.msra.gmra.mrb[184].mxu0 %vm1088_vm3, %v12648_v61  ;;  %v10827_v61 = vld [vmem:[%s11648_s18 + $0x90] sm:$0xff]  }
 0xfc8   : > { %5886 = vmatprep.mubr.bf16.mxu1 %v11446_v57  ;;  %5959 = vmatprep.mubr.bf16.mxu0 %v11446_v57 }
 0xfc9   : > { %10008 = vmatpush3.bf16.msra.mxu1 %v10818_v21  ;;  %10048 = vmatpush3.bf16.msra.mxu0 %v10819_v9 }
 0xfca   : > { %10009 = vmatprep.subr.bf16.mxu1 %v10820_v26  ;;  %10049 = vmatprep.subr.bf16.mxu0 %v10821_v27 }
 0xfcd   : > { %10010 = vmatpush3.bf16.msra.mxu1 %v10822_v59  ;;  %10050 = vmatpush3.bf16.msra.mxu0 %v10823_v30 }
 0xfce   : > { %10011 = vmatprep.subr.bf16.mxu1 %v10824_v31  ;;  %10051 = vmatprep.subr.bf16.mxu0 %v10825_v12 }
 0xfcf   : > { %9707 = vmatmul.mubr.msk.bf16.gmra.mrb[188].mxu1 %vm1088_vm3, %v12671_v24  ;;  %9711 = vmatmul.mubr.msk.bf16.gmra.mrb[188].mxu0 %vm1088_vm3, %v12671_v24  ;;  %v10835_v24 = vld [vmem:[%s11648_s18 + $0xa0] sm:$0xff]  }
 0xfd0   : > { %5896 = vmatprep.mubr.bf16.mxu1 %v11446_v57  ;;  %5969 = vmatprep.mubr.bf16.mxu0 %v11446_v57 }
 0xfd1   : > { %10012 = vmatpush3.bf16.msra.mxu1 %v10826_v33  ;;  %10052 = vmatpush3.bf16.msra.mxu0 %v10827_v61 }
 0xfd2   : > { %10013 = vmatprep.subr.bf16.mxu1 %v10828_v32  ;;  %10053 = vmatprep.subr.bf16.mxu0 %v10829_v37 }
 0xfd5   : > { %10014 = vmatpush3.bf16.msra.mxu1 %v10830_v43  ;;  %10054 = vmatpush3.bf16.msra.mxu0 %v10831_v56 }
 0xfd6   : > { %10015 = vmatprep.subr.bf16.mxu1 %v10832_v39  ;;  %10055 = vmatprep.subr.bf16.mxu0 %v10833_v58 }
 0xfd7   : > { %9708 = vmatmul.mubr.msk.bf16.gmra.mrb[192].mxu1 %vm1088_vm3, %v12693_v49  ;;  %9712 = vmatmul.mubr.msk.bf16.gmra.mrb[192].mxu0 %vm1088_vm3, %v12693_v49  ;;  %v10843_v49 = vld [vmem:[%s11648_s18 + $0xb0] sm:$0xff]  }
 0xfd8   : > { %5906 = vmatprep.mubr.bf16.mxu1 %v11446_v57  ;;  %5979 = vmatprep.mubr.bf16.mxu0 %v11446_v57  ;;  %v10844_v57 = vld [vmem:[%s11648_s18 + $0x78] sm:$0xff]  }
 0xfd9   : > { %10016 = vmatpush3.bf16.msra.mxu1 %v10834_v54  ;;  %10056 = vmatpush3.bf16.msra.mxu0 %v10835_v24 }
 0xfda   : > { %10017 = vmatprep.subr.bf16.mxu1 %v10836_v35  ;;  %10057 = vmatprep.subr.bf16.mxu0 %v10837_v62 }
 0xfdd   : > { %10018 = vmatpush3.bf16.msra.mxu1 %v10838_v55  ;;  %10058 = vmatpush3.bf16.msra.mxu0 %v10839_v4 }
 0xfde   : > { %10019 = vmatprep.subr.bf16.mxu1 %v10840_v5  ;;  %10059 = vmatprep.subr.bf16.mxu0 %v10841_v14 }
 0xfdf   : > { %9709 = vmatmul.mubr.msk.bf16.gmra.mrb[196].mxu1 %vm1088_vm3, %v12711_v42  ;;  %9713 = vmatmul.mubr.msk.bf16.gmra.mrb[196].mxu0 %vm1088_vm3, %v12711_v42  ;;  %v12848_v42 = vsub.s32 2, %v12842_v60 }
 0xfe1   : > { %10020 = vmatpush3.bf16.msra.mxu1 %v10842_v10  ;;  %10060 = vmatpush3.bf16.msra.mxu0 %v10843_v49  ;;  %15375 = vst [vmem:[#allocation22_spill] sm:$0xff] %v12848_v42  ;;  %v12862_v45 = vrot.slane %v12851_v52, %v12848_v42 }
 0xfe2   : > { %10021 = vmatprep.subr.bf16.mxu1 %v10844_v57  ;;  %10061 = vmatprep.subr.bf16.mxu0 %v10845_v1 }
 0xfe5   : > { %10022 = vmatpush3.bf16.msra.mxu1 %v10846_v22  ;;  %10062 = vmatpush3.bf16.msra.mxu0 %v10847_v3 }
 0xfe6   : > { %10087 = vmatprep.subr.bf16.mxu1 %v10848_v51  ;;  %10127 = vmatprep.subr.bf16.mxu0 %v10849_v28 }
0x100d   : > { %v5440_v40 = vpop.f32.mrb[136].mxu1  ;;  %v5513_v6 = vpop.f32.mrb[136].mxu0 }
0x100e   : > { %v5441_v38 = vadd.f32 %v5440_v40, %v12858_v25  ;;  %v5514_v46 = vadd.f32 %v5513_v6, %v12862_v45  ;;  %v5442_v47 = vpop.f32.mrb[137].mxu1  ;;  %v5515_v0 = vpop.f32.mrb[137].mxu0 }
0x100f   : > { %v5444_v29 = vpop.f32.mrb[138].mxu1  ;;  %v5517_v17 = vpop.f32.mrb[138].mxu0  ;;  %v12878_v63 = vadd.f32 %v5442_v47, %v12869_v36  ;;  %v12888_v30 = vadd.f32 %v5515_v0, %v12875_v19 }
0x1010   : > { %v6118_v13 = vmul.f32 0.044715, %v5441_v38  ;;  %v6120_v44 = vmul.f32 0.044715, %v5514_v46  ;;  %v5445_v18 = vadd.f32 %v5444_v29, %v12858_v25  ;;  %v12882_v20 = vadd.f32 %v5517_v17, %v12862_v45  ;;  %v5446_v21 = vpop.f32.mrb[139].mxu1  ;;  %v5519_v9 = vpop.f32.mrb[139].mxu0 }
0x1011   : > { %v12885_v59 = vadd.f32 %v5446_v21, %v12869_v36  ;;  %v12891_v12 = vadd.f32 %v5519_v9, %v12875_v19  ;;  %v12893_v33 = vmul.f32 0.5, %v5441_v38  ;;  %v6119_v43 = vmul.f32 0.044715, %v12878_v63 }
0x1012   : > { %v6246_v26 = vmul.f32 %v6118_v13, %v5441_v38  ;;  %v6248_v27 = vmul.f32 %v6120_v44, %v5514_v46  ;;  %v6134_v31 = vmul.f32 0.044715, %v5445_v18  ;;  %v6136_v37 = vmul.f32 0.044715, %v12882_v20 }
0x1013   : > { %v6135_v39 = vmul.f32 0.044715, %v12885_v59  ;;  %v12898_v35 = vmul.f32 0.5, %v5514_v46  ;;  %v6121_v14 = vmul.f32 0.044715, %v12888_v30 }
0x1014   : > { %v6374_v61 = vmul.f32 %v6246_v26, %v5441_v38  ;;  %v6376_v32 = vmul.f32 %v6248_v27, %v5514_v46  ;;  %v6262_v56 = vmul.f32 %v6134_v31, %v5445_v18  ;;  %v6264_v55 = vmul.f32 %v6136_v37, %v12882_v20 }
0x1015   : > { %v5450_v58 = vpop.f32.mrb[140].mxu1  ;;  %v5523_v54 = vpop.f32.mrb[140].mxu0  ;;  %v6137_v49 = vmul.f32 0.044715, %v12891_v12  ;;  %v6263_v47 = vmul.f32 %v6135_v39, %v12885_v59  ;;  %v6249_v44 = vmul.f32 %v6121_v14, %v12888_v30 }
0x1016   : > { %v6502_v24 = vadd.f32 %v6374_v61, %v5441_v38  ;;  %v6504_v62 = vadd.f32 %v6376_v32, %v5514_v46  ;;  %v5452_v4 = vpop.f32.mrb[141].mxu1  ;;  %v5525_v5 = vpop.f32.mrb[141].mxu0  ;;  %v6390_v10 = vmul.f32 %v6262_v56, %v5445_v18  ;;  %v12904_v57 = vadd.f32 %v5450_v58, %v12858_v25 }
0x1017   : > { %v5454_v1 = vpop.f32.mrb[142].mxu1  ;;  %v5527_v22 = vpop.f32.mrb[142].mxu0  ;;  %v6392_v28 = vmul.f32 %v6264_v55, %v12882_v20  ;;  %v6247_v38 = vmul.f32 %v6119_v43, %v12878_v63  ;;  %v12910_v0 = vadd.f32 %v5523_v54, %v12862_v45  ;;  %v12915_v13 = vadd.f32 %v5452_v4, %v12869_v36 }
0x1018   : > { %v6630_v3 = vmul.f32 0.7978846, %v6502_v24  ;;  %v6632_v51 = vmul.f32 0.7978846, %v6504_v62  ;;  %v5456_v40 = vpop.f32.mrb[143].mxu1  ;;  %v5529_v6 = vpop.f32.mrb[143].mxu0  ;;  %v6518_v46 = vadd.f32 %v6390_v10, %v5445_v18  ;;  %v6265_v9 = vmul.f32 %v6137_v49, %v12891_v12 }
0x1019   : > { %v6520_v29 = vadd.f32 %v6392_v28, %v12882_v20  ;;  %v6150_v17 = vmul.f32 0.044715, %v12904_v57  ;;  %v6151_v27 = vmul.f32 0.044715, %v12915_v13  ;;  %v12921_v31 = vadd.f32 %v5525_v5, %v12875_v19 }
0x101a   : > { %11088 = vtanh.f32 %v6630_v3  ;;  %v6646_v21 = vmul.f32 0.7978846, %v6518_v46  ;;  %v12924_v61 = vadd.f32 %v5454_v1, %v12858_v25  ;;  %v6375_v32 = vmul.f32 %v6247_v38, %v12878_v63 }
0x101b   : > { %11090 = vtanh.f32 %v6632_v51  ;;  %v6648_v26 = vmul.f32 0.7978846, %v6520_v29  ;;  %v6391_v37 = vmul.f32 %v6263_v47, %v12885_v59  ;;  %v12929_v43 = vadd.f32 %v5527_v22, %v12862_v45 }
0x101c   : > { %11092 = vtanh.f32 %v6646_v21  ;;  %v6278_v56 = vmul.f32 %v6150_v17, %v12904_v57  ;;  %v6152_v39 = vmul.f32 0.044715, %v12910_v0  ;;  %v6153_v58 = vmul.f32 0.044715, %v12921_v31 }
0x101d   : > { %11094 = vtanh.f32 %v6648_v26  ;;  %v6006_v54 = vmul.f32 0.5, %v5445_v18  ;;  %v6279_v24 = vmul.f32 %v6151_v27, %v12915_v13  ;;  %v12936_v62 = vadd.f32 %v5456_v40, %v12869_v36 }
0x101e   : > { %v12939_v55 = vadd.f32 %v5529_v6, %v12875_v19  ;;  %v6377_v4 = vmul.f32 %v6249_v44, %v12888_v30  ;;  %v6393_v5 = vmul.f32 %v6265_v9, %v12891_v12  ;;  %v6166_v14 = vmul.f32 0.044715, %v12924_v61 }
0x101f   : > { %v6168_v10 = vmul.f32 0.044715, %v12929_v43  ;;  %v6281_v49 = vmul.f32 %v6153_v58, %v12921_v31  ;;  %v6167_v18 = vmul.f32 0.044715, %v12936_v62  ;;  %v6503_v22 = vadd.f32 %v6375_v32, %v12878_v63 }
0x1020   : > { %v6169_v1 = vmul.f32 0.044715, %v12939_v55  ;;  %v6008_v3 = vmul.f32 0.5, %v12882_v20  ;;  %v6406_v51 = vmul.f32 %v6278_v56, %v12904_v57  ;;  %v6280_v28 = vmul.f32 %v6152_v39, %v12910_v0 }
0x1021   : > { %v6519_v40 = vadd.f32 %v6391_v37, %v12885_v59  ;;  %v6407_v6 = vmul.f32 %v6279_v24, %v12915_v13  ;;  %v6295_v38 = vmul.f32 %v6167_v18, %v12936_v62  ;;  %v6631_v47 = vmul.f32 0.7978846, %v6503_v22 }
0x1022   : > { %v6297_v46 = vmul.f32 %v6169_v1, %v12939_v55  ;;  %v6294_v17 = vmul.f32 %v6166_v14, %v12924_v61  ;;  %v6505_v21 = vadd.f32 %v6377_v4, %v12888_v30  ;;  %v6521_v20 = vadd.f32 %v6393_v5, %v12891_v12 }
0x1023   : > { %v6647_v44 = vmul.f32 0.7978846, %v6519_v40  ;;  %v6409_v26 = vmul.f32 %v6281_v49, %v12921_v31  ;;  %v6296_v27 = vmul.f32 %v6168_v10, %v12929_v43  ;;  %v6423_v32 = vmul.f32 %v6295_v38, %v12936_v62 }
0x1024   : > { %v11089_v29 = vpop.eup %11088  ;;  %11096 = vtanh.f32 %v6631_v47  ;;  %v6633_v37 = vmul.f32 0.7978846, %v6505_v21  ;;  %v6649_v56 = vmul.f32 0.7978846, %v6521_v20  ;;  %v6408_v24 = vmul.f32 %v6280_v28, %v12910_v0 }
0x1025   : > { %v11091_v9 = vpop.eup %11090  ;;  %11098 = vtanh.f32 %v6647_v44  ;;  %v6886_v39 = vadd.f32 1.0, %v11089_v29  ;;  %v6425_v14 = vmul.f32 %v6297_v46, %v12939_v55  ;;  %v6535_v5 = vadd.f32 %v6407_v6, %v12915_v13 }
0x1026   : > { %v11093_v58 = vpop.eup %11092  ;;  %v6888_v4 = vadd.f32 1.0, %v11091_v9  ;;  %v6422_v49 = vmul.f32 %v6294_v17, %v12924_v61  ;;  %11100 = vtanh.f32 %v6633_v37  ;;  %v6551_v1 = vadd.f32 %v6423_v32, %v12936_v62 }
0x1027   : > { %v11095_v18 = vpop.eup %11094  ;;  %v6902_v10 = vadd.f32 1.0, %v11093_v58  ;;  %v6424_v22 = vmul.f32 %v6296_v27, %v12929_v43  ;;  %11102 = vtanh.f32 %v6649_v56  ;;  %v6663_v38 = vmul.f32 0.7978846, %v6535_v5 }
0x1028   : > { %v6904_v40 = vadd.f32 1.0, %v11095_v18  ;;  %v7014_v47 = vmul.f32 %v6886_v39, %v12893_v33  ;;  %v6679_v29 = vmul.f32 0.7978846, %v6551_v1  ;;  %v6537_v46 = vadd.f32 %v6409_v26, %v12921_v31 }
0x1029   : > { %v7030_v28 = vmul.f32 %v6902_v10, %v6006_v54  ;;  %v12971_v6 = vmul.f32 %v6888_v4, %v12898_v35  ;;  %11104 = vtanh.f32 %v6663_v38  ;;  %v6553_v17 = vadd.f32 %v6425_v14, %v12939_v55 }
0x102a   : > { %v12973_v44 = vmul.f32 %v6904_v40, %v6008_v3  ;;  %11106 = vtanh.f32 %v6679_v29  ;;  %v6665_v20 = vmul.f32 0.7978846, %v6537_v46  ;;  %v6534_v33 = vadd.f32 %v6406_v51, %v12904_v57 }
0x102b   : > { %v7142_v21 = vpack.c.bf16 %v7030_v28, %v7014_v47  ;;  %v6681_v27 = vmul.f32 0.7978846, %v6553_v17  ;;  %v6550_v54 = vadd.f32 %v6422_v49, %v12924_v61  ;;  %v6536_v35 = vadd.f32 %v6408_v24, %v12910_v0  ;;  %v10850_v47 = vld [vmem:[%s11648_s18 + $0x100] sm:$0xff]  }
0x102c   : > { %v7144_v9 = vpack.c.bf16 %v12973_v44, %v12971_v6  ;;  %11108 = vtanh.f32 %v6665_v20  ;;  %v6662_v3 = vmul.f32 0.7978846, %v6534_v33  ;;  %v6552_v37 = vadd.f32 %v6424_v22, %v12929_v43  ;;  %v10852_v44 = vld [vmem:[%s11648_s18 + $0x148] sm:$0xff]   ;;  %v10851_v33 = vld [vmem:[%s11648_s18 + $0x180] sm:$0xff]  }
0x102d   : > { %11110 = vtanh.f32 %v6681_v27  ;;  %v6678_v32 = vmul.f32 0.7978846, %v6550_v54  ;;  %v5991_v39 = vmul.f32 0.5, %v12878_v63  ;;  %v6664_v14 = vmul.f32 0.7978846, %v6536_v35 }
0x102e   : > { %v11097_v26 = vpop.eup %11096  ;;  %v6007_v4 = vmul.f32 0.5, %v12885_v59  ;;  %11112 = vtanh.f32 %v6662_v3  ;;  %v6680_v51 = vmul.f32 0.7978846, %v6552_v37  ;;  %v5993_v22 = vmul.f32 0.5, %v12888_v30 }
0x102f   : > { %v11099_v56 = vpop.eup %11098  ;;  %v6887_v58 = vadd.f32 1.0, %v11097_v26  ;;  %11114 = vtanh.f32 %v6678_v32  ;;  %v6009_v63 = vmul.f32 0.5, %v12891_v12  ;;  %v6023_v17 = vmul.f32 0.5, %v12915_v13  ;;  %v10853_v32 = vld [vmem:[%s11648_s18 + $0x1c8] sm:$0xff]  }
0x1030   : > { %v6903_v5 = vadd.f32 1.0, %v11099_v56  ;;  %v11101_v18 = vpop.eup %11100  ;;  %11116 = vtanh.f32 %v6664_v14  ;;  %v6039_v20 = vmul.f32 0.5, %v12936_v62  ;;  %v6025_v37 = vmul.f32 0.5, %v12921_v31  ;;  %v10854_v56 = vld [vmem:[%s11648_s18 + $0x108] sm:$0xff]  }
0x1031   : > { %v11103_v24 = vpop.eup %11102  ;;  %v7015_v49 = vmul.f32 %v6887_v58, %v5991_v39  ;;  %v6889_v1 = vadd.f32 1.0, %v11101_v18  ;;  %11118 = vtanh.f32 %v6680_v51  ;;  %v6041_v13 = vmul.f32 0.5, %v12939_v55  ;;  %v10856_v58 = vld [vmem:[%s11648_s18 + $0x150] sm:$0xff]   ;;  %v10855_v18 = vld [vmem:[%s11648_s18 + $0x188] sm:$0xff]  }
0x1032   : > { %v7031_v10 = vmul.f32 %v6903_v5, %v6007_v4  ;;  %v6905_v40 = vadd.f32 1.0, %v11103_v24  ;;  %v6022_v31 = vmul.f32 0.5, %v12904_v57  ;;  %v6038_v55 = vmul.f32 0.5, %v12924_v61  ;;  %v10860_v61 = vld [vmem:[%s11648_s18 + $0x158] sm:$0xff]  }
0x1033   : > { %v11105_v59 = vpop.eup %11104  ;;  %v7017_v29 = vmul.f32 %v6889_v1, %v5993_v22  ;;  %v6024_v22 = vmul.f32 0.5, %v12910_v0  ;;  %v6040_v57 = vmul.f32 0.5, %v12929_v43 }
0x1034   : > { %v7143_v38 = vpack.c.bf16 %v7031_v10, %v7015_v49  ;;  %v11107_v28 = vpop.eup %11106  ;;  %v7033_v46 = vmul.f32 %v6905_v40, %v6009_v63  ;;  %v6919_v6 = vadd.f32 1.0, %v11105_v59  ;;  %v10858_v40 = vld [vmem:[%s11648_s18 + $0x110] sm:$0xff]  }
0x1035   : > { %v6935_v30 = vadd.f32 1.0, %v11107_v28  ;;  %v10859_v28 = vld [vmem:[%s11648_s18 + $0x190] sm:$0xff]  }
0x1036   : > { %8269 = vmatprep.mubr.bf16.mxu1 %v7143_v38  ;;  %v11109_v12 = vpop.eup %11108  ;;  %v7145_v27 = vpack.c.bf16 %v7033_v46, %v7017_v29  ;;  %v7047_v35 = vmul.f32 %v6919_v6, %v6023_v17  ;;  %v10861_v6 = vld [vmem:[%s11648_s18 + $0x1d8] sm:$0xff]   ;;  %v10864_v17 = vld [vmem:[%s11648_s18 + $0x160] sm:$0xff]  }
0x1037   : > { %8270 = vmatmul.mubr.bf16.vlgmr.msra.gmra.mrb[200].mxu1 %v7142_v21  ;;  %v11111_v54 = vpop.eup %11110  ;;  %v7063_v26 = vmul.f32 %v6935_v30, %v6039_v20  ;;  %v6921_v3 = vadd.f32 1.0, %v11109_v12  ;;  %v10863_v20 = vld [vmem:[%s11648_s18 + $0x198] sm:$0xff]   ;;  %v10865_v30 = vld [vmem:[%s11648_s18 + $0x1e0] sm:$0xff]   ;;  %v13011_v12 = vsub.s32 4, %v12842_v60 }
0x1038   : > { %10088 = vmatpush3.bf16.msra.mxu1 %v10850_v47  ;;  %8334 = vmatprep.mubr.bf16.mxu0 %v7145_v27  ;;  %v6937_v62 = vadd.f32 1.0, %v11111_v54  ;;  %v11113_v39 = vpop.eup %11112  ;;  %v13014_v27 = vsub.s32 6, %v12842_v60  ;;  %v13018_v54 = vsub.s32 5, %v12842_v60 }
0x1039   : > { %10089 = vmatprep.subr.bf16.mxu1 %v10852_v44  ;;  %8335 = vmatmul.mubr.bf16.vlgmr.msra.gmra.mrb[200].mxu0 %v7144_v9  ;;  %v7159_v21 = vpack.c.bf16 %v7063_v26, %v7047_v35  ;;  %v11115_v14 = vpop.eup %11114  ;;  %v7049_v4 = vmul.f32 %v6921_v3, %v6025_v37  ;;  %v6918_v51 = vadd.f32 1.0, %v11113_v39  ;;  %v10857_v9 = vld [vmem:[%s11648_s18 + $0x1d0] sm:$0xff]   ;;  %v10862_v44 = vld [vmem:[%s11648_s18 + $0x118] sm:$0xff]   ;;  %15378 = vst [vmem:[#allocation25_spill] sm:$0xff] %v13011_v12  ;;  %v13021_v35 = vsub.s32 7, %v12842_v60  ;;  %v10868_v26 = vld [vmem:[%s11648_s18 + $0x168] sm:$0xff]  }
0x103a   : > { %v7065_v5 = vmul.f32 %v6937_v62, %v6041_v13  ;;  %10128 = vmatpush3.bf16.msra.mxu0 %v10851_v33  ;;  %v11117_v24 = vpop.eup %11116  ;;  %v6934_v49 = vadd.f32 1.0, %v11115_v14  ;;  %15379 = vst [vmem:[#allocation26_spill] sm:$0xff] %v13014_v27  ;;  %v10866_v33 = vld [vmem:[%s11648_s18 + $0x120] sm:$0xff]   ;;  %15380 = vst [vmem:[#allocation27_spill] sm:$0xff] %v13018_v54  ;;  %v5151_v37 = vld [vmem:[%s11638_s7 + $0x8] sm:$0xff]  ;;  %v13033_v39 = vrot.slane %v12851_v52, %v13014_v27 }
0x103b   : > { %8277 = vmatprep.mubr.bf16.mxu1 %v7159_v21  ;;  %10129 = vmatprep.subr.bf16.mxu0 %v10853_v32  ;;  %v11119_v10 = vpop.eup %11118  ;;  %v6920_v63 = vadd.f32 1.0, %v11117_v24  ;;  %v7046_v59 = vmul.f32 %v6918_v51, %v6022_v31  ;;  %15381 = vst [vmem:[#allocation28_spill] sm:$0xff] %v13021_v35  ;;  %v10867_v3 = vld [vmem:[%s11648_s18 + $0x1a0] sm:$0xff]   ;;  %v10869_v32 = vld [vmem:[%s11648_s18 + $0x1e8] sm:$0xff]   ;;  %v13044_v51 = vrot.slane %v12851_v52, %v13018_v54  ;;  %v10872_v24 = vld [vmem:[%s11648_s18 + $0x170] sm:$0xff]  }
0x103c   : > { %v7161_v1 = vpack.c.bf16 %v7065_v5, %v7049_v4  ;;  %10090 = vmatpush3.bf16.msra.mxu1 %v10854_v56  ;;  %v7062_v38 = vmul.f32 %v6934_v49, %v6038_v55  ;;  %v6936_v47 = vadd.f32 1.0, %v11119_v10  ;;  %v13029_v56 = vrot.slane %v12851_v52, %v13011_v12  ;;  %v10870_v21 = vld [vmem:[%s11648_s18 + $0x128] sm:$0xff]  }
0x103d   : > { %10091 = vmatprep.subr.bf16.mxu1 %v10856_v58  ;;  %v7048_v0 = vmul.f32 %v6920_v63, %v6024_v22  ;;  %v10871_v10 = vld [vmem:[%s11648_s18 + $0x1a8] sm:$0xff]   ;;  %v13060_v22 = vrot.slane %v5151_v37, %v12845_v15 }
0x103e   : > { %8342 = vmatprep.mubr.bf16.mxu0 %v7161_v1  ;;  %10130 = vmatpush3.bf16.msra.mxu0 %v10855_v18  ;;  %v7158_v29 = vpack.c.bf16 %v7062_v38, %v7046_v59  ;;  %v7064_v46 = vmul.f32 %v6936_v47, %v6040_v57  ;;  %v13048_v18 = vrot.slane %v12851_v52, %v13021_v35  ;;  %v10873_v1 = vld [vmem:[%s11648_s18 + $0x1f0] sm:$0xff]  }
0x103f   : > { %10131 = vmatprep.subr.bf16.mxu0 %v10857_v9  ;;  %15382 = vst [vmem:[#allocation29_spill] sm:$0xff] %v13060_v22  ;;  %v13063_v52 = vrot.slane %v5151_v37, %v12848_v42 }
0x1040   : > { %10092 = vmatpush3.bf16.msra.mxu1 %v10858_v40  ;;  %v7160_v43 = vpack.c.bf16 %v7064_v46, %v7048_v0  ;;  %v10874_v46 = vld [vmem:[%s11648_s18 + $0x130] sm:$0xff]  }
0x1041   : > { %8278 = vmatmul.mubr.bf16.gmra.mrb[204].mxu1 %v7158_v29  ;;  %10093 = vmatprep.subr.bf16.mxu1 %v10860_v61  ;;  %15383 = vst [vmem:[#allocation30_spill] sm:$0xff] %v13063_v52 }
0x1042   : > { %10132 = vmatpush3.bf16.msra.mxu0 %v10859_v28 }
0x1043   : > { %8343 = vmatmul.mubr.bf16.gmra.mrb[204].mxu0 %v7160_v43  ;;  %10133 = vmatprep.subr.bf16.mxu0 %v10861_v6 }
0x1044   : > { %10094 = vmatpush3.bf16.msra.mxu1 %v10862_v44 }
0x1045   : > { %10095 = vmatprep.subr.bf16.mxu1 %v10864_v17 }
0x1046   : > { %10134 = vmatpush3.bf16.msra.mxu0 %v10863_v20  ;;  %v10876_v20 = vld [vmem:[%s11648_s18 + $0x178] sm:$0xff]  }
0x1047   : > { %10135 = vmatprep.subr.bf16.mxu0 %v10865_v30 }
0x1048   : > { %10096 = vmatpush3.bf16.msra.mxu1 %v10866_v33 }
0x1049   : > { %10097 = vmatprep.subr.bf16.mxu1 %v10868_v26 }
0x104a   : > { %v5460_v13 = vpop.f32.mrb[144].mxu1  ;;  %v5533_v62 = vpop.f32.mrb[144].mxu0  ;;  %10136 = vmatpush3.bf16.msra.mxu0 %v10867_v3 }
0x104b   : > { %v13037_v58 = vadd.f32 %v5460_v13, %v12858_v25  ;;  %v13040_v14 = vadd.f32 %v5533_v62, %v12862_v45  ;;  %v5462_v4 = vpop.f32.mrb[145].mxu1  ;;  %v5535_v5 = vpop.f32.mrb[145].mxu0  ;;  %10137 = vmatprep.subr.bf16.mxu0 %v10869_v32  ;;  %v10875_v32 = vld [vmem:[%s11648_s18 + $0x1b0] sm:$0xff]  }
0x104c   : > { %v13052_v31 = vadd.f32 %v5462_v4, %v12869_v36  ;;  %v13055_v55 = vadd.f32 %v5535_v5, %v12875_v19  ;;  %v5464_v49 = vpop.f32.mrb[146].mxu1  ;;  %v5537_v9 = vpop.f32.mrb[146].mxu0  ;;  %10098 = vmatpush3.bf16.msra.mxu1 %v10870_v21  ;;  %v10877_v21 = vld [vmem:[%s11648_s18 + $0x1f8] sm:$0xff]   ;;  %v13096_v4 = vrot.slane %v5151_v37, %v12854_v53  ;;  %v13099_v5 = vrot.slane %v5151_v37, %v12865_v34 }
0x104d   : > { %v6182_v63 = vmul.f32 0.044715, %v13037_v58  ;;  %v6184_v40 = vmul.f32 0.044715, %v13040_v14  ;;  %v13068_v59 = vadd.f32 %v5464_v49, %v12858_v25  ;;  %v13071_v38 = vadd.f32 %v5537_v9, %v12862_v45  ;;  %v5466_v57 = vpop.f32.mrb[147].mxu1  ;;  %v5539_v47 = vpop.f32.mrb[147].mxu0  ;;  %10099 = vmatprep.subr.bf16.mxu1 %v10872_v24 }
0x104e   : > { %v6183_v61 = vmul.f32 0.044715, %v13052_v31  ;;  %v6185_v28 = vmul.f32 0.044715, %v13055_v55  ;;  %v13076_v29 = vadd.f32 %v5466_v57, %v12869_v36  ;;  %v13079_v0 = vadd.f32 %v5539_v47, %v12875_v19  ;;  %10138 = vmatpush3.bf16.msra.mxu0 %v10871_v10  ;;  %15384 = vst [vmem:[#allocation31_spill] sm:$0xff] %v13096_v4  ;;  %15385 = vst [vmem:[#allocation32_spill] sm:$0xff] %v13099_v5 }
0x104f   : > { %v6310_v6 = vmul.f32 %v6182_v63, %v13037_v58  ;;  %v6312_v44 = vmul.f32 %v6184_v40, %v13040_v14  ;;  %v6198_v43 = vmul.f32 0.044715, %v13068_v59  ;;  %v6200_v17 = vmul.f32 0.044715, %v13071_v38  ;;  %10139 = vmatprep.subr.bf16.mxu0 %v10873_v1  ;;  %v10878_v40 = vld [vmem:[%s11648_s18 + $0x138] sm:$0xff]  }
0x1050   : > { %v6311_v30 = vmul.f32 %v6183_v61, %v13052_v31  ;;  %v6313_v33 = vmul.f32 %v6185_v28, %v13055_v55  ;;  %v6199_v26 = vmul.f32 0.044715, %v13076_v29  ;;  %v6201_v3 = vmul.f32 0.044715, %v13079_v0  ;;  %10100 = vmatpush3.bf16.msra.mxu1 %v10874_v46 }
0x1051   : > { %v6326_v13 = vmul.f32 %v6198_v43, %v13068_v59  ;;  %v6328_v62 = vmul.f32 %v6200_v17, %v13071_v38  ;;  %v13102_v24 = vmul.f32 %v6310_v6, %v13037_v58  ;;  %v13105_v49 = vmul.f32 %v6312_v44, %v13040_v14  ;;  %10101 = vmatprep.subr.bf16.mxu1 %v10876_v20  ;;  %v10880_v44 = vld [vmem:[%s11648_s18 + $0x240] sm:$0xff]  }
0x1052   : > { %v13108_v9 = vmul.f32 %v6311_v30, %v13052_v31  ;;  %v13111_v10 = vmul.f32 %v6313_v33, %v13055_v55  ;;  %v5470_v1 = vpop.f32.mrb[148].mxu1  ;;  %v5543_v63 = vpop.f32.mrb[148].mxu0  ;;  %v6327_v37 = vmul.f32 %v6199_v26, %v13076_v29  ;;  %v6329_v57 = vmul.f32 %v6201_v3, %v13079_v0  ;;  %10140 = vmatpush3.bf16.msra.mxu0 %v10875_v32  ;;  %v10879_v3 = vld [vmem:[%s11648_s18 + $0x1b8] sm:$0xff]  }
0x1053   : > { %v13117_v47 = vadd.f32 %v5470_v1, %v12858_v25  ;;  %v13120_v61 = vadd.f32 %v5543_v63, %v12862_v45  ;;  %v5472_v28 = vpop.f32.mrb[149].mxu1  ;;  %v5545_v6 = vpop.f32.mrb[149].mxu0  ;;  %v13124_v43 = vmul.f32 %v6326_v13, %v13068_v59  ;;  %v13127_v46 = vmul.f32 %v6328_v62, %v13071_v38  ;;  %v10881_v1 = vld [vmem:[%s11648_s18 + $0x2c0] sm:$0xff]   ;;  %10141 = vmatprep.subr.bf16.mxu0 %v10877_v21 }
0x1054   : > { %v13130_v17 = vadd.f32 %v5472_v28, %v12869_v36  ;;  %v13133_v30 = vadd.f32 %v5545_v6, %v12875_v19  ;;  %v5474_v33 = vpop.f32.mrb[150].mxu1  ;;  %v5547_v26 = vpop.f32.mrb[150].mxu0  ;;  %10102 = vmatpush3.bf16.msra.mxu1 %v10878_v40 }
0x1055   : > { %15386 = vst [vmem:[#allocation33_spill] sm:$0xff] %v13120_v61  ;;  %v6214_v20 = vmul.f32 0.044715, %v13117_v47  ;;  %v6216_v63 = vmul.f32 0.044715, %v13120_v61  ;;  %v13140_v13 = vadd.f32 %v5474_v33, %v12858_v25  ;;  %v13143_v62 = vadd.f32 %v5547_v26, %v12862_v45  ;;  %v5476_v28 = vpop.f32.mrb[151].mxu1  ;;  %10167 = vmatprep.subr.bf16.mxu1 %v10880_v44 }
0x1056   : > { %v5549_v7 = vpop.f32.mrb[151].mxu0  ;;  %v6215_v6 = vmul.f32 0.044715, %v13130_v17  ;;  %v6217_v34 = vmul.f32 0.044715, %v13133_v30  ;;  %v13148_v32 = vadd.f32 %v5476_v28, %v12869_v36  ;;  %10142 = vmatpush3.bf16.msra.mxu0 %v10879_v3 }
0x1057   : > { %15387 = vst [vmem:[#allocation34_spill] sm:$0xff] %v13143_v62  ;;  %v13151_v42 = vadd.f32 %v5549_v7, %v12875_v19  ;;  %v6342_v25 = vmul.f32 %v6214_v20, %v13117_v47  ;;  %v6344_v33 = vmul.f32 %v6216_v63, %v13120_v61  ;;  %v6230_v45 = vmul.f32 0.044715, %v13140_v13  ;;  %10207 = vmatprep.subr.bf16.mxu0 %v10881_v1 }
0x1058   : > { %v6232_v26 = vmul.f32 0.044715, %v13143_v62  ;;  %v6343_v21 = vmul.f32 %v6215_v6, %v13130_v17  ;;  %v6345_v53 = vmul.f32 %v6217_v34, %v13133_v30  ;;  %v6231_v36 = vmul.f32 0.044715, %v13148_v32 }
0x1059   : > { %v6233_v28 = vmul.f32 0.044715, %v13151_v42  ;;  %v13162_v7 = vmul.f32 %v6327_v37, %v13076_v29  ;;  %v13165_v19 = vmul.f32 %v6329_v57, %v13079_v0  ;;  %v6358_v40 = vmul.f32 %v6230_v45, %v13140_v13 }
0x105a   : > { %v6360_v20 = vmul.f32 %v6232_v26, %v13143_v62  ;;  %v13170_v44 = vmul.f32 %v6342_v25, %v13117_v47  ;;  %v13173_v34 = vmul.f32 %v6344_v33, %v13120_v61  ;;  %v6359_v63 = vmul.f32 %v6231_v36, %v13148_v32  ;;  %v5586_v37 = vpop.f32.mrb[152].mxu1  ;;  %v5659_v6 = vpop.f32.mrb[152].mxu0 }
0x105b   : > { %v6361_v3 = vmul.f32 %v6233_v28, %v13151_v42  ;;  %v13178_v57 = vmul.f32 %v6343_v21, %v13130_v17  ;;  %v13181_v45 = vmul.f32 %v6345_v53, %v13133_v30  ;;  %v5587_v1 = vadd.f32 %v5586_v37, %v13029_v56  ;;  %v5588_v26 = vpop.f32.mrb[153].mxu1  ;;  %v5661_v15 = vpop.f32.mrb[153].mxu0 }
0x105c   : > { %15388 = vst [vmem:[#allocation35_spill] sm:$0xff] %v13173_v34  ;;  %v5660_v25 = vadd.f32 %v5659_v6, %v13033_v39  ;;  %v13186_v33 = vmul.f32 %v6358_v40, %v13140_v13  ;;  %v13189_v36 = vmul.f32 %v6360_v20, %v13143_v62  ;;  %v13192_v28 = vadd.f32 %v5588_v26, %v13044_v51  ;;  %v5590_v53 = vpop.f32.mrb[154].mxu1  ;;  %v5663_v60 = vpop.f32.mrb[154].mxu0 }
0x105d   : > { %v13195_v21 = vadd.f32 %v5661_v15, %v13048_v18  ;;  %v13198_v37 = vmul.f32 %v6359_v63, %v13148_v32  ;;  %v13201_v6 = vmul.f32 %v6361_v3, %v13151_v42  ;;  %v6122_v48 = vmul.f32 0.044715, %v5587_v1  ;;  %v5592_v15 = vpop.f32.mrb[155].mxu1  ;;  %v5665_v8 = vpop.f32.mrb[155].mxu0 }
0x105e   : > { %15389 = vst [vmem:[#allocation36_spill] sm:$0xff] %v13189_v36  ;;  %v6124_v40 = vmul.f32 0.044715, %v5660_v25  ;;  %v6123_v23 = vmul.f32 0.044715, %v13192_v28  ;;  %v5591_v26 = vadd.f32 %v5590_v53, %v13029_v56  ;;  %v5664_v11 = vadd.f32 %v5663_v60, %v13033_v39 }
0x105f   : > { %15390 = vst [vmem:[#allocation37_spill] sm:$0xff] %v13195_v21  ;;  %v6125_v20 = vmul.f32 0.044715, %v13195_v21  ;;  %v6250_v50 = vmul.f32 %v6122_v48, %v5587_v1  ;;  %v13208_v63 = vadd.f32 %v5592_v15, %v13044_v51  ;;  %v13211_v3 = vadd.f32 %v5665_v8, %v13048_v18 }
0x1060   : > { %v6252_v2 = vmul.f32 %v6124_v40, %v5660_v25  ;;  %v13213_v41 = vmul.f32 0.5, %v5587_v1  ;;  %v13215_v16 = vmul.f32 0.5, %v5660_v25  ;;  %v6251_v35 = vmul.f32 %v6123_v23, %v13192_v28 }
0x1061   : > { %15391 = vst [vmem:[#allocation38_spill] sm:$0xff] %v13208_v63  ;;  %15392 = vst [vmem:[#allocation39_spill] sm:$0xff] %v13211_v3  ;;  %v6138_v54 = vmul.f32 0.044715, %v5591_v26  ;;  %v6378_v53 = vmul.f32 %v6250_v50, %v5587_v1  ;;  %v6253_v60 = vmul.f32 %v6125_v20, %v13195_v21  ;;  %v6140_v12 = vmul.f32 0.044715, %v5664_v11 }
0x1062   : > { %15393 = vst [vmem:[#allocation40_spill] sm:$0xff] %v13213_v41  ;;  %15394 = vst [vmem:[#allocation41_spill] sm:$0xff] %v13215_v16  ;;  %v6380_v27 = vmul.f32 %v6252_v2, %v5660_v25  ;;  %v13219_v48 = vmul.f32 0.5, %v5591_v26  ;;  %v13221_v15 = vmul.f32 0.5, %v5664_v11  ;;  %v6139_v8 = vmul.f32 0.044715, %v13208_v63 }
0x1063   : > { %v6266_v40 = vmul.f32 %v6138_v54, %v5591_v26  ;;  %v5596_v5 = vpop.f32.mrb[156].mxu1  ;;  %v5669_v4 = vpop.f32.mrb[156].mxu0  ;;  %v6506_v41 = vadd.f32 %v6378_v53, %v5587_v1  ;;  %v6268_v16 = vmul.f32 %v6140_v12, %v5664_v11  ;;  %v6141_v23 = vmul.f32 0.044715, %v13211_v3 }
0x1064   : > { %15395 = vst [vmem:[#allocation42_spill] sm:$0xff] %v13219_v48  ;;  %15396 = vst [vmem:[#allocation43_spill] sm:$0xff] %v13221_v15  ;;  %v6508_v52 = vadd.f32 %v6380_v27, %v5660_v25  ;;  %v5598_v22 = vpop.f32.mrb[157].mxu1  ;;  %v5671_v50 = vpop.f32.mrb[157].mxu0  ;;  %v6267_v20 = vmul.f32 %v6139_v8, %v13208_v63  ;;  %v13227_v36 = vadd.f32 %v5596_v5, %v13029_v56 }
0x1065   : > { %v6394_v2 = vmul.f32 %v6266_v40, %v5591_v26  ;;  %v13230_v54 = vadd.f32 %v5669_v4, %v13033_v39  ;;  %v5600_v15 = vpop.f32.mrb[158].mxu1  ;;  %v5673_v48 = vpop.f32.mrb[158].mxu0  ;;  %v6634_v62 = vmul.f32 0.7978846, %v6506_v41  ;;  %v13233_v27 = vmul.f32 %v6251_v35, %v13192_v28 }
0x1066   : > { %15397 = vst [vmem:[#allocation44_spill] sm:$0xff] %v13227_v36  ;;  %v6636_v34 = vmul.f32 0.7978846, %v6508_v52  ;;  %v6396_v12 = vmul.f32 %v6268_v16, %v5664_v11  ;;  %v5602_v1 = vpop.f32.mrb[159].mxu1  ;;  %v5675_v25 = vpop.f32.mrb[159].mxu0  ;;  %v6269_v40 = vmul.f32 %v6141_v23, %v13211_v3  ;;  %v13239_v4 = vmul.f32 %v6253_v60, %v13195_v21 }
0x1067   : > { %15398 = vst [vmem:[#allocation45_spill] sm:$0xff] %v13230_v54  ;;  %v6522_v53 = vadd.f32 %v6394_v2, %v5591_v26  ;;  %v6154_v8 = vmul.f32 0.044715, %v13227_v36  ;;  %v6156_v5 = vmul.f32 0.044715, %v13230_v54  ;;  %11120 = vtanh.f32 %v6634_v62 }
0x1068   : > { %15399 = vst [vmem:[#allocation46_spill] sm:$0xff] %v13239_v4  ;;  %v6524_v61 = vadd.f32 %v6396_v12, %v5664_v11  ;;  %v13242_v41 = vadd.f32 %v5598_v22, %v13044_v51  ;;  %11122 = vtanh.f32 %v6636_v34  ;;  %v13245_v16 = vmul.f32 %v6267_v20, %v13208_v63 }
0x1069   : > { %v6650_v35 = vmul.f32 0.7978846, %v6522_v53  ;;  %v6282_v52 = vmul.f32 %v6154_v8, %v13227_v36  ;;  %v6284_v26 = vmul.f32 %v6156_v5, %v13230_v54  ;;  %v13251_v62 = vadd.f32 %v5671_v50, %v13048_v18 }
0x106a   : > { %15400 = vst [vmem:[#allocation47_spill] sm:$0xff] %v13242_v41  ;;  %15401 = vst [vmem:[#allocation48_spill] sm:$0xff] %v13245_v16  ;;  %v6155_v23 = vmul.f32 0.044715, %v13242_v41  ;;  %v13254_v60 = vadd.f32 %v5600_v15, %v13029_v56  ;;  %v6652_v11 = vmul.f32 0.7978846, %v6524_v61  ;;  %v13257_v22 = vmul.f32 %v6269_v40, %v13211_v3 }
0x106b   : > { %15402 = vst [vmem:[#allocation49_spill] sm:$0xff] %v13251_v62  ;;  %11124 = vtanh.f32 %v6650_v35  ;;  %v13260_v34 = vadd.f32 %v5673_v48, %v13033_v39  ;;  %v5606_v2 = vpop.f32.mrb[160].mxu1  ;;  %v5679_v20 = vpop.f32.mrb[160].mxu0  ;;  %v13263_v12 = vmul.f32 %v6282_v52, %v13227_v36  ;;  %v6157_v50 = vmul.f32 0.044715, %v13251_v62 }
0x106c   : > { %15403 = vst [vmem:[#allocation50_spill] sm:$0xff] %v13254_v60  ;;  %15404 = vst [vmem:[#allocation51_spill] sm:$0xff] %v13257_v22  ;;  %v6283_v53 = vmul.f32 %v6155_v23, %v13242_v41  ;;  %v6170_v15 = vmul.f32 0.044715, %v13254_v60  ;;  %v5608_v8 = vpop.f32.mrb[161].mxu1  ;;  %v5681_v5 = vpop.f32.mrb[161].mxu0  ;;  %v13270_v40 = vadd.f32 %v5602_v1, %v13044_v51  ;;  %v13273_v48 = vadd.f32 %v5675_v25, %v13048_v18 }
0x106d   : > { %15405 = vst [vmem:[#allocation52_spill] sm:$0xff] %v13260_v34  ;;  %15406 = vst [vmem:[#allocation53_spill] sm:$0xff] %v13263_v12  ;;  %v6172_v61 = vmul.f32 0.044715, %v13260_v34  ;;  %v13276_v35 = vadd.f32 %v5606_v2, %v13029_v56  ;;  %v5610_v52 = vpop.f32.mrb[162].mxu1  ;;  %v5683_v12 = vpop.f32.mrb[162].mxu0  ;;  %v13279_v23 = vmul.f32 %v6284_v26, %v13230_v54  ;;  %v6285_v36 = vmul.f32 %v6157_v50, %v13251_v62 }
0x106e   : > { %15407 = vst [vmem:[#allocation54_spill] sm:$0xff] %v13270_v40  ;;  %15408 = vst [vmem:[#allocation55_spill] sm:$0xff] %v13273_v48  ;;  %v6298_v22 = vmul.f32 %v6170_v15, %v13254_v60  ;;  %v13284_v3 = vadd.f32 %v5679_v20, %v13033_v39  ;;  %v13286_v1 = vpop.f32.mrb[163].mxu1  ;;  %v13288_v4 = vpop.f32.mrb[163].mxu0  ;;  %v6171_v2 = vmul.f32 0.044715, %v13270_v40  ;;  %11126 = vtanh.f32 %v6652_v11 }
0x106f   : > { %15409 = vst [vmem:[#allocation56_spill] sm:$0xff] %v13276_v35  ;;  %15410 = vst [vmem:[#allocation57_spill] sm:$0xff] %v13279_v23  ;;  %v6300_v25 = vmul.f32 %v6172_v61, %v13260_v34  ;;  %v6173_v21 = vmul.f32 0.044715, %v13273_v48  ;;  %v6186_v26 = vmul.f32 0.044715, %v13276_v35  ;;  %v13295_v50 = vmul.f32 %v6283_v53, %v13242_v41 }
0x1070   : > { %15411 = vst [vmem:[#allocation58_spill] sm:$0xff] %v13284_v3  ;;  %v6188_v15 = vmul.f32 0.044715, %v13284_v3  ;;  %v13299_v20 = vadd.f32 %v5608_v8, %v13044_v51  ;;  %v13302_v23 = vmul.f32 %v6285_v36, %v13251_v62  ;;  %v6299_v61 = vmul.f32 %v6171_v2, %v13270_v40 }
0x1071   : > { %15412 = vst [vmem:[#allocation59_spill] sm:$0xff] %v13295_v50  ;;  %v6301_v54 = vmul.f32 %v6173_v21, %v13273_v48  ;;  %v6314_v16 = vmul.f32 %v6186_v26, %v13276_v35  ;;  %v13307_v63 = vpop.eup %11120  ;;  %v13310_v11 = vmul.f32 %v6298_v22, %v13254_v60  ;;  %v13315_v8 = vadd.f32 %v5681_v5, %v13048_v18 }
0x1072   : > { %15413 = vst [vmem:[#allocation60_spill] sm:$0xff] %v13299_v20  ;;  %15414 = vst [vmem:[#allocation61_spill] sm:$0xff] %v13302_v23  ;;  %v6316_v53 = vmul.f32 %v6188_v15, %v13284_v3  ;;  %v6187_v50 = vmul.f32 0.044715, %v13299_v20  ;;  %v13317_v36 = vpop.eup %11122  ;;  %v13320_v2 = vmul.f32 %v6300_v25, %v13260_v34  ;;  %v13323_v21 = vmul.f32 %v6299_v61, %v13270_v40  ;;  %v5616_v15 = vpop.f32.mrb[164].mxu1 }
0x1073   : > { %15415 = vst [vmem:[#allocation62_spill] sm:$0xff] %v13310_v11  ;;  %15416 = vst [vmem:[#allocation63_spill] sm:$0xff] %v13315_v8  ;;  %v13326_v26 = vmul.f32 %v6301_v54, %v13273_v48  ;;  %v13329_v22 = vmul.f32 0.5, %v13052_v31  ;;  %v13331_v11 = vpop.f32.mrb[164].mxu0  ;;  %v13334_v5 = vmul.f32 %v6314_v16, %v13276_v35  ;;  %v6189_v25 = vmul.f32 0.044715, %v13315_v8 }
0x1074   : > { %15417 = vst [vmem:[#allocation64_spill] sm:$0xff] %v13317_v36  ;;  %15418 = vst [vmem:[#allocation65_spill] sm:$0xff] %v13320_v2  ;;  %v6315_v60 = vmul.f32 %v6187_v50, %v13299_v20  ;;  %v6567_v61 = vadd.f32 %v13108_v9, %v13052_v31  ;;  %v5618_v2 = vpop.f32.mrb[165].mxu1  ;;  %v5691_v34 = vpop.f32.mrb[165].mxu0  ;;  %v13346_v48 = vmul.f32 0.5, %v13076_v29  ;;  %v6583_v16 = vadd.f32 %v13162_v7, %v13076_v29 }
0x1075   : > { %15419 = vst [vmem:[#allocation66_spill] sm:$0xff] %v13323_v21  ;;  %15420 = vst [vmem:[#allocation67_spill] sm:$0xff] %v13326_v26  ;;  %v13340_v54 = vpop.eup %11124  ;;  %v13343_v26 = vmul.f32 %v6316_v53, %v13284_v3  ;;  %v6569_v50 = vadd.f32 %v13111_v10, %v13055_v55  ;;  %v13354_v35 = vpop.f32.mrb[166].mxu0  ;;  %v6317_v31 = vmul.f32 %v6189_v25, %v13315_v8  ;;  %v13358_v23 = vmul.f32 0.5, %v13055_v55 }
0x1076   : > { %15421 = vst [vmem:[#allocation68_spill] sm:$0xff] %v13334_v5  ;;  %15422 = vst [vmem:[#allocation69_spill] sm:$0xff] %v13340_v54  ;;  %v13352_v5 = vpop.f32.mrb[166].mxu1  ;;  %v6695_v9 = vmul.f32 0.7978846, %v6567_v61  ;;  %v6585_v53 = vadd.f32 %v13165_v19, %v13079_v0  ;;  %v13364_v3 = vpop.f32.mrb[167].mxu0  ;;  %v13367_v10 = vadd.f32 %v5610_v52, %v13029_v56  ;;  %v13370_v62 = vadd.f32 %v5683_v12, %v13033_v39 }
0x1077   : > { %15423 = vst [vmem:[#allocation70_spill] sm:$0xff] %v13343_v26  ;;  %v13362_v26 = vpop.f32.mrb[167].mxu1  ;;  %v6711_v29 = vmul.f32 0.7978846, %v6583_v16  ;;  %v6697_v7 = vmul.f32 0.7978846, %v6569_v50  ;;  %v13373_v25 = vmul.f32 %v6315_v60, %v13299_v20  ;;  %v13379_v61 = vmul.f32 %v6317_v31, %v13315_v8 }
0x1078   : > { %15424 = vst [vmem:[#allocation71_spill] sm:$0xff] %v13367_v10  ;;  %15425 = vst [vmem:[#allocation72_spill] sm:$0xff] %v13370_v62  ;;  %11128 = vtanh.f32 %v6695_v9  ;;  %v13376_v55 = vmul.f32 0.5, %v13079_v0  ;;  %v6713_v19 = vmul.f32 0.7978846, %v6585_v53  ;;  %v13383_v50 = vpop.eup %11126  ;;  %v13386_v12 = vmul.f32 0.5, %v13037_v58 }
0x1079   : > { %15426 = vst [vmem:[#allocation73_spill] sm:$0xff] %v13373_v25  ;;  %15427 = vst [vmem:[#allocation74_spill] sm:$0xff] %v13379_v61  ;;  %11130 = vtanh.f32 %v6711_v29  ;;  %v6202_v16 = vmul.f32 0.044715, %v13367_v10  ;;  %v6204_v52 = vmul.f32 0.044715, %v13370_v62  ;;  %v6566_v60 = vadd.f32 %v13102_v24, %v13037_v58 }
0x107a   : > { %15428 = vst [vmem:[#allocation75_spill] sm:$0xff] %v13383_v50  ;;  %11132 = vtanh.f32 %v6697_v7  ;;  %v6582_v0 = vadd.f32 %v13124_v43, %v13068_v59  ;;  %v13394_v9 = vmul.f32 0.5, %v13068_v59  ;;  %v13397_v53 = vmul.f32 0.5, %v13040_v14  ;;  %v13399_v29 = vpop.f32.mrb[168].mxu1  ;;  %v13401_v7 = vpop.f32.mrb[168].mxu0 }
0x107b   : > { %11134 = vtanh.f32 %v6713_v19  ;;  %v6330_v31 = vmul.f32 %v6202_v16, %v13367_v10  ;;  %v6694_v61 = vmul.f32 0.7978846, %v6566_v60  ;;  %v6568_v58 = vadd.f32 %v13105_v49, %v13040_v14  ;;  %v13407_v43 = vpop.f32.mrb[169].mxu1  ;;  %v13409_v19 = vpop.f32.mrb[169].mxu0 }
0x107c   : > { %v6710_v8 = vmul.f32 0.7978846, %v6582_v0  ;;  %v6584_v24 = vadd.f32 %v13127_v46, %v13071_v38  ;;  %v6332_v59 = vmul.f32 %v6204_v52, %v13370_v62  ;;  %v13413_v16 = vmul.f32 0.5, %v13071_v38  ;;  %v13423_v14 = vpop.f32.mrb[170].mxu1  ;;  %v13425_v49 = vpop.f32.mrb[170].mxu0 }
0x107d   : > { %v13417_v25 = vadd.f32 %v13286_v1, %v13044_v51  ;;  %v13421_v60 = vadd.f32 %v13288_v4, %v13048_v18  ;;  %11136 = vtanh.f32 %v6694_v61  ;;  %v6696_v46 = vmul.f32 0.7978846, %v6568_v58  ;;  %v13430_v38 = vpop.f32.mrb[171].mxu1  ;;  %v13432_v20 = vpop.f32.mrb[171].mxu0 }
0x107e   : > { %v6712_v0 = vmul.f32 0.7978846, %v6584_v24  ;;  %v13428_v52 = vadd.f32 %v5616_v15, %v13029_v56  ;;  %15431 = vst [vmem:[#allocation78_spill] sm:$0xff] %v13430_v38  ;;  %15432 = vst [vmem:[#allocation79_spill] sm:$0xff] %v13432_v20  ;;  %11138 = vtanh.f32 %v6710_v8  ;;  %v13438_v21 = vadd.f32 %v13331_v11, %v13033_v39 }
0x107f   : > { %15429 = vst [vmem:[#allocation76_spill] sm:$0xff] %v13417_v25  ;;  %v6203_v1 = vmul.f32 0.044715, %v13417_v25  ;;  %v6205_v4 = vmul.f32 0.044715, %v13421_v60  ;;  %11140 = vtanh.f32 %v6696_v46  ;;  %v13442_v58 = vadd.f32 %v5618_v2, %v13044_v51 }
0x1080   : > { %15430 = vst [vmem:[#allocation77_spill] sm:$0xff] %v13428_v52  ;;  %15433 = vst [vmem:[#allocation80_spill] sm:$0xff] %v13438_v21  ;;  %v6218_v61 = vmul.f32 0.044715, %v13428_v52  ;;  %v13445_v15 = vadd.f32 %v5691_v34, %v13048_v18  ;;  %11142 = vtanh.f32 %v6712_v0  ;;  %v6220_v40 = vmul.f32 0.044715, %v13438_v21 }
0x1081   : > { %v6331_v8 = vmul.f32 %v6203_v1, %v13417_v25  ;;  %v6333_v24 = vmul.f32 %v6205_v4, %v13421_v60  ;;  %v13451_v11 = vmul.f32 %v6330_v31, %v13367_v10  ;;  %v6219_v20 = vmul.f32 0.044715, %v13442_v58 }
0x1082   : > { %15434 = vst [vmem:[#allocation81_spill] sm:$0xff] %v13445_v15  ;;  %v11129_v41 = vpop.eup %11128  ;;  %v6346_v46 = vmul.f32 %v6218_v61, %v13428_v52  ;;  %v6221_v2 = vmul.f32 0.044715, %v13445_v15  ;;  %v13457_v0 = vmul.f32 %v6332_v59, %v13370_v62  ;;  %v6348_v1 = vmul.f32 %v6220_v40, %v13438_v21  ;;  %v13463_v50 = vpop.f32.mrb[172].mxu1 }
0x1083   : > { %15435 = vst [vmem:[#allocation82_spill] sm:$0xff] %v13451_v11  ;;  %v11131_v38 = vpop.eup %11130  ;;  %v6951_v34 = vadd.f32 1.0, %v11129_v41  ;;  %v13461_v4 = vmul.f32 0.5, %v13130_v17  ;;  %15437 = vst [vmem:[#allocation84_spill] sm:$0xff] %v13463_v50  ;;  %v13465_v31 = vpop.f32.mrb[172].mxu0  ;;  %v13468_v10 = vmul.f32 %v6331_v8, %v13417_v25  ;;  %v6347_v36 = vmul.f32 %v6219_v20, %v13442_v58 }
0x1084   : > { %15436 = vst [vmem:[#allocation83_spill] sm:$0xff] %v13457_v0  ;;  %v11133_v11 = vpop.eup %11132  ;;  %v6967_v61 = vadd.f32 1.0, %v11131_v38  ;;  %v6349_v41 = vmul.f32 %v6221_v2, %v13445_v15  ;;  %v13472_v59 = vpop.f32.mrb[173].mxu1  ;;  %v13478_v50 = vmul.f32 %v6333_v24, %v13421_v60  ;;  %v13481_v38 = vmul.f32 %v6346_v46, %v13428_v52 }
0x1085   : > { %15438 = vst [vmem:[#allocation85_spill] sm:$0xff] %v13468_v10  ;;  %v13474_v0 = vpop.f32.mrb[173].mxu0  ;;  %v11135_v40 = vpop.eup %11134  ;;  %v7079_v62 = vmul.f32 %v6951_v34, %v13329_v22  ;;  %v6953_v54 = vadd.f32 1.0, %v11133_v11  ;;  %v13489_v25 = vmul.f32 %v6348_v1, %v13438_v21  ;;  %v13499_v11 = vmul.f32 %v6347_v36, %v13442_v58 }
0x1086   : > { %15439 = vst [vmem:[#allocation86_spill] sm:$0xff] %v13474_v0  ;;  %15440 = vst [vmem:[#allocation87_spill] sm:$0xff] %v13481_v38  ;;  %v13483_v8 = vpop.f32.mrb[174].mxu1  ;;  %v13485_v10 = vpop.f32.mrb[174].mxu0  ;;  %v7095_v20 = vmul.f32 %v6967_v61, %v13346_v48  ;;  %v6969_v2 = vadd.f32 1.0, %v11135_v40  ;;  %v13492_v0 = vmul.f32 0.5, %v13148_v32  ;;  %v13502_v46 = vmul.f32 %v6349_v41, %v13445_v15 }
0x1087   : > { %15441 = vst [vmem:[#allocation88_spill] sm:$0xff] %v13489_v25  ;;  %v13494_v22 = vpop.f32.mrb[175].mxu1  ;;  %v13496_v24 = vpop.f32.mrb[175].mxu0  ;;  %v6599_v48 = vadd.f32 %v13178_v57, %v13130_v17  ;;  %v6615_v34 = vadd.f32 %v13198_v37, %v13148_v32  ;;  %v7081_v40 = vmul.f32 %v6953_v54, %v13358_v23  ;;  %v6601_v21 = vadd.f32 %v13181_v45, %v13133_v30 }
0x1088   : > { %15442 = vst [vmem:[#allocation89_spill] sm:$0xff] %v13502_v46  ;;  %v11137_v1 = vpop.eup %11136  ;;  %v7175_v61 = vpack.c.bf16 %v7095_v20, %v7079_v62  ;;  %v7097_v25 = vmul.f32 %v6969_v2, %v13376_v55  ;;  %v6617_v46 = vadd.f32 %v13201_v6, %v13151_v42  ;;  %v13516_v62 = vadd.f32 %v13352_v5, %v13029_v56 }
0x1089   : > { %v11139_v36 = vpop.eup %11138  ;;  %v6950_v38 = vadd.f32 1.0, %v11137_v1  ;;  %v6727_v52 = vmul.f32 0.7978846, %v6599_v48  ;;  %v6743_v41 = vmul.f32 0.7978846, %v6615_v34 }
0x108a   : > { %v11141_v17 = vpop.eup %11140  ;;  %8285 = vmatprep.mubr.bf16.mxu1 %v7175_v61  ;;  %v7177_v57 = vpack.c.bf16 %v7097_v25, %v7081_v40  ;;  %v6966_v32 = vadd.f32 1.0, %v11139_v36  ;;  %v6729_v37 = vmul.f32 0.7978846, %v6601_v21  ;;  %15443 = vst [vmem:[#allocation90_spill] sm:$0xff] %v13516_v62  ;;  %v6745_v55 = vmul.f32 0.7978846, %v6617_v46 }
0x108b   : > { %v11143_v23 = vpop.eup %11142  ;;  %v7078_v54 = vmul.f32 %v6950_v38, %v13386_v12  ;;  %v6952_v45 = vadd.f32 1.0, %v11141_v17  ;;  %11144 = vtanh.f32 %v6727_v52  ;;  %v13519_v20 = vpop.f32.mrb[176].mxu1  ;;  %v6234_v21 = vmul.f32 0.044715, %v13516_v62 }
0x108c   : > { %v13521_v2 = vpop.f32.mrb[176].mxu0  ;;  %8350 = vmatprep.mubr.bf16.mxu0 %v7177_v57  ;;  %v7094_v6 = vmul.f32 %v6966_v32, %v13394_v9  ;;  %v6968_v25 = vadd.f32 1.0, %v11143_v23  ;;  %11146 = vtanh.f32 %v6743_v41  ;;  %v13525_v48 = vpop.f32.mrb[177].mxu1  ;;  %v13531_v12 = vmul.f32 0.5, %v13133_v30 }
0x108d   : > { %v13527_v56 = vpop.f32.mrb[177].mxu0  ;;  %v7080_v5 = vmul.f32 %v6952_v45, %v13397_v53  ;;  %11148 = vtanh.f32 %v6729_v37  ;;  %v13535_v52 = vadd.f32 %v13354_v35, %v13033_v39  ;;  %v13537_v38 = vpop.f32.mrb[178].mxu1  ;;  %v6362_v1 = vmul.f32 %v6234_v21, %v13516_v62  ;;  %v15446_v37 = vld [vmem:[#allocation33_spill] sm:$0xff] }
0x108e   : > { %v13539_v9 = vpop.f32.mrb[178].mxu0  ;;  %v7174_v46 = vpack.c.bf16 %v7094_v6, %v7078_v54  ;;  %v7096_v34 = vmul.f32 %v6968_v25, %v13413_v16  ;;  %11150 = vtanh.f32 %v6745_v55  ;;  %v13543_v61 = vpop.f32.mrb[179].mxu1  ;;  %v13548_v30 = vmul.f32 0.5, %v13151_v42  ;;  %v15449_v54 = vld [vmem:[#allocation36_spill] sm:$0xff] }
0x108f   : > { %15444 = vst [vmem:[#allocation91_spill] sm:$0xff] %v13535_v52  ;;  %v13545_v53 = vpop.f32.mrb[179].mxu0  ;;  %v6236_v39 = vmul.f32 0.044715, %v13535_v52  ;;  %v6598_v35 = vadd.f32 %v13170_v44, %v13117_v47  ;;  %v6614_v40 = vadd.f32 %v13186_v33, %v13140_v13  ;;  %v13556_v36 = vmul.f32 %v6362_v1, %v13516_v62  ;;  %v15447_v44 = vld [vmem:[#allocation35_spill] sm:$0xff]  ;;  %v15448_v33 = vld [vmem:[#allocation34_spill] sm:$0xff] }
0x1090   : > { %8286 = vmatmul.mubr.bf16.gmra.mrb[208].mxu1 %v7174_v46  ;;  %v7176_v16 = vpack.c.bf16 %v7096_v34, %v7080_v5  ;;  %v13559_v41 = vmul.f32 0.5, %v13117_v47  ;;  %v13562_v17 = vmul.f32 0.5, %v13140_v13  ;;  %v6600_v23 = vadd.f32 %v15447_v44, %v15446_v37  ;;  %v15450_v13 = vld [vmem:[#allocation29_spill] sm:$0xff]  ;;  %v15451_v5 = vld [vmem:[#allocation30_spill] sm:$0xff] }
0x1091   : > { %15445 = vst [vmem:[#allocation92_spill] sm:$0xff] %v13556_v36  ;;  %v6364_v42 = vmul.f32 %v6236_v39, %v13535_v52  ;;  %v6726_v57 = vmul.f32 0.7978846, %v6598_v35  ;;  %v6742_v32 = vmul.f32 0.7978846, %v6614_v40  ;;  %v6616_v45 = vadd.f32 %v15449_v54, %v15448_v33 }
0x1092   : > { %8351 = vmatmul.mubr.bf16.gmra.mrb[208].mxu0 %v7176_v16  ;;  %v13571_v55 = vadd.f32 %v13362_v26, %v13044_v51  ;;  %v13575_v47 = vadd.f32 %v13364_v3, %v13048_v18  ;;  %v5733_v6 = vadd.f32 %v13399_v29, %v15450_v13  ;;  %v13580_v25 = vmul.f32 0.5, %v15446_v37  ;;  %v13584_v34 = vpop.f32.mrb[180].mxu1  ;;  %v13586_v1 = vpop.f32.mrb[180].mxu0 }
0x1093   : > { %11152 = vtanh.f32 %v6726_v57  ;;  %v6728_v21 = vmul.f32 0.7978846, %v6600_v23  ;;  %v5806_v46 = vadd.f32 %v13401_v7, %v15451_v5  ;;  %v6744_v51 = vmul.f32 0.7978846, %v6616_v45  ;;  %v13596_v7 = vpop.f32.mrb[181].mxu1  ;;  %v13598_v40 = vpop.f32.mrb[181].mxu0 }
0x1094   : > { %11154 = vtanh.f32 %v6742_v32  ;;  %v6235_v18 = vmul.f32 0.044715, %v13571_v55  ;;  %v6237_v3 = vmul.f32 0.044715, %v13575_v47  ;;  %v13591_v29 = vmul.f32 %v6364_v42, %v13535_v52  ;;  %v13603_v44 = vpop.f32.mrb[182].mxu1  ;;  %v13605_v42 = vpop.f32.mrb[182].mxu0 }
0x1095   : > { %v11145_v26 = vpop.eup %11144  ;;  %v13594_v39 = vmul.f32 0.5, %v15448_v33  ;;  %11156 = vtanh.f32 %v6728_v21  ;;  %v6126_v35 = vmul.f32 0.044715, %v5733_v6  ;;  %v13601_v37 = vmul.f32 0.5, %v5733_v6  ;;  %15454 = vst [vmem:[#allocation34_spill] sm:$0xff] %v13603_v44  ;;  %15455 = vst [vmem:[#allocation36_spill] sm:$0xff] %v13605_v42 }
0x1096   : > { %15452 = vst [vmem:[#allocation33_spill] sm:$0xff] %v13591_v29  ;;  %v11147_v16 = vpop.eup %11146  ;;  %v6983_v57 = vadd.f32 1.0, %v11145_v26  ;;  %11158 = vtanh.f32 %v6744_v51  ;;  %v6363_v32 = vmul.f32 %v6235_v18, %v13571_v55  ;;  %v6128_v45 = vmul.f32 0.044715, %v5806_v46  ;;  %v15456_v21 = vld [vmem:[#allocation31_spill] sm:$0xff]  ;;  %v13611_v52 = vpop.f32.mrb[183].mxu1 }
0x1097   : > { %15453 = vst [vmem:[#allocation35_spill] sm:$0xff] %v13601_v37  ;;  %v11149_v23 = vpop.eup %11148  ;;  %v6999_v33 = vadd.f32 1.0, %v11147_v16  ;;  %v6254_v54 = vmul.f32 %v6126_v35, %v5733_v6  ;;  %v13609_v29 = vadd.f32 %v13407_v43, %v15456_v21  ;;  %15457 = vst [vmem:[#allocation29_spill] sm:$0xff] %v13611_v52  ;;  %v13613_v26 = vpop.f32.mrb[183].mxu0  ;;  %v6365_v36 = vmul.f32 %v6237_v3, %v13575_v47  ;;  %v15460_v52 = vld [vmem:[#allocation32_spill] sm:$0xff] }
0x1098   : > { %15458 = vst [vmem:[#allocation30_spill] sm:$0xff] %v13613_v26  ;;  %v11151_v51 = vpop.eup %11150  ;;  %v7111_v18 = vmul.f32 %v6983_v57, %v13461_v4  ;;  %v6985_v37 = vadd.f32 1.0, %v11149_v23  ;;  %v13617_v62 = vmul.f32 0.5, %v5806_v46  ;;  %v6256_v44 = vmul.f32 %v6128_v45, %v5806_v46 }
0x1099   : > { %v7127_v16 = vmul.f32 %v6999_v33, %v13492_v0  ;;  %v7001_v35 = vadd.f32 1.0, %v11151_v51  ;;  %v6382_v42 = vmul.f32 %v6254_v54, %v5733_v6  ;;  %v13622_v15 = vmul.f32 %v6363_v32, %v13571_v55  ;;  %v15466_v51 = vld [vmem:[#allocation38_spill] sm:$0xff] }
0x109a   : > { %15459 = vst [vmem:[#allocation31_spill] sm:$0xff] %v13617_v62  ;;  %v7113_v43 = vmul.f32 %v6985_v37, %v13531_v12  ;;  %v6127_v26 = vmul.f32 0.044715, %v13609_v29  ;;  %v13627_v4 = vadd.f32 %v13409_v19, %v15460_v52  ;;  %v6384_v62 = vmul.f32 %v6256_v44, %v5806_v46  ;;  %v13630_v0 = vpop.f32.mrb[184].mxu1  ;;  %v13632_v33 = vpop.f32.mrb[184].mxu0 }
0x109b   : > { %v7191_v57 = vpack.c.bf16 %v7127_v16, %v7111_v18  ;;  %v7129_v3 = vmul.f32 %v7001_v35, %v13548_v30  ;;  %v6510_v23 = vadd.f32 %v6382_v42, %v5733_v6  ;;  %15462 = vst [vmem:[#allocation93_spill] sm:$0xff] %v13630_v0  ;;  %15463 = vst [vmem:[#allocation94_spill] sm:$0xff] %v13632_v33  ;;  %v13641_v54 = vpop.f32.mrb[185].mxu1  ;;  %v13643_v45 = vpop.f32.mrb[185].mxu0  ;;  %v15467_v18 = vld [vmem:[#allocation48_spill] sm:$0xff] }
0x109c   : > { %15461 = vst [vmem:[#allocation32_spill] sm:$0xff] %v13627_v4  ;;  %v13635_v12 = vmul.f32 %v6365_v36, %v13575_v47  ;;  %v6255_v32 = vmul.f32 %v6127_v26, %v13609_v29  ;;  %v6129_v37 = vmul.f32 0.044715, %v13627_v4  ;;  %v6507_v19 = vadd.f32 %v13233_v27, %v13192_v28  ;;  %15464 = vst [vmem:[#allocation95_spill] sm:$0xff] %v13641_v54  ;;  %v13647_v16 = vpop.f32.mrb[186].mxu1  ;;  %v13649_v26 = vpop.f32.mrb[186].mxu0 }
0x109d   : > { %15465 = vst [vmem:[#allocation96_spill] sm:$0xff] %v13643_v45  ;;  %v11153_v30 = vpop.eup %11152  ;;  %8293 = vmatprep.mubr.bf16.mxu1 %v7191_v57  ;;  %v7193_v6 = vpack.c.bf16 %v7129_v3, %v7113_v43  ;;  %v6638_v44 = vmul.f32 0.7978846, %v6510_v23  ;;  %v6512_v42 = vadd.f32 %v6384_v62, %v5806_v46  ;;  %v6523_v36 = vadd.f32 %v15467_v18, %v15466_v51  ;;  %v13655_v0 = vpop.f32.mrb[187].mxu1 }
0x109e   : > { %15468 = vst [vmem:[#allocation38_spill] sm:$0xff] %v13647_v16  ;;  %15469 = vst [vmem:[#allocation48_spill] sm:$0xff] %v13649_v26  ;;  %v11155_v35 = vpop.eup %11154  ;;  %v6982_v33 = vadd.f32 1.0, %v11153_v30  ;;  %v6257_v27 = vmul.f32 %v6129_v37, %v13627_v4  ;;  %v13653_v54 = vmul.f32 0.5, %v13192_v28  ;;  %v6635_v45 = vmul.f32 0.7978846, %v6507_v19 }
0x109f   : > { %15470 = vst [vmem:[#allocation97_spill] sm:$0xff] %v13655_v0  ;;  %v13657_v43 = vpop.f32.mrb[187].mxu0  ;;  %v11157_v62 = vpop.eup %11156  ;;  %8358 = vmatprep.mubr.bf16.mxu0 %v7193_v6  ;;  %v6998_v46 = vadd.f32 1.0, %v11155_v35  ;;  %11160 = vtanh.f32 %v6638_v44  ;;  %v6640_v57 = vmul.f32 0.7978846, %v6512_v42  ;;  %v13660_v30 = vmul.f32 %v6255_v32, %v13609_v29  ;;  %v15473_v42 = vld [vmem:[#allocation37_spill] sm:$0xff] }
0x10a0   : > { %15471 = vst [vmem:[#allocation98_spill] sm:$0xff] %v13657_v43  ;;  %v6651_v3 = vmul.f32 0.7978846, %v6523_v36  ;;  %v11159_v23 = vpop.eup %11158  ;;  %v6984_v18 = vadd.f32 1.0, %v11157_v62  ;;  %v13663_v37 = vmul.f32 0.5, %v15466_v51  ;;  %11162 = vtanh.f32 %v6635_v45  ;;  %v15474_v36 = vld [vmem:[#allocation46_spill] sm:$0xff] }
0x10a1   : > { %v7110_v28 = vmul.f32 %v6982_v33, %v13559_v41  ;;  %v7126_v19 = vmul.f32 %v6998_v46, %v13562_v17  ;;  %v7000_v43 = vadd.f32 1.0, %v11159_v23  ;;  %11164 = vtanh.f32 %v6640_v57  ;;  %v15475_v62 = vld [vmem:[#allocation39_spill] sm:$0xff]  ;;  %v15479_v57 = vld [vmem:[#allocation69_spill] sm:$0xff] }
0x10a2   : > { %v7112_v6 = vmul.f32 %v6984_v18, %v13580_v25  ;;  %v13669_v44 = vmul.f32 %v6257_v27, %v13627_v4  ;;  %11166 = vtanh.f32 %v6651_v3  ;;  %v6509_v32 = vadd.f32 %v15474_v36, %v15473_v42  ;;  %v15476_v45 = vld [vmem:[#allocation51_spill] sm:$0xff]  ;;  %v13678_v17 = vpop.f32.mrb[188].mxu1  ;;  %v13680_v33 = vpop.f32.mrb[188].mxu0  ;;  %v15546_v4 = vld [vmem:[#allocation73_spill] sm:$0xff] }
0x10a3   : > { %v7190_v35 = vpack.c.bf16 %v7126_v19, %v7110_v28  ;;  %v7128_v51 = vmul.f32 %v7000_v43, %v13594_v39  ;;  %v6525_v0 = vadd.f32 %v15476_v45, %v15475_v62  ;;  %v5737_v41 = vadd.f32 %v13423_v14, %v15450_v13  ;;  %15477 = vst [vmem:[#allocation37_spill] sm:$0xff] %v13678_v17  ;;  %v13686_v23 = vpop.f32.mrb[189].mxu1  ;;  %v13688_v39 = vpop.f32.mrb[189].mxu0 }
0x10a4   : > { %15472 = vst [vmem:[#allocation99_spill] sm:$0xff] %v13669_v44  ;;  %15478 = vst [vmem:[#allocation46_spill] sm:$0xff] %v13680_v33  ;;  %v6637_v25 = vmul.f32 0.7978846, %v6509_v32  ;;  %v5810_v27 = vadd.f32 %v13425_v49, %v15451_v5  ;;  %v6890_v46 = vadd.f32 1.0, %v13307_v63  ;;  %v6906_v3 = vadd.f32 1.0, %v15479_v57 }
0x10a5   : > { %15480 = vst [vmem:[#allocation39_spill] sm:$0xff] %v13686_v23  ;;  %15481 = vst [vmem:[#allocation51_spill] sm:$0xff] %v13688_v39  ;;  %8294 = vmatmul.mubr.bf16.gmra.mrb[212].mxu1 %v7190_v35  ;;  %v7192_v43 = vpack.c.bf16 %v7128_v51, %v7112_v6  ;;  %v13691_v14 = vmul.f32 0.5, %v15473_v42  ;;  %v6653_v18 = vmul.f32 0.7978846, %v6525_v0  ;;  %v13693_v19 = vpop.f32.mrb[190].mxu1 }
0x10a6   : > { %v6142_v28 = vmul.f32 0.044715, %v5737_v41  ;;  %15482 = vst [vmem:[#allocation69_spill] sm:$0xff] %v13693_v19  ;;  %v13696_v36 = vmul.f32 0.5, %v15475_v62  ;;  %11168 = vtanh.f32 %v6637_v25  ;;  %v6144_v63 = vmul.f32 0.044715, %v5810_v27 }
0x10a7   : > { %v15483_v49 = vld [vmem:[#allocation40_spill] sm:$0xff]  ;;  %v13701_v45 = vpop.f32.mrb[190].mxu0  ;;  %8359 = vmatmul.mubr.bf16.gmra.mrb[212].mxu0 %v7192_v43  ;;  %11170 = vtanh.f32 %v6653_v18  ;;  %v15485_v35 = vld [vmem:[#allocation42_spill] sm:$0xff]  ;;  %v13707_v57 = vpop.f32.mrb[191].mxu1  ;;  %v15489_v25 = vld [vmem:[#allocation75_spill] sm:$0xff] }
0x10a8   : > { %v13699_v32 = vmul.f32 %v6890_v46, %v15483_v49  ;;  %15484 = vst [vmem:[#allocation40_spill] sm:$0xff] %v13701_v45  ;;  %v6270_v6 = vmul.f32 %v6142_v28, %v5737_v41  ;;  %v13704_v42 = vmul.f32 %v6906_v3, %v15485_v35  ;;  %v15486_v0 = vld [vmem:[#allocation64_spill] sm:$0xff]  ;;  %15487 = vst [vmem:[#allocation42_spill] sm:$0xff] %v13707_v57  ;;  %v13709_v19 = vpop.f32.mrb[191].mxu0  ;;  %v6908_v39 = vadd.f32 1.0, %v15489_v25  ;;  %v15490_v46 = vld [vmem:[#allocation78_spill] sm:$0xff] }
0x10a9   : > { %v6892_v51 = vadd.f32 1.0, %v15486_v0  ;;  %15488 = vst [vmem:[#allocation64_spill] sm:$0xff] %v13709_v19  ;;  %v6272_v62 = vmul.f32 %v6144_v63, %v5810_v27  ;;  %v13714_v49 = vadd.f32 %v15490_v46, %v15456_v21  ;;  %v15491_v43 = vld [vmem:[#allocation79_spill] sm:$0xff]  ;;  %v13720_v28 = vpop.eup %11160  ;;  %v15494_v0 = vld [vmem:[#allocation41_spill] sm:$0xff]  ;;  %v15495_v63 = vld [vmem:[#allocation84_spill] sm:$0xff] }
0x10aa   : > { %v13718_v18 = vadd.f32 %v15491_v43, %v15460_v52  ;;  %15493 = vst [vmem:[#allocation78_spill] sm:$0xff] %v13720_v28  ;;  %v6398_v3 = vmul.f32 %v6270_v6, %v5737_v41  ;;  %v7146_v35 = vpack.c.bf16 %v13704_v42, %v13699_v32  ;;  %v13729_v25 = vadd.f32 %v15495_v63, %v15450_v13  ;;  %v11163_v19 = vpop.eup %11162  ;;  %v15497_v45 = vld [vmem:[#allocation43_spill] sm:$0xff] }
0x10ab   : > { %v13725_v57 = vmul.f32 %v6892_v51, %v15494_v0  ;;  %v6400_v46 = vmul.f32 %v6272_v62, %v5810_v27  ;;  %v13732_v23 = vmul.f32 %v6908_v39, %v15497_v45  ;;  %v6143_v43 = vmul.f32 0.044715, %v13714_v49  ;;  %v13736_v6 = vpop.eup %11164  ;;  %v13743_v0 = vpop.f32.mrb[192].mxu1 }
0x10ac   : > { %15492 = vst [vmem:[#allocation75_spill] sm:$0xff] %v13718_v18  ;;  %15496 = vst [vmem:[#allocation79_spill] sm:$0xff] %v13729_v25  ;;  %v6145_v33 = vmul.f32 0.044715, %v13718_v18  ;;  %v6891_v17 = vadd.f32 1.0, %v11163_v19  ;;  %v6526_v32 = vadd.f32 %v6398_v3, %v5737_v41  ;;  %v13741_v51 = vadd.f32 %v13465_v31, %v15451_v5  ;;  %v13745_v62 = vpop.f32.mrb[192].mxu0  ;;  %v11167_v39 = vpop.eup %11166 }
0x10ad   : > { %15498 = vst [vmem:[#allocation41_spill] sm:$0xff] %v13736_v6  ;;  %v6158_v42 = vmul.f32 0.044715, %v13729_v25  ;;  %15500 = vst [vmem:[#allocation43_spill] sm:$0xff] %v13743_v0  ;;  %v6528_v45 = vadd.f32 %v6400_v46, %v5810_v27  ;;  %v6271_v28 = vmul.f32 %v6143_v43, %v13714_v49  ;;  %v6907_v3 = vadd.f32 1.0, %v11167_v39  ;;  %v13754_v16 = vpop.f32.mrb[193].mxu1 }
0x10ae   : > { %15499 = vst [vmem:[#allocation84_spill] sm:$0xff] %v13741_v51  ;;  %15501 = vst [vmem:[#allocation100_spill] sm:$0xff] %v13745_v62  ;;  %v6273_v19 = vmul.f32 %v6145_v33, %v13718_v18  ;;  %v13751_v6 = vmul.f32 0.5, %v5737_v41  ;;  %v6654_v26 = vmul.f32 0.7978846, %v6526_v32  ;;  %v13756_v0 = vpop.f32.mrb[193].mxu0  ;;  %v7019_v62 = vmul.f32 %v6891_v17, %v13653_v54 }
0x10af   : > { %v6286_v31 = vmul.f32 %v6158_v42, %v13729_v25  ;;  %15503 = vst [vmem:[#allocation102_spill] sm:$0xff] %v13754_v16  ;;  %15504 = vst [vmem:[#allocation103_spill] sm:$0xff] %v13756_v0  ;;  %v13759_v46 = vmul.f32 0.5, %v5810_v27  ;;  %v6656_v63 = vmul.f32 0.7978846, %v6528_v45  ;;  %v7035_v33 = vmul.f32 %v6907_v3, %v13663_v37  ;;  %v15509_v37 = vld [vmem:[#allocation86_spill] sm:$0xff] }
0x10b0   : > { %15502 = vst [vmem:[#allocation101_spill] sm:$0xff] %v13751_v6  ;;  %v6160_v43 = vmul.f32 0.044715, %v13741_v51  ;;  %v13764_v41 = vmul.f32 %v6271_v28, %v13714_v49  ;;  %v13767_v32 = vmul.f32 %v6273_v19, %v13718_v18  ;;  %v13771_v42 = vadd.f32 %v13472_v59, %v15456_v21  ;;  %v11169_v54 = vpop.eup %11168  ;;  %v10882_v19 = vld [vmem:[%s11648_s18 + $0x200] sm:$0xff]   ;;  %v10884_v16 = vld [vmem:[%s11648_s18 + $0x248] sm:$0xff]  }
0x10b1   : > { %15505 = vst [vmem:[#allocation104_spill] sm:$0xff] %v13759_v46  ;;  %11172 = vtanh.f32 %v6654_v26  ;;  %v13774_v17 = vmul.f32 %v6286_v31, %v13729_v25  ;;  %v13779_v39 = vadd.f32 %v15509_v37, %v15460_v52  ;;  %v11171_v28 = vpop.eup %11170  ;;  %v7147_v45 = vpack.c.bf16 %v7035_v33, %v7019_v62  ;;  %v15511_v31 = vld [vmem:[#allocation47_spill] sm:$0xff] }
0x10b2   : > { %15506 = vst [vmem:[#allocation105_spill] sm:$0xff] %v13767_v32  ;;  %15507 = vst [vmem:[#allocation106_spill] sm:$0xff] %v13771_v42  ;;  %v6288_v27 = vmul.f32 %v6160_v43, %v13741_v51  ;;  %v6893_v3 = vadd.f32 1.0, %v11169_v54  ;;  %11174 = vtanh.f32 %v6656_v63  ;;  %v6159_v0 = vmul.f32 0.044715, %v13771_v42  ;;  %v15512_v43 = vld [vmem:[#allocation59_spill] sm:$0xff] }
0x10b3   : > { %15508 = vst [vmem:[#allocation107_spill] sm:$0xff] %v13774_v17  ;;  %15510 = vst [vmem:[#allocation86_spill] sm:$0xff] %v13779_v39  ;;  %v6909_v59 = vadd.f32 1.0, %v11171_v28  ;;  %v6161_v26 = vmul.f32 0.044715, %v13779_v39  ;;  %v13786_v17 = vmul.f32 0.5, %v15511_v31  ;;  %v6539_v25 = vadd.f32 %v15512_v43, %v15511_v31  ;;  %8399 = vmatprep.mubr.bf16.mxu1 %v7147_v45 }
0x10b4   : > { %v7021_v37 = vmul.f32 %v6893_v3, %v13691_v14  ;;  %v13792_v62 = vmul.f32 %v6288_v27, %v13741_v51  ;;  %v15514_v63 = vld [vmem:[#allocation54_spill] sm:$0xff]  ;;  %8400 = vmatmul.mubr.bf16.vlgmr.msra.gmra.mrb[216].mxu1 %v7146_v35  ;;  %v6287_v6 = vmul.f32 %v6159_v0, %v13771_v42  ;;  %v10886_v3 = vld [vmem:[%s11648_s18 + $0x208] sm:$0xff]  }
0x10b5   : > { %v13795_v33 = vmul.f32 0.5, %v15514_v63  ;;  %v15515_v54 = vld [vmem:[#allocation66_spill] sm:$0xff]  ;;  %v7037_v46 = vmul.f32 %v6909_v59, %v13696_v36  ;;  %v6289_v45 = vmul.f32 %v6161_v26, %v13779_v39  ;;  %v6667_v14 = vmul.f32 0.7978846, %v6539_v25  ;;  %10168 = vmatpush3.bf16.msra.mxu1 %v10882_v19  ;;  %v15516_v31 = vld [vmem:[#allocation49_spill] sm:$0xff]  ;;  %v10883_v59 = vld [vmem:[%s11648_s18 + $0x280] sm:$0xff]  }
0x10b6   : > { %15513 = vst [vmem:[#allocation47_spill] sm:$0xff] %v13792_v62  ;;  %v6555_v28 = vadd.f32 %v15515_v54, %v15514_v63  ;;  %v13804_v43 = vmul.f32 0.5, %v15516_v31  ;;  %v15517_v62 = vld [vmem:[#allocation61_spill] sm:$0xff]  ;;  %v15518_v63 = vld [vmem:[#allocation55_spill] sm:$0xff]  ;;  %10169 = vmatprep.subr.bf16.mxu1 %v10884_v16  ;;  %v13816_v25 = vadd.f32 %v13483_v8, %v15450_v13  ;;  %v13824_v16 = vpop.f32.mrb[194].mxu1 }
0x10b7   : > { %v6541_v51 = vadd.f32 %v15517_v62, %v15516_v31  ;;  %v15519_v54 = vld [vmem:[#allocation67_spill] sm:$0xff]  ;;  %v7149_v35 = vpack.c.bf16 %v7037_v46, %v7021_v37  ;;  %11176 = vtanh.f32 %v6667_v14  ;;  %v13812_v0 = vmul.f32 0.5, %v15518_v63  ;;  %v10888_v19 = vld [vmem:[%s11648_s18 + $0x250] sm:$0xff]   ;;  %v10885_v26 = vld [vmem:[%s11648_s18 + $0x2c8] sm:$0xff]   ;;  %15522 = vst [vmem:[#allocation66_spill] sm:$0xff] %v13824_v16 }
0x10b8   : > { %v6683_v27 = vmul.f32 0.7978846, %v6555_v28  ;;  %v6557_v36 = vadd.f32 %v15519_v54, %v15518_v63  ;;  %15520 = vst [vmem:[#allocation59_spill] sm:$0xff] %v13816_v25  ;;  %v13822_v31 = vadd.f32 %v13485_v10, %v15451_v5  ;;  %v13827_v46 = vmul.f32 %v6287_v6, %v13771_v42  ;;  %v15525_v14 = vld [vmem:[#allocation44_spill] sm:$0xff]  ;;  %v15528_v54 = vld [vmem:[#allocation50_spill] sm:$0xff] }
0x10b9   : > { %v6669_v28 = vmul.f32 0.7978846, %v6541_v51  ;;  %8464 = vmatprep.mubr.bf16.mxu0 %v7149_v35  ;;  %v13830_v8 = vmul.f32 %v6289_v45, %v13779_v39  ;;  %v6174_v37 = vmul.f32 0.044715, %v13816_v25  ;;  %v15527_v63 = vpack.c.bf16 %v13732_v23, %v13725_v57  ;;  %10170 = vmatpush3.bf16.msra.mxu1 %v10886_v3  ;;  %v15529_v45 = vld [vmem:[#allocation62_spill] sm:$0xff]  ;;  %v15531_v3 = vld [vmem:[#allocation45_spill] sm:$0xff] }
0x10ba   : > { %11178 = vtanh.f32 %v6683_v27  ;;  %v6685_v62 = vmul.f32 0.7978846, %v6557_v36  ;;  %15521 = vst [vmem:[#allocation54_spill] sm:$0xff] %v13822_v31  ;;  %15523 = vst [vmem:[#allocation49_spill] sm:$0xff] %v13827_v46  ;;  %v15526_v27 = vld [vmem:[#allocation53_spill] sm:$0xff]  ;;  %v13840_v6 = vmul.f32 0.5, %v15525_v14  ;;  %v6554_v36 = vadd.f32 %v15529_v45, %v15528_v54  ;;  %10171 = vmatprep.subr.bf16.mxu1 %v10888_v19 }
0x10bb   : > { %15524 = vst [vmem:[#allocation61_spill] sm:$0xff] %v13830_v8  ;;  %v6538_v51 = vadd.f32 %v15526_v27, %v15525_v14  ;;  %8465 = vmatmul.mubr.bf16.vlgmr.msra.gmra.mrb[216].mxu0 %v15527_v63  ;;  %11180 = vtanh.f32 %v6669_v28  ;;  %v6176_v10 = vmul.f32 0.044715, %v13822_v31  ;;  %v10890_v35 = vld [vmem:[%s11648_s18 + $0x210] sm:$0xff]   ;;  %v13845_v16 = vpop.eup %11172  ;;  %v10887_v27 = vld [vmem:[%s11648_s18 + $0x288] sm:$0xff]   ;;  %v13849_v23 = vmul.f32 0.5, %v15528_v54 }
0x10bc   : > { %15530 = vst [vmem:[#allocation55_spill] sm:$0xff] %v13845_v16  ;;  %10208 = vmatpush3.bf16.msra.mxu0 %v10883_v59  ;;  %11182 = vtanh.f32 %v6685_v62  ;;  %v13852_v28 = vmul.f32 0.5, %v15531_v3  ;;  %v10892_v14 = vld [vmem:[%s11648_s18 + $0x258] sm:$0xff]   ;;  %v13855_v63 = vpop.eup %11174  ;;  %v6302_v45 = vmul.f32 %v6174_v37, %v13816_v25  ;;  %v6682_v8 = vmul.f32 0.7978846, %v6554_v36  ;;  %v15533_v59 = vld [vmem:[#allocation57_spill] sm:$0xff] }
0x10bd   : > { %v6666_v57 = vmul.f32 0.7978846, %v6538_v51  ;;  %15532 = vst [vmem:[#allocation67_spill] sm:$0xff] %v13855_v63  ;;  %10209 = vmatprep.subr.bf16.mxu0 %v10885_v26  ;;  %v6540_v39 = vadd.f32 %v15533_v59, %v15531_v3  ;;  %v15534_v62 = vld [vmem:[#allocation52_spill] sm:$0xff]  ;;  %v15535_v46 = vld [vmem:[#allocation65_spill] sm:$0xff]  ;;  %v6304_v51 = vmul.f32 %v6176_v10, %v13822_v31  ;;  %v13866_v19 = vadd.f32 %v13494_v22, %v15456_v21  ;;  %v10894_v37 = vld [vmem:[%s11648_s18 + $0x218] sm:$0xff]  }
0x10be   : > { %v6556_v54 = vadd.f32 %v15535_v46, %v15534_v62  ;;  %v10889_v42 = vld [vmem:[%s11648_s18 + $0x2d0] sm:$0xff]   ;;  %v13870_v26 = vadd.f32 %v13496_v24, %v15460_v52  ;;  %v13874_v36 = vmul.f32 0.5, %v15534_v62  ;;  %10172 = vmatpush3.bf16.msra.mxu1 %v10890_v35  ;;  %v13876_v10 = vpop.f32.mrb[194].mxu0  ;;  %v13883_v24 = vadd.f32 %v13519_v20, %v15450_v13  ;;  %v10897_v16 = vld [vmem:[%s11648_s18 + $0x2e0] sm:$0xff]  }
0x10bf   : > { %11184 = vtanh.f32 %v6666_v57  ;;  %15536 = vst [vmem:[#allocation44_spill] sm:$0xff] %v13866_v19  ;;  %v6668_v46 = vmul.f32 0.7978846, %v6540_v39  ;;  %15537 = vst [vmem:[#allocation53_spill] sm:$0xff] %v13876_v10  ;;  %v6175_v22 = vmul.f32 0.044715, %v13866_v19  ;;  %10173 = vmatprep.subr.bf16.mxu1 %v10892_v14  ;;  %v13891_v35 = vmul.f32 %v6302_v45, %v13816_v25 }
0x10c0   : > { %11186 = vtanh.f32 %v6682_v8  ;;  %v6684_v3 = vmul.f32 0.7978846, %v6556_v54  ;;  %10210 = vmatpush3.bf16.msra.mxu0 %v10887_v27  ;;  %v6177_v57 = vmul.f32 0.044715, %v13870_v26  ;;  %v10891_v59 = vld [vmem:[%s11648_s18 + $0x290] sm:$0xff]   ;;  %v13887_v8 = vadd.f32 %v13521_v2, %v15451_v5  ;;  %v10896_v39 = vld [vmem:[%s11648_s18 + $0x260] sm:$0xff]  }
0x10c1   : > { %15538 = vst [vmem:[#allocation50_spill] sm:$0xff] %v13891_v35  ;;  %11188 = vtanh.f32 %v6668_v46  ;;  %10211 = vmatprep.subr.bf16.mxu0 %v10889_v42  ;;  %v10893_v27 = vld [vmem:[%s11648_s18 + $0x2d8] sm:$0xff]   ;;  %v13896_v62 = vadd.f32 %v13525_v48, %v15456_v21  ;;  %v13900_v20 = vadd.f32 %v13527_v56, %v15460_v52  ;;  %v13902_v14 = vpop.f32.mrb[195].mxu1  ;;  %v13904_v2 = vpop.f32.mrb[195].mxu0  ;;  %v13907_v45 = vmul.f32 %v6304_v51, %v13822_v31  ;;  %v10898_v51 = vld [vmem:[%s11648_s18 + $0x220] sm:$0xff]  }
0x10c2   : > { %15539 = vst [vmem:[#allocation62_spill] sm:$0xff] %v13902_v14  ;;  %15540 = vst [vmem:[#allocation45_spill] sm:$0xff] %v13904_v2  ;;  %v11177_v54 = vpop.eup %11176  ;;  %11190 = vtanh.f32 %v6684_v3  ;;  %v6303_v42 = vmul.f32 %v6175_v22, %v13866_v19  ;;  %v6190_v48 = vmul.f32 0.044715, %v13883_v24  ;;  %v13911_v46 = vpop.f32.mrb[196].mxu1  ;;  %v6305_v35 = vmul.f32 %v6177_v57, %v13870_v26  ;;  %10174 = vmatpush3.bf16.msra.mxu1 %v10894_v37  ;;  %v10895_v3 = vld [vmem:[%s11648_s18 + $0x298] sm:$0xff]  }
0x10c3   : > { %15541 = vst [vmem:[#allocation57_spill] sm:$0xff] %v13907_v45  ;;  %15542 = vst [vmem:[#allocation52_spill] sm:$0xff] %v13911_v46  ;;  %v6923_v56 = vadd.f32 1.0, %v11177_v54  ;;  %v6192_v2 = vmul.f32 0.044715, %v13887_v8  ;;  %v15543_v31 = vld [vmem:[#allocation60_spill] sm:$0xff]  ;;  %10175 = vmatprep.subr.bf16.mxu1 %v10896_v39 }
0x10c4   : > { %v11179_v10 = vpop.eup %11178  ;;  %v6191_v14 = vmul.f32 0.044715, %v13896_v62  ;;  %10212 = vmatpush3.bf16.msra.mxu0 %v10891_v59  ;;  %v6318_v22 = vmul.f32 %v6190_v48, %v13883_v24  ;;  %v13920_v25 = vmul.f32 0.5, %v15543_v31  ;;  %v15544_v46 = vld [vmem:[#allocation76_spill] sm:$0xff]  ;;  %v13927_v54 = vmul.f32 %v6303_v42, %v13866_v19 }
0x10c5   : > { %v6939_v45 = vadd.f32 1.0, %v11179_v10  ;;  %v13923_v63 = vmul.f32 0.5, %v15544_v46  ;;  %v10900_v57 = vld [vmem:[%s11648_s18 + $0x268] sm:$0xff]   ;;  %v11181_v37 = vpop.eup %11180  ;;  %10213 = vmatprep.subr.bf16.mxu0 %v10893_v27  ;;  %v6320_v10 = vmul.f32 %v6192_v2, %v13887_v8  ;;  %v6193_v48 = vmul.f32 0.044715, %v13900_v20 }
0x10c6   : > { %15545 = vst [vmem:[#allocation65_spill] sm:$0xff] %v13927_v54  ;;  %v6319_v59 = vmul.f32 %v6191_v14, %v13896_v62  ;;  %v11183_v32 = vpop.eup %11182  ;;  %v7051_v44 = vmul.f32 %v6923_v56, %v13786_v17  ;;  %v6925_v18 = vadd.f32 1.0, %v11181_v37  ;;  %v6571_v42 = vadd.f32 %v15546_v4, %v15543_v31  ;;  %10176 = vmatpush3.bf16.msra.mxu1 %v10898_v51  ;;  %v10902_v19 = vld [vmem:[%s11648_s18 + $0x228] sm:$0xff]  }
0x10c7   : > { %v7067_v39 = vmul.f32 %v6939_v45, %v13795_v33  ;;  %v6941_v54 = vadd.f32 1.0, %v11183_v32  ;;  %v13938_v27 = vmul.f32 %v6305_v35, %v13870_v26  ;;  %v13941_v14 = vmul.f32 %v6318_v22, %v13883_v24  ;;  %v15547_v4 = vld [vmem:[#allocation85_spill] sm:$0xff]  ;;  %v10899_v35 = vld [vmem:[%s11648_s18 + $0x2a0] sm:$0xff]   ;;  %10177 = vmatprep.subr.bf16.mxu1 %v10900_v57 }
0x10c8   : > { %v6321_v2 = vmul.f32 %v6193_v48, %v13900_v20  ;;  %10214 = vmatpush3.bf16.msra.mxu0 %v10895_v3  ;;  %v13946_v33 = vmul.f32 %v6320_v10, %v13887_v8  ;;  %v6587_v32 = vadd.f32 %v15547_v4, %v15544_v46  ;;  %v6699_v31 = vmul.f32 0.7978846, %v6571_v42  ;;  %v10904_v45 = vld [vmem:[%s11648_s18 + $0x270] sm:$0xff]   ;;  %v10901_v3 = vld [vmem:[%s11648_s18 + $0x2e8] sm:$0xff]   ;;  %v13958_v10 = vpop.f32.mrb[196].mxu0 }
0x10c9   : > { %v11185_v17 = vpop.eup %11184  ;;  %v7163_v56 = vpack.c.bf16 %v7067_v39, %v7051_v44  ;;  %v7053_v37 = vmul.f32 %v6925_v18, %v13804_v43  ;;  %v7069_v51 = vmul.f32 %v6941_v54, %v13812_v0  ;;  %v13955_v44 = vmul.f32 %v6319_v59, %v13896_v62  ;;  %10215 = vmatprep.subr.bf16.mxu0 %v10897_v16  ;;  %v15548_v54 = vld [vmem:[#allocation63_spill] sm:$0xff]  ;;  %v15549_v59 = vld [vmem:[#allocation74_spill] sm:$0xff] }
0x10ca   : > { %v11187_v22 = vpop.eup %11186  ;;  %v6922_v48 = vadd.f32 1.0, %v11185_v17  ;;  %v13961_v39 = vmul.f32 %v6321_v2, %v13900_v20  ;;  %v6715_v57 = vmul.f32 0.7978846, %v6587_v32  ;;  %11192 = vtanh.f32 %v6699_v31  ;;  %10178 = vmatpush3.bf16.msra.mxu1 %v10902_v19  ;;  %v10906_v17 = vld [vmem:[%s11648_s18 + $0x230] sm:$0xff]   ;;  %v13971_v2 = vpop.f32.mrb[197].mxu0 }
0x10cb   : > { %8407 = vmatprep.mubr.bf16.mxu1 %v7163_v56  ;;  %v6938_v46 = vadd.f32 1.0, %v11187_v22  ;;  %v11189_v18 = vpop.eup %11188  ;;  %v7165_v43 = vpack.c.bf16 %v7069_v51, %v7053_v37  ;;  %v6573_v42 = vadd.f32 %v15549_v59, %v15548_v54  ;;  %v6589_v16 = vadd.f32 %v13478_v50, %v13421_v60  ;;  %v13969_v56 = vpop.f32.mrb[197].mxu1  ;;  %v10903_v22 = vld [vmem:[%s11648_s18 + $0x2a8] sm:$0xff]   ;;  %10179 = vmatprep.subr.bf16.mxu1 %v10904_v45  ;;  %v10905_v50 = vld [vmem:[%s11648_s18 + $0x2f0] sm:$0xff]  }
0x10cc   : > { %v7050_v0 = vmul.f32 %v6922_v48, %v13840_v6  ;;  %v11191_v4 = vpop.eup %11190  ;;  %v6924_v31 = vadd.f32 1.0, %v11189_v18  ;;  %11194 = vtanh.f32 %v6715_v57  ;;  %v13976_v6 = vadd.f32 %v13537_v38, %v15450_v13  ;;  %10216 = vmatpush3.bf16.msra.mxu0 %v10899_v35  ;;  %v15553_v59 = vld [vmem:[#allocation82_spill] sm:$0xff] }
0x10cd   : > { %v7066_v32 = vmul.f32 %v6938_v46, %v13849_v23  ;;  %8472 = vmatprep.mubr.bf16.mxu0 %v7165_v43  ;;  %v6940_v19 = vadd.f32 1.0, %v11191_v4  ;;  %v6701_v37 = vmul.f32 0.7978846, %v6573_v42  ;;  %v6717_v51 = vmul.f32 0.7978846, %v6589_v16  ;;  %10217 = vmatprep.subr.bf16.mxu0 %v10901_v3  ;;  %v10908_v23 = vld [vmem:[%s11648_s18 + $0x278] sm:$0xff]  }
0x10ce   : > { %v13982_v48 = vadd.f32 %v13539_v9, %v15451_v5  ;;  %v13986_v38 = vmul.f32 0.5, %v15548_v54  ;;  %v13989_v35 = vmul.f32 0.5, %v13421_v60  ;;  %v6206_v45 = vmul.f32 0.044715, %v13976_v6  ;;  %10180 = vmatpush3.bf16.msra.mxu1 %v10906_v17  ;;  %v15550_v3 = vld [vmem:[#allocation56_spill] sm:$0xff]  ;;  %v15552_v54 = vld [vmem:[#allocation71_spill] sm:$0xff] }
0x10cf   : > { %v7162_v46 = vpack.c.bf16 %v7066_v32, %v7050_v0  ;;  %v7052_v57 = vmul.f32 %v6924_v31, %v13852_v28  ;;  %v7068_v18 = vmul.f32 %v6940_v19, %v13874_v36  ;;  %11196 = vtanh.f32 %v6701_v37  ;;  %v15551_v60 = vld [vmem:[#allocation68_spill] sm:$0xff]  ;;  %v10907_v28 = vld [vmem:[%s11648_s18 + $0x2b0] sm:$0xff]   ;;  %v10910_v36 = vld [vmem:[%s11648_s18 + $0x238] sm:$0xff]   ;;  %10181 = vmatprep.subr.bf16.mxu1 %v10908_v23 }
0x10d0   : > { %v6208_v9 = vmul.f32 0.044715, %v13982_v48  ;;  %11198 = vtanh.f32 %v6717_v51  ;;  %v13996_v43 = vmul.f32 0.5, %v15550_v3  ;;  %v6570_v0 = vadd.f32 %v15551_v60, %v15550_v3  ;;  %10218 = vmatpush3.bf16.msra.mxu0 %v10903_v22  ;;  %v10909_v31 = vld [vmem:[%s11648_s18 + $0x2f8] sm:$0xff]   ;;  %v10912_v19 = vld [vmem:[%s11648_s18 + $0x340] sm:$0xff]  }
0x10d1   : > { %8408 = vmatmul.mubr.bf16.gmra.mrb[220].mxu1 %v7162_v46  ;;  %v6586_v42 = vadd.f32 %v15553_v59, %v15552_v54  ;;  %v7164_v16 = vpack.c.bf16 %v7068_v18, %v7052_v57  ;;  %v6334_v4 = vmul.f32 %v6206_v45, %v13976_v6  ;;  %v14007_v32 = vmul.f32 0.5, %v15552_v54  ;;  %10219 = vmatprep.subr.bf16.mxu0 %v10905_v50  ;;  %v15554_v46 = vld [vmem:[#allocation58_spill] sm:$0xff]  ;;  %v15556_v45 = vld [vmem:[#allocation72_spill] sm:$0xff]  ;;  %v15557_v3 = vld [vmem:[#allocation83_spill] sm:$0xff] }
0x10d2   : > { %v6336_v17 = vmul.f32 %v6208_v9, %v13982_v48  ;;  %v6698_v37 = vmul.f32 0.7978846, %v6570_v0  ;;  %v14012_v22 = vmul.f32 0.5, %v15554_v46  ;;  %v15555_v57 = vld [vmem:[#allocation70_spill] sm:$0xff]  ;;  %v14017_v9 = vmul.f32 0.5, %v15556_v45  ;;  %10182 = vmatpush3.bf16.msra.mxu1 %v10910_v36 }
0x10d3   : > { %v6714_v51 = vmul.f32 0.7978846, %v6586_v42  ;;  %v6572_v18 = vadd.f32 %v15555_v57, %v15554_v46  ;;  %8473 = vmatmul.mubr.bf16.gmra.mrb[220].mxu0 %v7164_v16  ;;  %v6588_v50 = vadd.f32 %v15557_v3, %v15556_v45  ;;  %v14023_v23 = vadd.f32 %v13543_v61, %v15456_v21  ;;  %v10911_v16 = vld [vmem:[%s11648_s18 + $0x2b8] sm:$0xff]   ;;  %v10913_v61 = vld [vmem:[%s11648_s18 + $0x3c0] sm:$0xff]   ;;  %10247 = vmatprep.subr.bf16.mxu1 %v10912_v19 }
0x10d4   : > { %v14027_v60 = vadd.f32 %v13545_v53, %v15460_v52  ;;  %v11193_v0 = vpop.eup %11192  ;;  %11200 = vtanh.f32 %v6698_v37  ;;  %v14031_v59 = vadd.f32 %v13584_v34, %v15450_v13  ;;  %v14035_v42 = vadd.f32 %v13586_v1, %v15451_v5  ;;  %10220 = vmatpush3.bf16.msra.mxu0 %v10907_v28  ;;  %v14040_v37 = vpop.f32.mrb[198].mxu1 }
0x10d5   : > { %v6700_v54 = vmul.f32 0.7978846, %v6572_v18  ;;  %v6955_v46 = vadd.f32 1.0, %v11193_v0  ;;  %11202 = vtanh.f32 %v6714_v51  ;;  %v6716_v57 = vmul.f32 0.7978846, %v6588_v50  ;;  %10221 = vmatprep.subr.bf16.mxu0 %v10909_v31  ;;  %15560 = vst [vmem:[#allocation73_spill] sm:$0xff] %v14040_v37 }
0x10d6   : > { %15558 = vst [vmem:[#allocation60_spill] sm:$0xff] %v14031_v59  ;;  %15559 = vst [vmem:[#allocation76_spill] sm:$0xff] %v14035_v42  ;;  %v6207_v53 = vmul.f32 0.044715, %v14023_v23  ;;  %v11195_v18 = vpop.eup %11194  ;;  %v6209_v34 = vmul.f32 0.044715, %v14027_v60  ;;  %v14046_v45 = vmul.f32 %v6334_v4, %v13976_v6  ;;  %v14054_v50 = vadd.f32 %v13596_v7, %v15456_v21 }
0x10d7   : > { %11204 = vtanh.f32 %v6700_v54  ;;  %v6222_v1 = vmul.f32 0.044715, %v14031_v59  ;;  %v6224_v28 = vmul.f32 0.044715, %v14035_v42  ;;  %v6971_v36 = vadd.f32 1.0, %v11195_v18 }
0x10d8   : > { %11206 = vtanh.f32 %v6716_v57  ;;  %v6335_v51 = vmul.f32 %v6207_v53, %v14023_v23  ;;  %v6337_v31 = vmul.f32 %v6209_v34, %v14027_v60  ;;  %10222 = vmatpush3.bf16.msra.mxu0 %v10911_v16  ;;  %v7083_v54 = vmul.f32 %v6955_v46, %v13920_v25 }
0x10d9   : > { %v6350_v19 = vmul.f32 %v6222_v1, %v14031_v59  ;;  %v6352_v3 = vmul.f32 %v6224_v28, %v14035_v42  ;;  %v11197_v0 = vpop.eup %11196  ;;  %v7099_v4 = vmul.f32 %v6971_v36, %v13923_v63  ;;  %v14059_v57 = vmul.f32 %v6336_v17, %v13982_v48  ;;  %10287 = vmatprep.subr.bf16.mxu0 %v10913_v61 }
0x10da   : > { %v14063_v53 = vadd.f32 %v13598_v40, %v15460_v52  ;;  %v11199_v18 = vpop.eup %11198  ;;  %v6957_v34 = vadd.f32 1.0, %v11197_v0  ;;  %v14066_v1 = vmul.f32 %v6335_v51, %v14023_v23  ;;  %v14069_v7 = vmul.f32 %v6337_v31, %v14027_v60  ;;  %v14076_v40 = vpop.f32.mrb[198].mxu0 }
0x10db   : > { %v14072_v25 = vmul.f32 0.5, %v13442_v58  ;;  %v7179_v63 = vpack.c.bf16 %v7099_v4, %v7083_v54  ;;  %v6973_v16 = vadd.f32 1.0, %v11199_v18  ;;  %v6223_v17 = vmul.f32 0.044715, %v14054_v50  ;;  %15562 = vst [vmem:[#allocation63_spill] sm:$0xff] %v14076_v40  ;;  %v14088_v31 = vpop.f32.mrb[199].mxu1 }
0x10dc   : > { %15561 = vst [vmem:[#allocation85_spill] sm:$0xff] %v14063_v53  ;;  %v6225_v46 = vmul.f32 0.044715, %v14063_v53  ;;  %v14079_v61 = vmul.f32 %v6350_v19, %v14031_v59  ;;  %v14082_v28 = vmul.f32 %v6352_v3, %v14035_v42  ;;  %v6603_v36 = vadd.f32 %v13499_v11, %v13442_v58  ;;  %15565 = vst [vmem:[#allocation68_spill] sm:$0xff] %v14088_v31  ;;  %v14090_v0 = vpop.f32.mrb[199].mxu0  ;;  %v15568_v42 = vld [vmem:[#allocation89_spill] sm:$0xff] }
0x10dd   : > { %v6619_v51 = vadd.f32 %v13622_v15, %v13571_v55  ;;  %15566 = vst [vmem:[#allocation71_spill] sm:$0xff] %v14090_v0  ;;  %8415 = vmatprep.mubr.bf16.mxu1 %v7179_v63  ;;  %v7085_v54 = vmul.f32 %v6957_v34, %v13986_v38  ;;  %v7101_v4 = vmul.f32 %v6973_v16, %v13989_v35  ;;  %v14096_v3 = vmul.f32 0.5, %v13571_v55  ;;  %v15567_v15 = vld [vmem:[#allocation81_spill] sm:$0xff] }
0x10de   : > { %15563 = vst [vmem:[#allocation74_spill] sm:$0xff] %v14079_v61  ;;  %15564 = vst [vmem:[#allocation56_spill] sm:$0xff] %v14082_v28  ;;  %v6351_v19 = vmul.f32 %v6223_v17, %v14054_v50  ;;  %v11201_v18 = vpop.eup %11200  ;;  %v6353_v58 = vmul.f32 %v6225_v46, %v14063_v53  ;;  %v6731_v11 = vmul.f32 0.7978846, %v6603_v36  ;;  %v6605_v31 = vadd.f32 %v15568_v42, %v15567_v15 }
0x10df   : > { %v6747_v28 = vmul.f32 0.7978846, %v6619_v51  ;;  %v11203_v61 = vpop.eup %11202  ;;  %v7181_v0 = vpack.c.bf16 %v7101_v4, %v7085_v54  ;;  %v6954_v63 = vadd.f32 1.0, %v11201_v18  ;;  %v14102_v38 = vmul.f32 0.5, %v15567_v15  ;;  %v15569_v51 = vld [vmem:[#allocation34_spill] sm:$0xff] }
0x10e0   : > { %v14105_v35 = vmul.f32 0.5, %v13575_v47  ;;  %v6970_v55 = vadd.f32 1.0, %v11203_v61  ;;  %11208 = vtanh.f32 %v6731_v11  ;;  %v6621_v16 = vadd.f32 %v13635_v12, %v13575_v47  ;;  %v15574_v11 = vld [vmem:[#allocation77_spill] sm:$0xff] }
0x10e1   : > { %v11205_v34 = vpop.eup %11204  ;;  %v6733_v17 = vmul.f32 0.7978846, %v6605_v31  ;;  %8480 = vmatprep.mubr.bf16.mxu0 %v7181_v0  ;;  %v7082_v42 = vmul.f32 %v6954_v63, %v13996_v43  ;;  %11210 = vtanh.f32 %v6747_v28  ;;  %v14112_v54 = vadd.f32 %v15569_v51, %v15450_v13  ;;  %v15572_v43 = vld [vmem:[#allocation36_spill] sm:$0xff] }
0x10e2   : > { %v11207_v46 = vpop.eup %11206  ;;  %v6956_v36 = vadd.f32 1.0, %v11205_v34  ;;  %v7098_v4 = vmul.f32 %v6970_v55, %v14007_v32  ;;  %v6749_v15 = vmul.f32 0.7978846, %v6621_v16  ;;  %v14116_v61 = vmul.f32 %v6351_v19, %v14054_v50  ;;  %v15576_v34 = vld [vmem:[#allocation90_spill] sm:$0xff]  ;;  %v15577_v55 = vld [vmem:[#allocation92_spill] sm:$0xff] }
0x10e3   : > { %15570 = vst [vmem:[#allocation82_spill] sm:$0xff] %v14112_v54  ;;  %v6972_v18 = vadd.f32 1.0, %v11207_v46  ;;  %11212 = vtanh.f32 %v6733_v17  ;;  %v14119_v47 = vmul.f32 %v6353_v58, %v14063_v53  ;;  %v6238_v12 = vmul.f32 0.044715, %v14112_v54  ;;  %v15575_v58 = vld [vmem:[#allocation87_spill] sm:$0xff]  ;;  %v15579_v46 = vld [vmem:[#allocation88_spill] sm:$0xff] }
0x10e4   : > { %v14124_v28 = vadd.f32 %v15572_v43, %v15451_v5  ;;  %v7178_v31 = vpack.c.bf16 %v7098_v4, %v7082_v42  ;;  %v7084_v13 = vmul.f32 %v6956_v36, %v14012_v22  ;;  %11214 = vtanh.f32 %v6749_v15  ;;  %v15581_v43 = vld [vmem:[#allocation33_spill] sm:$0xff] }
0x10e5   : > { %15571 = vst [vmem:[#allocation58_spill] sm:$0xff] %v14119_v47  ;;  %v7100_v32 = vmul.f32 %v6972_v18, %v14017_v9  ;;  %v14130_v19 = vmul.f32 0.5, %v15574_v11  ;;  %v6602_v63 = vadd.f32 %v15575_v58, %v15574_v11  ;;  %v6618_v16 = vadd.f32 %v15577_v55, %v15576_v34  ;;  %v15578_v9 = vld [vmem:[#allocation80_spill] sm:$0xff]  ;;  %v15580_v18 = vld [vmem:[#allocation91_spill] sm:$0xff]  ;;  %v15583_v11 = vld [vmem:[#allocation30_spill] sm:$0xff] }
0x10e6   : > { %15573 = vst [vmem:[#allocation70_spill] sm:$0xff] %v14124_v28  ;;  %v6240_v0 = vmul.f32 0.044715, %v14124_v28  ;;  %8416 = vmatmul.mubr.bf16.gmra.mrb[224].mxu1 %v7178_v31  ;;  %v6366_v17 = vmul.f32 %v6238_v12, %v14112_v54  ;;  %v14138_v22 = vmul.f32 0.5, %v15576_v34  ;;  %v6604_v42 = vadd.f32 %v15579_v46, %v15578_v9  ;;  %v15582_v12 = vld [vmem:[#allocation29_spill] sm:$0xff] }
0x10e7   : > { %v7180_v5 = vpack.c.bf16 %v7100_v32, %v7084_v13  ;;  %v6730_v36 = vmul.f32 0.7978846, %v6602_v63  ;;  %v6746_v51 = vmul.f32 0.7978846, %v6618_v16  ;;  %v14143_v4 = vmul.f32 0.5, %v15578_v9  ;;  %v11368_v34 = vld [vmem:[%s11638_s7 + $0x8] sm:$0xff] }
0x10e8   : > { %v14146_v15 = vmul.f32 0.5, %v15580_v18  ;;  %v6620_v31 = vadd.f32 %v15581_v43, %v15580_v18  ;;  %v6732_v13 = vmul.f32 0.7978846, %v6604_v42  ;;  %v14152_v32 = vadd.f32 %v15582_v12, %v15456_v21  ;;  %v15585_v55 = vld [vmem:[#allocation25_spill] sm:$0xff]  ;;  %v15588_v12 = vld [vmem:[#allocation94_spill] sm:$0xff] }
0x10e9   : > { %8481 = vmatmul.mubr.bf16.gmra.mrb[224].mxu0 %v7180_v5  ;;  %v14156_v58 = vadd.f32 %v15583_v11, %v15460_v52  ;;  %v6368_v63 = vmul.f32 %v6240_v0, %v14124_v28  ;;  %11216 = vtanh.f32 %v6730_v36  ;;  %v14161_v16 = vrot.slane %v11368_v34, %v15585_v55  ;;  %v15586_v5 = vld [vmem:[#allocation26_spill] sm:$0xff]  ;;  %v15587_v0 = vld [vmem:[#allocation93_spill] sm:$0xff] }
0x10ea   : > { %v14164_v9 = vrot.slane %v11368_v34, %v15586_v5  ;;  %v11209_v46 = vpop.eup %11208  ;;  %11218 = vtanh.f32 %v6746_v51  ;;  %v6748_v42 = vmul.f32 0.7978846, %v6620_v31  ;;  %v6239_v21 = vmul.f32 0.044715, %v14152_v32 }
0x10eb   : > { %15584 = vst [vmem:[#allocation72_spill] sm:$0xff] %v14156_v58  ;;  %v6241_v18 = vmul.f32 0.044715, %v14156_v58  ;;  %v11211_v43 = vpop.eup %11210  ;;  %v6987_v52 = vadd.f32 1.0, %v11209_v46  ;;  %11220 = vtanh.f32 %v6732_v13  ;;  %v5879_v36 = vadd.f32 %v15587_v0, %v14161_v16 }
0x10ec   : > { %v5952_v11 = vadd.f32 %v15588_v12, %v14164_v9  ;;  %v7003_v59 = vadd.f32 1.0, %v11211_v43  ;;  %11222 = vtanh.f32 %v6748_v42  ;;  %v6367_v5 = vmul.f32 %v6239_v21, %v14152_v32 }
0x10ed   : > { %v11213_v55 = vpop.eup %11212  ;;  %v6369_v51 = vmul.f32 %v6241_v18, %v14156_v58  ;;  %v14175_v40 = vmul.f32 %v6366_v17, %v14112_v54  ;;  %v14178_v46 = vmul.f32 %v6368_v63, %v14124_v28  ;;  %v6130_v13 = vmul.f32 0.044715, %v5879_v36  ;;  %v15602_v54 = vld [vmem:[#allocation75_spill] sm:$0xff] }
0x10ee   : > { %v6989_v31 = vadd.f32 1.0, %v11213_v55  ;;  %v11215_v37 = vpop.eup %11214  ;;  %v7115_v0 = vmul.f32 %v6987_v52, %v14072_v25  ;;  %v7131_v12 = vmul.f32 %v7003_v59, %v14096_v3  ;;  %v14183_v43 = vmul.f32 %v6367_v5, %v14152_v32  ;;  %v15596_v25 = vld [vmem:[#allocation28_spill] sm:$0xff] }
0x10ef   : > { %15589 = vst [vmem:[#allocation83_spill] sm:$0xff] %v14175_v40  ;;  %15590 = vst [vmem:[#allocation81_spill] sm:$0xff] %v14178_v46  ;;  %v14185_v42 = vmul.f32 0.5, %v5879_v36  ;;  %v7005_v21 = vadd.f32 1.0, %v11215_v37  ;;  %v14188_v18 = vmul.f32 %v6369_v51, %v14156_v58  ;;  %v6258_v17 = vmul.f32 %v6130_v13, %v5879_v36  ;;  %v15595_v46 = vld [vmem:[#allocation27_spill] sm:$0xff] }
0x10f0   : > { %15591 = vst [vmem:[#allocation89_spill] sm:$0xff] %v14183_v43  ;;  %v6132_v55 = vmul.f32 0.044715, %v5952_v11  ;;  %v7195_v40 = vpack.c.bf16 %v7131_v12, %v7115_v0  ;;  %v14190_v63 = vmul.f32 0.5, %v5952_v11  ;;  %v14193_v28 = vrot.slane %v11368_v34, %v15595_v46  ;;  %v15597_v51 = vld [vmem:[#allocation95_spill] sm:$0xff]  ;;  %v15599_v0 = vld [vmem:[#allocation96_spill] sm:$0xff] }
0x10f1   : > { %15592 = vst [vmem:[#allocation34_spill] sm:$0xff] %v14185_v42  ;;  %15593 = vst [vmem:[#allocation36_spill] sm:$0xff] %v14188_v18  ;;  %v14196_v52 = vrot.slane %v11368_v34, %v15596_v25  ;;  %v7117_v59 = vmul.f32 %v6989_v31, %v14102_v38  ;;  %v7133_v3 = vmul.f32 %v7005_v21, %v14105_v35  ;;  %v14209_v46 = vmul.f32 0.5, %v13609_v29 }
0x10f2   : > { %15594 = vst [vmem:[#allocation77_spill] sm:$0xff] %v14190_v63  ;;  %v6386_v5 = vmul.f32 %v6258_v17, %v5879_v36  ;;  %v6260_v37 = vmul.f32 %v6132_v55, %v5952_v11  ;;  %8423 = vmatprep.mubr.bf16.mxu1 %v7195_v40  ;;  %v14202_v13 = vadd.f32 %v15597_v51, %v14193_v28  ;;  %v14214_v40 = vmul.f32 0.5, %v13714_v49 }
0x10f3   : > { %v14206_v12 = vadd.f32 %v15599_v0, %v14196_v52  ;;  %v6511_v34 = vadd.f32 %v13660_v30, %v13609_v29  ;;  %v11217_v38 = vpop.eup %11216  ;;  %v7197_v31 = vpack.c.bf16 %v7133_v3, %v7117_v59  ;;  %v6527_v0 = vadd.f32 %v13764_v41, %v13714_v49  ;;  %v15601_v59 = vld [vmem:[#allocation32_spill] sm:$0xff] }
0x10f4   : > { %15598 = vst [vmem:[#allocation87_spill] sm:$0xff] %v14202_v13  ;;  %v6514_v35 = vadd.f32 %v6386_v5, %v5879_v36  ;;  %v6388_v21 = vmul.f32 %v6260_v37, %v5952_v11  ;;  %v11219_v17 = vpop.eup %11218  ;;  %v6986_v55 = vadd.f32 1.0, %v11217_v38  ;;  %v6131_v25 = vmul.f32 0.044715, %v14202_v13 }
0x10f5   : > { %15600 = vst [vmem:[#allocation90_spill] sm:$0xff] %v14206_v12  ;;  %v6133_v51 = vmul.f32 0.044715, %v14206_v12  ;;  %v11221_v63 = vpop.eup %11220  ;;  %8488 = vmatprep.mubr.bf16.mxu0 %v7197_v31  ;;  %v7002_v42 = vadd.f32 1.0, %v11219_v17  ;;  %v14221_v36 = vmul.f32 0.5, %v15601_v59  ;;  %v14225_v18 = vmul.f32 0.5, %v15602_v54 }
0x10f6   : > { %v6642_v29 = vmul.f32 0.7978846, %v6514_v35  ;;  %v6516_v30 = vadd.f32 %v6388_v21, %v5952_v11  ;;  %v11223_v3 = vpop.eup %11222  ;;  %v6988_v5 = vadd.f32 1.0, %v11221_v63  ;;  %v6259_v37 = vmul.f32 %v6131_v25, %v14202_v13  ;;  %v15604_v25 = vld [vmem:[#allocation99_spill] sm:$0xff] }
0x10f7   : > { %v6639_v38 = vmul.f32 0.7978846, %v6511_v34  ;;  %v7114_v58 = vmul.f32 %v6986_v55, %v14130_v19  ;;  %v7130_v49 = vmul.f32 %v7002_v42, %v14138_v22  ;;  %v7004_v41 = vadd.f32 1.0, %v11223_v3  ;;  %v15605_v19 = vld [vmem:[#allocation105_spill] sm:$0xff]  ;;  %v15606_v42 = vld [vmem:[#allocation38_spill] sm:$0xff] }
0x10f8   : > { %v6261_v31 = vmul.f32 %v6133_v51, %v14206_v12  ;;  %v7116_v11 = vmul.f32 %v6988_v5, %v14143_v4  ;;  %11224 = vtanh.f32 %v6642_v29  ;;  %v6644_v35 = vmul.f32 0.7978846, %v6516_v30  ;;  %v15607_v4 = vld [vmem:[#allocation48_spill] sm:$0xff]  ;;  %v15610_v5 = vld [vmem:[#allocation55_spill] sm:$0xff] }
0x10f9   : > { %v6655_v21 = vmul.f32 0.7978846, %v6527_v0  ;;  %v7194_v17 = vpack.c.bf16 %v7130_v49, %v7114_v58  ;;  %v7132_v63 = vmul.f32 %v7004_v41, %v14146_v15  ;;  %v14233_v34 = vmul.f32 %v6259_v37, %v14202_v13  ;;  %v15608_v0 = vld [vmem:[#allocation78_spill] sm:$0xff] }
0x10fa   : > { %v6513_v47 = vadd.f32 %v15604_v25, %v15601_v59  ;;  %11226 = vtanh.f32 %v6639_v38  ;;  %v6529_v22 = vadd.f32 %v15605_v19, %v15602_v54  ;;  %v5883_v55 = vadd.f32 %v15606_v42, %v14161_v16  ;;  %v15611_v38 = vld [vmem:[#allocation35_spill] sm:$0xff]  ;;  %v15615_v25 = vld [vmem:[#allocation97_spill] sm:$0xff] }
0x10fb   : > { %15603 = vst [vmem:[#allocation92_spill] sm:$0xff] %v14233_v34  ;;  %v5956_v51 = vadd.f32 %v15607_v4, %v14164_v9  ;;  %8424 = vmatmul.mubr.bf16.gmra.mrb[228].mxu1 %v7194_v17  ;;  %v7196_v58 = vpack.c.bf16 %v7132_v63, %v7116_v11  ;;  %11228 = vtanh.f32 %v6655_v21  ;;  %v6894_v29 = vadd.f32 1.0, %v15608_v0  ;;  %v15612_v11 = vld [vmem:[#allocation41_spill] sm:$0xff]  ;;  %v15613_v21 = vld [vmem:[#allocation67_spill] sm:$0xff]  ;;  %v15620_v0 = vld [vmem:[#allocation104_spill] sm:$0xff] }
0x10fc   : > { %v6641_v15 = vmul.f32 0.7978846, %v6513_v47  ;;  %11230 = vtanh.f32 %v6644_v35  ;;  %v14245_v30 = vmul.f32 %v6261_v31, %v14206_v12  ;;  %v6657_v59 = vmul.f32 0.7978846, %v6529_v22  ;;  %v15614_v63 = vld [vmem:[#allocation101_spill] sm:$0xff]  ;;  %v15617_v22 = vld [vmem:[#allocation98_spill] sm:$0xff] }
0x10fd   : > { %v6146_v3 = vmul.f32 0.044715, %v5883_v55  ;;  %8489 = vmatmul.mubr.bf16.gmra.mrb[228].mxu0 %v7196_v58  ;;  %v6148_v54 = vmul.f32 0.044715, %v5956_v51  ;;  %v6910_v37 = vadd.f32 1.0, %v15610_v5  ;;  %v14249_v49 = vmul.f32 %v6894_v29, %v15611_v38  ;;  %v15619_v58 = vld [vmem:[#allocation31_spill] sm:$0xff] }
0x10fe   : > { %15609 = vst [vmem:[#allocation80_spill] sm:$0xff] %v14245_v30  ;;  %11232 = vtanh.f32 %v6641_v15  ;;  %v6896_v47 = vadd.f32 1.0, %v15612_v11  ;;  %v6912_v17 = vadd.f32 1.0, %v15613_v21  ;;  %v14258_v19 = vadd.f32 %v15615_v25, %v14193_v28 }
0x10ff   : > { %11234 = vtanh.f32 %v6657_v59  ;;  %v6274_v41 = vmul.f32 %v6146_v3, %v5883_v55  ;;  %v6276_v35 = vmul.f32 %v6148_v54, %v5956_v51  ;;  %v14254_v31 = vmul.f32 %v6910_v37, %v15614_v63  ;;  %v15621_v59 = vld [vmem:[#allocation37_spill] sm:$0xff] }
0x1100   : > { %15616 = vst [vmem:[#allocation88_spill] sm:$0xff] %v14258_v19  ;;  %v14262_v42 = vadd.f32 %v15617_v22, %v14196_v52  ;;  %v14265_v15 = vmul.f32 %v6896_v47, %v15619_v58  ;;  %v14268_v29 = vmul.f32 %v6912_v17, %v15620_v0  ;;  %v14272_v3 = vadd.f32 %v15621_v59, %v14161_v16  ;;  %v15624_v17 = vld [vmem:[#allocation46_spill] sm:$0xff]  ;;  %v15628_v47 = vld [vmem:[#allocation51_spill] sm:$0xff] }
0x1101   : > { %v6402_v4 = vmul.f32 %v6274_v41, %v5883_v55  ;;  %v6404_v54 = vmul.f32 %v6276_v35, %v5956_v51  ;;  %v7150_v5 = vpack.c.bf16 %v14254_v31, %v14249_v49  ;;  %v6147_v37 = vmul.f32 0.044715, %v14258_v19  ;;  %v15626_v31 = vld [vmem:[#allocation39_spill] sm:$0xff] }
0x1102   : > { %15618 = vst [vmem:[#allocation91_spill] sm:$0xff] %v14262_v42  ;;  %15622 = vst [vmem:[#allocation33_spill] sm:$0xff] %v14272_v3  ;;  %v6149_v38 = vmul.f32 0.044715, %v14262_v42  ;;  %v14278_v11 = vpop.eup %11224  ;;  %v6162_v21 = vmul.f32 0.044715, %v14272_v3  ;;  %v14285_v63 = vadd.f32 %v15624_v17, %v14164_v9  ;;  %v14291_v22 = vadd.f32 %v15626_v31, %v14193_v28 }
0x1103   : > { %15623 = vst [vmem:[#allocation29_spill] sm:$0xff] %v14278_v11  ;;  %v6530_v41 = vadd.f32 %v6402_v4, %v5883_v55  ;;  %v6532_v35 = vadd.f32 %v6404_v54, %v5956_v51  ;;  %v6275_v25 = vmul.f32 %v6147_v37, %v14258_v19  ;;  %v14297_v11 = vadd.f32 %v15628_v47, %v14196_v52 }
0x1104   : > { %15625 = vst [vmem:[#allocation30_spill] sm:$0xff] %v14285_v63  ;;  %v6277_v49 = vmul.f32 %v6149_v38, %v14262_v42  ;;  %15627 = vst [vmem:[#allocation93_spill] sm:$0xff] %v14291_v22  ;;  %v11227_v58 = vpop.eup %11226  ;;  %v6290_v0 = vmul.f32 %v6162_v21, %v14272_v3  ;;  %v6164_v59 = vmul.f32 0.044715, %v14285_v63  ;;  %v14299_v30 = vmul.f32 0.5, %v5883_v55 }
0x1105   : > { %v6658_v4 = vmul.f32 0.7978846, %v6530_v41  ;;  %15629 = vst [vmem:[#allocation94_spill] sm:$0xff] %v14297_v11  ;;  %v11229_v17 = vpop.eup %11228  ;;  %v6895_v54 = vadd.f32 1.0, %v11227_v58  ;;  %v14301_v37 = vmul.f32 0.5, %v5956_v51  ;;  %v14306_v41 = vmul.f32 %v6275_v25, %v14258_v19 }
0x1106   : > { %15630 = vst [vmem:[#allocation95_spill] sm:$0xff] %v14299_v30  ;;  %v6660_v38 = vmul.f32 0.7978846, %v6532_v35  ;;  %v14303_v12 = vpop.eup %11230  ;;  %v6911_v31 = vadd.f32 1.0, %v11229_v17  ;;  %v14309_v21 = vmul.f32 %v6277_v49, %v14262_v42  ;;  %v6292_v34 = vmul.f32 %v6164_v59, %v14285_v63  ;;  %v15637_v30 = vld [vmem:[#allocation106_spill] sm:$0xff] }
0x1107   : > { %15631 = vst [vmem:[#allocation96_spill] sm:$0xff] %v14301_v37  ;;  %15632 = vst [vmem:[#allocation32_spill] sm:$0xff] %v14303_v12  ;;  %11236 = vtanh.f32 %v6658_v4  ;;  %v14313_v55 = vmul.f32 %v6290_v0, %v14272_v3  ;;  %v6163_v51 = vmul.f32 0.044715, %v14291_v22  ;;  %v6165_v35 = vmul.f32 0.044715, %v14297_v11 }
0x1108   : > { %15633 = vst [vmem:[#allocation75_spill] sm:$0xff] %v14306_v41  ;;  %15634 = vst [vmem:[#allocation99_spill] sm:$0xff] %v14309_v21  ;;  %v11233_v47 = vpop.eup %11232  ;;  %v7023_v25 = vmul.f32 %v6895_v54, %v14209_v46  ;;  %v7039_v17 = vmul.f32 %v6911_v31, %v14214_v40  ;;  %11238 = vtanh.f32 %v6660_v38  ;;  %v14320_v59 = vmul.f32 %v6292_v34, %v14285_v63  ;;  %v10914_v3 = vld [vmem:[%s11648_s18 + $0x300] sm:$0xff]   ;;  %v15638_v46 = vld [vmem:[#allocation49_spill] sm:$0xff] }
0x1109   : > { %15635 = vst [vmem:[#allocation105_spill] sm:$0xff] %v14313_v55  ;;  %v11235_v58 = vpop.eup %11234  ;;  %v6897_v49 = vadd.f32 1.0, %v11233_v47  ;;  %v6291_v4 = vmul.f32 %v6163_v51, %v14291_v22  ;;  %v6293_v0 = vmul.f32 %v6165_v35, %v14297_v11  ;;  %v14326_v12 = vmul.f32 0.5, %v15637_v30  ;;  %v15639_v54 = vld [vmem:[#allocation44_spill] sm:$0xff]  ;;  %v15640_v38 = vld [vmem:[#allocation65_spill] sm:$0xff] }
0x110a   : > { %v6913_v37 = vadd.f32 1.0, %v11235_v58  ;;  %15636 = vst [vmem:[#allocation38_spill] sm:$0xff] %v14320_v59  ;;  %v7151_v55 = vpack.c.bf16 %v7039_v17, %v7023_v25  ;;  %v6543_v40 = vadd.f32 %v15638_v46, %v15637_v30  ;;  %v6559_v31 = vadd.f32 %v15640_v38, %v15639_v54  ;;  %v10916_v51 = vld [vmem:[%s11648_s18 + $0x348] sm:$0xff]   ;;  %v15643_v46 = vld [vmem:[#allocation86_spill] sm:$0xff] }
0x110b   : > { %v7025_v34 = vmul.f32 %v6897_v49, %v14221_v36  ;;  %v14336_v35 = vmul.f32 %v6291_v4, %v14291_v22  ;;  %v14339_v58 = vmul.f32 0.5, %v15639_v54  ;;  %v14342_v25 = vmul.f32 %v6293_v0, %v14297_v11  ;;  %v15644_v38 = vld [vmem:[#allocation61_spill] sm:$0xff]  ;;  %v15647_v0 = vld [vmem:[#allocation40_spill] sm:$0xff] }
0x110c   : > { %v7041_v47 = vmul.f32 %v6913_v37, %v14225_v18  ;;  %8529 = vmatprep.mubr.bf16.mxu1 %v7151_v55  ;;  %v6671_v30 = vmul.f32 0.7978846, %v6543_v40  ;;  %v6687_v17 = vmul.f32 0.7978846, %v6559_v31  ;;  %v6545_v59 = vadd.f32 %v15644_v38, %v15643_v46  ;;  %v10915_v18 = vld [vmem:[%s11648_s18 + $0x380] sm:$0xff]   ;;  %v10917_v37 = vld [vmem:[%s11648_s18 + $0x3c8] sm:$0xff]  }
0x110d   : > { %15641 = vst [vmem:[#allocation48_spill] sm:$0xff] %v14336_v35  ;;  %15642 = vst [vmem:[#allocation78_spill] sm:$0xff] %v14342_v25  ;;  %8530 = vmatmul.mubr.bf16.vlgmr.msra.gmra.mrb[232].mxu1 %v7150_v5  ;;  %v10918_v49 = vld [vmem:[%s11648_s18 + $0x308] sm:$0xff]   ;;  %v6561_v4 = vadd.f32 %v13938_v27, %v13870_v26  ;;  %v14357_v40 = vadd.f32 %v15647_v0, %v14164_v9  ;;  %v14360_v31 = vmul.f32 0.5, %v15643_v46  ;;  %v14363_v5 = vmul.f32 0.5, %v13870_v26  ;;  %v14366_v27 = vpop.f32.mrb[200].mxu1 }
0x110e   : > { %v7153_v36 = vpack.c.bf16 %v7041_v47, %v7025_v34  ;;  %v15645_v54 = vld [vmem:[#allocation69_spill] sm:$0xff]  ;;  %10248 = vmatpush3.bf16.msra.mxu1 %v10914_v3  ;;  %11240 = vtanh.f32 %v6671_v30  ;;  %v6673_v34 = vmul.f32 0.7978846, %v6545_v59  ;;  %15649 = vst [vmem:[#allocation41_spill] sm:$0xff] %v14366_v27  ;;  %v15650_v30 = vpack.c.bf16 %v14268_v29, %v14265_v15  ;;  %v15651_v59 = vld [vmem:[#allocation79_spill] sm:$0xff]  ;;  %v14381_v27 = vpop.f32.mrb[201].mxu1 }
0x110f   : > { %v14353_v55 = vadd.f32 %v15645_v54, %v14161_v16  ;;  %15648 = vst [vmem:[#allocation35_spill] sm:$0xff] %v14357_v40  ;;  %v10920_v47 = vld [vmem:[%s11648_s18 + $0x350] sm:$0xff]   ;;  %10249 = vmatprep.subr.bf16.mxu1 %v10916_v51  ;;  %11242 = vtanh.f32 %v6687_v17  ;;  %v6689_v38 = vmul.f32 0.7978846, %v6561_v4  ;;  %v6180_v3 = vmul.f32 0.044715, %v14357_v40 }
0x1110   : > { %8594 = vmatprep.mubr.bf16.mxu0 %v7153_v36  ;;  %v10919_v26 = vld [vmem:[%s11648_s18 + $0x388] sm:$0xff]   ;;  %11244 = vtanh.f32 %v6673_v34  ;;  %v14375_v46 = vmul.f32 0.5, %v15651_v59  ;;  %v15652_v36 = vld [vmem:[#allocation107_spill] sm:$0xff]  ;;  %v15654_v4 = vld [vmem:[#allocation50_spill] sm:$0xff]  ;;  %15655 = vst [vmem:[#allocation67_spill] sm:$0xff] %v14381_v27 }
0x1111   : > { %15646 = vst [vmem:[#allocation55_spill] sm:$0xff] %v14353_v55  ;;  %v6178_v54 = vmul.f32 0.044715, %v14353_v55  ;;  %8595 = vmatmul.mubr.bf16.vlgmr.msra.gmra.mrb[232].mxu0 %v15650_v30  ;;  %v6542_v51 = vadd.f32 %v15652_v36, %v15651_v59  ;;  %v15653_v17 = vld [vmem:[#allocation59_spill] sm:$0xff]  ;;  %v14383_v63 = vpop.eup %11236  ;;  %11246 = vtanh.f32 %v6689_v38  ;;  %v15657_v34 = vld [vmem:[#allocation84_spill] sm:$0xff]  ;;  %v10921_v25 = vld [vmem:[%s11648_s18 + $0x3d0] sm:$0xff]  }
0x1112   : > { %v6558_v0 = vadd.f32 %v15654_v4, %v15653_v17  ;;  %15656 = vst [vmem:[#allocation101_spill] sm:$0xff] %v14383_v63  ;;  %10288 = vmatpush3.bf16.msra.mxu0 %v10915_v18  ;;  %v14387_v29 = vmul.f32 0.5, %v15653_v17  ;;  %v14390_v30 = vmul.f32 0.5, %v15657_v34  ;;  %v10922_v11 = vld [vmem:[%s11648_s18 + $0x310] sm:$0xff]   ;;  %v14394_v59 = vpop.f32.mrb[200].mxu0  ;;  %v14396_v36 = vpop.f32.mrb[202].mxu1  ;;  %10250 = vmatpush3.bf16.msra.mxu1 %v10918_v49 }
0x1113   : > { %v6306_v15 = vmul.f32 %v6178_v54, %v14353_v55  ;;  %15658 = vst [vmem:[#allocation97_spill] sm:$0xff] %v14394_v59  ;;  %15659 = vst [vmem:[#allocation98_spill] sm:$0xff] %v14396_v36  ;;  %v14398_v4 = vpop.eup %11238  ;;  %10289 = vmatprep.subr.bf16.mxu0 %v10917_v37  ;;  %v6670_v18 = vmul.f32 0.7978846, %v6542_v51  ;;  %v15661_v54 = vld [vmem:[#allocation47_spill] sm:$0xff]  ;;  %v15662_v27 = vld [vmem:[#allocation54_spill] sm:$0xff]  ;;  %v6308_v59 = vmul.f32 %v6180_v3, %v14357_v40  ;;  %10251 = vmatprep.subr.bf16.mxu1 %v10920_v47 }
0x1114   : > { %15660 = vst [vmem:[#allocation31_spill] sm:$0xff] %v14398_v4  ;;  %v6686_v38 = vmul.f32 0.7978846, %v6558_v0  ;;  %v6544_v17 = vadd.f32 %v15661_v54, %v15657_v34  ;;  %v15663_v35 = vld [vmem:[#allocation57_spill] sm:$0xff]  ;;  %v14404_v63 = vpop.f32.mrb[201].mxu0  ;;  %v14406_v21 = vpop.f32.mrb[203].mxu1 }
0x1115   : > { %v6560_v22 = vadd.f32 %v15663_v35, %v15662_v27  ;;  %15664 = vst [vmem:[#allocation104_spill] sm:$0xff] %v14404_v63  ;;  %15665 = vst [vmem:[#allocation37_spill] sm:$0xff] %v14406_v21  ;;  %v14410_v36 = vmul.f32 0.5, %v15662_v27  ;;  %v15666_v37 = vld [vmem:[#allocation42_spill] sm:$0xff]  ;;  %v15668_v51 = vld [vmem:[#allocation64_spill] sm:$0xff]  ;;  %v14421_v34 = vpop.f32.mrb[202].mxu0  ;;  %11248 = vtanh.f32 %v6670_v18  ;;  %v14435_v18 = vmul.f32 %v6306_v15, %v14353_v55 }
0x1116   : > { %v14414_v49 = vadd.f32 %v15666_v37, %v14193_v28  ;;  %v14418_v0 = vadd.f32 %v15668_v51, %v14196_v52  ;;  %v10924_v35 = vld [vmem:[%s11648_s18 + $0x358] sm:$0xff]   ;;  %15669 = vst [vmem:[#allocation39_spill] sm:$0xff] %v14421_v34  ;;  %v6672_v3 = vmul.f32 0.7978846, %v6544_v17  ;;  %v14425_v47 = vpop.f32.mrb[203].mxu0  ;;  %10290 = vmatpush3.bf16.msra.mxu0 %v10919_v26  ;;  %11250 = vtanh.f32 %v6686_v38  ;;  %v10923_v63 = vld [vmem:[%s11648_s18 + $0x390] sm:$0xff]   ;;  %10252 = vmatpush3.bf16.msra.mxu1 %v10922_v11 }
0x1117   : > { %v6688_v54 = vmul.f32 0.7978846, %v6560_v22  ;;  %v15670_v27 = vld [vmem:[#allocation43_spill] sm:$0xff]  ;;  %15671 = vst [vmem:[#allocation51_spill] sm:$0xff] %v14425_v47  ;;  %v15672_v34 = vld [vmem:[#allocation100_spill] sm:$0xff]  ;;  %15673 = vst [vmem:[#allocation106_spill] sm:$0xff] %v14435_v18  ;;  %10291 = vmatprep.subr.bf16.mxu0 %v10921_v25  ;;  %v14444_v47 = vmul.f32 %v6308_v59, %v14357_v40  ;;  %10253 = vmatprep.subr.bf16.mxu1 %v10924_v35 }
0x1118   : > { %15667 = vst [vmem:[#allocation46_spill] sm:$0xff] %v14414_v49  ;;  %v5899_v21 = vadd.f32 %v15670_v27, %v14161_v16  ;;  %v6179_v37 = vmul.f32 0.044715, %v14414_v49  ;;  %v6181_v51 = vmul.f32 0.044715, %v14418_v0  ;;  %v14432_v4 = vadd.f32 %v15672_v34, %v14164_v9  ;;  %v10925_v22 = vld [vmem:[%s11648_s18 + $0x3d8] sm:$0xff]   ;;  %v11241_v25 = vpop.eup %11240 }
0x1119   : > { %11252 = vtanh.f32 %v6672_v3  ;;  %v10926_v17 = vld [vmem:[%s11648_s18 + $0x318] sm:$0xff]   ;;  %15675 = vst [vmem:[#allocation49_spill] sm:$0xff] %v14444_v47  ;;  %v10928_v3 = vld [vmem:[%s11648_s18 + $0x360] sm:$0xff]   ;;  %v11243_v59 = vpop.eup %11242  ;;  %v14464_v47 = vpop.f32.mrb[204].mxu1 }
0x111a   : > { %v6194_v26 = vmul.f32 0.044715, %v5899_v21  ;;  %v15674_v38 = vld [vmem:[#allocation102_spill] sm:$0xff]  ;;  %11254 = vtanh.f32 %v6688_v54  ;;  %v6307_v34 = vmul.f32 %v6179_v37, %v14414_v49  ;;  %v6309_v15 = vmul.f32 %v6181_v51, %v14418_v0  ;;  %10292 = vmatpush3.bf16.msra.mxu0 %v10923_v63  ;;  %15678 = vst [vmem:[#allocation65_spill] sm:$0xff] %v14464_v47  ;;  %v11245_v40 = vpop.eup %11244  ;;  %10254 = vmatpush3.bf16.msra.mxu1 %v10926_v17  ;;  %v10930_v63 = vld [vmem:[%s11648_s18 + $0x320] sm:$0xff]   ;;  %v14473_v19 = vpop.f32.mrb[205].mxu1 }
0x111b   : > { %v14441_v27 = vadd.f32 %v15674_v38, %v14193_v28  ;;  %v14449_v11 = vmul.f32 0.5, %v5899_v21  ;;  %v6196_v55 = vmul.f32 0.044715, %v14432_v4  ;;  %v15676_v38 = vld [vmem:[#allocation103_spill] sm:$0xff]  ;;  %v6927_v54 = vadd.f32 1.0, %v11241_v25  ;;  %10293 = vmatprep.subr.bf16.mxu0 %v10925_v22  ;;  %15680 = vst [vmem:[#allocation61_spill] sm:$0xff] %v14473_v19  ;;  %v11247_v13 = vpop.eup %11246  ;;  %10255 = vmatprep.subr.bf16.mxu1 %v10928_v3 }
0x111c   : > { %v6322_v18 = vmul.f32 %v6194_v26, %v5899_v21  ;;  %v14454_v42 = vadd.f32 %v15676_v38, %v14196_v52  ;;  %v14457_v37 = vmul.f32 %v6307_v34, %v14414_v49  ;;  %v10927_v35 = vld [vmem:[%s11648_s18 + $0x398] sm:$0xff]   ;;  %v14461_v51 = vmul.f32 0.5, %v14432_v4  ;;  %v10932_v49 = vld [vmem:[%s11648_s18 + $0x368] sm:$0xff]   ;;  %v14480_v22 = vpop.f32.mrb[204].mxu0 }
0x111d   : > { %v6195_v26 = vmul.f32 0.044715, %v14441_v27  ;;  %v6943_v38 = vadd.f32 1.0, %v11243_v59  ;;  %v14467_v41 = vmul.f32 %v6309_v15, %v14418_v0  ;;  %v6324_v34 = vmul.f32 %v6196_v55, %v14432_v4 }
0x111e   : > { %15677 = vst [vmem:[#allocation44_spill] sm:$0xff] %v14457_v37  ;;  %v6450_v25 = vmul.f32 %v6322_v18, %v5899_v21  ;;  %v10929_v37 = vld [vmem:[%s11648_s18 + $0x3e0] sm:$0xff]   ;;  %v7055_v53 = vmul.f32 %v6927_v54, %v14326_v12  ;;  %v6929_v43 = vadd.f32 1.0, %v11245_v40  ;;  %v6197_v47 = vmul.f32 0.044715, %v14454_v42  ;;  %v14482_v18 = vpop.f32.mrb[206].mxu1  ;;  %10294 = vmatpush3.bf16.msra.mxu0 %v10927_v35  ;;  %10256 = vmatpush3.bf16.msra.mxu1 %v10930_v63 }
0x111f   : > { %15679 = vst [vmem:[#allocation86_spill] sm:$0xff] %v14467_v41  ;;  %v14478_v15 = vmul.f32 0.5, %v13896_v62  ;;  %15681 = vst [vmem:[#allocation69_spill] sm:$0xff] %v14482_v18  ;;  %v7071_v55 = vmul.f32 %v6943_v38, %v14339_v58  ;;  %v6945_v17 = vadd.f32 1.0, %v11247_v13  ;;  %v6452_v19 = vmul.f32 %v6324_v34, %v14432_v4  ;;  %v14486_v41 = vpop.f32.mrb[205].mxu0  ;;  %v14488_v12 = vpop.f32.mrb[207].mxu1  ;;  %10295 = vmatprep.subr.bf16.mxu0 %v10929_v37 }
0x1120   : > { %v6578_v59 = vadd.f32 %v6450_v25, %v5899_v21  ;;  %15682 = vst [vmem:[#allocation40_spill] sm:$0xff] %v14488_v12  ;;  %v7057_v40 = vmul.f32 %v6929_v43, %v14360_v31  ;;  %v6323_v3 = vmul.f32 %v6195_v26, %v14441_v27  ;;  %v14493_v54 = vmul.f32 0.5, %v14023_v23  ;;  %v10931_v13 = vld [vmem:[%s11648_s18 + $0x3a0] sm:$0xff]   ;;  %v14498_v21 = vpop.f32.mrb[206].mxu0  ;;  %v11249_v38 = vpop.eup %11248  ;;  %v10933_v31 = vld [vmem:[%s11648_s18 + $0x3e8] sm:$0xff]   ;;  %10257 = vmatprep.subr.bf16.mxu1 %v10932_v49  ;;  %v10936_v63 = vld [vmem:[%s11648_s18 + $0x370] sm:$0xff]  }
0x1121   : > { %v6575_v58 = vadd.f32 %v13955_v44, %v13896_v62  ;;  %15683 = vst [vmem:[#allocation79_spill] sm:$0xff] %v14498_v21  ;;  %v7167_v25 = vpack.c.bf16 %v7071_v55, %v7055_v53  ;;  %v7073_v34 = vmul.f32 %v6945_v17, %v14363_v5  ;;  %v6580_v43 = vadd.f32 %v6452_v19, %v14432_v4  ;;  %v14503_v35 = vpop.f32.mrb[207].mxu0  ;;  %v11251_v26 = vpop.eup %11250  ;;  %v10934_v53 = vld [vmem:[%s11648_s18 + $0x328] sm:$0xff]  }
0x1122   : > { %v6706_v12 = vmul.f32 0.7978846, %v6578_v59  ;;  %v6926_v18 = vadd.f32 1.0, %v11249_v38  ;;  %v6325_v62 = vmul.f32 %v6197_v47, %v14454_v42  ;;  %v6591_v44 = vadd.f32 %v14066_v1, %v14023_v23  ;;  %10296 = vmatpush3.bf16.msra.mxu0 %v10931_v13  ;;  %v10935_v23 = vld [vmem:[%s11648_s18 + $0x3a8] sm:$0xff]   ;;  %10258 = vmatpush3.bf16.msra.mxu1 %v10934_v53  ;;  %v15684_v38 = vld [vmem:[#allocation66_spill] sm:$0xff] }
0x1123   : > { %v6703_v21 = vmul.f32 0.7978846, %v6575_v58  ;;  %v11253_v5 = vpop.eup %11252  ;;  %8537 = vmatprep.mubr.bf16.mxu1 %v7167_v25  ;;  %v7169_v19 = vpack.c.bf16 %v7073_v34, %v7057_v40  ;;  %v6942_v4 = vadd.f32 1.0, %v11251_v26  ;;  %v6708_v37 = vmul.f32 0.7978846, %v6580_v43  ;;  %10297 = vmatprep.subr.bf16.mxu0 %v10933_v31  ;;  %v10937_v40 = vld [vmem:[%s11648_s18 + $0x3f0] sm:$0xff]  }
0x1124   : > { %11256 = vtanh.f32 %v6706_v12  ;;  %v11255_v55 = vpop.eup %11254  ;;  %v6928_v17 = vadd.f32 1.0, %v11253_v5  ;;  %v14511_v59 = vmul.f32 %v6323_v3, %v14441_v27  ;;  %v6719_v47 = vmul.f32 0.7978846, %v6591_v44  ;;  %10259 = vmatprep.subr.bf16.mxu1 %v10936_v63  ;;  %v10940_v25 = vld [vmem:[%s11648_s18 + $0x378] sm:$0xff]   ;;  %v15685_v31 = vld [vmem:[#allocation53_spill] sm:$0xff] }
0x1125   : > { %11258 = vtanh.f32 %v6703_v21  ;;  %8602 = vmatprep.mubr.bf16.mxu0 %v7169_v19  ;;  %v7054_v1 = vmul.f32 %v6926_v18, %v14375_v46  ;;  %v7070_v49 = vmul.f32 %v6942_v4, %v14387_v29  ;;  %v6944_v12 = vadd.f32 1.0, %v11255_v55  ;;  %v10938_v21 = vld [vmem:[%s11648_s18 + $0x330] sm:$0xff]   ;;  %v10942_v4 = vld [vmem:[%s11648_s18 + $0x338] sm:$0xff]  }
0x1126   : > { %11260 = vtanh.f32 %v6708_v37  ;;  %v7056_v58 = vmul.f32 %v6928_v17, %v14390_v30  ;;  %v14519_v3 = vmul.f32 %v6325_v62, %v14454_v42  ;;  %v6577_v13 = vadd.f32 %v13961_v39, %v13900_v20  ;;  %10298 = vmatpush3.bf16.msra.mxu0 %v10935_v23  ;;  %v10939_v26 = vld [vmem:[%s11648_s18 + $0x3b0] sm:$0xff]   ;;  %10260 = vmatpush3.bf16.msra.mxu1 %v10938_v21 }
0x1127   : > { %11262 = vtanh.f32 %v6719_v47  ;;  %v7166_v46 = vpack.c.bf16 %v7070_v49, %v7054_v1  ;;  %v7072_v29 = vmul.f32 %v6944_v12, %v14410_v36  ;;  %v6593_v18 = vadd.f32 %v14069_v7, %v14027_v60  ;;  %10299 = vmatprep.subr.bf16.mxu0 %v10937_v40  ;;  %10261 = vmatprep.subr.bf16.mxu1 %v10940_v25  ;;  %v15686_v21 = vld [vmem:[#allocation62_spill] sm:$0xff] }
0x1128   : > { %v5903_v30 = vadd.f32 %v15684_v38, %v14161_v16  ;;  %v14531_v34 = vmul.f32 0.5, %v13900_v20  ;;  %v14534_v43 = vmul.f32 0.5, %v14027_v60  ;;  %v6705_v39 = vmul.f32 0.7978846, %v6577_v13  ;;  %v10941_v20 = vld [vmem:[%s11648_s18 + $0x3f8] sm:$0xff]  }
0x1129   : > { %v5976_v36 = vadd.f32 %v15685_v31, %v14164_v9  ;;  %8538 = vmatmul.mubr.bf16.gmra.mrb[236].mxu1 %v7166_v46  ;;  %v7168_v7 = vpack.c.bf16 %v7072_v29, %v7056_v58  ;;  %v6721_v62 = vmul.f32 0.7978846, %v6593_v18  ;;  %v14540_v53 = vmul.f32 0.5, %v13883_v24 }
0x112a   : > { %v6210_v44 = vmul.f32 0.044715, %v5903_v30  ;;  %11264 = vtanh.f32 %v6705_v39  ;;  %v14544_v60 = vmul.f32 0.5, %v13976_v6  ;;  %v6574_v19 = vadd.f32 %v13941_v14, %v13883_v24  ;;  %10300 = vmatpush3.bf16.msra.mxu0 %v10939_v26  ;;  %v10943_v24 = vld [vmem:[%s11648_s18 + $0x3b8] sm:$0xff]   ;;  %10262 = vmatpush3.bf16.msra.mxu1 %v10942_v4 }
0x112b   : > { %v6212_v5 = vmul.f32 0.044715, %v5976_v36  ;;  %8603 = vmatmul.mubr.bf16.gmra.mrb[236].mxu0 %v7168_v7  ;;  %11266 = vtanh.f32 %v6721_v62  ;;  %v14549_v37 = vmul.f32 0.5, %v5903_v30  ;;  %v6590_v55 = vadd.f32 %v14046_v45, %v13976_v6  ;;  %10301 = vmatprep.subr.bf16.mxu0 %v10941_v20 }
0x112c   : > { %v6338_v63 = vmul.f32 %v6210_v44, %v5903_v30  ;;  %v14553_v17 = vmul.f32 0.5, %v5976_v36  ;;  %v6702_v23 = vmul.f32 0.7978846, %v6574_v19  ;;  %v6576_v1 = vadd.f32 %v13946_v33, %v13887_v8 }
0x112d   : > { %v6340_v47 = vmul.f32 %v6212_v5, %v5976_v36  ;;  %v6718_v12 = vmul.f32 0.7978846, %v6590_v55  ;;  %v14559_v40 = vmul.f32 0.5, %v13887_v8  ;;  %v6592_v58 = vadd.f32 %v14059_v57, %v13982_v48 }
0x112e   : > { %v11257_v14 = vpop.eup %11256  ;;  %v6466_v49 = vmul.f32 %v6338_v63, %v5903_v30  ;;  %11268 = vtanh.f32 %v6702_v23  ;;  %v6704_v13 = vmul.f32 0.7978846, %v6576_v1  ;;  %v14565_v46 = vadd.f32 %v15686_v21, %v14193_v28  ;;  %10302 = vmatpush3.bf16.msra.mxu0 %v10943_v24 }
0x112f   : > { %v11259_v6 = vpop.eup %11258  ;;  %v6468_v45 = vmul.f32 %v6340_v47, %v5976_v36  ;;  %11270 = vtanh.f32 %v6718_v12  ;;  %v6720_v38 = vmul.f32 0.7978846, %v6592_v58  ;;  %v6962_v25 = vadd.f32 1.0, %v11257_v14 }
0x1130   : > { %v11261_v33 = vpop.eup %11260  ;;  %v6959_v29 = vadd.f32 1.0, %v11259_v6  ;;  %v6594_v18 = vadd.f32 %v6466_v49, %v5903_v30  ;;  %v14568_v57 = vmul.f32 0.5, %v13982_v48  ;;  %11272 = vtanh.f32 %v6704_v13  ;;  %v15687_v30 = vld [vmem:[#allocation45_spill] sm:$0xff]  ;;  %v15688_v48 = vld [vmem:[#allocation52_spill] sm:$0xff] }
0x1131   : > { %v11263_v8 = vpop.eup %11262  ;;  %v6596_v39 = vadd.f32 %v6468_v45, %v5976_v36  ;;  %v6964_v31 = vadd.f32 1.0, %v11261_v33  ;;  %11274 = vtanh.f32 %v6720_v38  ;;  %v6211_v20 = vmul.f32 0.044715, %v14565_v46 }
0x1132   : > { %v6975_v26 = vadd.f32 1.0, %v11263_v8  ;;  %v6722_v7 = vmul.f32 0.7978846, %v6594_v18  ;;  %v7087_v62 = vmul.f32 %v6959_v29, %v14478_v15  ;;  %v14574_v5 = vadd.f32 %v15687_v30, %v14196_v52 }
0x1133   : > { %v6724_v44 = vmul.f32 0.7978846, %v6596_v39  ;;  %v5909_v19 = vadd.f32 %v15688_v48, %v14161_v16  ;;  %v5982_v4 = vadd.f32 %v13958_v10, %v14164_v9  ;;  %v6339_v15 = vmul.f32 %v6211_v20, %v14565_v46 }
0x1134   : > { %v7103_v36 = vmul.f32 %v6975_v26, %v14493_v54  ;;  %11276 = vtanh.f32 %v6722_v7  ;;  %v11265_v63 = vpop.eup %11264  ;;  %v6213_v55 = vmul.f32 0.044715, %v14574_v5  ;;  %v14585_v47 = vadd.f32 %v13969_v56, %v14193_v28 }
0x1135   : > { %11278 = vtanh.f32 %v6724_v44  ;;  %v11267_v23 = vpop.eup %11266  ;;  %v14588_v54 = vmul.f32 %v6962_v25, %v14449_v11  ;;  %v6961_v24 = vadd.f32 1.0, %v11265_v63  ;;  %v6226_v14 = vmul.f32 0.044715, %v5909_v19 }
0x1136   : > { %v7183_v1 = vpack.c.bf16 %v7103_v36, %v7087_v62  ;;  %v14591_v49 = vmul.f32 %v6964_v31, %v14461_v51  ;;  %v6977_v10 = vadd.f32 1.0, %v11267_v23  ;;  %v6341_v12 = vmul.f32 %v6213_v55, %v14574_v5 }
0x1137   : > { %v14594_v58 = vmul.f32 0.5, %v5909_v19  ;;  %v14597_v6 = vmul.f32 %v6339_v15, %v14565_v46  ;;  %v6354_v56 = vmul.f32 %v6226_v14, %v5909_v19  ;;  %v6228_v45 = vmul.f32 0.044715, %v5982_v4 }
0x1138   : > { %8545 = vmatprep.mubr.bf16.mxu1 %v7183_v1  ;;  %v6227_v11 = vmul.f32 0.044715, %v14585_v47  ;;  %v11269_v13 = vpop.eup %11268  ;;  %v7089_v21 = vmul.f32 %v6961_v24, %v14531_v34  ;;  %v7105_v33 = vmul.f32 %v6977_v10, %v14534_v43  ;;  %v14602_v51 = vmul.f32 0.5, %v5982_v4 }
0x1139   : > { %v14606_v29 = vadd.f32 %v13971_v2, %v14196_v52  ;;  %v11271_v18 = vpop.eup %11270  ;;  %v6958_v38 = vadd.f32 1.0, %v11269_v13  ;;  %v14609_v8 = vmul.f32 %v6341_v12, %v14574_v5  ;;  %v6482_v25 = vmul.f32 %v6354_v56, %v5909_v19 }
0x113a   : > { %v6356_v39 = vmul.f32 %v6228_v45, %v5982_v4  ;;  %v11273_v31 = vpop.eup %11272  ;;  %v7185_v26 = vpack.c.bf16 %v7105_v33, %v7089_v21  ;;  %v6974_v7 = vadd.f32 1.0, %v11271_v18  ;;  %v14613_v43 = vmul.f32 0.5, %v14054_v50  ;;  %v15691_v18 = vld [vmem:[#allocation58_spill] sm:$0xff] }
0x113b   : > { %v6229_v34 = vmul.f32 0.044715, %v14606_v29  ;;  %v11275_v62 = vpop.eup %11274  ;;  %v6960_v44 = vadd.f32 1.0, %v11273_v31  ;;  %v6610_v20 = vadd.f32 %v6482_v25, %v5909_v19  ;;  %v6355_v30 = vmul.f32 %v6227_v11, %v14585_v47  ;;  %v15689_v11 = vld [vmem:[#allocation89_spill] sm:$0xff]  ;;  %v15692_v25 = vld [vmem:[#allocation72_spill] sm:$0xff] }
0x113c   : > { %v6484_v2 = vmul.f32 %v6356_v39, %v5982_v4  ;;  %8610 = vmatprep.mubr.bf16.mxu0 %v7185_v26  ;;  %v7086_v36 = vmul.f32 %v6958_v38, %v14540_v53  ;;  %v7102_v48 = vmul.f32 %v6974_v7, %v14544_v60  ;;  %v6976_v63 = vadd.f32 1.0, %v11275_v62  ;;  %v15693_v39 = vld [vmem:[#allocation36_spill] sm:$0xff]  ;;  %v15694_v26 = vld [vmem:[#allocation73_spill] sm:$0xff] }
0x113d   : > { %v14619_v15 = vmul.f32 0.5, %v14152_v32  ;;  %v6738_v23 = vmul.f32 0.7978846, %v6610_v20  ;;  %v6357_v24 = vmul.f32 %v6229_v34, %v14606_v29  ;;  %v6607_v19 = vadd.f32 %v14116_v61, %v14054_v50  ;;  %v15695_v34 = vld [vmem:[#allocation63_spill] sm:$0xff] }
0x113e   : > { %v11277_v55 = vpop.eup %11276  ;;  %v6612_v1 = vadd.f32 %v6484_v2, %v5982_v4  ;;  %v7182_v12 = vpack.c.bf16 %v7102_v48, %v7086_v36  ;;  %v7088_v56 = vmul.f32 %v6960_v44, %v14559_v40  ;;  %v7104_v53 = vmul.f32 %v6976_v63, %v14568_v57  ;;  %v15696_v63 = vld [vmem:[#allocation60_spill] sm:$0xff] }
0x113f   : > { %v11279_v14 = vpop.eup %11278  ;;  %v6978_v10 = vadd.f32 1.0, %v11277_v55  ;;  %11280 = vtanh.f32 %v6738_v23  ;;  %v6623_v13 = vadd.f32 %v15689_v11, %v14152_v32  ;;  %v14632_v50 = vmul.f32 %v6355_v30, %v14585_v47  ;;  %v15697_v23 = vld [vmem:[#allocation82_spill] sm:$0xff]  ;;  %v15701_v11 = vld [vmem:[#allocation56_spill] sm:$0xff] }
0x1140   : > { %v6980_v60 = vadd.f32 1.0, %v11279_v14  ;;  %v6740_v45 = vmul.f32 0.7978846, %v6612_v1  ;;  %8546 = vmatmul.mubr.bf16.gmra.mrb[240].mxu1 %v7182_v12  ;;  %v7184_v21 = vpack.c.bf16 %v7104_v53, %v7088_v56  ;;  %v6735_v61 = vmul.f32 0.7978846, %v6607_v19  ;;  %v15699_v19 = vld [vmem:[#allocation83_spill] sm:$0xff] }
0x1141   : > { %v14629_v4 = vmul.f32 %v6978_v10, %v14549_v37  ;;  %v14638_v40 = vmul.f32 %v6357_v24, %v14606_v29  ;;  %v6751_v57 = vmul.f32 0.7978846, %v6623_v13  ;;  %v15690_v37 = vld [vmem:[#allocation85_spill] sm:$0xff]  ;;  %v6625_v31 = vadd.f32 %v15693_v39, %v15692_v25 }
0x1142   : > { %v14635_v33 = vmul.f32 %v6980_v60, %v14553_v17  ;;  %11282 = vtanh.f32 %v6740_v45  ;;  %8611 = vmatmul.mubr.bf16.gmra.mrb[240].mxu0 %v7184_v21  ;;  %v6609_v38 = vadd.f32 %v15691_v18, %v15690_v37  ;;  %v5913_v7 = vadd.f32 %v15694_v26, %v14161_v16  ;;  %v15700_v45 = vld [vmem:[#allocation76_spill] sm:$0xff]  ;;  %v15702_v21 = vld [vmem:[#allocation70_spill] sm:$0xff]  ;;  %v15736_v17 = vld [vmem:[#allocation49_spill] sm:$0xff] }
0x1143   : > { %v7186_v32 = vpack.c.bf16 %v14629_v4, %v14588_v54  ;;  %11284 = vtanh.f32 %v6735_v61  ;;  %v5986_v62 = vadd.f32 %v15695_v34, %v14164_v9  ;;  %v14653_v44 = vmul.f32 0.5, %v15690_v37  ;;  %v15698_v9 = vld [vmem:[#allocation74_spill] sm:$0xff]  ;;  %v15703_v61 = vld [vmem:[#allocation81_spill] sm:$0xff] }
0x1144   : > { %11286 = vtanh.f32 %v6751_v57  ;;  %v14656_v20 = vmul.f32 0.5, %v15692_v25  ;;  %v6737_v2 = vmul.f32 0.7978846, %v6609_v38  ;;  %v6753_v30 = vmul.f32 0.7978846, %v6625_v31  ;;  %v15704_v25 = vld [vmem:[#allocation68_spill] sm:$0xff] }
0x1145   : > { %v6242_v36 = vmul.f32 0.044715, %v5913_v7  ;;  %v6244_v48 = vmul.f32 0.044715, %v5986_v62  ;;  %v14659_v55 = vmul.f32 0.5, %v15696_v63  ;;  %v14662_v1 = vmul.f32 0.5, %v15697_v23 }
0x1146   : > { %11288 = vtanh.f32 %v6737_v2  ;;  %v14664_v16 = vmul.f32 0.5, %v5913_v7  ;;  %v6606_v24 = vadd.f32 %v15698_v9, %v15696_v63  ;;  %v6622_v14 = vadd.f32 %v15699_v19, %v15697_v23  ;;  %v15705_v31 = vld [vmem:[#allocation71_spill] sm:$0xff] }
0x1147   : > { %11290 = vtanh.f32 %v6753_v30  ;;  %v6370_v10 = vmul.f32 %v6242_v36, %v5913_v7  ;;  %v14670_v12 = vmul.f32 0.5, %v5986_v62  ;;  %v6372_v56 = vmul.f32 %v6244_v48, %v5986_v62 }
0x1148   : > { %v6734_v53 = vmul.f32 0.7978846, %v6606_v24  ;;  %v6750_v60 = vmul.f32 0.7978846, %v6622_v14  ;;  %v6608_v13 = vadd.f32 %v15701_v11, %v15700_v45  ;;  %v6624_v57 = vadd.f32 %v15703_v61, %v15702_v21 }
0x1149   : > { %v11281_v37 = vpop.eup %11280  ;;  %v6498_v18 = vmul.f32 %v6370_v10, %v5913_v7  ;;  %v6500_v38 = vmul.f32 %v6372_v56, %v5986_v62  ;;  %v14678_v39 = vadd.f32 %v15704_v25, %v14193_v28  ;;  %v14682_v26 = vadd.f32 %v15705_v31, %v14196_v52 }
0x114a   : > { %v6994_v34 = vadd.f32 1.0, %v11281_v37  ;;  %11292 = vtanh.f32 %v6734_v53  ;;  %v6736_v2 = vmul.f32 0.7978846, %v6608_v13  ;;  %v6752_v30 = vmul.f32 0.7978846, %v6624_v57  ;;  %v15706_v37 = vld [vmem:[#allocation87_spill] sm:$0xff] }
0x114b   : > { %v6626_v48 = vadd.f32 %v6498_v18, %v5913_v7  ;;  %v6628_v63 = vadd.f32 %v6500_v38, %v5986_v62  ;;  %11294 = vtanh.f32 %v6750_v60  ;;  %v6243_v23 = vmul.f32 0.044715, %v14678_v39 }
0x114c   : > { %v11283_v36 = vpop.eup %11282  ;;  %v6096_v19 = vmul.f32 0.5, %v15700_v45  ;;  %11296 = vtanh.f32 %v6736_v2  ;;  %v6245_v28 = vmul.f32 0.044715, %v14682_v26  ;;  %v6112_v11 = vmul.f32 0.5, %v15702_v21  ;;  %v15707_v21 = vld [vmem:[#allocation88_spill] sm:$0xff] }
0x114d   : > { %v11285_v9 = vpop.eup %11284  ;;  %v6996_v24 = vadd.f32 1.0, %v11283_v36  ;;  %v6754_v10 = vmul.f32 0.7978846, %v6626_v48  ;;  %v6756_v56 = vmul.f32 0.7978846, %v6628_v63  ;;  %11298 = vtanh.f32 %v6752_v30  ;;  %v15710_v48 = vld [vmem:[#allocation90_spill] sm:$0xff] }
0x114e   : > { %v11287_v14 = vpop.eup %11286  ;;  %v6991_v52 = vadd.f32 1.0, %v11285_v9  ;;  %v6371_v7 = vmul.f32 %v6243_v23, %v14678_v39  ;;  %v6373_v62 = vmul.f32 %v6245_v28, %v14682_v26  ;;  %v14691_v60 = vmul.f32 %v6994_v34, %v14594_v58  ;;  %v15711_v63 = vld [vmem:[#allocation80_spill] sm:$0xff] }
0x114f   : > { %v7007_v53 = vadd.f32 1.0, %v11287_v14  ;;  %v14694_v45 = vmul.f32 %v6996_v24, %v14602_v51  ;;  %11300 = vtanh.f32 %v6754_v10  ;;  %v14699_v18 = vmul.f32 0.5, %v15706_v37  ;;  %v15708_v51 = vld [vmem:[#allocation92_spill] sm:$0xff]  ;;  %v15712_v14 = vld [vmem:[#allocation91_spill] sm:$0xff] }
0x1150   : > { %v7119_v13 = vmul.f32 %v6991_v52, %v14613_v43  ;;  %v11289_v61 = vpop.eup %11288  ;;  %11302 = vtanh.f32 %v6756_v56  ;;  %v14702_v38 = vmul.f32 0.5, %v15707_v21  ;;  %v14705_v58 = vmul.f32 %v6371_v7, %v14678_v39  ;;  %v15709_v43 = vld [vmem:[#allocation75_spill] sm:$0xff] }
0x1151   : > { %v7135_v57 = vmul.f32 %v7007_v53, %v14619_v15  ;;  %v11291_v25 = vpop.eup %11290  ;;  %v6993_v31 = vadd.f32 1.0, %v11289_v61  ;;  %v6515_v34 = vadd.f32 %v15708_v51, %v15706_v37  ;;  %v6531_v2 = vadd.f32 %v15709_v43, %v15707_v21  ;;  %v15713_v52 = vld [vmem:[#allocation99_spill] sm:$0xff]  ;;  %v15716_v51 = vld [vmem:[#allocation32_spill] sm:$0xff] }
0x1152   : > { %v7009_v15 = vadd.f32 1.0, %v11291_v25  ;;  %v14712_v36 = vmul.f32 %v6373_v62, %v14682_v26  ;;  %v6517_v23 = vadd.f32 %v15711_v63, %v15710_v48  ;;  %v6533_v10 = vadd.f32 %v15713_v52, %v15712_v14 }
0x1153   : > { %v7199_v30 = vpack.c.bf16 %v7135_v57, %v7119_v13  ;;  %v7121_v9 = vmul.f32 %v6993_v31, %v14653_v44  ;;  %v6643_v24 = vmul.f32 0.7978846, %v6515_v34  ;;  %v6659_v28 = vmul.f32 0.7978846, %v6531_v2  ;;  %v15714_v13 = vld [vmem:[#allocation29_spill] sm:$0xff]  ;;  %v15717_v2 = vld [vmem:[#allocation34_spill] sm:$0xff] }
0x1154   : > { %v11293_v56 = vpop.eup %11292  ;;  %v7137_v53 = vmul.f32 %v7009_v15, %v14656_v20  ;;  %v6645_v7 = vmul.f32 0.7978846, %v6517_v23  ;;  %v6898_v61 = vadd.f32 1.0, %v15714_v13  ;;  %v15715_v57 = vld [vmem:[#allocation101_spill] sm:$0xff]  ;;  %v6661_v25 = vmul.f32 0.7978846, %v6533_v10 }
0x1155   : > { %8553 = vmatprep.mubr.bf16.mxu1 %v7199_v30  ;;  %v6914_v62 = vadd.f32 1.0, %v15715_v57  ;;  %v11295_v37 = vpop.eup %11294  ;;  %v6990_v21 = vadd.f32 1.0, %v11293_v56  ;;  %11304 = vtanh.f32 %v6643_v24  ;;  %v6900_v44 = vadd.f32 1.0, %v15716_v51  ;;  %v15718_v23 = vld [vmem:[#allocation95_spill] sm:$0xff]  ;;  %v15721_v51 = vld [vmem:[#allocation96_spill] sm:$0xff] }
0x1156   : > { %v11297_v31 = vpop.eup %11296  ;;  %v7201_v34 = vpack.c.bf16 %v7137_v53, %v7121_v9  ;;  %v7006_v43 = vadd.f32 1.0, %v11295_v37  ;;  %11306 = vtanh.f32 %v6659_v28  ;;  %v14724_v63 = vmul.f32 %v6898_v61, %v15717_v2  ;;  %v15719_v56 = vld [vmem:[#allocation31_spill] sm:$0xff]  ;;  %v15725_v2 = vld [vmem:[#allocation44_spill] sm:$0xff] }
0x1157   : > { %v11299_v30 = vpop.eup %11298  ;;  %v7118_v20 = vmul.f32 %v6990_v21, %v14659_v55  ;;  %v6992_v15 = vadd.f32 1.0, %v11297_v31  ;;  %11308 = vtanh.f32 %v6645_v7  ;;  %v14728_v52 = vmul.f32 %v6914_v62, %v15718_v23  ;;  %v15720_v55 = vld [vmem:[#allocation77_spill] sm:$0xff] }
0x1158   : > { %8618 = vmatprep.mubr.bf16.mxu0 %v7201_v34  ;;  %v7134_v24 = vmul.f32 %v7006_v43, %v14662_v1  ;;  %v7008_v10 = vadd.f32 1.0, %v11299_v30  ;;  %11310 = vtanh.f32 %v6661_v25  ;;  %v6916_v9 = vadd.f32 1.0, %v15719_v56  ;;  %v15722_v34 = vld [vmem:[#allocation93_spill] sm:$0xff]  ;;  %v15726_v56 = vld [vmem:[#allocation94_spill] sm:$0xff] }
0x1159   : > { %v11301_v53 = vpop.eup %11300  ;;  %v7120_v28 = vmul.f32 %v6992_v15, %v6096_v19  ;;  %v6005_v13 = vmul.f32 0.5, %v15710_v48  ;;  %v7154_v61 = vpack.c.bf16 %v14728_v52, %v14724_v63  ;;  %v14736_v57 = vmul.f32 %v6900_v44, %v15720_v55  ;;  %v15723_v19 = vld [vmem:[#allocation48_spill] sm:$0xff]  ;;  %v15724_v48 = vld [vmem:[#allocation46_spill] sm:$0xff] }
0x115a   : > { %v11303_v7 = vpop.eup %11302  ;;  %v7010_v62 = vadd.f32 1.0, %v11301_v53  ;;  %v7198_v37 = vpack.c.bf16 %v7134_v24, %v7118_v20  ;;  %v7136_v21 = vmul.f32 %v7008_v10, %v6112_v11  ;;  %v14739_v1 = vmul.f32 %v6916_v9, %v15721_v51  ;;  %v15727_v53 = vld [vmem:[#allocation78_spill] sm:$0xff]  ;;  %v15730_v51 = vld [vmem:[#allocation105_spill] sm:$0xff] }
0x115b   : > { %v7012_v25 = vadd.f32 1.0, %v11303_v7  ;;  %v6021_v31 = vmul.f32 0.5, %v15712_v14  ;;  %v6547_v43 = vadd.f32 %v15723_v19, %v15722_v34  ;;  %v6563_v30 = vadd.f32 %v15725_v2, %v15724_v48  ;;  %v15728_v55 = vld [vmem:[#allocation86_spill] sm:$0xff] }
0x115c   : > { %v14747_v15 = vmul.f32 %v7010_v62, %v14664_v16  ;;  %8554 = vmatmul.mubr.bf16.gmra.mrb[244].mxu1 %v7198_v37  ;;  %v7200_v44 = vpack.c.bf16 %v7136_v21, %v7120_v28  ;;  %v7156_v11 = vpack.c.bf16 %v14739_v1, %v14736_v57  ;;  %v14752_v20 = vmul.f32 0.5, %v15722_v34  ;;  %v15729_v21 = vld [vmem:[#allocation33_spill] sm:$0xff] }
0x115d   : > { %v14755_v23 = vmul.f32 %v7012_v25, %v14670_v12  ;;  %v14758_v14 = vmul.f32 0.5, %v15724_v48  ;;  %v6675_v24 = vmul.f32 0.7978846, %v6547_v43  ;;  %v6691_v10 = vmul.f32 0.7978846, %v6563_v30 }
0x115e   : > { %8619 = vmatmul.mubr.bf16.gmra.mrb[244].mxu0 %v7200_v44  ;;  %v14763_v9 = vmul.f32 0.5, %v15726_v56  ;;  %v6549_v28 = vadd.f32 %v15727_v53, %v15726_v56  ;;  %v6565_v7 = vadd.f32 %v15728_v55, %v14418_v0  ;;  %v14772_v37 = vmul.f32 0.5, %v14418_v0  ;;  %v15731_v56 = vld [vmem:[#allocation55_spill] sm:$0xff]  ;;  %v15732_v53 = vld [vmem:[#allocation106_spill] sm:$0xff] }
0x115f   : > { %v11305_v12 = vpop.eup %11304  ;;  %11312 = vtanh.f32 %v6675_v24  ;;  %v6546_v25 = vadd.f32 %v15730_v51, %v15729_v21  ;;  %v14777_v44 = vmul.f32 0.5, %v15729_v21  ;;  %v6562_v55 = vadd.f32 %v15732_v53, %v15731_v56  ;;  %v15735_v53 = vld [vmem:[#allocation35_spill] sm:$0xff] }
0x1160   : > { %v11307_v34 = vpop.eup %11306  ;;  %v6899_v19 = vadd.f32 1.0, %v11305_v12  ;;  %11314 = vtanh.f32 %v6691_v10  ;;  %v6677_v43 = vmul.f32 0.7978846, %v6549_v28  ;;  %v6693_v48 = vmul.f32 0.7978846, %v6565_v7  ;;  %v15733_v12 = vld [vmem:[#allocation30_spill] sm:$0xff] }
0x1161   : > { %v11309_v2 = vpop.eup %11308  ;;  %v6915_v30 = vadd.f32 1.0, %v11307_v34  ;;  %v6674_v24 = vmul.f32 0.7978846, %v6546_v25  ;;  %v14783_v51 = vmul.f32 0.5, %v15731_v56  ;;  %v6690_v7 = vmul.f32 0.7978846, %v6562_v55 }
0x1162   : > { %v11311_v62 = vpop.eup %11310  ;;  %v7027_v0 = vmul.f32 %v6899_v19, %v14699_v18  ;;  %v6901_v16 = vadd.f32 1.0, %v11309_v2  ;;  %11316 = vtanh.f32 %v6677_v43  ;;  %v14787_v21 = vmul.f32 0.5, %v15733_v12  ;;  %v15734_v34 = vld [vmem:[#allocation38_spill] sm:$0xff] }
0x1163   : > { %v7043_v10 = vmul.f32 %v6915_v30, %v14702_v38  ;;  %v6917_v28 = vadd.f32 1.0, %v11311_v62  ;;  %11318 = vtanh.f32 %v6693_v48  ;;  %v6548_v25 = vadd.f32 %v15734_v34, %v15733_v12 }
0x1164   : > { %11320 = vtanh.f32 %v6674_v24  ;;  %v6564_v18 = vadd.f32 %v15736_v17, %v15735_v53  ;;  %v7029_v43 = vmul.f32 %v6901_v16, %v6005_v13  ;;  %v14794_v56 = vmul.f32 0.5, %v15735_v53 }
0x1165   : > { %v7155_v19 = vpack.c.bf16 %v7043_v10, %v7027_v0  ;;  %v7045_v2 = vmul.f32 %v6917_v28, %v6021_v31  ;;  %11322 = vtanh.f32 %v6690_v7  ;;  %v6676_v38 = vmul.f32 0.7978846, %v6548_v25  ;;  %v14826_v10 = vpop.f32.mrb[208].mxu0 }
0x1166   : > { %v6692_v62 = vmul.f32 0.7978846, %v6564_v18  ;;  %v6579_v48 = vadd.f32 %v14511_v59, %v14441_v27  ;;  %v14799_v55 = vmul.f32 0.5, %v14441_v27  ;;  %v14802_v24 = vmul.f32 0.5, %v14565_v46  ;;  %v14813_v27 = vpop.f32.mrb[208].mxu1  ;;  %v14832_v7 = vpop.f32.mrb[209].mxu0 }
0x1167   : > { %8659 = vmatprep.mubr.bf16.mxu1 %v7155_v19  ;;  %v7157_v30 = vpack.c.bf16 %v7045_v2, %v7029_v43  ;;  %v6595_v17 = vadd.f32 %v14597_v6, %v14565_v46  ;;  %11324 = vtanh.f32 %v6676_v38  ;;  %v6581_v59 = vadd.f32 %v14519_v3, %v14454_v42  ;;  %v14821_v63 = vpop.f32.mrb[209].mxu1  ;;  %v14843_v25 = vpop.f32.mrb[210].mxu0 }
0x1168   : > { %8660 = vmatmul.mubr.bf16.vlgmr.msra.gmra.mrb[248].mxu1 %v7154_v61  ;;  %v6707_v13 = vmul.f32 0.7978846, %v6579_v48  ;;  %v6597_v31 = vadd.f32 %v14609_v8, %v14574_v5  ;;  %11326 = vtanh.f32 %v6692_v62  ;;  %v14816_v46 = vmul.f32 0.5, %v14454_v42  ;;  %v14834_v12 = vpop.f32.mrb[210].mxu1  ;;  %v14848_v43 = vpop.f32.mrb[211].mxu0 }
0x1169   : > { %v11313_v16 = vpop.eup %11312  ;;  %8724 = vmatprep.mubr.bf16.mxu0 %v7157_v30  ;;  %v6723_v0 = vmul.f32 0.7978846, %v6595_v17  ;;  %v14819_v6 = vmul.f32 0.5, %v14574_v5  ;;  %v6709_v8 = vmul.f32 0.7978846, %v6581_v59  ;;  %v6611_v42 = vadd.f32 %v14632_v50, %v14585_v47  ;;  %v14845_v50 = vpop.f32.mrb[211].mxu1 }
0x116a   : > { %v11315_v52 = vpop.eup %11314  ;;  %8725 = vmatmul.mubr.bf16.vlgmr.msra.gmra.mrb[248].mxu0 %v7156_v11  ;;  %v6931_v3 = vadd.f32 1.0, %v11313_v16  ;;  %11328 = vtanh.f32 %v6707_v13  ;;  %v6725_v61 = vmul.f32 0.7978846, %v6597_v31  ;;  %v6627_v5 = vadd.f32 %v14705_v58, %v14678_v39  ;;  %v14861_v31 = vld [vmem:[%s818_s4] ss:$0 sm:$0xff]  ;;  %v15737_v16 = vld [vmem:[#allocation41_spill] sm:$0xff] }
0x116b   : > { %v6947_v28 = vadd.f32 1.0, %v11315_v52  ;;  %11330 = vtanh.f32 %v6723_v0  ;;  %v14838_v11 = vmul.f32 0.5, %v14585_v47  ;;  %v14841_v34 = vmul.f32 0.5, %v14678_v39  ;;  %v15738_v0 = vld [vmem:[#allocation67_spill] sm:$0xff]  ;;  %v15739_v52 = vld [vmem:[#allocation97_spill] sm:$0xff] }
0x116c   : > { %v11317_v57 = vpop.eup %11316  ;;  %v7059_v1 = vmul.f32 %v6931_v3, %v14752_v20  ;;  %11332 = vtanh.f32 %v6709_v8  ;;  %v6739_v19 = vmul.f32 0.7978846, %v6611_v42  ;;  %v6755_v47 = vmul.f32 0.7978846, %v6627_v5  ;;  %v15740_v3 = vld [vmem:[#allocation104_spill] sm:$0xff]  ;;  %v15741_v42 = vld [vmem:[#allocation98_spill] sm:$0xff] }
0x116d   : > { %v11319_v53 = vpop.eup %11318  ;;  %v7075_v58 = vmul.f32 %v6947_v28, %v14758_v14  ;;  %v6933_v18 = vadd.f32 1.0, %v11317_v57  ;;  %11334 = vtanh.f32 %v6725_v61  ;;  %v6613_v39 = vadd.f32 %v14638_v40, %v14606_v29  ;;  %v15742_v5 = vld [vmem:[#allocation37_spill] sm:$0xff] }
0x116e   : > { %v11321_v20 = vpop.eup %11320  ;;  %v6949_v2 = vadd.f32 1.0, %v11319_v53  ;;  %v6629_v38 = vadd.f32 %v14712_v36, %v14682_v26  ;;  %11336 = vtanh.f32 %v6739_v19  ;;  %v10065_v8 = vadd.f32 %v15740_v3, %v15739_v52 }
0x116f   : > { %v11323_v62 = vpop.eup %11322  ;;  %v7171_v48 = vpack.c.bf16 %v7075_v58, %v7059_v1  ;;  %v7061_v30 = vmul.f32 %v6933_v18, %v14763_v9  ;;  %v6930_v14 = vadd.f32 1.0, %v11321_v20  ;;  %11338 = vtanh.f32 %v6755_v47  ;;  %v15743_v58 = vld [vmem:[#allocation39_spill] sm:$0xff] }
0x1170   : > { %v7077_v17 = vmul.f32 %v6949_v2, %v14772_v37  ;;  %v6946_v13 = vadd.f32 1.0, %v11323_v62  ;;  %v6741_v59 = vmul.f32 0.7978846, %v6613_v39  ;;  %v6757_v36 = vmul.f32 0.7978846, %v6629_v38  ;;  %v15744_v18 = vld [vmem:[#allocation51_spill] sm:$0xff] }
0x1171   : > { %8667 = vmatprep.mubr.bf16.mxu1 %v7171_v48  ;;  %v7058_v40 = vmul.f32 %v6930_v14, %v14777_v44  ;;  %v10025_v9 = vadd.f32 %v15738_v0, %v15737_v16  ;;  %v11325_v37 = vpop.eup %11324  ;;  %v10028_v57 = vadd.f32 %v15742_v5, %v15741_v42  ;;  %v10068_v19 = vadd.f32 %v15744_v18, %v15743_v58  ;;  %v15745_v38 = vld [vmem:[#allocation65_spill] sm:$0xff] }
0x1172   : > { %v7173_v61 = vpack.c.bf16 %v7077_v17, %v7061_v30  ;;  %v7074_v28 = vmul.f32 %v6946_v13, %v14783_v51  ;;  %11340 = vtanh.f32 %v6741_v59  ;;  %v11327_v1 = vpop.eup %11326  ;;  %v6932_v53 = vadd.f32 1.0, %v11325_v37  ;;  %v15746_v51 = vld [vmem:[#allocation61_spill] sm:$0xff]  ;;  %v15748_v37 = vld [vmem:[#allocation40_spill] sm:$0xff] }
0x1173   : > { %11342 = vtanh.f32 %v6757_v36  ;;  %v8272_v44 = vadd.f32 %v10025_v9, %v14861_v31  ;;  %v6948_v47 = vadd.f32 1.0, %v11327_v1  ;;  %v8275_v39 = vadd.f32 %v10028_v57, %v14861_v31 }
0x1174   : > { %v11329_v20 = vpop.eup %11328  ;;  %8732 = vmatprep.mubr.bf16.mxu0 %v7173_v61  ;;  %v7170_v2 = vpack.c.bf16 %v7074_v28, %v7058_v40  ;;  %v10031_v62 = vadd.f32 %v15746_v51, %v15745_v38  ;;  %v7060_v30 = vmul.f32 %v6932_v53, %v14787_v21  ;;  %v10071_v13 = vadd.f32 %v14486_v41, %v14480_v22  ;;  %v15747_v21 = vld [vmem:[#allocation69_spill] sm:$0xff]  ;;  %v15749_v61 = vld [vmem:[#allocation79_spill] sm:$0xff] }
0x1175   : > { %v11331_v48 = vpop.eup %11330  ;;  %v6963_v14 = vadd.f32 1.0, %v11329_v20  ;;  %v14878_v17 = vadd.f32 %v10065_v8, %v8272_v44  ;;  %v7076_v36 = vmul.f32 %v6948_v47, %v14794_v56  ;;  %v14883_v16 = vadd.f32 %v10068_v19, %v8275_v39 }
0x1176   : > { %v11333_v59 = vpop.eup %11332  ;;  %8668 = vmatmul.mubr.bf16.gmra.mrb[252].mxu1 %v7170_v2  ;;  %v6979_v40 = vadd.f32 1.0, %v11331_v48  ;;  %v8280_v0 = vadd.f32 %v10031_v62, %v14861_v31  ;;  %v10034_v8 = vadd.f32 %v15748_v37, %v15747_v21  ;;  %v10074_v28 = vadd.f32 %v14503_v35, %v15749_v61 }
0x1177   : > { %v11335_v9 = vpop.eup %11334  ;;  %v7091_v52 = vmul.f32 %v6963_v14, %v14799_v55  ;;  %v6965_v3 = vadd.f32 1.0, %v11333_v59  ;;  %v7172_v41 = vpack.c.bf16 %v7076_v36, %v7060_v30  ;;  %v10037_v55 = vadd.f32 %v14821_v63, %v14813_v27 }
0x1178   : > { %v7107_v22 = vmul.f32 %v6979_v40, %v14802_v24  ;;  %v6981_v42 = vadd.f32 1.0, %v11335_v9  ;;  %v14892_v56 = vadd.f32 %v10071_v13, %v8280_v0  ;;  %v11337_v5 = vpop.eup %11336  ;;  %v8283_v1 = vadd.f32 %v10034_v8, %v14861_v31 }
0x1179   : > { %v7093_v57 = vmul.f32 %v6965_v3, %v14816_v46  ;;  %v10077_v53 = vadd.f32 %v14832_v7, %v14826_v10  ;;  %v11339_v44 = vpop.eup %11338  ;;  %8733 = vmatmul.mubr.bf16.gmra.mrb[252].mxu0 %v7172_v41  ;;  %v6995_v24 = vadd.f32 1.0, %v11337_v5  ;;  %v10040_v18 = vadd.f32 %v14845_v50, %v14834_v12  ;;  %v10041_v50 = vpop.f32.mrb[212].mxu1 }
0x117a   : > { %v7187_v35 = vpack.c.bf16 %v7107_v22, %v7091_v52  ;;  %v7109_v58 = vmul.f32 %v6981_v42, %v14819_v6  ;;  %v7011_v19 = vadd.f32 1.0, %v11339_v44  ;;  %v14903_v20 = vadd.f32 %v10074_v28, %v8283_v1  ;;  %v10042_v62 = vpop.f32.mrb[213].mxu1  ;;  %v10081_v48 = vpop.f32.mrb[212].mxu0 }
0x117b   : > { %v8288_v46 = vadd.f32 %v10037_v55, %v14861_v31  ;;  %v10080_v27 = vadd.f32 %v14848_v43, %v14843_v25  ;;  %v8291_v7 = vadd.f32 %v10040_v18, %v14861_v31  ;;  %v7123_v6 = vmul.f32 %v6995_v24, %v14838_v11  ;;  %v10044_v30 = vpop.f32.mrb[214].mxu1  ;;  %v10082_v59 = vpop.f32.mrb[213].mxu0 }
0x117c   : > { %v11341_v63 = vpop.eup %11340  ;;  %8675 = vmatprep.mubr.bf16.mxu1 %v7187_v35  ;;  %v7189_v10 = vpack.c.bf16 %v7109_v58, %v7093_v57  ;;  %v7139_v47 = vmul.f32 %v7011_v19, %v14841_v34  ;;  %v6101_v25 = vmul.f32 0.5, %v14606_v29  ;;  %v6117_v43 = vmul.f32 0.5, %v14682_v26  ;;  %v10045_v36 = vpop.f32.mrb[215].mxu1 }
0x117d   : > { %v11343_v2 = vpop.eup %11342  ;;  %v6997_v39 = vadd.f32 1.0, %v11341_v63  ;;  %v14911_v12 = vadd.f32 %v10077_v53, %v8288_v46  ;;  %v14918_v51 = vadd.f32 %v10080_v27, %v8291_v7  ;;  %v10043_v34 = vadd.f32 %v10042_v62, %v10041_v50 }
0x117e   : > { %8740 = vmatprep.mubr.bf16.mxu0 %v7189_v10  ;;  %8676 = vmatmul.mubr.bf16.gmra.mrb[0].mxu1 %v7186_v32  ;;  %v7013_v38 = vadd.f32 1.0, %v11343_v2  ;;  %v7203_v11 = vpack.c.bf16 %v7139_v47, %v7123_v6  ;;  %v10083_v4 = vadd.f32 %v10082_v59, %v10081_v48  ;;  %v10084_v32 = vpop.f32.mrb[214].mxu0  ;;  %v10046_v29 = vadd.f32 %v10045_v36, %v10044_v30 }
0x117f   : > { %v7125_v14 = vmul.f32 %v6997_v39, %v6101_v25  ;;  %v8296_v54 = vadd.f32 %v10043_v34, %v14861_v31  ;;  %v15750_v26 = vpack.c.bf16 %v14635_v33, %v14591_v49  ;;  %v10085_v0 = vpop.f32.mrb[215].mxu0  ;;  %v15751_v37 = vpack.c.bf16 %v14747_v15, %v14691_v60 }
0x1180   : > { %v7141_v13 = vmul.f32 %v7013_v38, %v6117_v43  ;;  %8683 = vmatprep.mubr.bf16.mxu1 %v7203_v11  ;;  %v8299_v52 = vadd.f32 %v10046_v29, %v14861_v31  ;;  %v10086_v3 = vadd.f32 %v10085_v0, %v10084_v32  ;;  %v15752_v8 = vpack.c.bf16 %v14755_v23, %v14694_v45 }
0x1181   : > { %8741 = vmatmul.mubr.bf16.gmra.mrb[0].mxu0 %v15750_v26  ;;  %v8361_v9 = vadd.f32 %v10083_v4, %v8296_v54 }
0x1182   : > { %v7205_v40 = vpack.c.bf16 %v7141_v13, %v7125_v14  ;;  %v14925_v21 = vadd.f32 %v10086_v3, %v8299_v52 }
0x1184   : > { %8748 = vmatprep.mubr.bf16.mxu0 %v7205_v40 }
0x1186   : > { %8684 = vmatmul.mubr.bf16.gmra.mrb[4].mxu1 %v15751_v37 }
0x1187   : > { %v10103_v61 = vpop.f32.mrb[216].mxu1 }
0x1188   : > { %v10104_v49 = vpop.f32.mrb[217].mxu1 }
0x1189   : > { %8749 = vmatmul.mubr.bf16.gmra.mrb[4].mxu0 %v15752_v8  ;;  %v10105_v33 = vadd.f32 %v10104_v49, %v10103_v61  ;;  %v10106_v28 = vpop.f32.mrb[218].mxu1 }
0x118a   : > { %v10107_v41 = vpop.f32.mrb[219].mxu1 }
0x118b   : > { %v8402_v22 = vadd.f32 %v10105_v33, %v14878_v17  ;;  %v10108_v31 = vadd.f32 %v10107_v41, %v10106_v28 }
0x118d   : > { %v8405_v57 = vadd.f32 %v10108_v31, %v14883_v16 }
0x118e   : > { %v10143_v42 = vpop.f32.mrb[216].mxu0 }
0x118f   : > { %v10144_v5 = vpop.f32.mrb[217].mxu0 }
0x1190   : > { %v10145_v1 = vadd.f32 %v10144_v5, %v10143_v42  ;;  %v10146_v55 = vpop.f32.mrb[218].mxu0 }
0x1191   : > { %v10147_v60 = vpop.f32.mrb[219].mxu0 }
0x1192   : > { %v8467_v15 = vadd.f32 %v10145_v1, %v8402_v22  ;;  %v10148_v53 = vadd.f32 %v10147_v60, %v10146_v55 }
0x1194   : > { %v8470_v44 = vadd.f32 %v10148_v53, %v8405_v57 }
0x11a4   : > { %v10109_v45 = vpop.f32.mrb[220].mxu1 }
0x11a5   : > { %v10110_v23 = vpop.f32.mrb[221].mxu1 }
0x11a6   : > { %v10111_v35 = vadd.f32 %v10110_v23, %v10109_v45  ;;  %v10112_v58 = vpop.f32.mrb[222].mxu1  ;;  %v10149_v24 = vpop.f32.mrb[220].mxu0 }
0x11a7   : > { %v10113_v18 = vpop.f32.mrb[223].mxu1  ;;  %v10150_v17 = vpop.f32.mrb[221].mxu0 }
0x11a8   : > { %v8410_v19 = vadd.f32 %v10111_v35, %v14892_v56  ;;  %v10114_v46 = vadd.f32 %v10113_v18, %v10112_v58  ;;  %v10151_v27 = vadd.f32 %v10150_v17, %v10149_v24  ;;  %v10152_v63 = vpop.f32.mrb[222].mxu0 }
0x11a9   : > { %v10153_v10 = vpop.f32.mrb[223].mxu0 }
0x11aa   : > { %v8413_v16 = vadd.f32 %v10114_v46, %v14903_v20  ;;  %v8475_v7 = vadd.f32 %v10151_v27, %v8410_v19  ;;  %v10154_v2 = vadd.f32 %v10153_v10, %v10152_v63 }
0x11ac   : > { %v8478_v6 = vadd.f32 %v10154_v2, %v8413_v16 }
0x11b9   : > { %v10115_v47 = vpop.f32.mrb[224].mxu1 }
0x11ba   : > { %v10116_v39 = vpop.f32.mrb[225].mxu1 }
0x11bb   : > { %v10117_v25 = vadd.f32 %v10116_v39, %v10115_v47  ;;  %v10118_v43 = vpop.f32.mrb[226].mxu1 }
0x11bc   : > { %v10155_v50 = vpop.f32.mrb[224].mxu0  ;;  %v10119_v62 = vpop.f32.mrb[227].mxu1 }
0x11bd   : > { %v10156_v38 = vpop.f32.mrb[225].mxu0  ;;  %v8418_v11 = vadd.f32 %v10117_v25, %v14911_v12  ;;  %v10120_v34 = vadd.f32 %v10119_v62, %v10118_v43 }
0x11be   : > { %v10157_v56 = vadd.f32 %v10156_v38, %v10155_v50  ;;  %v10158_v48 = vpop.f32.mrb[226].mxu0 }
0x11bf   : > { %v10159_v30 = vpop.f32.mrb[227].mxu0  ;;  %v8421_v20 = vadd.f32 %v10120_v34, %v14918_v51 }
0x11c0   : > { %v8483_v14 = vadd.f32 %v10157_v56, %v8418_v11  ;;  %v10160_v13 = vadd.f32 %v10159_v30, %v10158_v48 }
0x11c2   : > { %v8486_v59 = vadd.f32 %v10160_v13, %v8421_v20 }
0x11ce   : > { %v10121_v36 = vpop.f32.mrb[228].mxu1 }
0x11cf   : > { %v10122_v54 = vpop.f32.mrb[229].mxu1 }
0x11d0   : > { %v10161_v4 = vpop.f32.mrb[228].mxu0  ;;  %v10123_v32 = vadd.f32 %v10122_v54, %v10121_v36  ;;  %v10124_v29 = vpop.f32.mrb[230].mxu1 }
0x11d1   : > { %v10162_v26 = vpop.f32.mrb[229].mxu0  ;;  %v10125_v40 = vpop.f32.mrb[231].mxu1 }
0x11d2   : > { %v8426_v0 = vadd.f32 %v10123_v32, %v8361_v9  ;;  %v10163_v52 = vadd.f32 %v10162_v26, %v10161_v4  ;;  %v10164_v3 = vpop.f32.mrb[230].mxu0  ;;  %v10126_v12 = vadd.f32 %v10125_v40, %v10124_v29 }
0x11d3   : > { %v10165_v37 = vpop.f32.mrb[231].mxu0 }
0x11d4   : > { %v8491_v8 = vadd.f32 %v10163_v52, %v8426_v0  ;;  %v8429_v61 = vadd.f32 %v10126_v12, %v14925_v21  ;;  %v10166_v49 = vadd.f32 %v10165_v37, %v10164_v3 }
0x11d6   : > { %v8494_v33 = vadd.f32 %v10166_v49, %v8429_v61 }
0x11e0   : > { %v10183_v51 = vpop.f32.mrb[232].mxu1 }
0x11e1   : > { %v10184_v28 = vpop.f32.mrb[233].mxu1 }
0x11e2   : > { %v10185_v41 = vadd.f32 %v10184_v28, %v10183_v51  ;;  %v10186_v22 = vpop.f32.mrb[234].mxu1 }
0x11e3   : > { %v10187_v42 = vpop.f32.mrb[235].mxu1 }
0x11e4   : > { %v10223_v31 = vpop.f32.mrb[232].mxu0  ;;  %v8532_v5 = vadd.f32 %v10185_v41, %v8467_v15  ;;  %v10188_v1 = vadd.f32 %v10187_v42, %v10186_v22 }
0x11e5   : > { %v10224_v57 = vpop.f32.mrb[233].mxu0 }
0x11e6   : > { %v10225_v55 = vadd.f32 %v10224_v57, %v10223_v31  ;;  %v10226_v9 = vpop.f32.mrb[234].mxu0  ;;  %v8535_v60 = vadd.f32 %v10188_v1, %v8470_v44 }
0x11e7   : > { %v10227_v53 = vpop.f32.mrb[235].mxu0 }
0x11e8   : > { %v8597_v45 = vadd.f32 %v10225_v55, %v8532_v5  ;;  %v10228_v23 = vadd.f32 %v10227_v53, %v10226_v9 }
0x11ea   : > { %v8600_v35 = vadd.f32 %v10228_v23, %v8535_v60 }
0x11fc   : > { %v10189_v58 = vpop.f32.mrb[236].mxu1 }
0x11fd   : > { %v10190_v21 = vpop.f32.mrb[237].mxu1 }
0x11fe   : > { %v10229_v24 = vpop.f32.mrb[236].mxu0  ;;  %v10191_v18 = vadd.f32 %v10190_v21, %v10189_v58  ;;  %v10192_v19 = vpop.f32.mrb[238].mxu1 }
0x11ff   : > { %v10230_v17 = vpop.f32.mrb[237].mxu0  ;;  %v10193_v46 = vpop.f32.mrb[239].mxu1 }
0x1200   : > { %v8540_v27 = vadd.f32 %v10191_v18, %v8475_v7  ;;  %v10231_v63 = vadd.f32 %v10230_v17, %v10229_v24  ;;  %v10232_v16 = vpop.f32.mrb[238].mxu0  ;;  %v10194_v15 = vadd.f32 %v10193_v46, %v10192_v19  ;;  %v15754_v17 = vld [vmem:[#allocation13_spill] sm:$0xff] }
0x1201   : > { %v10233_v10 = vpop.f32.mrb[239].mxu0 }
0x1202   : > { %v14940_v2 = vadd.f32 %v10231_v63, %v8540_v27  ;;  %v8543_v47 = vadd.f32 %v10194_v15, %v8478_v6  ;;  %v10234_v44 = vadd.f32 %v10233_v10, %v10232_v16 }
0x1204   : > { %v14942_v39 = vadd.f32 %v10234_v44, %v8543_v47 }
0x1213   : > { %v10195_v50 = vpop.f32.mrb[240].mxu1 }
0x1214   : > { %v10196_v25 = vpop.f32.mrb[241].mxu1 }
0x1215   : > { %v10235_v43 = vpop.f32.mrb[240].mxu0  ;;  %v10197_v38 = vadd.f32 %v10196_v25, %v10195_v50  ;;  %v10198_v62 = vpop.f32.mrb[242].mxu1 }
0x1216   : > { %v10236_v11 = vpop.f32.mrb[241].mxu0  ;;  %v10199_v56 = vpop.f32.mrb[243].mxu1 }
0x1217   : > { %v8548_v48 = vadd.f32 %v10197_v38, %v8483_v14  ;;  %v10237_v34 = vadd.f32 %v10236_v11, %v10235_v43  ;;  %v10238_v7 = vpop.f32.mrb[242].mxu0  ;;  %v10200_v30 = vadd.f32 %v10199_v56, %v10198_v62 }
0x1218   : > { %v10239_v20 = vpop.f32.mrb[243].mxu0 }
0x1219   : > { %v14944_v13 = vadd.f32 %v10237_v34, %v8548_v48  ;;  %v8551_v36 = vadd.f32 %v10200_v30, %v8486_v59  ;;  %v10240_v54 = vadd.f32 %v10239_v20, %v10238_v7 }
0x121b   : > { %v14946_v6 = vadd.f32 %v10240_v54, %v8551_v36  ;;  %v15755_v36 = vld [vmem:[#allocation15_spill] sm:$0xff] }
0x122f   : > { %v10201_v4 = vpop.f32.mrb[244].mxu1 }
0x1230   : > { %v10202_v32 = vpop.f32.mrb[245].mxu1 }
0x1231   : > { %v10241_v29 = vpop.f32.mrb[244].mxu0  ;;  %v10203_v26 = vadd.f32 %v10202_v32, %v10201_v4  ;;  %v10204_v40 = vpop.f32.mrb[246].mxu1 }
0x1232   : > { %v10242_v0 = vpop.f32.mrb[245].mxu0  ;;  %v10205_v52 = vpop.f32.mrb[247].mxu1 }
0x1233   : > { %v8556_v3 = vadd.f32 %v10203_v26, %v8491_v8  ;;  %v10243_v12 = vadd.f32 %v10242_v0, %v10241_v29  ;;  %v10244_v14 = vpop.f32.mrb[246].mxu0  ;;  %v10206_v37 = vadd.f32 %v10205_v52, %v10204_v40  ;;  %v15756_v40 = vld [vmem:[#allocation14_spill] sm:$0xff] }
0x1234   : > { %v10245_v61 = vpop.f32.mrb[247].mxu0 }
0x1235   : > { %v14948_v49 = vadd.f32 %v10243_v12, %v8556_v3  ;;  %v8559_v51 = vadd.f32 %v10206_v37, %v8494_v33  ;;  %v10246_v28 = vadd.f32 %v10245_v61, %v10244_v14  ;;  %v15753_v33 = vld [vmem:[#allocation12_spill] sm:$0xff] }
0x1237   : > { %v14950_v59 = vadd.f32 %v10246_v28, %v8559_v51 }
0x123b   : > { %v10263_v41 = vpop.f32.mrb[248].mxu1 }
0x123c   : > { %v10264_v22 = vpop.f32.mrb[249].mxu1 }
0x123d   : > { %v10303_v31 = vpop.f32.mrb[248].mxu0  ;;  %v10265_v42 = vadd.f32 %v10264_v22, %v10263_v41  ;;  %v10266_v5 = vpop.f32.mrb[250].mxu1 }
0x123e   : > { %v10304_v57 = vpop.f32.mrb[249].mxu0  ;;  %v10267_v1 = vpop.f32.mrb[251].mxu1 }
0x123f   : > { %v8662_v55 = vadd.f32 %v10265_v42, %v8597_v45  ;;  %v10305_v9 = vadd.f32 %v10304_v57, %v10303_v31  ;;  %v10306_v8 = vpop.f32.mrb[250].mxu0  ;;  %v10268_v60 = vadd.f32 %v10267_v1, %v10266_v5  ;;  %v15757_v42 = vld [vmem:[#allocation16_spill] sm:$0xff] }
0x1240   : > { %v10307_v53 = vpop.f32.mrb[251].mxu0 }
0x1241   : > { %v8727_v23 = vadd.f32 %v10305_v9, %v8662_v55  ;;  %v8665_v58 = vadd.f32 %v10268_v60, %v8600_v35  ;;  %v10308_v21 = vadd.f32 %v10307_v53, %v10306_v8  ;;  %v15758_v8 = vld [vmem:[#allocation17_spill] sm:$0xff] }
0x1243   : > { %v8730_v24 = vadd.f32 %v10308_v21, %v8665_v58  ;;  %v14953_v18 = vadd.f32 %v8727_v23, %v15753_v33 }
0x1245   : > { %v8767_v19 = vsel %vm1088_vm3, %v14953_v18, 0.0  ;;  %v14958_v46 = vadd.f32 %v8730_v24, %v15754_v17 }
0x1246   : > { %8768 = vadd.xlane.f32.xlu1 %v8767_v19 }
0x1247   : > { %v8770_v45 = vsel %vm1088_vm3, %v14958_v46, 0.0 }
0x1248   : > { %8771 = vadd.xlane.f32.xlu0 %v8770_v45 }
0x1249   : > { %v10269_v27 = vpop.f32.mrb[252].mxu1 }
0x124a   : > { %v10270_v63 = vpop.f32.mrb[253].mxu1 }
0x124b   : > { %v10271_v16 = vadd.f32 %v10270_v63, %v10269_v27  ;;  %v10272_v35 = vpop.f32.mrb[254].mxu1  ;;  %v15759_v27 = vld [vmem:[#allocation19_spill] sm:$0xff] }
0x124c   : > { %v10273_v15 = vpop.f32.mrb[255].mxu1  ;;  %v10309_v10 = vpop.f32.mrb[252].mxu0 }
0x124d   : > { %v8670_v47 = vadd.f32 %v10271_v16, %v14940_v2  ;;  %v10274_v44 = vadd.f32 %v10273_v15, %v10272_v35  ;;  %v10310_v50 = vpop.f32.mrb[253].mxu0  ;;  %v15760_v16 = vld [vmem:[#allocation18_spill] sm:$0xff] }
0x124e   : > { %v10311_v25 = vadd.f32 %v10310_v50, %v10309_v10  ;;  %v10312_v43 = vpop.f32.mrb[254].mxu0 }
0x124f   : > { %v8673_v38 = vadd.f32 %v10274_v44, %v14942_v39  ;;  %v10313_v62 = vpop.f32.mrb[255].mxu0 }
0x1250   : > { %v8735_v11 = vadd.f32 %v10311_v25, %v8670_v47  ;;  %v10314_v56 = vadd.f32 %v10313_v62, %v10312_v43 }
0x1251   : > { %v10275_v48 = vpop.f32.mrb[0].mxu1 }
0x1252   : > { %v10276_v34 = vpop.f32.mrb[1].mxu1  ;;  %v8738_v7 = vadd.f32 %v10314_v56, %v8673_v38  ;;  %v8759_v54 = vadd.f32 %v8735_v11, %v15755_v36 }
0x1253   : > { %v10277_v30 = vadd.f32 %v10276_v34, %v10275_v48  ;;  %v10278_v20 = vpop.f32.mrb[2].mxu1 }
0x1254   : > { %v10279_v4 = vpop.f32.mrb[3].mxu1  ;;  %v10315_v32 = vpop.f32.mrb[0].mxu0  ;;  %v8773_v26 = vsel %vm1088_vm3, %v8759_v54, 0.0  ;;  %v8760_v0 = vadd.f32 %v8738_v7, %v15756_v40 }
0x1255   : > { %v8678_v2 = vadd.f32 %v10277_v30, %v14944_v13  ;;  %v10280_v29 = vadd.f32 %v10279_v4, %v10278_v20  ;;  %v10316_v39 = vpop.f32.mrb[1].mxu0  ;;  %8774 = vadd.xlane.f32.xlu1 %v8773_v26 }
0x1256   : > { %v10317_v52 = vadd.f32 %v10316_v39, %v10315_v32  ;;  %v10318_v3 = vpop.f32.mrb[2].mxu0  ;;  %v8776_v14 = vsel %vm1088_vm3, %v8760_v0, 0.0 }
0x1257   : > { %v8681_v12 = vadd.f32 %v10280_v29, %v14946_v6  ;;  %v10319_v37 = vpop.f32.mrb[3].mxu0  ;;  %8777 = vadd.xlane.f32.xlu0 %v8776_v14 }
0x1258   : > { %v8743_v61 = vadd.f32 %v10317_v52, %v8678_v2  ;;  %v10320_v51 = vadd.f32 %v10319_v37, %v10318_v3 }
0x1259   : > { %v10281_v28 = vpop.f32.mrb[4].mxu1 }
0x125a   : > { %v10282_v41 = vpop.f32.mrb[5].mxu1  ;;  %v8746_v13 = vadd.f32 %v10320_v51, %v8681_v12  ;;  %v8761_v5 = vadd.f32 %v8743_v61, %v15757_v42 }
0x125b   : > { %v10283_v22 = vadd.f32 %v10282_v41, %v10281_v28  ;;  %v10284_v31 = vpop.f32.mrb[6].mxu1 }
0x125c   : > { %v10285_v57 = vpop.f32.mrb[7].mxu1  ;;  %v10321_v1 = vpop.f32.mrb[4].mxu0  ;;  %v8779_v6 = vsel %vm1088_vm3, %v8761_v5, 0.0  ;;  %v8762_v60 = vadd.f32 %v8746_v13, %v15758_v8  ;;  %v9843_v8 = vld [vmem:[%s821_s5] ss:$0 sm:$0xff] }
0x125d   : > { %v8686_v55 = vadd.f32 %v10283_v22, %v14948_v49  ;;  %v10286_v9 = vadd.f32 %v10285_v57, %v10284_v31  ;;  %v10322_v53 = vpop.f32.mrb[5].mxu0  ;;  %8780 = vadd.xlane.f32.xlu1 %v8779_v6 }
0x125e   : > { %v10323_v23 = vadd.f32 %v10322_v53, %v10321_v1  ;;  %v10324_v58 = vpop.f32.mrb[6].mxu0  ;;  %v8782_v24 = vsel %vm1088_vm3, %v8762_v60, 0.0 }
0x125f   : > { %v8689_v21 = vadd.f32 %v10286_v9, %v14950_v59  ;;  %v10325_v33 = vpop.f32.mrb[7].mxu0  ;;  %8783 = vadd.xlane.f32.xlu0 %v8782_v24 }
0x1260   : > { %v8751_v19 = vadd.f32 %v10323_v23, %v8686_v55  ;;  %v10326_v17 = vadd.f32 %v10325_v33, %v10324_v58  ;;  %v9844_v58 = vld [vmem:[%s824_s26] ss:$0 sm:$0xff]  ;;  %s15761_s26 = sld [smem:[#allocation116_spill]] (!%p9845_p9) }
0x1262   : > { %v8754_v45 = vadd.f32 %v10326_v17, %v8689_v21  ;;  %v8763_v49 = vadd.f32 %v8751_v19, %v15759_v27 }
0x1264   : > { %v8785_v63 = vsel %vm1088_vm3, %v8763_v49, 0.0  ;;  %v8764_v35 = vadd.f32 %v8754_v45, %v15760_v16 }
0x1265   : > { %8786 = vadd.xlane.f32.xlu1 %v8785_v63 }
0x1266   : > { %v8788_v15 = vsel %vm1088_vm3, %v8764_v35, 0.0 }
0x1267   : > { %8789 = vadd.xlane.f32.xlu0 %v8788_v15 }
0x12d3   : > { %v8769_v10 = vpop.xlane.xlu1 %8768 }
0x12d4   : > { %v8791_v47 = vmul.f32 0.03125, %v8769_v10 }
0x12d5   : > { %v8772_v59 = vpop.xlane.xlu0 %8771 }
0x12d6   : > { %v8799_v44 = vsub.f32 %v14953_v18, %v8791_v47  ;;  %v8792_v50 = vmul.f32 0.03125, %v8772_v59 }
0x12d8   : > { %v8800_v25 = vsub.f32 %v14958_v46, %v8792_v50  ;;  %v8807_v43 = vmul.f32 %v8799_v44, %v8799_v44 }
0x12da   : > { %v8815_v38 = vsel %vm1088_vm3, %v8807_v43, 0.0  ;;  %v8808_v62 = vmul.f32 %v8800_v25, %v8800_v25 }
0x12db   : > { %8816 = vadd.xlane.f32.xlu1 %v8815_v38 }
0x12dc   : > { %v8818_v11 = vsel %vm1088_vm3, %v8808_v62, 0.0 }
0x12dd   : > { %8819 = vadd.xlane.f32.xlu0 %v8818_v11 }
0x12e2   : > { %v8775_v56 = vpop.xlane.xlu1 %8774 }
0x12e3   : > { %v8793_v48 = vmul.f32 0.03125, %v8775_v56 }
0x12e4   : > { %v8778_v34 = vpop.xlane.xlu0 %8777 }
0x12e5   : > { %v14984_v7 = vsub.f32 %v8759_v54, %v8793_v48  ;;  %v8794_v30 = vmul.f32 0.03125, %v8778_v34 }
0x12e7   : > { %v14986_v20 = vsub.f32 %v8760_v0, %v8794_v30  ;;  %v8809_v18 = vmul.f32 %v14984_v7, %v14984_v7 }
0x12e9   : > { %v8821_v46 = vsel %vm1088_vm3, %v8809_v18, 0.0  ;;  %v8810_v36 = vmul.f32 %v14986_v20, %v14986_v20 }
0x12ea   : > { %v8781_v4 = vpop.xlane.xlu1 %8780  ;;  %8822 = vadd.xlane.f32.xlu1 %v8821_v46 }
0x12eb   : > { %v8795_v32 = vmul.f32 0.03125, %v8781_v4  ;;  %v8824_v2 = vsel %vm1088_vm3, %v8810_v36, 0.0 }
0x12ec   : > { %v8784_v29 = vpop.xlane.xlu0 %8783  ;;  %8825 = vadd.xlane.f32.xlu0 %v8824_v2 }
0x12ed   : > { %v14994_v54 = vsub.f32 %v8761_v5, %v8795_v32  ;;  %v8796_v26 = vmul.f32 0.03125, %v8784_v29 }
0x12ef   : > { %v14996_v40 = vsub.f32 %v8762_v60, %v8796_v26  ;;  %v8811_v0 = vmul.f32 %v14994_v54, %v14994_v54 }
0x12f1   : > { %v8827_v39 = vsel %vm1088_vm3, %v8811_v0, 0.0  ;;  %v8812_v52 = vmul.f32 %v14996_v40, %v14996_v40 }
0x12f2   : > { %8828 = vadd.xlane.f32.xlu1 %v8827_v39  ;;  %v8787_v3 = vpop.xlane.xlu1 %8786 }
0x12f3   : > { %v8797_v12 = vmul.f32 0.03125, %v8787_v3  ;;  %v8830_v14 = vsel %vm1088_vm3, %v8812_v52, 0.0 }
0x12f4   : > { %8831 = vadd.xlane.f32.xlu0 %v8830_v14  ;;  %v8790_v37 = vpop.xlane.xlu0 %8789 }
0x12f5   : > { %v15004_v61 = vsub.f32 %v8763_v49, %v8797_v12  ;;  %v8798_v51 = vmul.f32 0.03125, %v8790_v37 }
0x12f7   : > { %v15006_v28 = vsub.f32 %v8764_v35, %v8798_v51  ;;  %v8813_v41 = vmul.f32 %v15004_v61, %v15004_v61 }
0x12f9   : > { %v8833_v13 = vsel %vm1088_vm3, %v8813_v41, 0.0  ;;  %v8814_v22 = vmul.f32 %v15006_v28, %v15006_v28 }
0x12fa   : > { %8834 = vadd.xlane.f32.xlu1 %v8833_v13 }
0x12fb   : > { %v8836_v31 = vsel %vm1088_vm3, %v8814_v22, 0.0  ;;  %v11447_v22 = vmov (!%p9845_p9), 0  }
0x12fc   : > { %8837 = vadd.xlane.f32.xlu0 %v8836_v31  ;;  %11370 = vset.pattern.permute.xlu1 (!%p9845_p9), %v11447_v22 }
0x12fd   : > { %11369 = vset.pattern.permute.xlu0 (!%p9845_p9), %v11447_v22 }
0x1368   : > { %v8817_v42 = vpop.xlane.xlu1 %8816 }
0x1369   : > { %v8839_v5 = vmul.f32 0.03125, %v8817_v42 }
0x136a   : > { %v8820_v57 = vpop.xlane.xlu0 %8819 }
0x136b   : > { %v8847_v1 = vadd.f32 1e-05, %v8839_v5  ;;  %v8840_v55 = vmul.f32 0.03125, %v8820_v57 }
0x136d   : > { %11344 = vrsqrt.f32 %v8847_v1  ;;  %v8848_v9 = vadd.f32 1e-05, %v8840_v55 }
0x136f   : > { %11346 = vrsqrt.f32 %v8848_v9 }
0x1377   : > { %v11345_v6 = vpop.eup %11344  ;;  %v8823_v53 = vpop.xlane.xlu1 %8822 }
0x1378   : > { %v8863_v60 = vmul.f32 %v11345_v6, %v8799_v44  ;;  %v8841_v21 = vmul.f32 0.03125, %v8823_v53 }
0x1379   : > { %v11347_v23 = vpop.eup %11346  ;;  %v8826_v19 = vpop.xlane.xlu0 %8825 }
0x137a   : > { %v8877_v24 = vmul.f32 %v9843_v8, %v8863_v60  ;;  %v8864_v33 = vmul.f32 %v11347_v23, %v8800_v25  ;;  %v8849_v17 = vadd.f32 1e-05, %v8841_v21  ;;  %v8842_v45 = vmul.f32 0.03125, %v8826_v19  ;;  %v9847_v21 = vld [vmem:[#allocation4] ss:$0 sm:$0xff] (!%p9845_p9) }
0x137c   : > { %v15024_v27 = vadd.f32 %v9844_v58, %v8877_v24  ;;  %v8878_v49 = vmul.f32 %v9843_v8, %v8864_v33  ;;  %11348 = vrsqrt.f32 %v8849_v17  ;;  %v8850_v63 = vadd.f32 1e-05, %v8842_v45 }
0x137e   : > { %8899 = vst.msk [vmem:[#allocation2] sm:$0xff] %vm1088_vm3, %v15024_v27  ;;  %v15028_v16 = vadd.f32 %v9844_v58, %v8878_v49  ;;  %11350 = vrsqrt.f32 %v8850_v63  ;;  %v15762_v49 = vlaneseq (!%p9845_p9) }
0x137f   : > { %v8829_v35 = vpop.xlane.xlu1 %8828 }
0x1380   : > { %8900 = vst.msk [vmem:[#allocation2 + $0x8] sm:$0xff] %vm1088_vm3, %v15028_v16  ;;  %v8843_v15 = vmul.f32 0.03125, %v8829_v35  ;;  %v8977_v63 = vand.u32 (!%p9845_p9), 127, %v15762_v49 }
0x1381   : > { %v8832_v10 = vpop.xlane.xlu0 %8831 }
0x1382   : > { %v8851_v47 = vadd.f32 1e-05, %v8843_v15  ;;  %v8844_v59 = vmul.f32 0.03125, %v8832_v10  ;;  %v15763_v10 = vld [vmem:[#allocation20_spill] sm:$0xff] (!%p9845_p9) }
0x1384   : > { %11352 = vrsqrt.f32 %v8851_v47  ;;  %v8852_v44 = vadd.f32 1e-05, %v8844_v59  ;;  %v15084_v47 = vsub.s32 (!%p9845_p9), %v8977_v63, %v15763_v10 }
0x1386   : > { %v11349_v50 = vpop.eup %11348  ;;  %11354 = vrsqrt.f32 %v8852_v44 }
0x1387   : > { %v8865_v25 = vmul.f32 %v11349_v50, %v14984_v7  ;;  %v8835_v43 = vpop.xlane.xlu1 %8834 }
0x1388   : > { %v11351_v38 = vpop.eup %11350  ;;  %v8845_v62 = vmul.f32 0.03125, %v8835_v43 }
0x1389   : > { %v8879_v11 = vmul.f32 %v9843_v8, %v8865_v25  ;;  %v8866_v56 = vmul.f32 %v11351_v38, %v14986_v20  ;;  %v8838_v48 = vpop.xlane.xlu0 %8837 }
0x138a   : > { %v8853_v34 = vadd.f32 1e-05, %v8845_v62  ;;  %v8846_v30 = vmul.f32 0.03125, %v8838_v48 }
0x138b   : > { %v15034_v18 = vadd.f32 %v9844_v58, %v8879_v11  ;;  %v8880_v46 = vmul.f32 %v9843_v8, %v8866_v56 }
0x138c   : > { %11356 = vrsqrt.f32 %v8853_v34  ;;  %v8854_v36 = vadd.f32 1e-05, %v8846_v30 }
0x138d   : > { %8901 = vst.msk [vmem:[#allocation2 + $0x10] sm:$0xff] %vm1088_vm3, %v15034_v18  ;;  %v15038_v4 = vadd.f32 %v9844_v58, %v8880_v46 }
0x138e   : > { %v11353_v7 = vpop.eup %11352  ;;  %11358 = vrsqrt.f32 %v8854_v36 }
0x138f   : > { %8902 = vst.msk [vmem:[#allocation2 + $0x18] sm:$0xff] %vm1088_vm3, %v15038_v4  ;;  %v8867_v20 = vmul.f32 %v11353_v7, %v14994_v54 }
0x1390   : > { %v11355_v32 = vpop.eup %11354 }
0x1391   : > { %v8881_v2 = vmul.f32 %v9843_v8, %v8867_v20  ;;  %v8868_v29 = vmul.f32 %v11355_v32, %v14996_v40 }
0x1393   : > { %v15044_v26 = vadd.f32 %v9844_v58, %v8881_v2  ;;  %v8882_v0 = vmul.f32 %v9843_v8, %v8868_v29 }
0x1395   : > { %8903 = vst.msk [vmem:[#allocation2 + $0x20] sm:$0xff] %vm1088_vm3, %v15044_v26  ;;  %v15048_v39 = vadd.f32 %v9844_v58, %v8882_v0 }
0x1396   : > { %v11357_v52 = vpop.eup %11356 }
0x1397   : > { %8904 = vst.msk [vmem:[#allocation2 + $0x28] sm:$0xff] %vm1088_vm3, %v15048_v39  ;;  %v8869_v3 = vmul.f32 %v11357_v52, %v15004_v61  ;;  %v9846_v61 = vld [vmem:[%s15761_s26] ss:$0 sm:$0xff] (!%p9845_p9) }
0x1398   : > { %v11359_v12 = vpop.eup %11358  ;;  %v8919_v41 = vmul.f32 (!%p9845_p9), %v9846_v61, %v15028_v16  ;;  %v8920_v13 = vmul.f32 (!%p9845_p9), %v9846_v61, %v15034_v18  ;;  %v8921_v31 = vmul.f32 (!%p9845_p9), %v9846_v61, %v15038_v4  ;;  %v8922_v1 = vmul.f32 (!%p9845_p9), %v9846_v61, %v15044_v26 }
0x1399   : > { %v8883_v54 = vmul.f32 %v9843_v8, %v8869_v3  ;;  %v8870_v14 = vmul.f32 %v11359_v12, %v15006_v28  ;;  %8910 = sbr.rel (%p9845_p9) target bundleno = 5840 (0x16d0), region = 104  ;;  %v8918_v28 = vmul.f32 (!%p9845_p9), %v9846_v61, %v15024_v27  ;;  %v8923_v9 = vmul.f32 (!%p9845_p9), %v9846_v61, %v15048_v39 }
0x139a   : > { %v8932_v5 = vsel (!%p9845_p9), %vm1088_vm3, %v8920_v13, 0.0  ;;  %v8929_v57 = vsel (!%p9845_p9), %vm1088_vm3, %v8919_v41, 0.0  ;;  %v8935_v55 = vsel (!%p9845_p9), %vm1088_vm3, %v8921_v31, 0.0  ;;  %v8938_v6 = vsel (!%p9845_p9), %vm1088_vm3, %v8922_v1, 0.0  ;;  %v15765_v13 = vld [vmem:[#allocation23_spill] sm:$0xff] (!%p9845_p9)  ;;  %v15766_v31 = vld [vmem:[#allocation28_spill] sm:$0xff] (!%p9845_p9) }
0x139b   : > { %v15054_v37 = vadd.f32 %v9844_v58, %v8883_v54  ;;  %v8884_v40 = vmul.f32 %v9843_v8, %v8870_v14  ;;  %v8926_v42 = vsel (!%p9845_p9), %vm1088_vm3, %v8918_v28, 0.0  ;;  %8933 = vadd.xlane.f32.xlu1 (!%p9845_p9), %v8932_v5  ;;  %v8941_v60 = vsel (!%p9845_p9), %vm1088_vm3, %v8923_v9, 0.0  ;;  %v15764_v28 = vld [vmem:[#allocation21_spill] sm:$0xff] (!%p9845_p9)  ;;  %v15767_v5 = vld [vmem:[#allocation22_spill] sm:$0xff] (!%p9845_p9) }
0x139c   : > { %8927 = vadd.xlane.f32.xlu0 (!%p9845_p9), %v8926_v42 }
0x139d   : > { %8905 = vst.msk [vmem:[#allocation2 + $0x30] sm:$0xff] %vm1088_vm3, %v15054_v37  ;;  %v15058_v51 = vadd.f32 %v9844_v58, %v8884_v40  ;;  %v8924_v8 = vmul.f32 (!%p9845_p9), %v9846_v61, %v15054_v37 }
0x139f   : > { %8906 = vst.msk [vmem:[#allocation2 + $0x38] sm:$0xff] %vm1088_vm3, %v15058_v51  ;;  %8936 = vadd.xlane.f32.xlu1 (!%p9845_p9), %v8935_v55  ;;  %v8925_v53 = vmul.f32 (!%p9845_p9), %v9846_v61, %v15058_v51  ;;  %v8944_v23 = vsel (!%p9845_p9), %vm1088_vm3, %v8924_v8, 0.0  ;;  %v15768_v8 = vld [vmem:[#allocation24_spill] sm:$0xff] (!%p9845_p9) }
0x13a0   : > { %8930 = vadd.xlane.f32.xlu0 %v8929_v57 }
0x13a1   : > { %v8947_v58 = vsel %vm1088_vm3, %v8925_v53, 0.0 }
0x13a3   : > { %8942 = vadd.xlane.f32.xlu1 %v8941_v60 }
0x13a4   : > { %8939 = vadd.xlane.f32.xlu0 %v8938_v6 }
0x13a7   : > { %8948 = vadd.xlane.f32.xlu1 %v8947_v58 }
0x13a8   : > { %8945 = vadd.xlane.f32.xlu0 %v8944_v23 }
0x13be   : > { %8957 = vperm.xlu0 %11369, %v9847_v21   ;;  %v15769_v21 = vld [vmem:[#allocation25_spill] sm:$0xff] }
0x1428   : > { %v8934_v19 = vpop.xlane.xlu1 %8933 }
0x1429   : > { %v8928_v24 = vpop.xlane.xlu0 %8927 }
0x142c   : > { %v8937_v45 = vpop.xlane.xlu1 %8936 }
0x142d   : > { %v8931_v33 = vpop.xlane.xlu0 %8930 }
0x1430   : > { %v8943_v15 = vpop.xlane.xlu1 %8942 }
0x1431   : > { %v8940_v17 = vpop.xlane.xlu0 %8939 }
0x1434   : > { %v8949_v38 = vpop.xlane.xlu1 %8948 }
0x1435   : > { %v8946_v35 = vpop.xlane.xlu0 %8945 }
0x143d   : > { %v8958_v59 = vpop.permute.xlu0 %8957 }
0x143e   : > { %v8960_v44 = vadd.f32 %v8958_v59, %v8928_v24  ;;  %v8961_v50 = vadd.f32 %v8958_v59, %v8931_v33  ;;  %v8962_v25 = vadd.f32 %v8958_v59, %v8934_v19  ;;  %v8963_v43 = vadd.f32 %v8958_v59, %v8937_v45 }
0x143f   : > { %v8964_v62 = vadd.f32 %v8958_v59, %v8940_v17  ;;  %v8965_v11 = vadd.f32 %v8958_v59, %v8943_v15  ;;  %v8966_v30 = vadd.f32 %v8958_v59, %v8946_v35  ;;  %v8967_v46 = vadd.f32 %v8958_v59, %v8949_v38  ;;  %v15770_v17 = vld [vmem:[#allocation27_spill] sm:$0xff]  ;;  %v15771_v15 = vld [vmem:[#allocation26_spill] sm:$0xff] }
0x1440   : > { %v8981_v56 = vrot.slane %v8960_v44, %v15084_v47  ;;  %v8985_v48 = vrot.slane %v8961_v50, %v15084_v47  ;;  %v8989_v34 = vrot.slane %v8962_v25, %v15084_v47  ;;  %v8993_v36 = vrot.slane %v8963_v43, %v15084_v47 }
0x1441   : > { %v8997_v20 = vrot.slane %v8964_v62, %v15084_v47  ;;  %v9001_v2 = vrot.slane %v8965_v11, %v15084_v47  ;;  %v9005_v0 = vrot.slane %v8966_v30, %v15084_v47  ;;  %v9009_v3 = vrot.slane %v8967_v46, %v15084_v47 }
0x1442   : > { %v9011_v7 = vsel %vm9010_vm10, %v8985_v48, %v8981_v56 }
0x1443   : > { %v9013_v32 = vsel %vm9012_vm11, %v8989_v34, %v9011_v7 }
0x1444   : > { %v9015_v29 = vsel %vm9014_vm12, %v8993_v36, %v9013_v32 }
0x1445   : > { %v9017_v52 = vsel %vm9016_vm13, %v8997_v20, %v9015_v29 }
0x1446   : > { %v9019_v12 = vsel %vm9018_vm14, %v9001_v2, %v9017_v52 }
0x1447   : > { %v9021_v54 = vsel %vm9020_vm15, %v9005_v0, %v9019_v12 }
0x1448   : > { %v9023_v14 = vsel %vm9022_vm0, %v9009_v3, %v9021_v54 }
0x1449   : > { %v9025_v40 = vsel %vm1192_vm5, %v9023_v14, -inf }
0x144a   : > { %9026 = vmax.xlane.f32.xlu1 %v9025_v40 }
0x14d7   : > { %v9027_v61 = vpop.xlane.xlu1 %9026 }
0x14d8   : > { %v9032_v41 = vrot.slane %v9027_v61, %v15764_v28  ;;  %v9036_v22 = vrot.slane %v9027_v61, %v15765_v13  ;;  %v9060_v42 = vrot.slane %v9027_v61, %v15766_v31  ;;  %v9040_v57 = vrot.slane %v9027_v61, %v15767_v5 }
0x14d9   : > { %v9044_v60 = vrot.slane %v9027_v61, %v15768_v8  ;;  %v9048_v24 = vrot.slane %v9027_v61, %v15769_v21  ;;  %v9052_v45 = vrot.slane %v9027_v61, %v15770_v17  ;;  %v9056_v10 = vrot.slane %v9027_v61, %v15771_v15 }
0x14da   : > { %v9069_v1 = vsub.f32 %v8960_v44, %v9032_v41  ;;  %v9070_v55 = vsub.f32 %v8961_v50, %v9036_v22  ;;  %v9076_v6 = vsub.f32 %v8967_v46, %v9060_v42  ;;  %v9071_v53 = vsub.f32 %v8962_v25, %v9040_v57 }
0x14db   : > { %v9072_v33 = vsub.f32 %v8963_v43, %v9044_v60  ;;  %v9073_v49 = vsub.f32 %v8964_v62, %v9048_v24  ;;  %v9074_v59 = vsub.f32 %v8965_v11, %v9052_v45  ;;  %v9075_v25 = vsub.f32 %v8966_v30, %v9056_v10 }
0x14dc   : > { %v9077_v9 = vmul.f32 1.442695, %v9069_v1  ;;  %v9079_v23 = vmul.f32 1.442695, %v9070_v55  ;;  %v9091_v58 = vmul.f32 1.442695, %v9076_v6 }
0x14dd   : > { %v9081_v19 = vmul.f32 1.442695, %v9071_v53  ;;  %v9083_v63 = vmul.f32 1.442695, %v9072_v33  ;;  %v9085_v44 = vmul.f32 1.442695, %v9073_v49 }
0x14de   : > { %11371 = vpow2.f32 %v9077_v9  ;;  %v9087_v43 = vmul.f32 1.442695, %v9074_v59  ;;  %v9089_v62 = vmul.f32 1.442695, %v9075_v25 }
0x14df   : > { %11373 = vpow2.f32 %v9079_v23 }
0x14e0   : > { %11375 = vpow2.f32 %v9091_v58 }
0x14e1   : > { %11377 = vpow2.f32 %v9081_v19 }
0x14e2   : > { %11379 = vpow2.f32 %v9083_v63 }
0x14e3   : > { %11381 = vpow2.f32 %v9085_v44 }
0x14e4   : > { %11383 = vpow2.f32 %v9087_v43 }
0x14e5   : > { %11385 = vpow2.f32 %v9089_v62 }
0x14e8   : > { %v11372_v35 = vpop.eup %11371 }
0x14e9   : > { %9102 = vperm.xlu1 %11370, %v11372_v35   ;;  %v11374_v50 = vpop.eup %11373 }
0x14ea   : > { %v15110_v38 = vpop.eup %11375 }
0x14eb   : > { %v11378_v56 = vpop.eup %11377  ;;  %9123 = vperm.xlu0 %11369, %v15110_v38  }
0x14ec   : > { %v11380_v48 = vpop.eup %11379 }
0x14ed   : > { %9105 = vperm.xlu1 %11370, %v11374_v50   ;;  %v11382_v34 = vpop.eup %11381 }
0x14ee   : > { %v11384_v11 = vpop.eup %11383 }
0x14ef   : > { %v11386_v46 = vpop.eup %11385 }
0x14f1   : > { %9108 = vperm.xlu1 %11370, %v11378_v56  }
0x14f5   : > { %9111 = vperm.xlu1 %11370, %v11380_v48  }
0x14f9   : > { %9114 = vperm.xlu1 %11370, %v11382_v34  }
0x14fd   : > { %9117 = vperm.xlu1 %11370, %v11384_v11  }
0x1501   : > { %9120 = vperm.xlu1 %11370, %v11386_v46  }
0x1568   : > { %v9103_v30 = vpop.permute.xlu1 %9102 }
0x1569   : > { %v9128_v0 = vrot.slane %v9103_v30, %v15084_v47 }
0x156a   : > { %v9124_v40 = vpop.permute.xlu0 %9123 }
0x156b   : > { %v9156_v1 = vrot.slane %v9124_v40, %v15084_v47 }
0x156c   : > { %v9106_v36 = vpop.permute.xlu1 %9105 }
0x156d   : > { %v9132_v2 = vrot.slane %v9106_v36, %v15084_v47 }
0x156f   : > { %v9157_v54 = vsel %vm9010_vm10, %v9132_v2, %v9128_v0 }
0x1570   : > { %v9109_v7 = vpop.permute.xlu1 %9108 }
0x1571   : > { %v9136_v29 = vrot.slane %v9109_v7, %v15084_v47 }
0x1573   : > { %v9158_v61 = vsel %vm9012_vm11, %v9136_v29, %v9157_v54 }
0x1574   : > { %v9112_v20 = vpop.permute.xlu1 %9111 }
0x1575   : > { %v9140_v52 = vrot.slane %v9112_v20, %v15084_v47 }
0x1577   : > { %v9159_v41 = vsel %vm9014_vm12, %v9140_v52, %v9158_v61 }
0x1578   : > { %v9115_v32 = vpop.permute.xlu1 %9114 }
0x1579   : > { %v9144_v12 = vrot.slane %v9115_v32, %v15084_v47 }
0x157b   : > { %v9160_v42 = vsel %vm9016_vm13, %v9144_v12, %v9159_v41 }
0x157c   : > { %v9118_v3 = vpop.permute.xlu1 %9117 }
0x157d   : > { %v9148_v14 = vrot.slane %v9118_v3, %v15084_v47 }
0x157f   : > { %v9161_v55 = vsel %vm9018_vm14, %v9148_v14, %v9160_v42 }
0x1580   : > { %v9121_v22 = vpop.permute.xlu1 %9120 }
0x1581   : > { %v9152_v57 = vrot.slane %v9121_v22, %v15084_v47 }
0x1583   : > { %v9162_v9 = vsel %vm9020_vm15, %v9152_v57, %v9161_v55 }
0x1584   : > { %v9163_v6 = vsel %vm9022_vm0, %v9156_v1, %v9162_v9 }
0x1585   : > { %v9165_v60 = vsel %vm1192_vm5, %v9163_v6, 0.0 }
0x1586   : > { %9166 = vadd.xlane.f32.xlu1 %v9165_v60 }
0x1613   : > { %v9167_v53 = vpop.xlane.xlu1 %9166 }
0x1614   : > { %11387 = vrcp.f32 %v9167_v53 }
0x161e   : > { %v11388_v23 = vpop.eup %11387 }
0x161f   : > { %v9173_v58 = vrot.slane %v11388_v23, %v15764_v28  ;;  %v9177_v33 = vrot.slane %v11388_v23, %v15765_v13  ;;  %v9181_v47 = vrot.slane %v11388_v23, %v15767_v5  ;;  %v9185_v49 = vrot.slane %v11388_v23, %v15768_v8 }
0x1620   : > { %v9189_v10 = vrot.slane %v11388_v23, %v15769_v21  ;;  %v9193_v44 = vrot.slane %v11388_v23, %v15770_v17  ;;  %v9197_v13 = vrot.slane %v11388_v23, %v15771_v15  ;;  %v9201_v5 = vrot.slane %v11388_v23, %v15766_v31 }
0x1621   : > { %v9210_v24 = vmul.f32 %v11372_v35, %v9173_v58  ;;  %v9211_v19 = vmul.f32 %v11374_v50, %v9177_v33  ;;  %v9212_v45 = vmul.f32 %v11378_v56, %v9181_v47  ;;  %v9213_v63 = vmul.f32 %v11380_v48, %v9185_v49 }
0x1622   : > { %v9214_v59 = vmul.f32 %v11382_v34, %v9189_v10  ;;  %v9215_v28 = vmul.f32 %v11384_v11, %v9193_v44  ;;  %v9216_v35 = vmul.f32 %v11386_v46, %v9197_v13  ;;  %v9217_v50 = vmul.f32 %v15110_v38, %v9201_v5 }
0x1623   : > { %9220 = vperm.xlu0 %11369, %v9210_v24  }
0x1627   : > { %9225 = vperm.xlu0 %11369, %v9211_v19  }
0x162b   : > { %9230 = vperm.xlu0 %11369, %v9212_v45  }
0x162f   : > { %9235 = vperm.xlu0 %11369, %v9213_v63  }
0x1633   : > { %9240 = vperm.xlu0 %11369, %v9214_v59  }
0x1637   : > { %9245 = vperm.xlu0 %11369, %v9215_v28  }
0x163b   : > { %9250 = vperm.xlu0 %11369, %v9216_v35  }
0x163f   : > { %9255 = vperm.xlu0 %11369, %v9217_v50  }
0x16a2   : > { %v9221_v8 = vpop.permute.xlu0 %9220 }
0x16a3   : > { %v9258_v56 = vmul.f32 %v9221_v8, %v15024_v27 }
0x16a5   : > { %v9266_v31 = vsel %vm1088_vm3, %v9258_v56, 0.0 }
0x16a6   : > { %v9226_v25 = vpop.permute.xlu0 %9225  ;;  %v9267_v30 = vrot.slane %v9266_v31, 4 }
0x16a7   : > { %v9259_v21 = vmul.f32 %v9226_v25, %v15028_v16 }
0x16a8   : > { %v9268_v32 = vadd.f32 %v9267_v30, %v9266_v31 }
0x16a9   : > { %v9273_v62 = vsel %vm1088_vm3, %v9259_v21, 0.0 }
0x16aa   : > { %v9231_v43 = vpop.permute.xlu0 %9230  ;;  %v9274_v38 = vrot.slane %v9273_v62, 4  ;;  %v9269_v14 = vrot.slane %v9268_v32, 2 }
0x16ab   : > { %v9260_v17 = vmul.f32 %v9231_v43, %v15034_v18 }
0x16ac   : > { %v9275_v7 = vadd.f32 %v9274_v38, %v9273_v62  ;;  %v9270_v9 = vadd.f32 %v9269_v14, %v9268_v32 }
0x16ad   : > { %v9280_v15 = vsel %vm1088_vm3, %v9260_v17, 0.0 }
0x16ae   : > { %v9236_v48 = vpop.permute.xlu0 %9235  ;;  %v9281_v11 = vrot.slane %v9280_v15, 4 }
0x16af   : > { %v9261_v34 = vmul.f32 %v9236_v48, %v15038_v4  ;;  %v9276_v4 = vrot.slane %v9275_v7, 2 }
0x16b0   : > { %v9282_v18 = vadd.f32 %v9281_v11, %v9280_v15 }
0x16b1   : > { %v9287_v46 = vsel %vm1088_vm3, %v9261_v34, 0.0  ;;  %v9277_v42 = vadd.f32 %v9276_v4, %v9275_v7 }
0x16b2   : > { %v9288_v16 = vrot.slane %v9287_v46, 4  ;;  %v9241_v36 = vpop.permute.xlu0 %9240  ;;  %v9283_v12 = vrot.slane %v9282_v18, 2 }
0x16b3   : > { %v9262_v27 = vmul.f32 %v9241_v36, %v15044_v26  ;;  %v9278_v24 = vrot.slane %v9277_v42, 1 }
0x16b4   : > { %v9289_v2 = vadd.f32 %v9288_v16, %v9287_v46  ;;  %v9284_v1 = vadd.f32 %v9283_v12, %v9282_v18 }
0x16b5   : > { %v9294_v20 = vsel %vm1088_vm3, %v9262_v27, 0.0  ;;  %v9279_v44 = vadd.f32 %v9278_v24, %v9277_v42 }
0x16b6   : > { %v9295_v29 = vrot.slane %v9294_v20, 4  ;;  %v9246_v0 = vpop.permute.xlu0 %9245  ;;  %v9290_v40 = vrot.slane %v9289_v2, 2  ;;  %v9285_v47 = vrot.slane %v9284_v1, 1 }
0x16b7   : > { %v9263_v52 = vmul.f32 %v9246_v0, %v15048_v39 }
0x16b8   : > { %v9296_v3 = vadd.f32 %v9295_v29, %v9294_v20  ;;  %v9291_v6 = vadd.f32 %v9290_v40, %v9289_v2  ;;  %v9286_v5 = vadd.f32 %v9285_v47, %v9284_v1 }
0x16b9   : > { %v9301_v54 = vsel %vm1088_vm3, %v9263_v52, 0.0 }
0x16ba   : > { %v9302_v61 = vrot.slane %v9301_v54, 4  ;;  %v9251_v41 = vpop.permute.xlu0 %9250  ;;  %v9297_v26 = vrot.slane %v9296_v3, 2  ;;  %v9292_v49 = vrot.slane %v9291_v6, 1 }
0x16bb   : > { %v9264_v22 = vmul.f32 %v9251_v41, %v15054_v37  ;;  %v9271_v37 = vrot.slane %v9270_v9, 1 }
0x16bc   : > { %v9303_v57 = vadd.f32 %v9302_v61, %v9301_v54  ;;  %v9298_v23 = vadd.f32 %v9297_v26, %v9296_v3  ;;  %v9293_v8 = vadd.f32 %v9292_v49, %v9291_v6 }
0x16bd   : > { %v9308_v55 = vsel %vm1088_vm3, %v9264_v22, 0.0  ;;  %v9272_v50 = vadd.f32 %v9271_v37, %v9270_v9 }
0x16be   : > { %v9304_v39 = vrot.slane %v9303_v57, 2  ;;  %v9309_v60 = vrot.slane %v9308_v55, 4  ;;  %v9256_v53 = vpop.permute.xlu0 %9255  ;;  %v9299_v59 = vrot.slane %v9298_v23, 1 }
0x16bf   : > { %v9265_v58 = vmul.f32 %v9256_v53, %v15058_v51  ;;  %v9330_v43 = vsel %vm9010_vm10, %v9279_v44, %v9272_v50 }
0x16c0   : > { %v9305_v33 = vadd.f32 %v9304_v39, %v9303_v57  ;;  %v9310_v19 = vadd.f32 %v9309_v60, %v9308_v55  ;;  %v9300_v21 = vadd.f32 %v9299_v59, %v9298_v23  ;;  %v9331_v62 = vsel %vm9012_vm11, %v9286_v5, %v9330_v43 }
0x16c1   : > { %v9315_v45 = vsel %vm1088_vm3, %v9265_v58, 0.0  ;;  %v9332_v48 = vsel %vm9014_vm12, %v9293_v8, %v9331_v62 }
0x16c2   : > { %v9311_v63 = vrot.slane %v9310_v19, 2  ;;  %v9316_v10 = vrot.slane %v9315_v45, 4  ;;  %v9306_v28 = vrot.slane %v9305_v33, 1  ;;  %v9333_v34 = vsel %vm9016_vm13, %v9300_v21, %v9332_v48 }
0x16c4   : > { %v9312_v13 = vadd.f32 %v9311_v63, %v9310_v19  ;;  %v9317_v35 = vadd.f32 %v9316_v10, %v9315_v45  ;;  %v9307_v56 = vadd.f32 %v9306_v28, %v9305_v33 }
0x16c6   : > { %v9313_v51 = vrot.slane %v9312_v13, 1  ;;  %v9318_v25 = vrot.slane %v9317_v35, 2  ;;  %v9334_v38 = vsel %vm9018_vm14, %v9307_v56, %v9333_v34 }
0x16c8   : > { %v9319_v17 = vadd.f32 %v9318_v25, %v9317_v35  ;;  %v9314_v15 = vadd.f32 %v9313_v51, %v9312_v13 }
0x16ca   : > { %v9320_v31 = vrot.slane %v9319_v17, 1  ;;  %v9335_v46 = vsel %vm9020_vm15, %v9314_v15, %v9334_v38 }
0x16cc   : > { %v9321_v11 = vadd.f32 %v9320_v31, %v9319_v17 }
0x16ce   : > { %v9336_v30 = vsel %vm9022_vm0, %v9321_v11, %v9335_v46 }
0x16cf   : > { %9338 = vst.msk [vmem:[%s15772_s20] sm:$0xff] %vm1088_vm3, %v9336_v30 }
0x16d0 PF: > { %s15773_s22 = sld [smem:[#allocation7_spill]]  ;;  %s15774_s20 = sld [smem:[#allocation5_spill]] }
0x16d1   : > { %s15775_s21 = sld [smem:[#allocation6_spill]]  ;;  %s15776_s1 = sld [smem:[#allocation8_spill]] }
0x16d6   : > { %s31_s2 = sadd.s32 1, %s15773_s22   ;;  %s15777_s22 = sld [smem:[#allocation9_spill]] }
0x16d7   : > { %p28_p10 = scmp.ge.s32.totalorder %s31_s2, 6  }
0x16d9   :  { %30 = sbr.rel (!%p28_p10) target bundleno = 11 (0xb), region = 173 }

</bundles_post_ra>
